<compile_context>
chip_gen: v7x
topology: tpu7x:2x2x1
jax: 0.10.0
libtpu: 0.0.40
codegen_flags: <defaults>
</compile_context>

<pallas_src>
import jax
import jax.numpy as jnp
from jax.experimental import pallas as pl
from jax.experimental.pallas import tpu as pltpu

BN_EPS = 1e-5


def _up_conv_kernel(x_ref, w_ref, scale_ref, shift_ref, o_ref):
    """One (batch, row-tile, cout-tile) grid step.

    x_ref:     (1, Cin, 1, TH+2, 2W+2) bf16  column-upsampled, zero-padded halo slab
    w_ref:     (2, TC, 6*Cin)          bf16  row-phase-folded weights (a, cout, (u,kw,cin))
    scale_ref: (TC, 1) f32                   gamma / sqrt(var + eps)
    shift_ref: (TC, 1) f32                   (bias - mean) * scale + beta
    o_ref:     (1, TC, TH, 4W)               NCHW rows; lane index = a*2W + output_col
    """
    tc = o_ref.shape[1]
    th = o_ref.shape[2]
    w2 = o_ref.shape[3] // 2            # 2*W == output row width

    # Hoisted once per grid step (JAX does not CSE broadcast_in_dim).
    scale = jnp.broadcast_to(scale_ref[...], (tc, w2))
    shift = jnp.broadcast_to(shift_ref[...], (tc, w2))

    for a in range(2):                  # output row phase: output rows 2*i + a
        w_a = w_ref[a]                  # (TC, 6*Cin)
        for i in range(th):             # output row index within the tile
            # 6 taps = 2 row taps (u, row-upsample folded) x 3 column taps (kw,
            # plain conv over the column-upsampled slab).  Each tap is a strided
            # (Cin, 2W) load; concat gives a 6*Cin-wide MXU contraction.
            taps = [x_ref[0, :, 0, i + a + u, pl.ds(kw, w2)]
                    for u in range(2) for kw in range(3)]
            rhs = jnp.concatenate(taps, axis=0)                    # (6*Cin, 2W)
            acc = jnp.dot(w_a, rhs, preferred_element_type=jnp.float32)  # (TC, 2W)
            y = jnp.maximum(acc * scale + shift, 0.0)              # bias+BN+ReLU (f32)
            # Lane-dense store: 2W-wide row at lane offset a*2W of the 4W block.
            o_ref[0, :, i, pl.ds(a * w2, w2)] = y.astype(o_ref.dtype)


def _fold_rows_into_weights(weight_hwio):
    """3x3 HWIO weights -> (2, Cout, 6*Cin).

    The nearest-x2 row-upsample is folded into 2 row taps (u) per output-row
    phase a (output row 2i+a reads original rows i+a+u-1); the 3 column taps kw
    stay unfolded and act on the column-upsampled input.  Row blocks are ordered
    (u, kw, cin) to match the kernel's RHS concatenation order.
    """
    w = weight_hwio.astype(jnp.float32)               # (3, 3, Cin, Cout)
    per_a = []
    for a in range(2):
        blocks = []
        for u in range(2):
            for kw in range(3):
                acc = jnp.zeros_like(w[0, 0])          # (Cin, Cout)
                for kh in range(3):
                    if (a + kh - 1) // 2 - a + 1 == u:
                        acc = acc + w[kh, kw]
                blocks.append(acc)
        per_a.append(jnp.concatenate(blocks, axis=0).T)   # (Cout, 6*Cin)
    return jnp.stack(per_a, axis=0)                       # (2, Cout, 6*Cin)


def _pick_cout_tile(cout):
    """Cout tile: full if <=256, else the largest multiple-of-8 divisor <= 256."""
    if cout <= 256:
        return cout
    best = cout                                        # fall back: no tiling
    for d in range(8, 257, 8):
        if cout % d == 0:
            best = d
    return best


def _pick_row_tile(h, w, cin, tc, in_bytes, out_bytes,
                   budget=24 * 1024 * 1024, max_th=32):
    """Largest multiple-of-8 divisor of H whose per-step VMEM estimate fits."""
    cands = [d for d in range(8, min(h, max_th) + 1, 8) if h % d == 0]
    if not cands:
        cands = [h]

    def est(th):
        slab = cin * (th + 2) * (2 * w + 2) * in_bytes       # input halo slab
        wts = 2 * tc * 6 * cin * in_bytes                    # folded weights
        outb = tc * th * 4 * w * out_bytes                   # output block
        tmp = 6 * cin * 2 * w * in_bytes + 4 * tc * 2 * w * 4  # live temporaries
        return 2 * slab + 2 * wts + 2 * outb + tmp           # x2: double buffering

    fit = [th for th in cands if est(th) <= budget]
    return max(fit) if fit else min(cands)


def up_conv_forward(x_nchw, weight_hwio, bias, gamma, beta,
                    running_mean, running_var, *,
                    compute_dtype=jnp.bfloat16, out_dtype=jnp.float32,
                    row_tile=None, vmem_limit_bytes=32 * 1024 * 1024):
    """up_conv forward: x (N, Cin, H, W) f32 -> (N, Cout, 2H, 2W) out_dtype.

    On v6e (128 MiB VMEM) vmem_limit_bytes can be raised to 64-96 MiB together with
    a larger row_tile; the defaults are sized for v7x's 64 MiB per TensorCore.
    """
    N, Cin, H, W = x_nchw.shape
    Cout = weight_hwio.shape[-1]

    TC = _pick_cout_tile(Cout)
    if row_tile is None:
        TH = _pick_row_tile(H, W, Cin, TC,
                            jnp.dtype(compute_dtype).itemsize,
                            jnp.dtype(out_dtype).itemsize)
    else:
        TH = row_tile
    assert H % TH == 0, f"row_tile {TH} must divide H={H}"
    assert Cout % TC == 0
    nrt = H // TH
    nct = Cout // TC
    Wu = 2 * W + 2

    # ---- input prep (fused by XLA into one gather-style pass; stays channel-major,
    # so no NCHW<->NHWC transpose is ever materialised) ----
    xp = jnp.pad(x_nchw, ((0, 0), (0, 0), (1, 1), (1, 1)))       # (N, Cin, H+2, W+2)
    # nearest x2 column upsample of the padded image; trim to the conv-ready
    # (one zero column each side) width 2W+2.
    xup = jnp.repeat(xp, 2, axis=3)[:, :, :, 1:2 * W + 3]        # (N, Cin, H+2, 2W+2)
    # halo row-slabs: rows [rt*TH, rt*TH + TH + 2) per row tile.
    row_idx = jnp.arange(nrt)[:, None] * TH + jnp.arange(TH + 2)[None, :]
    slabs = xup[:, :, row_idx, :].astype(compute_dtype)          # (N, Cin, nrt, TH+2, Wu)

    w_folded = _fold_rows_into_weights(weight_hwio).astype(compute_dtype)  # (2, Cout, 6Cin)

    # Fold conv bias + eval-mode BatchNorm into per-channel scale/shift (f32).
    inv_std = 1.0 / jnp.sqrt(running_var.astype(jnp.float32) + BN_EPS)
    scale = (gamma * inv_std).reshape(Cout, 1).astype(jnp.float32)
    shift = ((bias - running_mean) * gamma * inv_std + beta).reshape(Cout, 1)
    shift = shift.astype(jnp.float32)

    out = pl.pallas_call(
        _up_conv_kernel,
        out_shape=jax.ShapeDtypeStruct((N, Cout, H, 4 * W), out_dtype),
        grid_spec=pltpu.PrefetchScalarGridSpec(
            num_scalar_prefetch=0,
            grid=(N, nrt, nct),
            in_specs=[
                # halo slab: blocked over batch and row-tile -> small per-step DMA
                pl.BlockSpec((1, Cin, 1, TH + 2, Wu),
                             lambda n, rt, ct: (n, 0, rt, 0, 0)),
                pl.BlockSpec((2, TC, 6 * Cin), lambda n, rt, ct: (0, ct, 0)),
                pl.BlockSpec((TC, 1), lambda n, rt, ct: (ct, 0)),
                pl.BlockSpec((TC, 1), lambda n, rt, ct: (ct, 0)),
            ],
            out_specs=pl.BlockSpec((1, TC, TH, 4 * W),
                                   lambda n, rt, ct: (n, ct, rt, 0)),
        ),
        compiler_params=pltpu.CompilerParams(
            dimension_semantics=("parallel", "parallel", "arbitrary"),
            vmem_limit_bytes=vmem_limit_bytes),
    )(slabs, w_folded, scale, shift)

    # Free reshape (contiguity preserving): [n, c, i, a*2W + col] -> [n, c, 2i+a, col]
    return out.reshape(N, Cout, 2 * H, 2 * W)


def _reference(x_nchw, weight_hwio, bias, gamma, beta, running_mean, running_var):
    """Pure-JAX f32 reference matching the PyTorch module (eval-mode BN)."""
    xu = jnp.repeat(jnp.repeat(x_nchw, 2, axis=2), 2, axis=3)
    xh = jnp.transpose(xu, (0, 2, 3, 1))
    y = jax.lax.conv_general_dilated(
        xh, weight_hwio, window_strides=(1, 1), padding=((1, 1), (1, 1)),
        dimension_numbers=("NHWC", "HWIO", "NHWC"))
    y = y + bias
    y = (y - running_mean) / jnp.sqrt(running_var + BN_EPS) * gamma + beta
    y = jnp.maximum(y, 0.0)
    return jnp.transpose(y, (0, 3, 1, 2))


if __name__ == "__main__":
    key = jax.random.PRNGKey(0)
    k_x, k_w, k_b, k_g, k_beta = jax.random.split(key, 5)

    N, Cin, H, W = 2, 4, 16, 16
    Cout = 8

    x = jax.random.normal(k_x, (N, Cin, H, W), dtype=jnp.float32)
    weight = 0.1 * jax.random.normal(k_w, (3, 3, Cin, Cout), dtype=jnp.float32)  # HWIO
    bias = 0.1 * jax.random.normal(k_b, (Cout,), dtype=jnp.float32)
    gamma = 1.0 + 0.05 * jax.random.normal(k_g, (Cout,), dtype=jnp.float32)
    beta = 0.05 * jax.random.normal(k_beta, (Cout,), dtype=jnp.float32)
    running_mean = jnp.zeros((Cout,), dtype=jnp.float32)   # PyTorch default eval stats
    running_var = jnp.ones((Cout,), dtype=jnp.float32)

    out = up_conv_forward(x, weight, bias, gamma, beta, running_mean, running_var)
    out = jax.block_until_ready(out)
    assert out.shape == (N, Cout, 2 * H, 2 * W), out.shape

    ref = jax.block_until_ready(
        _reference(x, weight, bias, gamma, beta, running_mean, running_var))
    max_err = float(jnp.max(jnp.abs(out.astype(jnp.float32) - ref)))
    assert max_err < 5e-2, f"max abs err vs reference = {max_err}"

    print("KERNEL_OK")
</pallas_src>

<mosaic_0001>
module attributes {stable_mosaic.version = 11 : i64} {
  func.func @_up_conv_kernel(%arg0: i32, %arg1: i32, %arg2: i32, %arg3: memref<1x4x1x18x34xbf16, #tpu.memory_space<vmem>>, %arg4: memref<2x8x24xbf16, #tpu.memory_space<vmem>>, %arg5: memref<8x1xf32, #tpu.memory_space<vmem>>, %arg6: memref<8x1xf32, #tpu.memory_space<vmem>>, %arg7: memref<1x8x16x64xf32, #tpu.memory_space<vmem>>) attributes {dimension_semantics = [#tpu.dimension_semantics<parallel>, #tpu.dimension_semantics<parallel>, #tpu.dimension_semantics<arbitrary>], iteration_bounds = array<i64: 2, 1, 1>, scalar_prefetch = 0 : i64, scratch_operands = 0 : i64, tpu.core_type = #tpu.core_type<tc>, window_params = [{transform_indices = @transform_0, window_bounds = array<i64: 1, 4, 1, 18, 34>}, {transform_indices = @transform_1, window_bounds = array<i64: 2, 8, 24>}, {transform_indices = @transform_2, window_bounds = array<i64: 8, 1>}, {transform_indices = @transform_3, window_bounds = array<i64: 8, 1>}, {transform_indices = @transform_4, window_bounds = array<i64: 1, 8, 16, 64>}]} {
    %c0 = arith.constant 0 : index
    %c0_0 = arith.constant 0 : index
    %0 = vector.load %arg5[%c0, %c0_0] : memref<8x1xf32, #tpu.memory_space<vmem>>, vector<8x1xf32>
    %1 = vector.shape_cast %0 : vector<8x1xf32> to vector<8x1xf32>
    %2 = vector.broadcast %1 : vector<8x1xf32> to vector<8x32xf32>
    %c0_1 = arith.constant 0 : index
    %c0_2 = arith.constant 0 : index
    %3 = vector.load %arg6[%c0_1, %c0_2] : memref<8x1xf32, #tpu.memory_space<vmem>>, vector<8x1xf32>
    %4 = vector.shape_cast %3 : vector<8x1xf32> to vector<8x1xf32>
    %5 = vector.broadcast %4 : vector<8x1xf32> to vector<8x32xf32>
    %c0_3 = arith.constant 0 : index
    %c0_4 = arith.constant 0 : index
    %c0_5 = arith.constant 0 : index
    %6 = vector.load %arg4[%c0_3, %c0_4, %c0_5] : memref<2x8x24xbf16, #tpu.memory_space<vmem>>, vector<1x8x24xbf16>
    %7 = vector.shape_cast %6 : vector<1x8x24xbf16> to vector<8x24xbf16>
    %c0_6 = arith.constant 0 : index
    %c0_7 = arith.constant 0 : index
    %c0_8 = arith.constant 0 : index
    %c0_9 = arith.constant 0 : index
    %c0_10 = arith.constant 0 : index
    %8 = vector.load %arg3[%c0_6, %c0_7, %c0_8, %c0_9, %c0_10] : memref<1x4x1x18x34xbf16, #tpu.memory_space<vmem>>, vector<1x4x1x1x32xbf16>
    %9 = vector.shape_cast %8 : vector<1x4x1x1x32xbf16> to vector<4x32xbf16>
    %c0_11 = arith.constant 0 : index
    %c0_12 = arith.constant 0 : index
    %c0_13 = arith.constant 0 : index
    %c0_14 = arith.constant 0 : index
    %c1 = arith.constant 1 : index
    %10 = vector.load %arg3[%c0_11, %c0_12, %c0_13, %c0_14, %c1] : memref<1x4x1x18x34xbf16, #tpu.memory_space<vmem>>, vector<1x4x1x1x32xbf16>
    %11 = vector.shape_cast %10 : vector<1x4x1x1x32xbf16> to vector<4x32xbf16>
    %c0_15 = arith.constant 0 : index
    %c0_16 = arith.constant 0 : index
    %c0_17 = arith.constant 0 : index
    %c0_18 = arith.constant 0 : index
    %c2 = arith.constant 2 : index
    %12 = vector.load %arg3[%c0_15, %c0_16, %c0_17, %c0_18, %c2] : memref<1x4x1x18x34xbf16, #tpu.memory_space<vmem>>, vector<1x4x1x1x32xbf16>
    %13 = vector.shape_cast %12 : vector<1x4x1x1x32xbf16> to vector<4x32xbf16>
    %c0_19 = arith.constant 0 : index
    %c0_20 = arith.constant 0 : index
    %c0_21 = arith.constant 0 : index
    %c1_22 = arith.constant 1 : index
    %c0_23 = arith.constant 0 : index
    %14 = vector.load %arg3[%c0_19, %c0_20, %c0_21, %c1_22, %c0_23] : memref<1x4x1x18x34xbf16, #tpu.memory_space<vmem>>, vector<1x4x1x1x32xbf16>
    %15 = vector.shape_cast %14 : vector<1x4x1x1x32xbf16> to vector<4x32xbf16>
    %c0_24 = arith.constant 0 : index
    %c0_25 = arith.constant 0 : index
    %c0_26 = arith.constant 0 : index
    %c1_27 = arith.constant 1 : index
    %c1_28 = arith.constant 1 : index
    %16 = vector.load %arg3[%c0_24, %c0_25, %c0_26, %c1_27, %c1_28] : memref<1x4x1x18x34xbf16, #tpu.memory_space<vmem>>, vector<1x4x1x1x32xbf16>
    %17 = vector.shape_cast %16 : vector<1x4x1x1x32xbf16> to vector<4x32xbf16>
    %c0_29 = arith.constant 0 : index
    %c0_30 = arith.constant 0 : index
    %c0_31 = arith.constant 0 : index
    %c1_32 = arith.constant 1 : index
    %c2_33 = arith.constant 2 : index
    %18 = vector.load %arg3[%c0_29, %c0_30, %c0_31, %c1_32, %c2_33] : memref<1x4x1x18x34xbf16, #tpu.memory_space<vmem>>, vector<1x4x1x1x32xbf16>
    %19 = vector.shape_cast %18 : vector<1x4x1x1x32xbf16> to vector<4x32xbf16>
    %20 = tpu.concatenate %9, %11, %13, %15, %17, %19 in 0 : vector<4x32xbf16>, vector<4x32xbf16>, vector<4x32xbf16>, vector<4x32xbf16>, vector<4x32xbf16>, vector<4x32xbf16> -> vector<24x32xbf16>
    %cst = arith.constant dense<0.000000e+00> : vector<8x32xf32>
    %21 = tpu.matmul %7, %20, %cst {dimension_numbers = #tpu.dot_dimension_numbers<[1], [0], [0], [1], [0, 0, 1, 1], [], []>} : vector<8x24xbf16>, vector<24x32xbf16>, vector<8x32xf32> -> vector<8x32xf32>
    %22 = arith.mulf %21, %2 : vector<8x32xf32>
    %23 = arith.addf %22, %5 : vector<8x32xf32>
    %cst_34 = arith.constant 0.000000e+00 : f32
    %24 = vector.broadcast %cst_34 : f32 to vector<8x32xf32>
    %25 = arith.maximumf %23, %24 : vector<8x32xf32>
    %c0_35 = arith.constant 0 : index
    %c0_36 = arith.constant 0 : index
    %c0_37 = arith.constant 0 : index
    %c0_38 = arith.constant 0 : index
    %26 = vector.load %arg7[%c0_35, %c0_36, %c0_37, %c0_38] : memref<1x8x16x64xf32, #tpu.memory_space<vmem>>, vector<1x8x1x32xf32>
    %27 = vector.shape_cast %26 : vector<1x8x1x32xf32> to vector<8x32xf32>
    %28 = vector.shape_cast %25 : vector<8x32xf32> to vector<1x8x1x32xf32>
    tpu.vector_store %arg7[%c0_35, %c0_36, %c0_37, %c0_38], %28 {strides = array<i32>} : memref<1x8x16x64xf32, #tpu.memory_space<vmem>>, vector<1x8x1x32xf32>,
    %c0_39 = arith.constant 0 : index
    %c0_40 = arith.constant 0 : index
    %c0_41 = arith.constant 0 : index
    %c1_42 = arith.constant 1 : index
    %c0_43 = arith.constant 0 : index
    %29 = vector.load %arg3[%c0_39, %c0_40, %c0_41, %c1_42, %c0_43] : memref<1x4x1x18x34xbf16, #tpu.memory_space<vmem>>, vector<1x4x1x1x32xbf16>
    %30 = vector.shape_cast %29 : vector<1x4x1x1x32xbf16> to vector<4x32xbf16>
    %c0_44 = arith.constant 0 : index
    %c0_45 = arith.constant 0 : index
    %c0_46 = arith.constant 0 : index
    %c1_47 = arith.constant 1 : index
    %c1_48 = arith.constant 1 : index
    %31 = vector.load %arg3[%c0_44, %c0_45, %c0_46, %c1_47, %c1_48] : memref<1x4x1x18x34xbf16, #tpu.memory_space<vmem>>, vector<1x4x1x1x32xbf16>
    %32 = vector.shape_cast %31 : vector<1x4x1x1x32xbf16> to vector<4x32xbf16>
    %c0_49 = arith.constant 0 : index
    %c0_50 = arith.constant 0 : index
    %c0_51 = arith.constant 0 : index
    %c1_52 = arith.constant 1 : index
    %c2_53 = arith.constant 2 : index
    %33 = vector.load %arg3[%c0_49, %c0_50, %c0_51, %c1_52, %c2_53] : memref<1x4x1x18x34xbf16, #tpu.memory_space<vmem>>, vector<1x4x1x1x32xbf16>
    %34 = vector.shape_cast %33 : vector<1x4x1x1x32xbf16> to vector<4x32xbf16>
    %c0_54 = arith.constant 0 : index
    %c0_55 = arith.constant 0 : index
    %c0_56 = arith.constant 0 : index
    %c2_57 = arith.constant 2 : index
    %c0_58 = arith.constant 0 : index
    %35 = vector.load %arg3[%c0_54, %c0_55, %c0_56, %c2_57, %c0_58] : memref<1x4x1x18x34xbf16, #tpu.memory_space<vmem>>, vector<1x4x1x1x32xbf16>
    %36 = vector.shape_cast %35 : vector<1x4x1x1x32xbf16> to vector<4x32xbf16>
    %c0_59 = arith.constant 0 : index
    %c0_60 = arith.constant 0 : index
    %c0_61 = arith.constant 0 : index
    %c2_62 = arith.constant 2 : index
    %c1_63 = arith.constant 1 : index
    %37 = vector.load %arg3[%c0_59, %c0_60, %c0_61, %c2_62, %c1_63] : memref<1x4x1x18x34xbf16, #tpu.memory_space<vmem>>, vector<1x4x1x1x32xbf16>
    %38 = vector.shape_cast %37 : vector<1x4x1x1x32xbf16> to vector<4x32xbf16>
    %c0_64 = arith.constant 0 : index
    %c0_65 = arith.constant 0 : index
    %c0_66 = arith.constant 0 : index
    %c2_67 = arith.constant 2 : index
    %c2_68 = arith.constant 2 : index
    %39 = vector.load %arg3[%c0_64, %c0_65, %c0_66, %c2_67, %c2_68] : memref<1x4x1x18x34xbf16, #tpu.memory_space<vmem>>, vector<1x4x1x1x32xbf16>
    %40 = vector.shape_cast %39 : vector<1x4x1x1x32xbf16> to vector<4x32xbf16>
    %41 = tpu.concatenate %30, %32, %34, %36, %38, %40 in 0 : vector<4x32xbf16>, vector<4x32xbf16>, vector<4x32xbf16>, vector<4x32xbf16>, vector<4x32xbf16>, vector<4x32xbf16> -> vector<24x32xbf16>
    %cst_69 = arith.constant dense<0.000000e+00> : vector<8x32xf32>
    %42 = tpu.matmul %7, %41, %cst_69 {dimension_numbers = #tpu.dot_dimension_numbers<[1], [0], [0], [1], [0, 0, 1, 1], [], []>} : vector<8x24xbf16>, vector<24x32xbf16>, vector<8x32xf32> -> vector<8x32xf32>
    %43 = arith.mulf %42, %2 : vector<8x32xf32>
    %44 = arith.addf %43, %5 : vector<8x32xf32>
    %cst_70 = arith.constant 0.000000e+00 : f32
    %45 = vector.broadcast %cst_70 : f32 to vector<8x32xf32>
    %46 = arith.maximumf %44, %45 : vector<8x32xf32>
    %c0_71 = arith.constant 0 : index
    %c0_72 = arith.constant 0 : index
    %c1_73 = arith.constant 1 : index
    %c0_74 = arith.constant 0 : index
    %47 = vector.load %arg7[%c0_71, %c0_72, %c1_73, %c0_74] : memref<1x8x16x64xf32, #tpu.memory_space<vmem>>, vector<1x8x1x32xf32>
    %48 = vector.shape_cast %47 : vector<1x8x1x32xf32> to vector<8x32xf32>
    %49 = vector.shape_cast %46 : vector<8x32xf32> to vector<1x8x1x32xf32>
    tpu.vector_store %arg7[%c0_71, %c0_72, %c1_73, %c0_74], %49 {strides = array<i32>} : memref<1x8x16x64xf32, #tpu.memory_space<vmem>>, vector<1x8x1x32xf32>,
    %c0_75 = arith.constant 0 : index
    %c0_76 = arith.constant 0 : index
    %c0_77 = arith.constant 0 : index
    %c2_78 = arith.constant 2 : index
    %c0_79 = arith.constant 0 : index
    %50 = vector.load %arg3[%c0_75, %c0_76, %c0_77, %c2_78, %c0_79] : memref<1x4x1x18x34xbf16, #tpu.memory_space<vmem>>, vector<1x4x1x1x32xbf16>
    %51 = vector.shape_cast %50 : vector<1x4x1x1x32xbf16> to vector<4x32xbf16>
    %c0_80 = arith.constant 0 : index
    %c0_81 = arith.constant 0 : index
    %c0_82 = arith.constant 0 : index
    %c2_83 = arith.constant 2 : index
    %c1_84 = arith.constant 1 : index
    %52 = vector.load %arg3[%c0_80, %c0_81, %c0_82, %c2_83, %c1_84] : memref<1x4x1x18x34xbf16, #tpu.memory_space<vmem>>, vector<1x4x1x1x32xbf16>
    %53 = vector.shape_cast %52 : vector<1x4x1x1x32xbf16> to vector<4x32xbf16>
    %c0_85 = arith.constant 0 : index
    %c0_86 = arith.constant 0 : index
    %c0_87 = arith.constant 0 : index
    %c2_88 = arith.constant 2 : index
    %c2_89 = arith.constant 2 : index
    %54 = vector.load %arg3[%c0_85, %c0_86, %c0_87, %c2_88, %c2_89] : memref<1x4x1x18x34xbf16, #tpu.memory_space<vmem>>, vector<1x4x1x1x32xbf16>
    %55 = vector.shape_cast %54 : vector<1x4x1x1x32xbf16> to vector<4x32xbf16>
    %c0_90 = arith.constant 0 : index
    %c0_91 = arith.constant 0 : index
    %c0_92 = arith.constant 0 : index
    %c3 = arith.constant 3 : index
    %c0_93 = arith.constant 0 : index
    %56 = vector.load %arg3[%c0_90, %c0_91, %c0_92, %c3, %c0_93] : memref<1x4x1x18x34xbf16, #tpu.memory_space<vmem>>, vector<1x4x1x1x32xbf16>
    %57 = vector.shape_cast %56 : vector<1x4x1x1x32xbf16> to vector<4x32xbf16>
    %c0_94 = arith.constant 0 : index
    %c0_95 = arith.constant 0 : index
    %c0_96 = arith.constant 0 : index
    %c3_97 = arith.constant 3 : index
    %c1_98 = arith.constant 1 : index
    %58 = vector.load %arg3[%c0_94, %c0_95, %c0_96, %c3_97, %c1_98] : memref<1x4x1x18x34xbf16, #tpu.memory_space<vmem>>, vector<1x4x1x1x32xbf16>
    %59 = vector.shape_cast %58 : vector<1x4x1x1x32xbf16> to vector<4x32xbf16>
    %c0_99 = arith.constant 0 : index
    %c0_100 = arith.constant 0 : index
    %c0_101 = arith.constant 0 : index
    %c3_102 = arith.constant 3 : index
    %c2_103 = arith.constant 2 : index
    %60 = vector.load %arg3[%c0_99, %c0_100, %c0_101, %c3_102, %c2_103] : memref<1x4x1x18x34xbf16, #tpu.memory_space<vmem>>, vector<1x4x1x1x32xbf16>
    %61 = vector.shape_cast %60 : vector<1x4x1x1x32xbf16> to vector<4x32xbf16>
    %62 = tpu.concatenate %51, %53, %55, %57, %59, %61 in 0 : vector<4x32xbf16>, vector<4x32xbf16>, vector<4x32xbf16>, vector<4x32xbf16>, vector<4x32xbf16>, vector<4x32xbf16> -> vector<24x32xbf16>
    %cst_104 = arith.constant dense<0.000000e+00> : vector<8x32xf32>
    %63 = tpu.matmul %7, %62, %cst_104 {dimension_numbers = #tpu.dot_dimension_numbers<[1], [0], [0], [1], [0, 0, 1, 1], [], []>} : vector<8x24xbf16>, vector<24x32xbf16>, vector<8x32xf32> -> vector<8x32xf32>
    %64 = arith.mulf %63, %2 : vector<8x32xf32>
    %65 = arith.addf %64, %5 : vector<8x32xf32>
    %cst_105 = arith.constant 0.000000e+00 : f32
    %66 = vector.broadcast %cst_105 : f32 to vector<8x32xf32>
    %67 = arith.maximumf %65, %66 : vector<8x32xf32>
    %c0_106 = arith.constant 0 : index
    %c0_107 = arith.constant 0 : index
    %c2_108 = arith.constant 2 : index
    %c0_109 = arith.constant 0 : index
    %68 = vector.load %arg7[%c0_106, %c0_107, %c2_108, %c0_109] : memref<1x8x16x64xf32, #tpu.memory_space<vmem>>, vector<1x8x1x32xf32>
    %69 = vector.shape_cast %68 : vector<1x8x1x32xf32> to vector<8x32xf32>
    %70 = vector.shape_cast %67 : vector<8x32xf32> to vector<1x8x1x32xf32>
    tpu.vector_store %arg7[%c0_106, %c0_107, %c2_108, %c0_109], %70 {strides = array<i32>} : memref<1x8x16x64xf32, #tpu.memory_space<vmem>>, vector<1x8x1x32xf32>,
    %c0_110 = arith.constant 0 : index
    %c0_111 = arith.constant 0 : index
    %c0_112 = arith.constant 0 : index
    %c3_113 = arith.constant 3 : index
    %c0_114 = arith.constant 0 : index
    %71 = vector.load %arg3[%c0_110, %c0_111, %c0_112, %c3_113, %c0_114] : memref<1x4x1x18x34xbf16, #tpu.memory_space<vmem>>, vector<1x4x1x1x32xbf16>
    %72 = vector.shape_cast %71 : vector<1x4x1x1x32xbf16> to vector<4x32xbf16>
    %c0_115 = arith.constant 0 : index
    %c0_116 = arith.constant 0 : index
    %c0_117 = arith.constant 0 : index
    %c3_118 = arith.constant 3 : index
    %c1_119 = arith.constant 1 : index
    %73 = vector.load %arg3[%c0_115, %c0_116, %c0_117, %c3_118, %c1_119] : memref<1x4x1x18x34xbf16, #tpu.memory_space<vmem>>, vector<1x4x1x1x32xbf16>
    %74 = vector.shape_cast %73 : vector<1x4x1x1x32xbf16> to vector<4x32xbf16>
    %c0_120 = arith.constant 0 : index
    %c0_121 = arith.constant 0 : index
    %c0_122 = arith.constant 0 : index
    %c3_123 = arith.constant 3 : index
    %c2_124 = arith.constant 2 : index
    %75 = vector.load %arg3[%c0_120, %c0_121, %c0_122, %c3_123, %c2_124] : memref<1x4x1x18x34xbf16, #tpu.memory_space<vmem>>, vector<1x4x1x1x32xbf16>
    %76 = vector.shape_cast %75 : vector<1x4x1x1x32xbf16> to vector<4x32xbf16>
    %c0_125 = arith.constant 0 : index
    %c0_126 = arith.constant 0 : index
    %c0_127 = arith.constant 0 : index
    %c4 = arith.constant 4 : index
    %c0_128 = arith.constant 0 : index
    %77 = vector.load %arg3[%c0_125, %c0_126, %c0_127, %c4, %c0_128] : memref<1x4x1x18x34xbf16, #tpu.memory_space<vmem>>, vector<1x4x1x1x32xbf16>
    %78 = vector.shape_cast %77 : vector<1x4x1x1x32xbf16> to vector<4x32xbf16>
    %c0_129 = arith.constant 0 : index
    %c0_130 = arith.constant 0 : index
    %c0_131 = arith.constant 0 : index
    %c4_132 = arith.constant 4 : index
    %c1_133 = arith.constant 1 : index
    %79 = vector.load %arg3[%c0_129, %c0_130, %c0_131, %c4_132, %c1_133] : memref<1x4x1x18x34xbf16, #tpu.memory_space<vmem>>, vector<1x4x1x1x32xbf16>
    %80 = vector.shape_cast %79 : vector<1x4x1x1x32xbf16> to vector<4x32xbf16>
    %c0_134 = arith.constant 0 : index
    %c0_135 = arith.constant 0 : index
    %c0_136 = arith.constant 0 : index
    %c4_137 = arith.constant 4 : index
    %c2_138 = arith.constant 2 : index
    %81 = vector.load %arg3[%c0_134, %c0_135, %c0_136, %c4_137, %c2_138] : memref<1x4x1x18x34xbf16, #tpu.memory_space<vmem>>, vector<1x4x1x1x32xbf16>
    %82 = vector.shape_cast %81 : vector<1x4x1x1x32xbf16> to vector<4x32xbf16>
    %83 = tpu.concatenate %72, %74, %76, %78, %80, %82 in 0 : vector<4x32xbf16>, vector<4x32xbf16>, vector<4x32xbf16>, vector<4x32xbf16>, vector<4x32xbf16>, vector<4x32xbf16> -> vector<24x32xbf16>
    %cst_139 = arith.constant dense<0.000000e+00> : vector<8x32xf32>
    %84 = tpu.matmul %7, %83, %cst_139 {dimension_numbers = #tpu.dot_dimension_numbers<[1], [0], [0], [1], [0, 0, 1, 1], [], []>} : vector<8x24xbf16>, vector<24x32xbf16>, vector<8x32xf32> -> vector<8x32xf32>
    %85 = arith.mulf %84, %2 : vector<8x32xf32>
    %86 = arith.addf %85, %5 : vector<8x32xf32>
    %cst_140 = arith.constant 0.000000e+00 : f32
    %87 = vector.broadcast %cst_140 : f32 to vector<8x32xf32>
    %88 = arith.maximumf %86, %87 : vector<8x32xf32>
    %c0_141 = arith.constant 0 : index
    %c0_142 = arith.constant 0 : index
    %c3_143 = arith.constant 3 : index
    %c0_144 = arith.constant 0 : index
    %89 = vector.load %arg7[%c0_141, %c0_142, %c3_143, %c0_144] : memref<1x8x16x64xf32, #tpu.memory_space<vmem>>, vector<1x8x1x32xf32>
    %90 = vector.shape_cast %89 : vector<1x8x1x32xf32> to vector<8x32xf32>
    %91 = vector.shape_cast %88 : vector<8x32xf32> to vector<1x8x1x32xf32>
    tpu.vector_store %arg7[%c0_141, %c0_142, %c3_143, %c0_144], %91 {strides = array<i32>} : memref<1x8x16x64xf32, #tpu.memory_space<vmem>>, vector<1x8x1x32xf32>,
    %c0_145 = arith.constant 0 : index
    %c0_146 = arith.constant 0 : index
    %c0_147 = arith.constant 0 : index
    %c4_148 = arith.constant 4 : index
    %c0_149 = arith.constant 0 : index
    %92 = vector.load %arg3[%c0_145, %c0_146, %c0_147, %c4_148, %c0_149] : memref<1x4x1x18x34xbf16, #tpu.memory_space<vmem>>, vector<1x4x1x1x32xbf16>
    %93 = vector.shape_cast %92 : vector<1x4x1x1x32xbf16> to vector<4x32xbf16>
    %c0_150 = arith.constant 0 : index
    %c0_151 = arith.constant 0 : index
    %c0_152 = arith.constant 0 : index
    %c4_153 = arith.constant 4 : index
    %c1_154 = arith.constant 1 : index
    %94 = vector.load %arg3[%c0_150, %c0_151, %c0_152, %c4_153, %c1_154] : memref<1x4x1x18x34xbf16, #tpu.memory_space<vmem>>, vector<1x4x1x1x32xbf16>
    %95 = vector.shape_cast %94 : vector<1x4x1x1x32xbf16> to vector<4x32xbf16>
    %c0_155 = arith.constant 0 : index
    %c0_156 = arith.constant 0 : index
    %c0_157 = arith.constant 0 : index
    %c4_158 = arith.constant 4 : index
    %c2_159 = arith.constant 2 : index
    %96 = vector.load %arg3[%c0_155, %c0_156, %c0_157, %c4_158, %c2_159] : memref<1x4x1x18x34xbf16, #tpu.memory_space<vmem>>, vector<1x4x1x1x32xbf16>
    %97 = vector.shape_cast %96 : vector<1x4x1x1x32xbf16> to vector<4x32xbf16>
    %c0_160 = arith.constant 0 : index
    %c0_161 = arith.constant 0 : index
    %c0_162 = arith.constant 0 : index
    %c5 = arith.constant 5 : index
    %c0_163 = arith.constant 0 : index
    %98 = vector.load %arg3[%c0_160, %c0_161, %c0_162, %c5, %c0_163] : memref<1x4x1x18x34xbf16, #tpu.memory_space<vmem>>, vector<1x4x1x1x32xbf16>
    %99 = vector.shape_cast %98 : vector<1x4x1x1x32xbf16> to vector<4x32xbf16>
    %c0_164 = arith.constant 0 : index
    %c0_165 = arith.constant 0 : index
    %c0_166 = arith.constant 0 : index
    %c5_167 = arith.constant 5 : index
    %c1_168 = arith.constant 1 : index
    %100 = vector.load %arg3[%c0_164, %c0_165, %c0_166, %c5_167, %c1_168] : memref<1x4x1x18x34xbf16, #tpu.memory_space<vmem>>, vector<1x4x1x1x32xbf16>
    %101 = vector.shape_cast %100 : vector<1x4x1x1x32xbf16> to vector<4x32xbf16>
    %c0_169 = arith.constant 0 : index
    %c0_170 = arith.constant 0 : index
    %c0_171 = arith.constant 0 : index
    %c5_172 = arith.constant 5 : index
    %c2_173 = arith.constant 2 : index
    %102 = vector.load %arg3[%c0_169, %c0_170, %c0_171, %c5_172, %c2_173] : memref<1x4x1x18x34xbf16, #tpu.memory_space<vmem>>, vector<1x4x1x1x32xbf16>
    %103 = vector.shape_cast %102 : vector<1x4x1x1x32xbf16> to vector<4x32xbf16>
    %104 = tpu.concatenate %93, %95, %97, %99, %101, %103 in 0 : vector<4x32xbf16>, vector<4x32xbf16>, vector<4x32xbf16>, vector<4x32xbf16>, vector<4x32xbf16>, vector<4x32xbf16> -> vector<24x32xbf16>
    %cst_174 = arith.constant dense<0.000000e+00> : vector<8x32xf32>
    %105 = tpu.matmul %7, %104, %cst_174 {dimension_numbers = #tpu.dot_dimension_numbers<[1], [0], [0], [1], [0, 0, 1, 1], [], []>} : vector<8x24xbf16>, vector<24x32xbf16>, vector<8x32xf32> -> vector<8x32xf32>
    %106 = arith.mulf %105, %2 : vector<8x32xf32>
    %107 = arith.addf %106, %5 : vector<8x32xf32>
    %cst_175 = arith.constant 0.000000e+00 : f32
    %108 = vector.broadcast %cst_175 : f32 to vector<8x32xf32>
    %109 = arith.maximumf %107, %108 : vector<8x32xf32>
    %c0_176 = arith.constant 0 : index
    %c0_177 = arith.constant 0 : index
    %c4_178 = arith.constant 4 : index
    %c0_179 = arith.constant 0 : index
    %110 = vector.load %arg7[%c0_176, %c0_177, %c4_178, %c0_179] : memref<1x8x16x64xf32, #tpu.memory_space<vmem>>, vector<1x8x1x32xf32>
    %111 = vector.shape_cast %110 : vector<1x8x1x32xf32> to vector<8x32xf32>
    %112 = vector.shape_cast %109 : vector<8x32xf32> to vector<1x8x1x32xf32>
    tpu.vector_store %arg7[%c0_176, %c0_177, %c4_178, %c0_179], %112 {strides = array<i32>} : memref<1x8x16x64xf32, #tpu.memory_space<vmem>>, vector<1x8x1x32xf32>,
    %c0_180 = arith.constant 0 : index
    %c0_181 = arith.constant 0 : index
    %c0_182 = arith.constant 0 : index
    %c5_183 = arith.constant 5 : index
    %c0_184 = arith.constant 0 : index
    %113 = vector.load %arg3[%c0_180, %c0_181, %c0_182, %c5_183, %c0_184] : memref<1x4x1x18x34xbf16, #tpu.memory_space<vmem>>, vector<1x4x1x1x32xbf16>
    %114 = vector.shape_cast %113 : vector<1x4x1x1x32xbf16> to vector<4x32xbf16>
    %c0_185 = arith.constant 0 : index
    %c0_186 = arith.constant 0 : index
    %c0_187 = arith.constant 0 : index
    %c5_188 = arith.constant 5 : index
    %c1_189 = arith.constant 1 : index
    %115 = vector.load %arg3[%c0_185, %c0_186, %c0_187, %c5_188, %c1_189] : memref<1x4x1x18x34xbf16, #tpu.memory_space<vmem>>, vector<1x4x1x1x32xbf16>
    %116 = vector.shape_cast %115 : vector<1x4x1x1x32xbf16> to vector<4x32xbf16>
    %c0_190 = arith.constant 0 : index
    %c0_191 = arith.constant 0 : index
    %c0_192 = arith.constant 0 : index
    %c5_193 = arith.constant 5 : index
    %c2_194 = arith.constant 2 : index
    %117 = vector.load %arg3[%c0_190, %c0_191, %c0_192, %c5_193, %c2_194] : memref<1x4x1x18x34xbf16, #tpu.memory_space<vmem>>, vector<1x4x1x1x32xbf16>
    %118 = vector.shape_cast %117 : vector<1x4x1x1x32xbf16> to vector<4x32xbf16>
    %c0_195 = arith.constant 0 : index
    %c0_196 = arith.constant 0 : index
    %c0_197 = arith.constant 0 : index
    %c6 = arith.constant 6 : index
    %c0_198 = arith.constant 0 : index
    %119 = vector.load %arg3[%c0_195, %c0_196, %c0_197, %c6, %c0_198] : memref<1x4x1x18x34xbf16, #tpu.memory_space<vmem>>, vector<1x4x1x1x32xbf16>
    %120 = vector.shape_cast %119 : vector<1x4x1x1x32xbf16> to vector<4x32xbf16>
    %c0_199 = arith.constant 0 : index
    %c0_200 = arith.constant 0 : index
    %c0_201 = arith.constant 0 : index
    %c6_202 = arith.constant 6 : index
    %c1_203 = arith.constant 1 : index
    %121 = vector.load %arg3[%c0_199, %c0_200, %c0_201, %c6_202, %c1_203] : memref<1x4x1x18x34xbf16, #tpu.memory_space<vmem>>, vector<1x4x1x1x32xbf16>
    %122 = vector.shape_cast %121 : vector<1x4x1x1x32xbf16> to vector<4x32xbf16>
    %c0_204 = arith.constant 0 : index
    %c0_205 = arith.constant 0 : index
    %c0_206 = arith.constant 0 : index
    %c6_207 = arith.constant 6 : index
    %c2_208 = arith.constant 2 : index
    %123 = vector.load %arg3[%c0_204, %c0_205, %c0_206, %c6_207, %c2_208] : memref<1x4x1x18x34xbf16, #tpu.memory_space<vmem>>, vector<1x4x1x1x32xbf16>
    %124 = vector.shape_cast %123 : vector<1x4x1x1x32xbf16> to vector<4x32xbf16>
    %125 = tpu.concatenate %114, %116, %118, %120, %122, %124 in 0 : vector<4x32xbf16>, vector<4x32xbf16>, vector<4x32xbf16>, vector<4x32xbf16>, vector<4x32xbf16>, vector<4x32xbf16> -> vector<24x32xbf16>
    %cst_209 = arith.constant dense<0.000000e+00> : vector<8x32xf32>
    %126 = tpu.matmul %7, %125, %cst_209 {dimension_numbers = #tpu.dot_dimension_numbers<[1], [0], [0], [1], [0, 0, 1, 1], [], []>} : vector<8x24xbf16>, vector<24x32xbf16>, vector<8x32xf32> -> vector<8x32xf32>
    %127 = arith.mulf %126, %2 : vector<8x32xf32>
    %128 = arith.addf %127, %5 : vector<8x32xf32>
    %cst_210 = arith.constant 0.000000e+00 : f32
    %129 = vector.broadcast %cst_210 : f32 to vector<8x32xf32>
    %130 = arith.maximumf %128, %129 : vector<8x32xf32>
    %c0_211 = arith.constant 0 : index
    %c0_212 = arith.constant 0 : index
    %c5_213 = arith.constant 5 : index
    %c0_214 = arith.constant 0 : index
    %131 = vector.load %arg7[%c0_211, %c0_212, %c5_213, %c0_214] : memref<1x8x16x64xf32, #tpu.memory_space<vmem>>, vector<1x8x1x32xf32>
    %132 = vector.shape_cast %131 : vector<1x8x1x32xf32> to vector<8x32xf32>
    %133 = vector.shape_cast %130 : vector<8x32xf32> to vector<1x8x1x32xf32>
    tpu.vector_store %arg7[%c0_211, %c0_212, %c5_213, %c0_214], %133 {strides = array<i32>} : memref<1x8x16x64xf32, #tpu.memory_space<vmem>>, vector<1x8x1x32xf32>,
    %c0_215 = arith.constant 0 : index
    %c0_216 = arith.constant 0 : index
    %c0_217 = arith.constant 0 : index
    %c6_218 = arith.constant 6 : index
    %c0_219 = arith.constant 0 : index
    %134 = vector.load %arg3[%c0_215, %c0_216, %c0_217, %c6_218, %c0_219] : memref<1x4x1x18x34xbf16, #tpu.memory_space<vmem>>, vector<1x4x1x1x32xbf16>
    %135 = vector.shape_cast %134 : vector<1x4x1x1x32xbf16> to vector<4x32xbf16>
    %c0_220 = arith.constant 0 : index
    %c0_221 = arith.constant 0 : index
    %c0_222 = arith.constant 0 : index
    %c6_223 = arith.constant 6 : index
    %c1_224 = arith.constant 1 : index
    %136 = vector.load %arg3[%c0_220, %c0_221, %c0_222, %c6_223, %c1_224] : memref<1x4x1x18x34xbf16, #tpu.memory_space<vmem>>, vector<1x4x1x1x32xbf16>
    %137 = vector.shape_cast %136 : vector<1x4x1x1x32xbf16> to vector<4x32xbf16>
    %c0_225 = arith.constant 0 : index
    %c0_226 = arith.constant 0 : index
    %c0_227 = arith.constant 0 : index
    %c6_228 = arith.constant 6 : index
    %c2_229 = arith.constant 2 : index
    %138 = vector.load %arg3[%c0_225, %c0_226, %c0_227, %c6_228, %c2_229] : memref<1x4x1x18x34xbf16, #tpu.memory_space<vmem>>, vector<1x4x1x1x32xbf16>
    %139 = vector.shape_cast %138 : vector<1x4x1x1x32xbf16> to vector<4x32xbf16>
    %c0_230 = arith.constant 0 : index
    %c0_231 = arith.constant 0 : index
    %c0_232 = arith.constant 0 : index
    %c7 = arith.constant 7 : index
    %c0_233 = arith.constant 0 : index
    %140 = vector.load %arg3[%c0_230, %c0_231, %c0_232, %c7, %c0_233] : memref<1x4x1x18x34xbf16, #tpu.memory_space<vmem>>, vector<1x4x1x1x32xbf16>
    %141 = vector.shape_cast %140 : vector<1x4x1x1x32xbf16> to vector<4x32xbf16>
    %c0_234 = arith.constant 0 : index
    %c0_235 = arith.constant 0 : index
    %c0_236 = arith.constant 0 : index
    %c7_237 = arith.constant 7 : index
    %c1_238 = arith.constant 1 : index
    %142 = vector.load %arg3[%c0_234, %c0_235, %c0_236, %c7_237, %c1_238] : memref<1x4x1x18x34xbf16, #tpu.memory_space<vmem>>, vector<1x4x1x1x32xbf16>
    %143 = vector.shape_cast %142 : vector<1x4x1x1x32xbf16> to vector<4x32xbf16>
    %c0_239 = arith.constant 0 : index
    %c0_240 = arith.constant 0 : index
    %c0_241 = arith.constant 0 : index
    %c7_242 = arith.constant 7 : index
    %c2_243 = arith.constant 2 : index
    %144 = vector.load %arg3[%c0_239, %c0_240, %c0_241, %c7_242, %c2_243] : memref<1x4x1x18x34xbf16, #tpu.memory_space<vmem>>, vector<1x4x1x1x32xbf16>
    %145 = vector.shape_cast %144 : vector<1x4x1x1x32xbf16> to vector<4x32xbf16>
    %146 = tpu.concatenate %135, %137, %139, %141, %143, %145 in 0 : vector<4x32xbf16>, vector<4x32xbf16>, vector<4x32xbf16>, vector<4x32xbf16>, vector<4x32xbf16>, vector<4x32xbf16> -> vector<24x32xbf16>
    %cst_244 = arith.constant dense<0.000000e+00> : vector<8x32xf32>
    %147 = tpu.matmul %7, %146, %cst_244 {dimension_numbers = #tpu.dot_dimension_numbers<[1], [0], [0], [1], [0, 0, 1, 1], [], []>} : vector<8x24xbf16>, vector<24x32xbf16>, vector<8x32xf32> -> vector<8x32xf32>
    %148 = arith.mulf %147, %2 : vector<8x32xf32>
    %149 = arith.addf %148, %5 : vector<8x32xf32>
    %cst_245 = arith.constant 0.000000e+00 : f32
    %150 = vector.broadcast %cst_245 : f32 to vector<8x32xf32>
    %151 = arith.maximumf %149, %150 : vector<8x32xf32>
    %c0_246 = arith.constant 0 : index
    %c0_247 = arith.constant 0 : index
    %c6_248 = arith.constant 6 : index
    %c0_249 = arith.constant 0 : index
    %152 = vector.load %arg7[%c0_246, %c0_247, %c6_248, %c0_249] : memref<1x8x16x64xf32, #tpu.memory_space<vmem>>, vector<1x8x1x32xf32>
    %153 = vector.shape_cast %152 : vector<1x8x1x32xf32> to vector<8x32xf32>
    %154 = vector.shape_cast %151 : vector<8x32xf32> to vector<1x8x1x32xf32>
    tpu.vector_store %arg7[%c0_246, %c0_247, %c6_248, %c0_249], %154 {strides = array<i32>} : memref<1x8x16x64xf32, #tpu.memory_space<vmem>>, vector<1x8x1x32xf32>,
    %c0_250 = arith.constant 0 : index
    %c0_251 = arith.constant 0 : index
    %c0_252 = arith.constant 0 : index
    %c7_253 = arith.constant 7 : index
    %c0_254 = arith.constant 0 : index
    %155 = vector.load %arg3[%c0_250, %c0_251, %c0_252, %c7_253, %c0_254] : memref<1x4x1x18x34xbf16, #tpu.memory_space<vmem>>, vector<1x4x1x1x32xbf16>
    %156 = vector.shape_cast %155 : vector<1x4x1x1x32xbf16> to vector<4x32xbf16>
    %c0_255 = arith.constant 0 : index
    %c0_256 = arith.constant 0 : index
    %c0_257 = arith.constant 0 : index
    %c7_258 = arith.constant 7 : index
    %c1_259 = arith.constant 1 : index
    %157 = vector.load %arg3[%c0_255, %c0_256, %c0_257, %c7_258, %c1_259] : memref<1x4x1x18x34xbf16, #tpu.memory_space<vmem>>, vector<1x4x1x1x32xbf16>
    %158 = vector.shape_cast %157 : vector<1x4x1x1x32xbf16> to vector<4x32xbf16>
    %c0_260 = arith.constant 0 : index
    %c0_261 = arith.constant 0 : index
    %c0_262 = arith.constant 0 : index
    %c7_263 = arith.constant 7 : index
    %c2_264 = arith.constant 2 : index
    %159 = vector.load %arg3[%c0_260, %c0_261, %c0_262, %c7_263, %c2_264] : memref<1x4x1x18x34xbf16, #tpu.memory_space<vmem>>, vector<1x4x1x1x32xbf16>
    %160 = vector.shape_cast %159 : vector<1x4x1x1x32xbf16> to vector<4x32xbf16>
    %c0_265 = arith.constant 0 : index
    %c0_266 = arith.constant 0 : index
    %c0_267 = arith.constant 0 : index
    %c8 = arith.constant 8 : index
    %c0_268 = arith.constant 0 : index
    %161 = vector.load %arg3[%c0_265, %c0_266, %c0_267, %c8, %c0_268] : memref<1x4x1x18x34xbf16, #tpu.memory_space<vmem>>, vector<1x4x1x1x32xbf16>
    %162 = vector.shape_cast %161 : vector<1x4x1x1x32xbf16> to vector<4x32xbf16>
    %c0_269 = arith.constant 0 : index
    %c0_270 = arith.constant 0 : index
    %c0_271 = arith.constant 0 : index
    %c8_272 = arith.constant 8 : index
    %c1_273 = arith.constant 1 : index
    %163 = vector.load %arg3[%c0_269, %c0_270, %c0_271, %c8_272, %c1_273] : memref<1x4x1x18x34xbf16, #tpu.memory_space<vmem>>, vector<1x4x1x1x32xbf16>
    %164 = vector.shape_cast %163 : vector<1x4x1x1x32xbf16> to vector<4x32xbf16>
    %c0_274 = arith.constant 0 : index
    %c0_275 = arith.constant 0 : index
    %c0_276 = arith.constant 0 : index
    %c8_277 = arith.constant 8 : index
    %c2_278 = arith.constant 2 : index
    %165 = vector.load %arg3[%c0_274, %c0_275, %c0_276, %c8_277, %c2_278] : memref<1x4x1x18x34xbf16, #tpu.memory_space<vmem>>, vector<1x4x1x1x32xbf16>
    %166 = vector.shape_cast %165 : vector<1x4x1x1x32xbf16> to vector<4x32xbf16>
    %167 = tpu.concatenate %156, %158, %160, %162, %164, %166 in 0 : vector<4x32xbf16>, vector<4x32xbf16>, vector<4x32xbf16>, vector<4x32xbf16>, vector<4x32xbf16>, vector<4x32xbf16> -> vector<24x32xbf16>
    %cst_279 = arith.constant dense<0.000000e+00> : vector<8x32xf32>
    %168 = tpu.matmul %7, %167, %cst_279 {dimension_numbers = #tpu.dot_dimension_numbers<[1], [0], [0], [1], [0, 0, 1, 1], [], []>} : vector<8x24xbf16>, vector<24x32xbf16>, vector<8x32xf32> -> vector<8x32xf32>
    %169 = arith.mulf %168, %2 : vector<8x32xf32>
    %170 = arith.addf %169, %5 : vector<8x32xf32>
    %cst_280 = arith.constant 0.000000e+00 : f32
    %171 = vector.broadcast %cst_280 : f32 to vector<8x32xf32>
    %172 = arith.maximumf %170, %171 : vector<8x32xf32>
    %c0_281 = arith.constant 0 : index
    %c0_282 = arith.constant 0 : index
    %c7_283 = arith.constant 7 : index
    %c0_284 = arith.constant 0 : index
    %173 = vector.load %arg7[%c0_281, %c0_282, %c7_283, %c0_284] : memref<1x8x16x64xf32, #tpu.memory_space<vmem>>, vector<1x8x1x32xf32>
    %174 = vector.shape_cast %173 : vector<1x8x1x32xf32> to vector<8x32xf32>
    %175 = vector.shape_cast %172 : vector<8x32xf32> to vector<1x8x1x32xf32>
    tpu.vector_store %arg7[%c0_281, %c0_282, %c7_283, %c0_284], %175 {strides = array<i32>} : memref<1x8x16x64xf32, #tpu.memory_space<vmem>>, vector<1x8x1x32xf32>,
    %c0_285 = arith.constant 0 : index
    %c0_286 = arith.constant 0 : index
    %c0_287 = arith.constant 0 : index
    %c8_288 = arith.constant 8 : index
    %c0_289 = arith.constant 0 : index
    %176 = vector.load %arg3[%c0_285, %c0_286, %c0_287, %c8_288, %c0_289] : memref<1x4x1x18x34xbf16, #tpu.memory_space<vmem>>, vector<1x4x1x1x32xbf16>
    %177 = vector.shape_cast %176 : vector<1x4x1x1x32xbf16> to vector<4x32xbf16>
    %c0_290 = arith.constant 0 : index
    %c0_291 = arith.constant 0 : index
    %c0_292 = arith.constant 0 : index
    %c8_293 = arith.constant 8 : index
    %c1_294 = arith.constant 1 : index
    %178 = vector.load %arg3[%c0_290, %c0_291, %c0_292, %c8_293, %c1_294] : memref<1x4x1x18x34xbf16, #tpu.memory_space<vmem>>, vector<1x4x1x1x32xbf16>
    %179 = vector.shape_cast %178 : vector<1x4x1x1x32xbf16> to vector<4x32xbf16>
    %c0_295 = arith.constant 0 : index
    %c0_296 = arith.constant 0 : index
    %c0_297 = arith.constant 0 : index
    %c8_298 = arith.constant 8 : index
    %c2_299 = arith.constant 2 : index
    %180 = vector.load %arg3[%c0_295, %c0_296, %c0_297, %c8_298, %c2_299] : memref<1x4x1x18x34xbf16, #tpu.memory_space<vmem>>, vector<1x4x1x1x32xbf16>
    %181 = vector.shape_cast %180 : vector<1x4x1x1x32xbf16> to vector<4x32xbf16>
    %c0_300 = arith.constant 0 : index
    %c0_301 = arith.constant 0 : index
    %c0_302 = arith.constant 0 : index
    %c9 = arith.constant 9 : index
    %c0_303 = arith.constant 0 : index
    %182 = vector.load %arg3[%c0_300, %c0_301, %c0_302, %c9, %c0_303] : memref<1x4x1x18x34xbf16, #tpu.memory_space<vmem>>, vector<1x4x1x1x32xbf16>
    %183 = vector.shape_cast %182 : vector<1x4x1x1x32xbf16> to vector<4x32xbf16>
    %c0_304 = arith.constant 0 : index
    %c0_305 = arith.constant 0 : index
    %c0_306 = arith.constant 0 : index
    %c9_307 = arith.constant 9 : index
    %c1_308 = arith.constant 1 : index
    %184 = vector.load %arg3[%c0_304, %c0_305, %c0_306, %c9_307, %c1_308] : memref<1x4x1x18x34xbf16, #tpu.memory_space<vmem>>, vector<1x4x1x1x32xbf16>
    %185 = vector.shape_cast %184 : vector<1x4x1x1x32xbf16> to vector<4x32xbf16>
    %c0_309 = arith.constant 0 : index
    %c0_310 = arith.constant 0 : index
    %c0_311 = arith.constant 0 : index
    %c9_312 = arith.constant 9 : index
    %c2_313 = arith.constant 2 : index
    %186 = vector.load %arg3[%c0_309, %c0_310, %c0_311, %c9_312, %c2_313] : memref<1x4x1x18x34xbf16, #tpu.memory_space<vmem>>, vector<1x4x1x1x32xbf16>
    %187 = vector.shape_cast %186 : vector<1x4x1x1x32xbf16> to vector<4x32xbf16>
    %188 = tpu.concatenate %177, %179, %181, %183, %185, %187 in 0 : vector<4x32xbf16>, vector<4x32xbf16>, vector<4x32xbf16>, vector<4x32xbf16>, vector<4x32xbf16>, vector<4x32xbf16> -> vector<24x32xbf16>
    %cst_314 = arith.constant dense<0.000000e+00> : vector<8x32xf32>
    %189 = tpu.matmul %7, %188, %cst_314 {dimension_numbers = #tpu.dot_dimension_numbers<[1], [0], [0], [1], [0, 0, 1, 1], [], []>} : vector<8x24xbf16>, vector<24x32xbf16>, vector<8x32xf32> -> vector<8x32xf32>
    %190 = arith.mulf %189, %2 : vector<8x32xf32>
    %191 = arith.addf %190, %5 : vector<8x32xf32>
    %cst_315 = arith.constant 0.000000e+00 : f32
    %192 = vector.broadcast %cst_315 : f32 to vector<8x32xf32>
    %193 = arith.maximumf %191, %192 : vector<8x32xf32>
    %c0_316 = arith.constant 0 : index
    %c0_317 = arith.constant 0 : index
    %c8_318 = arith.constant 8 : index
    %c0_319 = arith.constant 0 : index
    %194 = vector.load %arg7[%c0_316, %c0_317, %c8_318, %c0_319] : memref<1x8x16x64xf32, #tpu.memory_space<vmem>>, vector<1x8x1x32xf32>
    %195 = vector.shape_cast %194 : vector<1x8x1x32xf32> to vector<8x32xf32>
    %196 = vector.shape_cast %193 : vector<8x32xf32> to vector<1x8x1x32xf32>
    tpu.vector_store %arg7[%c0_316, %c0_317, %c8_318, %c0_319], %196 {strides = array<i32>} : memref<1x8x16x64xf32, #tpu.memory_space<vmem>>, vector<1x8x1x32xf32>,
    %c0_320 = arith.constant 0 : index
    %c0_321 = arith.constant 0 : index
    %c0_322 = arith.constant 0 : index
    %c9_323 = arith.constant 9 : index
    %c0_324 = arith.constant 0 : index
    %197 = vector.load %arg3[%c0_320, %c0_321, %c0_322, %c9_323, %c0_324] : memref<1x4x1x18x34xbf16, #tpu.memory_space<vmem>>, vector<1x4x1x1x32xbf16>
    %198 = vector.shape_cast %197 : vector<1x4x1x1x32xbf16> to vector<4x32xbf16>
    %c0_325 = arith.constant 0 : index
    %c0_326 = arith.constant 0 : index
    %c0_327 = arith.constant 0 : index
    %c9_328 = arith.constant 9 : index
    %c1_329 = arith.constant 1 : index
    %199 = vector.load %arg3[%c0_325, %c0_326, %c0_327, %c9_328, %c1_329] : memref<1x4x1x18x34xbf16, #tpu.memory_space<vmem>>, vector<1x4x1x1x32xbf16>
    %200 = vector.shape_cast %199 : vector<1x4x1x1x32xbf16> to vector<4x32xbf16>
    %c0_330 = arith.constant 0 : index
    %c0_331 = arith.constant 0 : index
    %c0_332 = arith.constant 0 : index
    %c9_333 = arith.constant 9 : index
    %c2_334 = arith.constant 2 : index
    %201 = vector.load %arg3[%c0_330, %c0_331, %c0_332, %c9_333, %c2_334] : memref<1x4x1x18x34xbf16, #tpu.memory_space<vmem>>, vector<1x4x1x1x32xbf16>
    %202 = vector.shape_cast %201 : vector<1x4x1x1x32xbf16> to vector<4x32xbf16>
    %c0_335 = arith.constant 0 : index
    %c0_336 = arith.constant 0 : index
    %c0_337 = arith.constant 0 : index
    %c10 = arith.constant 10 : index
    %c0_338 = arith.constant 0 : index
    %203 = vector.load %arg3[%c0_335, %c0_336, %c0_337, %c10, %c0_338] : memref<1x4x1x18x34xbf16, #tpu.memory_space<vmem>>, vector<1x4x1x1x32xbf16>
    %204 = vector.shape_cast %203 : vector<1x4x1x1x32xbf16> to vector<4x32xbf16>
    %c0_339 = arith.constant 0 : index
    %c0_340 = arith.constant 0 : index
    %c0_341 = arith.constant 0 : index
    %c10_342 = arith.constant 10 : index
    %c1_343 = arith.constant 1 : index
    %205 = vector.load %arg3[%c0_339, %c0_340, %c0_341, %c10_342, %c1_343] : memref<1x4x1x18x34xbf16, #tpu.memory_space<vmem>>, vector<1x4x1x1x32xbf16>
    %206 = vector.shape_cast %205 : vector<1x4x1x1x32xbf16> to vector<4x32xbf16>
    %c0_344 = arith.constant 0 : index
    %c0_345 = arith.constant 0 : index
    %c0_346 = arith.constant 0 : index
    %c10_347 = arith.constant 10 : index
    %c2_348 = arith.constant 2 : index
    %207 = vector.load %arg3[%c0_344, %c0_345, %c0_346, %c10_347, %c2_348] : memref<1x4x1x18x34xbf16, #tpu.memory_space<vmem>>, vector<1x4x1x1x32xbf16>
    %208 = vector.shape_cast %207 : vector<1x4x1x1x32xbf16> to vector<4x32xbf16>
    %209 = tpu.concatenate %198, %200, %202, %204, %206, %208 in 0 : vector<4x32xbf16>, vector<4x32xbf16>, vector<4x32xbf16>, vector<4x32xbf16>, vector<4x32xbf16>, vector<4x32xbf16> -> vector<24x32xbf16>
    %cst_349 = arith.constant dense<0.000000e+00> : vector<8x32xf32>
    %210 = tpu.matmul %7, %209, %cst_349 {dimension_numbers = #tpu.dot_dimension_numbers<[1], [0], [0], [1], [0, 0, 1, 1], [], []>} : vector<8x24xbf16>, vector<24x32xbf16>, vector<8x32xf32> -> vector<8x32xf32>
    %211 = arith.mulf %210, %2 : vector<8x32xf32>
    %212 = arith.addf %211, %5 : vector<8x32xf32>
    %cst_350 = arith.constant 0.000000e+00 : f32
    %213 = vector.broadcast %cst_350 : f32 to vector<8x32xf32>
    %214 = arith.maximumf %212, %213 : vector<8x32xf32>
    %c0_351 = arith.constant 0 : index
    %c0_352 = arith.constant 0 : index
    %c9_353 = arith.constant 9 : index
    %c0_354 = arith.constant 0 : index
    %215 = vector.load %arg7[%c0_351, %c0_352, %c9_353, %c0_354] : memref<1x8x16x64xf32, #tpu.memory_space<vmem>>, vector<1x8x1x32xf32>
    %216 = vector.shape_cast %215 : vector<1x8x1x32xf32> to vector<8x32xf32>
    %217 = vector.shape_cast %214 : vector<8x32xf32> to vector<1x8x1x32xf32>
    tpu.vector_store %arg7[%c0_351, %c0_352, %c9_353, %c0_354], %217 {strides = array<i32>} : memref<1x8x16x64xf32, #tpu.memory_space<vmem>>, vector<1x8x1x32xf32>,
    %c0_355 = arith.constant 0 : index
    %c0_356 = arith.constant 0 : index
    %c0_357 = arith.constant 0 : index
    %c10_358 = arith.constant 10 : index
    %c0_359 = arith.constant 0 : index
    %218 = vector.load %arg3[%c0_355, %c0_356, %c0_357, %c10_358, %c0_359] : memref<1x4x1x18x34xbf16, #tpu.memory_space<vmem>>, vector<1x4x1x1x32xbf16>
    %219 = vector.shape_cast %218 : vector<1x4x1x1x32xbf16> to vector<4x32xbf16>
    %c0_360 = arith.constant 0 : index
    %c0_361 = arith.constant 0 : index
    %c0_362 = arith.constant 0 : index
    %c10_363 = arith.constant 10 : index
    %c1_364 = arith.constant 1 : index
    %220 = vector.load %arg3[%c0_360, %c0_361, %c0_362, %c10_363, %c1_364] : memref<1x4x1x18x34xbf16, #tpu.memory_space<vmem>>, vector<1x4x1x1x32xbf16>
    %221 = vector.shape_cast %220 : vector<1x4x1x1x32xbf16> to vector<4x32xbf16>
    %c0_365 = arith.constant 0 : index
    %c0_366 = arith.constant 0 : index
    %c0_367 = arith.constant 0 : index
    %c10_368 = arith.constant 10 : index
    %c2_369 = arith.constant 2 : index
    %222 = vector.load %arg3[%c0_365, %c0_366, %c0_367, %c10_368, %c2_369] : memref<1x4x1x18x34xbf16, #tpu.memory_space<vmem>>, vector<1x4x1x1x32xbf16>
    %223 = vector.shape_cast %222 : vector<1x4x1x1x32xbf16> to vector<4x32xbf16>
    %c0_370 = arith.constant 0 : index
    %c0_371 = arith.constant 0 : index
    %c0_372 = arith.constant 0 : index
    %c11 = arith.constant 11 : index
    %c0_373 = arith.constant 0 : index
    %224 = vector.load %arg3[%c0_370, %c0_371, %c0_372, %c11, %c0_373] : memref<1x4x1x18x34xbf16, #tpu.memory_space<vmem>>, vector<1x4x1x1x32xbf16>
    %225 = vector.shape_cast %224 : vector<1x4x1x1x32xbf16> to vector<4x32xbf16>
    %c0_374 = arith.constant 0 : index
    %c0_375 = arith.constant 0 : index
    %c0_376 = arith.constant 0 : index
    %c11_377 = arith.constant 11 : index
    %c1_378 = arith.constant 1 : index
    %226 = vector.load %arg3[%c0_374, %c0_375, %c0_376, %c11_377, %c1_378] : memref<1x4x1x18x34xbf16, #tpu.memory_space<vmem>>, vector<1x4x1x1x32xbf16>
    %227 = vector.shape_cast %226 : vector<1x4x1x1x32xbf16> to vector<4x32xbf16>
    %c0_379 = arith.constant 0 : index
    %c0_380 = arith.constant 0 : index
    %c0_381 = arith.constant 0 : index
    %c11_382 = arith.constant 11 : index
    %c2_383 = arith.constant 2 : index
    %228 = vector.load %arg3[%c0_379, %c0_380, %c0_381, %c11_382, %c2_383] : memref<1x4x1x18x34xbf16, #tpu.memory_space<vmem>>, vector<1x4x1x1x32xbf16>
    %229 = vector.shape_cast %228 : vector<1x4x1x1x32xbf16> to vector<4x32xbf16>
    %230 = tpu.concatenate %219, %221, %223, %225, %227, %229 in 0 : vector<4x32xbf16>, vector<4x32xbf16>, vector<4x32xbf16>, vector<4x32xbf16>, vector<4x32xbf16>, vector<4x32xbf16> -> vector<24x32xbf16>
    %cst_384 = arith.constant dense<0.000000e+00> : vector<8x32xf32>
    %231 = tpu.matmul %7, %230, %cst_384 {dimension_numbers = #tpu.dot_dimension_numbers<[1], [0], [0], [1], [0, 0, 1, 1], [], []>} : vector<8x24xbf16>, vector<24x32xbf16>, vector<8x32xf32> -> vector<8x32xf32>
    %232 = arith.mulf %231, %2 : vector<8x32xf32>
    %233 = arith.addf %232, %5 : vector<8x32xf32>
    %cst_385 = arith.constant 0.000000e+00 : f32
    %234 = vector.broadcast %cst_385 : f32 to vector<8x32xf32>
    %235 = arith.maximumf %233, %234 : vector<8x32xf32>
    %c0_386 = arith.constant 0 : index
    %c0_387 = arith.constant 0 : index
    %c10_388 = arith.constant 10 : index
    %c0_389 = arith.constant 0 : index
    %236 = vector.load %arg7[%c0_386, %c0_387, %c10_388, %c0_389] : memref<1x8x16x64xf32, #tpu.memory_space<vmem>>, vector<1x8x1x32xf32>
    %237 = vector.shape_cast %236 : vector<1x8x1x32xf32> to vector<8x32xf32>
    %238 = vector.shape_cast %235 : vector<8x32xf32> to vector<1x8x1x32xf32>
    tpu.vector_store %arg7[%c0_386, %c0_387, %c10_388, %c0_389], %238 {strides = array<i32>} : memref<1x8x16x64xf32, #tpu.memory_space<vmem>>, vector<1x8x1x32xf32>,
    %c0_390 = arith.constant 0 : index
    %c0_391 = arith.constant 0 : index
    %c0_392 = arith.constant 0 : index
    %c11_393 = arith.constant 11 : index
    %c0_394 = arith.constant 0 : index
    %239 = vector.load %arg3[%c0_390, %c0_391, %c0_392, %c11_393, %c0_394] : memref<1x4x1x18x34xbf16, #tpu.memory_space<vmem>>, vector<1x4x1x1x32xbf16>
    %240 = vector.shape_cast %239 : vector<1x4x1x1x32xbf16> to vector<4x32xbf16>
    %c0_395 = arith.constant 0 : index
    %c0_396 = arith.constant 0 : index
    %c0_397 = arith.constant 0 : index
    %c11_398 = arith.constant 11 : index
    %c1_399 = arith.constant 1 : index
    %241 = vector.load %arg3[%c0_395, %c0_396, %c0_397, %c11_398, %c1_399] : memref<1x4x1x18x34xbf16, #tpu.memory_space<vmem>>, vector<1x4x1x1x32xbf16>
    %242 = vector.shape_cast %241 : vector<1x4x1x1x32xbf16> to vector<4x32xbf16>
    %c0_400 = arith.constant 0 : index
    %c0_401 = arith.constant 0 : index
    %c0_402 = arith.constant 0 : index
    %c11_403 = arith.constant 11 : index
    %c2_404 = arith.constant 2 : index
    %243 = vector.load %arg3[%c0_400, %c0_401, %c0_402, %c11_403, %c2_404] : memref<1x4x1x18x34xbf16, #tpu.memory_space<vmem>>, vector<1x4x1x1x32xbf16>
    %244 = vector.shape_cast %243 : vector<1x4x1x1x32xbf16> to vector<4x32xbf16>
    %c0_405 = arith.constant 0 : index
    %c0_406 = arith.constant 0 : index
    %c0_407 = arith.constant 0 : index
    %c12 = arith.constant 12 : index
    %c0_408 = arith.constant 0 : index
    %245 = vector.load %arg3[%c0_405, %c0_406, %c0_407, %c12, %c0_408] : memref<1x4x1x18x34xbf16, #tpu.memory_space<vmem>>, vector<1x4x1x1x32xbf16>
    %246 = vector.shape_cast %245 : vector<1x4x1x1x32xbf16> to vector<4x32xbf16>
    %c0_409 = arith.constant 0 : index
    %c0_410 = arith.constant 0 : index
    %c0_411 = arith.constant 0 : index
    %c12_412 = arith.constant 12 : index
    %c1_413 = arith.constant 1 : index
    %247 = vector.load %arg3[%c0_409, %c0_410, %c0_411, %c12_412, %c1_413] : memref<1x4x1x18x34xbf16, #tpu.memory_space<vmem>>, vector<1x4x1x1x32xbf16>
    %248 = vector.shape_cast %247 : vector<1x4x1x1x32xbf16> to vector<4x32xbf16>
    %c0_414 = arith.constant 0 : index
    %c0_415 = arith.constant 0 : index
    %c0_416 = arith.constant 0 : index
    %c12_417 = arith.constant 12 : index
    %c2_418 = arith.constant 2 : index
    %249 = vector.load %arg3[%c0_414, %c0_415, %c0_416, %c12_417, %c2_418] : memref<1x4x1x18x34xbf16, #tpu.memory_space<vmem>>, vector<1x4x1x1x32xbf16>
    %250 = vector.shape_cast %249 : vector<1x4x1x1x32xbf16> to vector<4x32xbf16>
    %251 = tpu.concatenate %240, %242, %244, %246, %248, %250 in 0 : vector<4x32xbf16>, vector<4x32xbf16>, vector<4x32xbf16>, vector<4x32xbf16>, vector<4x32xbf16>, vector<4x32xbf16> -> vector<24x32xbf16>
    %cst_419 = arith.constant dense<0.000000e+00> : vector<8x32xf32>
    %252 = tpu.matmul %7, %251, %cst_419 {dimension_numbers = #tpu.dot_dimension_numbers<[1], [0], [0], [1], [0, 0, 1, 1], [], []>} : vector<8x24xbf16>, vector<24x32xbf16>, vector<8x32xf32> -> vector<8x32xf32>
    %253 = arith.mulf %252, %2 : vector<8x32xf32>
    %254 = arith.addf %253, %5 : vector<8x32xf32>
    %cst_420 = arith.constant 0.000000e+00 : f32
    %255 = vector.broadcast %cst_420 : f32 to vector<8x32xf32>
    %256 = arith.maximumf %254, %255 : vector<8x32xf32>
    %c0_421 = arith.constant 0 : index
    %c0_422 = arith.constant 0 : index
    %c11_423 = arith.constant 11 : index
    %c0_424 = arith.constant 0 : index
    %257 = vector.load %arg7[%c0_421, %c0_422, %c11_423, %c0_424] : memref<1x8x16x64xf32, #tpu.memory_space<vmem>>, vector<1x8x1x32xf32>
    %258 = vector.shape_cast %257 : vector<1x8x1x32xf32> to vector<8x32xf32>
    %259 = vector.shape_cast %256 : vector<8x32xf32> to vector<1x8x1x32xf32>
    tpu.vector_store %arg7[%c0_421, %c0_422, %c11_423, %c0_424], %259 {strides = array<i32>} : memref<1x8x16x64xf32, #tpu.memory_space<vmem>>, vector<1x8x1x32xf32>,
    %c0_425 = arith.constant 0 : index
    %c0_426 = arith.constant 0 : index
    %c0_427 = arith.constant 0 : index
    %c12_428 = arith.constant 12 : index
    %c0_429 = arith.constant 0 : index
    %260 = vector.load %arg3[%c0_425, %c0_426, %c0_427, %c12_428, %c0_429] : memref<1x4x1x18x34xbf16, #tpu.memory_space<vmem>>, vector<1x4x1x1x32xbf16>
    %261 = vector.shape_cast %260 : vector<1x4x1x1x32xbf16> to vector<4x32xbf16>
    %c0_430 = arith.constant 0 : index
    %c0_431 = arith.constant 0 : index
    %c0_432 = arith.constant 0 : index
    %c12_433 = arith.constant 12 : index
    %c1_434 = arith.constant 1 : index
    %262 = vector.load %arg3[%c0_430, %c0_431, %c0_432, %c12_433, %c1_434] : memref<1x4x1x18x34xbf16, #tpu.memory_space<vmem>>, vector<1x4x1x1x32xbf16>
    %263 = vector.shape_cast %262 : vector<1x4x1x1x32xbf16> to vector<4x32xbf16>
    %c0_435 = arith.constant 0 : index
    %c0_436 = arith.constant 0 : index
    %c0_437 = arith.constant 0 : index
    %c12_438 = arith.constant 12 : index
    %c2_439 = arith.constant 2 : index
    %264 = vector.load %arg3[%c0_435, %c0_436, %c0_437, %c12_438, %c2_439] : memref<1x4x1x18x34xbf16, #tpu.memory_space<vmem>>, vector<1x4x1x1x32xbf16>
    %265 = vector.shape_cast %264 : vector<1x4x1x1x32xbf16> to vector<4x32xbf16>
    %c0_440 = arith.constant 0 : index
    %c0_441 = arith.constant 0 : index
    %c0_442 = arith.constant 0 : index
    %c13 = arith.constant 13 : index
    %c0_443 = arith.constant 0 : index
    %266 = vector.load %arg3[%c0_440, %c0_441, %c0_442, %c13, %c0_443] : memref<1x4x1x18x34xbf16, #tpu.memory_space<vmem>>, vector<1x4x1x1x32xbf16>
    %267 = vector.shape_cast %266 : vector<1x4x1x1x32xbf16> to vector<4x32xbf16>
    %c0_444 = arith.constant 0 : index
    %c0_445 = arith.constant 0 : index
    %c0_446 = arith.constant 0 : index
    %c13_447 = arith.constant 13 : index
    %c1_448 = arith.constant 1 : index
    %268 = vector.load %arg3[%c0_444, %c0_445, %c0_446, %c13_447, %c1_448] : memref<1x4x1x18x34xbf16, #tpu.memory_space<vmem>>, vector<1x4x1x1x32xbf16>
    %269 = vector.shape_cast %268 : vector<1x4x1x1x32xbf16> to vector<4x32xbf16>
    %c0_449 = arith.constant 0 : index
    %c0_450 = arith.constant 0 : index
    %c0_451 = arith.constant 0 : index
    %c13_452 = arith.constant 13 : index
    %c2_453 = arith.constant 2 : index
    %270 = vector.load %arg3[%c0_449, %c0_450, %c0_451, %c13_452, %c2_453] : memref<1x4x1x18x34xbf16, #tpu.memory_space<vmem>>, vector<1x4x1x1x32xbf16>
    %271 = vector.shape_cast %270 : vector<1x4x1x1x32xbf16> to vector<4x32xbf16>
    %272 = tpu.concatenate %261, %263, %265, %267, %269, %271 in 0 : vector<4x32xbf16>, vector<4x32xbf16>, vector<4x32xbf16>, vector<4x32xbf16>, vector<4x32xbf16>, vector<4x32xbf16> -> vector<24x32xbf16>
    %cst_454 = arith.constant dense<0.000000e+00> : vector<8x32xf32>
    %273 = tpu.matmul %7, %272, %cst_454 {dimension_numbers = #tpu.dot_dimension_numbers<[1], [0], [0], [1], [0, 0, 1, 1], [], []>} : vector<8x24xbf16>, vector<24x32xbf16>, vector<8x32xf32> -> vector<8x32xf32>
    %274 = arith.mulf %273, %2 : vector<8x32xf32>
    %275 = arith.addf %274, %5 : vector<8x32xf32>
    %cst_455 = arith.constant 0.000000e+00 : f32
    %276 = vector.broadcast %cst_455 : f32 to vector<8x32xf32>
    %277 = arith.maximumf %275, %276 : vector<8x32xf32>
    %c0_456 = arith.constant 0 : index
    %c0_457 = arith.constant 0 : index
    %c12_458 = arith.constant 12 : index
    %c0_459 = arith.constant 0 : index
    %278 = vector.load %arg7[%c0_456, %c0_457, %c12_458, %c0_459] : memref<1x8x16x64xf32, #tpu.memory_space<vmem>>, vector<1x8x1x32xf32>
    %279 = vector.shape_cast %278 : vector<1x8x1x32xf32> to vector<8x32xf32>
    %280 = vector.shape_cast %277 : vector<8x32xf32> to vector<1x8x1x32xf32>
    tpu.vector_store %arg7[%c0_456, %c0_457, %c12_458, %c0_459], %280 {strides = array<i32>} : memref<1x8x16x64xf32, #tpu.memory_space<vmem>>, vector<1x8x1x32xf32>,
    %c0_460 = arith.constant 0 : index
    %c0_461 = arith.constant 0 : index
    %c0_462 = arith.constant 0 : index
    %c13_463 = arith.constant 13 : index
    %c0_464 = arith.constant 0 : index
    %281 = vector.load %arg3[%c0_460, %c0_461, %c0_462, %c13_463, %c0_464] : memref<1x4x1x18x34xbf16, #tpu.memory_space<vmem>>, vector<1x4x1x1x32xbf16>
    %282 = vector.shape_cast %281 : vector<1x4x1x1x32xbf16> to vector<4x32xbf16>
    %c0_465 = arith.constant 0 : index
    %c0_466 = arith.constant 0 : index
    %c0_467 = arith.constant 0 : index
    %c13_468 = arith.constant 13 : index
    %c1_469 = arith.constant 1 : index
    %283 = vector.load %arg3[%c0_465, %c0_466, %c0_467, %c13_468, %c1_469] : memref<1x4x1x18x34xbf16, #tpu.memory_space<vmem>>, vector<1x4x1x1x32xbf16>
    %284 = vector.shape_cast %283 : vector<1x4x1x1x32xbf16> to vector<4x32xbf16>
    %c0_470 = arith.constant 0 : index
    %c0_471 = arith.constant 0 : index
    %c0_472 = arith.constant 0 : index
    %c13_473 = arith.constant 13 : index
    %c2_474 = arith.constant 2 : index
    %285 = vector.load %arg3[%c0_470, %c0_471, %c0_472, %c13_473, %c2_474] : memref<1x4x1x18x34xbf16, #tpu.memory_space<vmem>>, vector<1x4x1x1x32xbf16>
    %286 = vector.shape_cast %285 : vector<1x4x1x1x32xbf16> to vector<4x32xbf16>
    %c0_475 = arith.constant 0 : index
    %c0_476 = arith.constant 0 : index
    %c0_477 = arith.constant 0 : index
    %c14 = arith.constant 14 : index
    %c0_478 = arith.constant 0 : index
    %287 = vector.load %arg3[%c0_475, %c0_476, %c0_477, %c14, %c0_478] : memref<1x4x1x18x34xbf16, #tpu.memory_space<vmem>>, vector<1x4x1x1x32xbf16>
    %288 = vector.shape_cast %287 : vector<1x4x1x1x32xbf16> to vector<4x32xbf16>
    %c0_479 = arith.constant 0 : index
    %c0_480 = arith.constant 0 : index
    %c0_481 = arith.constant 0 : index
    %c14_482 = arith.constant 14 : index
    %c1_483 = arith.constant 1 : index
    %289 = vector.load %arg3[%c0_479, %c0_480, %c0_481, %c14_482, %c1_483] : memref<1x4x1x18x34xbf16, #tpu.memory_space<vmem>>, vector<1x4x1x1x32xbf16>
    %290 = vector.shape_cast %289 : vector<1x4x1x1x32xbf16> to vector<4x32xbf16>
    %c0_484 = arith.constant 0 : index
    %c0_485 = arith.constant 0 : index
    %c0_486 = arith.constant 0 : index
    %c14_487 = arith.constant 14 : index
    %c2_488 = arith.constant 2 : index
    %291 = vector.load %arg3[%c0_484, %c0_485, %c0_486, %c14_487, %c2_488] : memref<1x4x1x18x34xbf16, #tpu.memory_space<vmem>>, vector<1x4x1x1x32xbf16>
    %292 = vector.shape_cast %291 : vector<1x4x1x1x32xbf16> to vector<4x32xbf16>
    %293 = tpu.concatenate %282, %284, %286, %288, %290, %292 in 0 : vector<4x32xbf16>, vector<4x32xbf16>, vector<4x32xbf16>, vector<4x32xbf16>, vector<4x32xbf16>, vector<4x32xbf16> -> vector<24x32xbf16>
    %cst_489 = arith.constant dense<0.000000e+00> : vector<8x32xf32>
    %294 = tpu.matmul %7, %293, %cst_489 {dimension_numbers = #tpu.dot_dimension_numbers<[1], [0], [0], [1], [0, 0, 1, 1], [], []>} : vector<8x24xbf16>, vector<24x32xbf16>, vector<8x32xf32> -> vector<8x32xf32>
    %295 = arith.mulf %294, %2 : vector<8x32xf32>
    %296 = arith.addf %295, %5 : vector<8x32xf32>
    %cst_490 = arith.constant 0.000000e+00 : f32
    %297 = vector.broadcast %cst_490 : f32 to vector<8x32xf32>
    %298 = arith.maximumf %296, %297 : vector<8x32xf32>
    %c0_491 = arith.constant 0 : index
    %c0_492 = arith.constant 0 : index
    %c13_493 = arith.constant 13 : index
    %c0_494 = arith.constant 0 : index
    %299 = vector.load %arg7[%c0_491, %c0_492, %c13_493, %c0_494] : memref<1x8x16x64xf32, #tpu.memory_space<vmem>>, vector<1x8x1x32xf32>
    %300 = vector.shape_cast %299 : vector<1x8x1x32xf32> to vector<8x32xf32>
    %301 = vector.shape_cast %298 : vector<8x32xf32> to vector<1x8x1x32xf32>
    tpu.vector_store %arg7[%c0_491, %c0_492, %c13_493, %c0_494], %301 {strides = array<i32>} : memref<1x8x16x64xf32, #tpu.memory_space<vmem>>, vector<1x8x1x32xf32>,
    %c0_495 = arith.constant 0 : index
    %c0_496 = arith.constant 0 : index
    %c0_497 = arith.constant 0 : index
    %c14_498 = arith.constant 14 : index
    %c0_499 = arith.constant 0 : index
    %302 = vector.load %arg3[%c0_495, %c0_496, %c0_497, %c14_498, %c0_499] : memref<1x4x1x18x34xbf16, #tpu.memory_space<vmem>>, vector<1x4x1x1x32xbf16>
    %303 = vector.shape_cast %302 : vector<1x4x1x1x32xbf16> to vector<4x32xbf16>
    %c0_500 = arith.constant 0 : index
    %c0_501 = arith.constant 0 : index
    %c0_502 = arith.constant 0 : index
    %c14_503 = arith.constant 14 : index
    %c1_504 = arith.constant 1 : index
    %304 = vector.load %arg3[%c0_500, %c0_501, %c0_502, %c14_503, %c1_504] : memref<1x4x1x18x34xbf16, #tpu.memory_space<vmem>>, vector<1x4x1x1x32xbf16>
    %305 = vector.shape_cast %304 : vector<1x4x1x1x32xbf16> to vector<4x32xbf16>
    %c0_505 = arith.constant 0 : index
    %c0_506 = arith.constant 0 : index
    %c0_507 = arith.constant 0 : index
    %c14_508 = arith.constant 14 : index
    %c2_509 = arith.constant 2 : index
    %306 = vector.load %arg3[%c0_505, %c0_506, %c0_507, %c14_508, %c2_509] : memref<1x4x1x18x34xbf16, #tpu.memory_space<vmem>>, vector<1x4x1x1x32xbf16>
    %307 = vector.shape_cast %306 : vector<1x4x1x1x32xbf16> to vector<4x32xbf16>
    %c0_510 = arith.constant 0 : index
    %c0_511 = arith.constant 0 : index
    %c0_512 = arith.constant 0 : index
    %c15 = arith.constant 15 : index
    %c0_513 = arith.constant 0 : index
    %308 = vector.load %arg3[%c0_510, %c0_511, %c0_512, %c15, %c0_513] : memref<1x4x1x18x34xbf16, #tpu.memory_space<vmem>>, vector<1x4x1x1x32xbf16>
    %309 = vector.shape_cast %308 : vector<1x4x1x1x32xbf16> to vector<4x32xbf16>
    %c0_514 = arith.constant 0 : index
    %c0_515 = arith.constant 0 : index
    %c0_516 = arith.constant 0 : index
    %c15_517 = arith.constant 15 : index
    %c1_518 = arith.constant 1 : index
    %310 = vector.load %arg3[%c0_514, %c0_515, %c0_516, %c15_517, %c1_518] : memref<1x4x1x18x34xbf16, #tpu.memory_space<vmem>>, vector<1x4x1x1x32xbf16>
    %311 = vector.shape_cast %310 : vector<1x4x1x1x32xbf16> to vector<4x32xbf16>
    %c0_519 = arith.constant 0 : index
    %c0_520 = arith.constant 0 : index
    %c0_521 = arith.constant 0 : index
    %c15_522 = arith.constant 15 : index
    %c2_523 = arith.constant 2 : index
    %312 = vector.load %arg3[%c0_519, %c0_520, %c0_521, %c15_522, %c2_523] : memref<1x4x1x18x34xbf16, #tpu.memory_space<vmem>>, vector<1x4x1x1x32xbf16>
    %313 = vector.shape_cast %312 : vector<1x4x1x1x32xbf16> to vector<4x32xbf16>
    %314 = tpu.concatenate %303, %305, %307, %309, %311, %313 in 0 : vector<4x32xbf16>, vector<4x32xbf16>, vector<4x32xbf16>, vector<4x32xbf16>, vector<4x32xbf16>, vector<4x32xbf16> -> vector<24x32xbf16>
    %cst_524 = arith.constant dense<0.000000e+00> : vector<8x32xf32>
    %315 = tpu.matmul %7, %314, %cst_524 {dimension_numbers = #tpu.dot_dimension_numbers<[1], [0], [0], [1], [0, 0, 1, 1], [], []>} : vector<8x24xbf16>, vector<24x32xbf16>, vector<8x32xf32> -> vector<8x32xf32>
    %316 = arith.mulf %315, %2 : vector<8x32xf32>
    %317 = arith.addf %316, %5 : vector<8x32xf32>
    %cst_525 = arith.constant 0.000000e+00 : f32
    %318 = vector.broadcast %cst_525 : f32 to vector<8x32xf32>
    %319 = arith.maximumf %317, %318 : vector<8x32xf32>
    %c0_526 = arith.constant 0 : index
    %c0_527 = arith.constant 0 : index
    %c14_528 = arith.constant 14 : index
    %c0_529 = arith.constant 0 : index
    %320 = vector.load %arg7[%c0_526, %c0_527, %c14_528, %c0_529] : memref<1x8x16x64xf32, #tpu.memory_space<vmem>>, vector<1x8x1x32xf32>
    %321 = vector.shape_cast %320 : vector<1x8x1x32xf32> to vector<8x32xf32>
    %322 = vector.shape_cast %319 : vector<8x32xf32> to vector<1x8x1x32xf32>
    tpu.vector_store %arg7[%c0_526, %c0_527, %c14_528, %c0_529], %322 {strides = array<i32>} : memref<1x8x16x64xf32, #tpu.memory_space<vmem>>, vector<1x8x1x32xf32>,
    %c0_530 = arith.constant 0 : index
    %c0_531 = arith.constant 0 : index
    %c0_532 = arith.constant 0 : index
    %c15_533 = arith.constant 15 : index
    %c0_534 = arith.constant 0 : index
    %323 = vector.load %arg3[%c0_530, %c0_531, %c0_532, %c15_533, %c0_534] : memref<1x4x1x18x34xbf16, #tpu.memory_space<vmem>>, vector<1x4x1x1x32xbf16>
    %324 = vector.shape_cast %323 : vector<1x4x1x1x32xbf16> to vector<4x32xbf16>
    %c0_535 = arith.constant 0 : index
    %c0_536 = arith.constant 0 : index
    %c0_537 = arith.constant 0 : index
    %c15_538 = arith.constant 15 : index
    %c1_539 = arith.constant 1 : index
    %325 = vector.load %arg3[%c0_535, %c0_536, %c0_537, %c15_538, %c1_539] : memref<1x4x1x18x34xbf16, #tpu.memory_space<vmem>>, vector<1x4x1x1x32xbf16>
    %326 = vector.shape_cast %325 : vector<1x4x1x1x32xbf16> to vector<4x32xbf16>
    %c0_540 = arith.constant 0 : index
    %c0_541 = arith.constant 0 : index
    %c0_542 = arith.constant 0 : index
    %c15_543 = arith.constant 15 : index
    %c2_544 = arith.constant 2 : index
    %327 = vector.load %arg3[%c0_540, %c0_541, %c0_542, %c15_543, %c2_544] : memref<1x4x1x18x34xbf16, #tpu.memory_space<vmem>>, vector<1x4x1x1x32xbf16>
    %328 = vector.shape_cast %327 : vector<1x4x1x1x32xbf16> to vector<4x32xbf16>
    %c0_545 = arith.constant 0 : index
    %c0_546 = arith.constant 0 : index
    %c0_547 = arith.constant 0 : index
    %c16 = arith.constant 16 : index
    %c0_548 = arith.constant 0 : index
    %329 = vector.load %arg3[%c0_545, %c0_546, %c0_547, %c16, %c0_548] : memref<1x4x1x18x34xbf16, #tpu.memory_space<vmem>>, vector<1x4x1x1x32xbf16>
    %330 = vector.shape_cast %329 : vector<1x4x1x1x32xbf16> to vector<4x32xbf16>
    %c0_549 = arith.constant 0 : index
    %c0_550 = arith.constant 0 : index
    %c0_551 = arith.constant 0 : index
    %c16_552 = arith.constant 16 : index
    %c1_553 = arith.constant 1 : index
    %331 = vector.load %arg3[%c0_549, %c0_550, %c0_551, %c16_552, %c1_553] : memref<1x4x1x18x34xbf16, #tpu.memory_space<vmem>>, vector<1x4x1x1x32xbf16>
    %332 = vector.shape_cast %331 : vector<1x4x1x1x32xbf16> to vector<4x32xbf16>
    %c0_554 = arith.constant 0 : index
    %c0_555 = arith.constant 0 : index
    %c0_556 = arith.constant 0 : index
    %c16_557 = arith.constant 16 : index
    %c2_558 = arith.constant 2 : index
    %333 = vector.load %arg3[%c0_554, %c0_555, %c0_556, %c16_557, %c2_558] : memref<1x4x1x18x34xbf16, #tpu.memory_space<vmem>>, vector<1x4x1x1x32xbf16>
    %334 = vector.shape_cast %333 : vector<1x4x1x1x32xbf16> to vector<4x32xbf16>
    %335 = tpu.concatenate %324, %326, %328, %330, %332, %334 in 0 : vector<4x32xbf16>, vector<4x32xbf16>, vector<4x32xbf16>, vector<4x32xbf16>, vector<4x32xbf16>, vector<4x32xbf16> -> vector<24x32xbf16>
    %cst_559 = arith.constant dense<0.000000e+00> : vector<8x32xf32>
    %336 = tpu.matmul %7, %335, %cst_559 {dimension_numbers = #tpu.dot_dimension_numbers<[1], [0], [0], [1], [0, 0, 1, 1], [], []>} : vector<8x24xbf16>, vector<24x32xbf16>, vector<8x32xf32> -> vector<8x32xf32>
    %337 = arith.mulf %336, %2 : vector<8x32xf32>
    %338 = arith.addf %337, %5 : vector<8x32xf32>
    %cst_560 = arith.constant 0.000000e+00 : f32
    %339 = vector.broadcast %cst_560 : f32 to vector<8x32xf32>
    %340 = arith.maximumf %338, %339 : vector<8x32xf32>
    %c0_561 = arith.constant 0 : index
    %c0_562 = arith.constant 0 : index
    %c15_563 = arith.constant 15 : index
    %c0_564 = arith.constant 0 : index
    %341 = vector.load %arg7[%c0_561, %c0_562, %c15_563, %c0_564] : memref<1x8x16x64xf32, #tpu.memory_space<vmem>>, vector<1x8x1x32xf32>
    %342 = vector.shape_cast %341 : vector<1x8x1x32xf32> to vector<8x32xf32>
    %343 = vector.shape_cast %340 : vector<8x32xf32> to vector<1x8x1x32xf32>
    tpu.vector_store %arg7[%c0_561, %c0_562, %c15_563, %c0_564], %343 {strides = array<i32>} : memref<1x8x16x64xf32, #tpu.memory_space<vmem>>, vector<1x8x1x32xf32>,
    %c1_565 = arith.constant 1 : index
    %c0_566 = arith.constant 0 : index
    %c0_567 = arith.constant 0 : index
    %344 = vector.load %arg4[%c1_565, %c0_566, %c0_567] : memref<2x8x24xbf16, #tpu.memory_space<vmem>>, vector<1x8x24xbf16>
    %345 = vector.shape_cast %344 : vector<1x8x24xbf16> to vector<8x24xbf16>
    %c0_568 = arith.constant 0 : index
    %c0_569 = arith.constant 0 : index
    %c0_570 = arith.constant 0 : index
    %c1_571 = arith.constant 1 : index
    %c0_572 = arith.constant 0 : index
    %346 = vector.load %arg3[%c0_568, %c0_569, %c0_570, %c1_571, %c0_572] : memref<1x4x1x18x34xbf16, #tpu.memory_space<vmem>>, vector<1x4x1x1x32xbf16>
    %347 = vector.shape_cast %346 : vector<1x4x1x1x32xbf16> to vector<4x32xbf16>
    %c0_573 = arith.constant 0 : index
    %c0_574 = arith.constant 0 : index
    %c0_575 = arith.constant 0 : index
    %c1_576 = arith.constant 1 : index
    %c1_577 = arith.constant 1 : index
    %348 = vector.load %arg3[%c0_573, %c0_574, %c0_575, %c1_576, %c1_577] : memref<1x4x1x18x34xbf16, #tpu.memory_space<vmem>>, vector<1x4x1x1x32xbf16>
    %349 = vector.shape_cast %348 : vector<1x4x1x1x32xbf16> to vector<4x32xbf16>
    %c0_578 = arith.constant 0 : index
    %c0_579 = arith.constant 0 : index
    %c0_580 = arith.constant 0 : index
    %c1_581 = arith.constant 1 : index
    %c2_582 = arith.constant 2 : index
    %350 = vector.load %arg3[%c0_578, %c0_579, %c0_580, %c1_581, %c2_582] : memref<1x4x1x18x34xbf16, #tpu.memory_space<vmem>>, vector<1x4x1x1x32xbf16>
    %351 = vector.shape_cast %350 : vector<1x4x1x1x32xbf16> to vector<4x32xbf16>
    %c0_583 = arith.constant 0 : index
    %c0_584 = arith.constant 0 : index
    %c0_585 = arith.constant 0 : index
    %c2_586 = arith.constant 2 : index
    %c0_587 = arith.constant 0 : index
    %352 = vector.load %arg3[%c0_583, %c0_584, %c0_585, %c2_586, %c0_587] : memref<1x4x1x18x34xbf16, #tpu.memory_space<vmem>>, vector<1x4x1x1x32xbf16>
    %353 = vector.shape_cast %352 : vector<1x4x1x1x32xbf16> to vector<4x32xbf16>
    %c0_588 = arith.constant 0 : index
    %c0_589 = arith.constant 0 : index
    %c0_590 = arith.constant 0 : index
    %c2_591 = arith.constant 2 : index
    %c1_592 = arith.constant 1 : index
    %354 = vector.load %arg3[%c0_588, %c0_589, %c0_590, %c2_591, %c1_592] : memref<1x4x1x18x34xbf16, #tpu.memory_space<vmem>>, vector<1x4x1x1x32xbf16>
    %355 = vector.shape_cast %354 : vector<1x4x1x1x32xbf16> to vector<4x32xbf16>
    %c0_593 = arith.constant 0 : index
    %c0_594 = arith.constant 0 : index
    %c0_595 = arith.constant 0 : index
    %c2_596 = arith.constant 2 : index
    %c2_597 = arith.constant 2 : index
    %356 = vector.load %arg3[%c0_593, %c0_594, %c0_595, %c2_596, %c2_597] : memref<1x4x1x18x34xbf16, #tpu.memory_space<vmem>>, vector<1x4x1x1x32xbf16>
    %357 = vector.shape_cast %356 : vector<1x4x1x1x32xbf16> to vector<4x32xbf16>
    %358 = tpu.concatenate %347, %349, %351, %353, %355, %357 in 0 : vector<4x32xbf16>, vector<4x32xbf16>, vector<4x32xbf16>, vector<4x32xbf16>, vector<4x32xbf16>, vector<4x32xbf16> -> vector<24x32xbf16>
    %cst_598 = arith.constant dense<0.000000e+00> : vector<8x32xf32>
    %359 = tpu.matmul %345, %358, %cst_598 {dimension_numbers = #tpu.dot_dimension_numbers<[1], [0], [0], [1], [0, 0, 1, 1], [], []>} : vector<8x24xbf16>, vector<24x32xbf16>, vector<8x32xf32> -> vector<8x32xf32>
    %360 = arith.mulf %359, %2 : vector<8x32xf32>
    %361 = arith.addf %360, %5 : vector<8x32xf32>
    %cst_599 = arith.constant 0.000000e+00 : f32
    %362 = vector.broadcast %cst_599 : f32 to vector<8x32xf32>
    %363 = arith.maximumf %361, %362 : vector<8x32xf32>
    %c0_600 = arith.constant 0 : index
    %c0_601 = arith.constant 0 : index
    %c0_602 = arith.constant 0 : index
    %c32 = arith.constant 32 : index
    %364 = vector.load %arg7[%c0_600, %c0_601, %c0_602, %c32] : memref<1x8x16x64xf32, #tpu.memory_space<vmem>>, vector<1x8x1x32xf32>
    %365 = vector.shape_cast %364 : vector<1x8x1x32xf32> to vector<8x32xf32>
    %366 = vector.shape_cast %363 : vector<8x32xf32> to vector<1x8x1x32xf32>
    tpu.vector_store %arg7[%c0_600, %c0_601, %c0_602, %c32], %366 {strides = array<i32>} : memref<1x8x16x64xf32, #tpu.memory_space<vmem>>, vector<1x8x1x32xf32>,
    %c0_603 = arith.constant 0 : index
    %c0_604 = arith.constant 0 : index
    %c0_605 = arith.constant 0 : index
    %c2_606 = arith.constant 2 : index
    %c0_607 = arith.constant 0 : index
    %367 = vector.load %arg3[%c0_603, %c0_604, %c0_605, %c2_606, %c0_607] : memref<1x4x1x18x34xbf16, #tpu.memory_space<vmem>>, vector<1x4x1x1x32xbf16>
    %368 = vector.shape_cast %367 : vector<1x4x1x1x32xbf16> to vector<4x32xbf16>
    %c0_608 = arith.constant 0 : index
    %c0_609 = arith.constant 0 : index
    %c0_610 = arith.constant 0 : index
    %c2_611 = arith.constant 2 : index
    %c1_612 = arith.constant 1 : index
    %369 = vector.load %arg3[%c0_608, %c0_609, %c0_610, %c2_611, %c1_612] : memref<1x4x1x18x34xbf16, #tpu.memory_space<vmem>>, vector<1x4x1x1x32xbf16>
    %370 = vector.shape_cast %369 : vector<1x4x1x1x32xbf16> to vector<4x32xbf16>
    %c0_613 = arith.constant 0 : index
    %c0_614 = arith.constant 0 : index
    %c0_615 = arith.constant 0 : index
    %c2_616 = arith.constant 2 : index
    %c2_617 = arith.constant 2 : index
    %371 = vector.load %arg3[%c0_613, %c0_614, %c0_615, %c2_616, %c2_617] : memref<1x4x1x18x34xbf16, #tpu.memory_space<vmem>>, vector<1x4x1x1x32xbf16>
    %372 = vector.shape_cast %371 : vector<1x4x1x1x32xbf16> to vector<4x32xbf16>
    %c0_618 = arith.constant 0 : index
    %c0_619 = arith.constant 0 : index
    %c0_620 = arith.constant 0 : index
    %c3_621 = arith.constant 3 : index
    %c0_622 = arith.constant 0 : index
    %373 = vector.load %arg3[%c0_618, %c0_619, %c0_620, %c3_621, %c0_622] : memref<1x4x1x18x34xbf16, #tpu.memory_space<vmem>>, vector<1x4x1x1x32xbf16>
    %374 = vector.shape_cast %373 : vector<1x4x1x1x32xbf16> to vector<4x32xbf16>
    %c0_623 = arith.constant 0 : index
    %c0_624 = arith.constant 0 : index
    %c0_625 = arith.constant 0 : index
    %c3_626 = arith.constant 3 : index
    %c1_627 = arith.constant 1 : index
    %375 = vector.load %arg3[%c0_623, %c0_624, %c0_625, %c3_626, %c1_627] : memref<1x4x1x18x34xbf16, #tpu.memory_space<vmem>>, vector<1x4x1x1x32xbf16>
    %376 = vector.shape_cast %375 : vector<1x4x1x1x32xbf16> to vector<4x32xbf16>
    %c0_628 = arith.constant 0 : index
    %c0_629 = arith.constant 0 : index
    %c0_630 = arith.constant 0 : index
    %c3_631 = arith.constant 3 : index
    %c2_632 = arith.constant 2 : index
    %377 = vector.load %arg3[%c0_628, %c0_629, %c0_630, %c3_631, %c2_632] : memref<1x4x1x18x34xbf16, #tpu.memory_space<vmem>>, vector<1x4x1x1x32xbf16>
    %378 = vector.shape_cast %377 : vector<1x4x1x1x32xbf16> to vector<4x32xbf16>
    %379 = tpu.concatenate %368, %370, %372, %374, %376, %378 in 0 : vector<4x32xbf16>, vector<4x32xbf16>, vector<4x32xbf16>, vector<4x32xbf16>, vector<4x32xbf16>, vector<4x32xbf16> -> vector<24x32xbf16>
    %cst_633 = arith.constant dense<0.000000e+00> : vector<8x32xf32>
    %380 = tpu.matmul %345, %379, %cst_633 {dimension_numbers = #tpu.dot_dimension_numbers<[1], [0], [0], [1], [0, 0, 1, 1], [], []>} : vector<8x24xbf16>, vector<24x32xbf16>, vector<8x32xf32> -> vector<8x32xf32>
    %381 = arith.mulf %380, %2 : vector<8x32xf32>
    %382 = arith.addf %381, %5 : vector<8x32xf32>
    %cst_634 = arith.constant 0.000000e+00 : f32
    %383 = vector.broadcast %cst_634 : f32 to vector<8x32xf32>
    %384 = arith.maximumf %382, %383 : vector<8x32xf32>
    %c0_635 = arith.constant 0 : index
    %c0_636 = arith.constant 0 : index
    %c1_637 = arith.constant 1 : index
    %c32_638 = arith.constant 32 : index
    %385 = vector.load %arg7[%c0_635, %c0_636, %c1_637, %c32_638] : memref<1x8x16x64xf32, #tpu.memory_space<vmem>>, vector<1x8x1x32xf32>
    %386 = vector.shape_cast %385 : vector<1x8x1x32xf32> to vector<8x32xf32>
    %387 = vector.shape_cast %384 : vector<8x32xf32> to vector<1x8x1x32xf32>
    tpu.vector_store %arg7[%c0_635, %c0_636, %c1_637, %c32_638], %387 {strides = array<i32>} : memref<1x8x16x64xf32, #tpu.memory_space<vmem>>, vector<1x8x1x32xf32>,
    %c0_639 = arith.constant 0 : index
    %c0_640 = arith.constant 0 : index
    %c0_641 = arith.constant 0 : index
    %c3_642 = arith.constant 3 : index
    %c0_643 = arith.constant 0 : index
    %388 = vector.load %arg3[%c0_639, %c0_640, %c0_641, %c3_642, %c0_643] : memref<1x4x1x18x34xbf16, #tpu.memory_space<vmem>>, vector<1x4x1x1x32xbf16>
    %389 = vector.shape_cast %388 : vector<1x4x1x1x32xbf16> to vector<4x32xbf16>
    %c0_644 = arith.constant 0 : index
    %c0_645 = arith.constant 0 : index
    %c0_646 = arith.constant 0 : index
    %c3_647 = arith.constant 3 : index
    %c1_648 = arith.constant 1 : index
    %390 = vector.load %arg3[%c0_644, %c0_645, %c0_646, %c3_647, %c1_648] : memref<1x4x1x18x34xbf16, #tpu.memory_space<vmem>>, vector<1x4x1x1x32xbf16>
    %391 = vector.shape_cast %390 : vector<1x4x1x1x32xbf16> to vector<4x32xbf16>
    %c0_649 = arith.constant 0 : index
    %c0_650 = arith.constant 0 : index
    %c0_651 = arith.constant 0 : index
    %c3_652 = arith.constant 3 : index
    %c2_653 = arith.constant 2 : index
    %392 = vector.load %arg3[%c0_649, %c0_650, %c0_651, %c3_652, %c2_653] : memref<1x4x1x18x34xbf16, #tpu.memory_space<vmem>>, vector<1x4x1x1x32xbf16>
    %393 = vector.shape_cast %392 : vector<1x4x1x1x32xbf16> to vector<4x32xbf16>
    %c0_654 = arith.constant 0 : index
    %c0_655 = arith.constant 0 : index
    %c0_656 = arith.constant 0 : index
    %c4_657 = arith.constant 4 : index
    %c0_658 = arith.constant 0 : index
    %394 = vector.load %arg3[%c0_654, %c0_655, %c0_656, %c4_657, %c0_658] : memref<1x4x1x18x34xbf16, #tpu.memory_space<vmem>>, vector<1x4x1x1x32xbf16>
    %395 = vector.shape_cast %394 : vector<1x4x1x1x32xbf16> to vector<4x32xbf16>
    %c0_659 = arith.constant 0 : index
    %c0_660 = arith.constant 0 : index
    %c0_661 = arith.constant 0 : index
    %c4_662 = arith.constant 4 : index
    %c1_663 = arith.constant 1 : index
    %396 = vector.load %arg3[%c0_659, %c0_660, %c0_661, %c4_662, %c1_663] : memref<1x4x1x18x34xbf16, #tpu.memory_space<vmem>>, vector<1x4x1x1x32xbf16>
    %397 = vector.shape_cast %396 : vector<1x4x1x1x32xbf16> to vector<4x32xbf16>
    %c0_664 = arith.constant 0 : index
    %c0_665 = arith.constant 0 : index
    %c0_666 = arith.constant 0 : index
    %c4_667 = arith.constant 4 : index
    %c2_668 = arith.constant 2 : index
    %398 = vector.load %arg3[%c0_664, %c0_665, %c0_666, %c4_667, %c2_668] : memref<1x4x1x18x34xbf16, #tpu.memory_space<vmem>>, vector<1x4x1x1x32xbf16>
    %399 = vector.shape_cast %398 : vector<1x4x1x1x32xbf16> to vector<4x32xbf16>
    %400 = tpu.concatenate %389, %391, %393, %395, %397, %399 in 0 : vector<4x32xbf16>, vector<4x32xbf16>, vector<4x32xbf16>, vector<4x32xbf16>, vector<4x32xbf16>, vector<4x32xbf16> -> vector<24x32xbf16>
    %cst_669 = arith.constant dense<0.000000e+00> : vector<8x32xf32>
    %401 = tpu.matmul %345, %400, %cst_669 {dimension_numbers = #tpu.dot_dimension_numbers<[1], [0], [0], [1], [0, 0, 1, 1], [], []>} : vector<8x24xbf16>, vector<24x32xbf16>, vector<8x32xf32> -> vector<8x32xf32>
    %402 = arith.mulf %401, %2 : vector<8x32xf32>
    %403 = arith.addf %402, %5 : vector<8x32xf32>
    %cst_670 = arith.constant 0.000000e+00 : f32
    %404 = vector.broadcast %cst_670 : f32 to vector<8x32xf32>
    %405 = arith.maximumf %403, %404 : vector<8x32xf32>
    %c0_671 = arith.constant 0 : index
    %c0_672 = arith.constant 0 : index
    %c2_673 = arith.constant 2 : index
    %c32_674 = arith.constant 32 : index
    %406 = vector.load %arg7[%c0_671, %c0_672, %c2_673, %c32_674] : memref<1x8x16x64xf32, #tpu.memory_space<vmem>>, vector<1x8x1x32xf32>
    %407 = vector.shape_cast %406 : vector<1x8x1x32xf32> to vector<8x32xf32>
    %408 = vector.shape_cast %405 : vector<8x32xf32> to vector<1x8x1x32xf32>
    tpu.vector_store %arg7[%c0_671, %c0_672, %c2_673, %c32_674], %408 {strides = array<i32>} : memref<1x8x16x64xf32, #tpu.memory_space<vmem>>, vector<1x8x1x32xf32>,
    %c0_675 = arith.constant 0 : index
    %c0_676 = arith.constant 0 : index
    %c0_677 = arith.constant 0 : index
    %c4_678 = arith.constant 4 : index
    %c0_679 = arith.constant 0 : index
    %409 = vector.load %arg3[%c0_675, %c0_676, %c0_677, %c4_678, %c0_679] : memref<1x4x1x18x34xbf16, #tpu.memory_space<vmem>>, vector<1x4x1x1x32xbf16>
    %410 = vector.shape_cast %409 : vector<1x4x1x1x32xbf16> to vector<4x32xbf16>
    %c0_680 = arith.constant 0 : index
    %c0_681 = arith.constant 0 : index
    %c0_682 = arith.constant 0 : index
    %c4_683 = arith.constant 4 : index
    %c1_684 = arith.constant 1 : index
    %411 = vector.load %arg3[%c0_680, %c0_681, %c0_682, %c4_683, %c1_684] : memref<1x4x1x18x34xbf16, #tpu.memory_space<vmem>>, vector<1x4x1x1x32xbf16>
    %412 = vector.shape_cast %411 : vector<1x4x1x1x32xbf16> to vector<4x32xbf16>
    %c0_685 = arith.constant 0 : index
    %c0_686 = arith.constant 0 : index
    %c0_687 = arith.constant 0 : index
    %c4_688 = arith.constant 4 : index
    %c2_689 = arith.constant 2 : index
    %413 = vector.load %arg3[%c0_685, %c0_686, %c0_687, %c4_688, %c2_689] : memref<1x4x1x18x34xbf16, #tpu.memory_space<vmem>>, vector<1x4x1x1x32xbf16>
    %414 = vector.shape_cast %413 : vector<1x4x1x1x32xbf16> to vector<4x32xbf16>
    %c0_690 = arith.constant 0 : index
    %c0_691 = arith.constant 0 : index
    %c0_692 = arith.constant 0 : index
    %c5_693 = arith.constant 5 : index
    %c0_694 = arith.constant 0 : index
    %415 = vector.load %arg3[%c0_690, %c0_691, %c0_692, %c5_693, %c0_694] : memref<1x4x1x18x34xbf16, #tpu.memory_space<vmem>>, vector<1x4x1x1x32xbf16>
    %416 = vector.shape_cast %415 : vector<1x4x1x1x32xbf16> to vector<4x32xbf16>
    %c0_695 = arith.constant 0 : index
    %c0_696 = arith.constant 0 : index
    %c0_697 = arith.constant 0 : index
    %c5_698 = arith.constant 5 : index
    %c1_699 = arith.constant 1 : index
    %417 = vector.load %arg3[%c0_695, %c0_696, %c0_697, %c5_698, %c1_699] : memref<1x4x1x18x34xbf16, #tpu.memory_space<vmem>>, vector<1x4x1x1x32xbf16>
    %418 = vector.shape_cast %417 : vector<1x4x1x1x32xbf16> to vector<4x32xbf16>
    %c0_700 = arith.constant 0 : index
    %c0_701 = arith.constant 0 : index
    %c0_702 = arith.constant 0 : index
    %c5_703 = arith.constant 5 : index
    %c2_704 = arith.constant 2 : index
    %419 = vector.load %arg3[%c0_700, %c0_701, %c0_702, %c5_703, %c2_704] : memref<1x4x1x18x34xbf16, #tpu.memory_space<vmem>>, vector<1x4x1x1x32xbf16>
    %420 = vector.shape_cast %419 : vector<1x4x1x1x32xbf16> to vector<4x32xbf16>
    %421 = tpu.concatenate %410, %412, %414, %416, %418, %420 in 0 : vector<4x32xbf16>, vector<4x32xbf16>, vector<4x32xbf16>, vector<4x32xbf16>, vector<4x32xbf16>, vector<4x32xbf16> -> vector<24x32xbf16>
    %cst_705 = arith.constant dense<0.000000e+00> : vector<8x32xf32>
    %422 = tpu.matmul %345, %421, %cst_705 {dimension_numbers = #tpu.dot_dimension_numbers<[1], [0], [0], [1], [0, 0, 1, 1], [], []>} : vector<8x24xbf16>, vector<24x32xbf16>, vector<8x32xf32> -> vector<8x32xf32>
    %423 = arith.mulf %422, %2 : vector<8x32xf32>
    %424 = arith.addf %423, %5 : vector<8x32xf32>
    %cst_706 = arith.constant 0.000000e+00 : f32
    %425 = vector.broadcast %cst_706 : f32 to vector<8x32xf32>
    %426 = arith.maximumf %424, %425 : vector<8x32xf32>
    %c0_707 = arith.constant 0 : index
    %c0_708 = arith.constant 0 : index
    %c3_709 = arith.constant 3 : index
    %c32_710 = arith.constant 32 : index
    %427 = vector.load %arg7[%c0_707, %c0_708, %c3_709, %c32_710] : memref<1x8x16x64xf32, #tpu.memory_space<vmem>>, vector<1x8x1x32xf32>
    %428 = vector.shape_cast %427 : vector<1x8x1x32xf32> to vector<8x32xf32>
    %429 = vector.shape_cast %426 : vector<8x32xf32> to vector<1x8x1x32xf32>
    tpu.vector_store %arg7[%c0_707, %c0_708, %c3_709, %c32_710], %429 {strides = array<i32>} : memref<1x8x16x64xf32, #tpu.memory_space<vmem>>, vector<1x8x1x32xf32>,
    %c0_711 = arith.constant 0 : index
    %c0_712 = arith.constant 0 : index
    %c0_713 = arith.constant 0 : index
    %c5_714 = arith.constant 5 : index
    %c0_715 = arith.constant 0 : index
    %430 = vector.load %arg3[%c0_711, %c0_712, %c0_713, %c5_714, %c0_715] : memref<1x4x1x18x34xbf16, #tpu.memory_space<vmem>>, vector<1x4x1x1x32xbf16>
    %431 = vector.shape_cast %430 : vector<1x4x1x1x32xbf16> to vector<4x32xbf16>
    %c0_716 = arith.constant 0 : index
    %c0_717 = arith.constant 0 : index
    %c0_718 = arith.constant 0 : index
    %c5_719 = arith.constant 5 : index
    %c1_720 = arith.constant 1 : index
    %432 = vector.load %arg3[%c0_716, %c0_717, %c0_718, %c5_719, %c1_720] : memref<1x4x1x18x34xbf16, #tpu.memory_space<vmem>>, vector<1x4x1x1x32xbf16>
    %433 = vector.shape_cast %432 : vector<1x4x1x1x32xbf16> to vector<4x32xbf16>
    %c0_721 = arith.constant 0 : index
    %c0_722 = arith.constant 0 : index
    %c0_723 = arith.constant 0 : index
    %c5_724 = arith.constant 5 : index
    %c2_725 = arith.constant 2 : index
    %434 = vector.load %arg3[%c0_721, %c0_722, %c0_723, %c5_724, %c2_725] : memref<1x4x1x18x34xbf16, #tpu.memory_space<vmem>>, vector<1x4x1x1x32xbf16>
    %435 = vector.shape_cast %434 : vector<1x4x1x1x32xbf16> to vector<4x32xbf16>
    %c0_726 = arith.constant 0 : index
    %c0_727 = arith.constant 0 : index
    %c0_728 = arith.constant 0 : index
    %c6_729 = arith.constant 6 : index
    %c0_730 = arith.constant 0 : index
    %436 = vector.load %arg3[%c0_726, %c0_727, %c0_728, %c6_729, %c0_730] : memref<1x4x1x18x34xbf16, #tpu.memory_space<vmem>>, vector<1x4x1x1x32xbf16>
    %437 = vector.shape_cast %436 : vector<1x4x1x1x32xbf16> to vector<4x32xbf16>
    %c0_731 = arith.constant 0 : index
    %c0_732 = arith.constant 0 : index
    %c0_733 = arith.constant 0 : index
    %c6_734 = arith.constant 6 : index
    %c1_735 = arith.constant 1 : index
    %438 = vector.load %arg3[%c0_731, %c0_732, %c0_733, %c6_734, %c1_735] : memref<1x4x1x18x34xbf16, #tpu.memory_space<vmem>>, vector<1x4x1x1x32xbf16>
    %439 = vector.shape_cast %438 : vector<1x4x1x1x32xbf16> to vector<4x32xbf16>
    %c0_736 = arith.constant 0 : index
    %c0_737 = arith.constant 0 : index
    %c0_738 = arith.constant 0 : index
    %c6_739 = arith.constant 6 : index
    %c2_740 = arith.constant 2 : index
    %440 = vector.load %arg3[%c0_736, %c0_737, %c0_738, %c6_739, %c2_740] : memref<1x4x1x18x34xbf16, #tpu.memory_space<vmem>>, vector<1x4x1x1x32xbf16>
    %441 = vector.shape_cast %440 : vector<1x4x1x1x32xbf16> to vector<4x32xbf16>
    %442 = tpu.concatenate %431, %433, %435, %437, %439, %441 in 0 : vector<4x32xbf16>, vector<4x32xbf16>, vector<4x32xbf16>, vector<4x32xbf16>, vector<4x32xbf16>, vector<4x32xbf16> -> vector<24x32xbf16>
    %cst_741 = arith.constant dense<0.000000e+00> : vector<8x32xf32>
    %443 = tpu.matmul %345, %442, %cst_741 {dimension_numbers = #tpu.dot_dimension_numbers<[1], [0], [0], [1], [0, 0, 1, 1], [], []>} : vector<8x24xbf16>, vector<24x32xbf16>, vector<8x32xf32> -> vector<8x32xf32>
    %444 = arith.mulf %443, %2 : vector<8x32xf32>
    %445 = arith.addf %444, %5 : vector<8x32xf32>
    %cst_742 = arith.constant 0.000000e+00 : f32
    %446 = vector.broadcast %cst_742 : f32 to vector<8x32xf32>
    %447 = arith.maximumf %445, %446 : vector<8x32xf32>
    %c0_743 = arith.constant 0 : index
    %c0_744 = arith.constant 0 : index
    %c4_745 = arith.constant 4 : index
    %c32_746 = arith.constant 32 : index
    %448 = vector.load %arg7[%c0_743, %c0_744, %c4_745, %c32_746] : memref<1x8x16x64xf32, #tpu.memory_space<vmem>>, vector<1x8x1x32xf32>
    %449 = vector.shape_cast %448 : vector<1x8x1x32xf32> to vector<8x32xf32>
    %450 = vector.shape_cast %447 : vector<8x32xf32> to vector<1x8x1x32xf32>
    tpu.vector_store %arg7[%c0_743, %c0_744, %c4_745, %c32_746], %450 {strides = array<i32>} : memref<1x8x16x64xf32, #tpu.memory_space<vmem>>, vector<1x8x1x32xf32>,
    %c0_747 = arith.constant 0 : index
    %c0_748 = arith.constant 0 : index
    %c0_749 = arith.constant 0 : index
    %c6_750 = arith.constant 6 : index
    %c0_751 = arith.constant 0 : index
    %451 = vector.load %arg3[%c0_747, %c0_748, %c0_749, %c6_750, %c0_751] : memref<1x4x1x18x34xbf16, #tpu.memory_space<vmem>>, vector<1x4x1x1x32xbf16>
    %452 = vector.shape_cast %451 : vector<1x4x1x1x32xbf16> to vector<4x32xbf16>
    %c0_752 = arith.constant 0 : index
    %c0_753 = arith.constant 0 : index
    %c0_754 = arith.constant 0 : index
    %c6_755 = arith.constant 6 : index
    %c1_756 = arith.constant 1 : index
    %453 = vector.load %arg3[%c0_752, %c0_753, %c0_754, %c6_755, %c1_756] : memref<1x4x1x18x34xbf16, #tpu.memory_space<vmem>>, vector<1x4x1x1x32xbf16>
    %454 = vector.shape_cast %453 : vector<1x4x1x1x32xbf16> to vector<4x32xbf16>
    %c0_757 = arith.constant 0 : index
    %c0_758 = arith.constant 0 : index
    %c0_759 = arith.constant 0 : index
    %c6_760 = arith.constant 6 : index
    %c2_761 = arith.constant 2 : index
    %455 = vector.load %arg3[%c0_757, %c0_758, %c0_759, %c6_760, %c2_761] : memref<1x4x1x18x34xbf16, #tpu.memory_space<vmem>>, vector<1x4x1x1x32xbf16>
    %456 = vector.shape_cast %455 : vector<1x4x1x1x32xbf16> to vector<4x32xbf16>
    %c0_762 = arith.constant 0 : index
    %c0_763 = arith.constant 0 : index
    %c0_764 = arith.constant 0 : index
    %c7_765 = arith.constant 7 : index
    %c0_766 = arith.constant 0 : index
    %457 = vector.load %arg3[%c0_762, %c0_763, %c0_764, %c7_765, %c0_766] : memref<1x4x1x18x34xbf16, #tpu.memory_space<vmem>>, vector<1x4x1x1x32xbf16>
    %458 = vector.shape_cast %457 : vector<1x4x1x1x32xbf16> to vector<4x32xbf16>
    %c0_767 = arith.constant 0 : index
    %c0_768 = arith.constant 0 : index
    %c0_769 = arith.constant 0 : index
    %c7_770 = arith.constant 7 : index
    %c1_771 = arith.constant 1 : index
    %459 = vector.load %arg3[%c0_767, %c0_768, %c0_769, %c7_770, %c1_771] : memref<1x4x1x18x34xbf16, #tpu.memory_space<vmem>>, vector<1x4x1x1x32xbf16>
    %460 = vector.shape_cast %459 : vector<1x4x1x1x32xbf16> to vector<4x32xbf16>
    %c0_772 = arith.constant 0 : index
    %c0_773 = arith.constant 0 : index
    %c0_774 = arith.constant 0 : index
    %c7_775 = arith.constant 7 : index
    %c2_776 = arith.constant 2 : index
    %461 = vector.load %arg3[%c0_772, %c0_773, %c0_774, %c7_775, %c2_776] : memref<1x4x1x18x34xbf16, #tpu.memory_space<vmem>>, vector<1x4x1x1x32xbf16>
    %462 = vector.shape_cast %461 : vector<1x4x1x1x32xbf16> to vector<4x32xbf16>
    %463 = tpu.concatenate %452, %454, %456, %458, %460, %462 in 0 : vector<4x32xbf16>, vector<4x32xbf16>, vector<4x32xbf16>, vector<4x32xbf16>, vector<4x32xbf16>, vector<4x32xbf16> -> vector<24x32xbf16>
    %cst_777 = arith.constant dense<0.000000e+00> : vector<8x32xf32>
    %464 = tpu.matmul %345, %463, %cst_777 {dimension_numbers = #tpu.dot_dimension_numbers<[1], [0], [0], [1], [0, 0, 1, 1], [], []>} : vector<8x24xbf16>, vector<24x32xbf16>, vector<8x32xf32> -> vector<8x32xf32>
    %465 = arith.mulf %464, %2 : vector<8x32xf32>
    %466 = arith.addf %465, %5 : vector<8x32xf32>
    %cst_778 = arith.constant 0.000000e+00 : f32
    %467 = vector.broadcast %cst_778 : f32 to vector<8x32xf32>
    %468 = arith.maximumf %466, %467 : vector<8x32xf32>
    %c0_779 = arith.constant 0 : index
    %c0_780 = arith.constant 0 : index
    %c5_781 = arith.constant 5 : index
    %c32_782 = arith.constant 32 : index
    %469 = vector.load %arg7[%c0_779, %c0_780, %c5_781, %c32_782] : memref<1x8x16x64xf32, #tpu.memory_space<vmem>>, vector<1x8x1x32xf32>
    %470 = vector.shape_cast %469 : vector<1x8x1x32xf32> to vector<8x32xf32>
    %471 = vector.shape_cast %468 : vector<8x32xf32> to vector<1x8x1x32xf32>
    tpu.vector_store %arg7[%c0_779, %c0_780, %c5_781, %c32_782], %471 {strides = array<i32>} : memref<1x8x16x64xf32, #tpu.memory_space<vmem>>, vector<1x8x1x32xf32>,
    %c0_783 = arith.constant 0 : index
    %c0_784 = arith.constant 0 : index
    %c0_785 = arith.constant 0 : index
    %c7_786 = arith.constant 7 : index
    %c0_787 = arith.constant 0 : index
    %472 = vector.load %arg3[%c0_783, %c0_784, %c0_785, %c7_786, %c0_787] : memref<1x4x1x18x34xbf16, #tpu.memory_space<vmem>>, vector<1x4x1x1x32xbf16>
    %473 = vector.shape_cast %472 : vector<1x4x1x1x32xbf16> to vector<4x32xbf16>
    %c0_788 = arith.constant 0 : index
    %c0_789 = arith.constant 0 : index
    %c0_790 = arith.constant 0 : index
    %c7_791 = arith.constant 7 : index
    %c1_792 = arith.constant 1 : index
    %474 = vector.load %arg3[%c0_788, %c0_789, %c0_790, %c7_791, %c1_792] : memref<1x4x1x18x34xbf16, #tpu.memory_space<vmem>>, vector<1x4x1x1x32xbf16>
    %475 = vector.shape_cast %474 : vector<1x4x1x1x32xbf16> to vector<4x32xbf16>
    %c0_793 = arith.constant 0 : index
    %c0_794 = arith.constant 0 : index
    %c0_795 = arith.constant 0 : index
    %c7_796 = arith.constant 7 : index
    %c2_797 = arith.constant 2 : index
    %476 = vector.load %arg3[%c0_793, %c0_794, %c0_795, %c7_796, %c2_797] : memref<1x4x1x18x34xbf16, #tpu.memory_space<vmem>>, vector<1x4x1x1x32xbf16>
    %477 = vector.shape_cast %476 : vector<1x4x1x1x32xbf16> to vector<4x32xbf16>
    %c0_798 = arith.constant 0 : index
    %c0_799 = arith.constant 0 : index
    %c0_800 = arith.constant 0 : index
    %c8_801 = arith.constant 8 : index
    %c0_802 = arith.constant 0 : index
    %478 = vector.load %arg3[%c0_798, %c0_799, %c0_800, %c8_801, %c0_802] : memref<1x4x1x18x34xbf16, #tpu.memory_space<vmem>>, vector<1x4x1x1x32xbf16>
    %479 = vector.shape_cast %478 : vector<1x4x1x1x32xbf16> to vector<4x32xbf16>
    %c0_803 = arith.constant 0 : index
    %c0_804 = arith.constant 0 : index
    %c0_805 = arith.constant 0 : index
    %c8_806 = arith.constant 8 : index
    %c1_807 = arith.constant 1 : index
    %480 = vector.load %arg3[%c0_803, %c0_804, %c0_805, %c8_806, %c1_807] : memref<1x4x1x18x34xbf16, #tpu.memory_space<vmem>>, vector<1x4x1x1x32xbf16>
    %481 = vector.shape_cast %480 : vector<1x4x1x1x32xbf16> to vector<4x32xbf16>
    %c0_808 = arith.constant 0 : index
    %c0_809 = arith.constant 0 : index
    %c0_810 = arith.constant 0 : index
    %c8_811 = arith.constant 8 : index
    %c2_812 = arith.constant 2 : index
    %482 = vector.load %arg3[%c0_808, %c0_809, %c0_810, %c8_811, %c2_812] : memref<1x4x1x18x34xbf16, #tpu.memory_space<vmem>>, vector<1x4x1x1x32xbf16>
    %483 = vector.shape_cast %482 : vector<1x4x1x1x32xbf16> to vector<4x32xbf16>
    %484 = tpu.concatenate %473, %475, %477, %479, %481, %483 in 0 : vector<4x32xbf16>, vector<4x32xbf16>, vector<4x32xbf16>, vector<4x32xbf16>, vector<4x32xbf16>, vector<4x32xbf16> -> vector<24x32xbf16>
    %cst_813 = arith.constant dense<0.000000e+00> : vector<8x32xf32>
    %485 = tpu.matmul %345, %484, %cst_813 {dimension_numbers = #tpu.dot_dimension_numbers<[1], [0], [0], [1], [0, 0, 1, 1], [], []>} : vector<8x24xbf16>, vector<24x32xbf16>, vector<8x32xf32> -> vector<8x32xf32>
    %486 = arith.mulf %485, %2 : vector<8x32xf32>
    %487 = arith.addf %486, %5 : vector<8x32xf32>
    %cst_814 = arith.constant 0.000000e+00 : f32
    %488 = vector.broadcast %cst_814 : f32 to vector<8x32xf32>
    %489 = arith.maximumf %487, %488 : vector<8x32xf32>
    %c0_815 = arith.constant 0 : index
    %c0_816 = arith.constant 0 : index
    %c6_817 = arith.constant 6 : index
    %c32_818 = arith.constant 32 : index
    %490 = vector.load %arg7[%c0_815, %c0_816, %c6_817, %c32_818] : memref<1x8x16x64xf32, #tpu.memory_space<vmem>>, vector<1x8x1x32xf32>
    %491 = vector.shape_cast %490 : vector<1x8x1x32xf32> to vector<8x32xf32>
    %492 = vector.shape_cast %489 : vector<8x32xf32> to vector<1x8x1x32xf32>
    tpu.vector_store %arg7[%c0_815, %c0_816, %c6_817, %c32_818], %492 {strides = array<i32>} : memref<1x8x16x64xf32, #tpu.memory_space<vmem>>, vector<1x8x1x32xf32>,
    %c0_819 = arith.constant 0 : index
    %c0_820 = arith.constant 0 : index
    %c0_821 = arith.constant 0 : index
    %c8_822 = arith.constant 8 : index
    %c0_823 = arith.constant 0 : index
    %493 = vector.load %arg3[%c0_819, %c0_820, %c0_821, %c8_822, %c0_823] : memref<1x4x1x18x34xbf16, #tpu.memory_space<vmem>>, vector<1x4x1x1x32xbf16>
    %494 = vector.shape_cast %493 : vector<1x4x1x1x32xbf16> to vector<4x32xbf16>
    %c0_824 = arith.constant 0 : index
    %c0_825 = arith.constant 0 : index
    %c0_826 = arith.constant 0 : index
    %c8_827 = arith.constant 8 : index
    %c1_828 = arith.constant 1 : index
    %495 = vector.load %arg3[%c0_824, %c0_825, %c0_826, %c8_827, %c1_828] : memref<1x4x1x18x34xbf16, #tpu.memory_space<vmem>>, vector<1x4x1x1x32xbf16>
    %496 = vector.shape_cast %495 : vector<1x4x1x1x32xbf16> to vector<4x32xbf16>
    %c0_829 = arith.constant 0 : index
    %c0_830 = arith.constant 0 : index
    %c0_831 = arith.constant 0 : index
    %c8_832 = arith.constant 8 : index
    %c2_833 = arith.constant 2 : index
    %497 = vector.load %arg3[%c0_829, %c0_830, %c0_831, %c8_832, %c2_833] : memref<1x4x1x18x34xbf16, #tpu.memory_space<vmem>>, vector<1x4x1x1x32xbf16>
    %498 = vector.shape_cast %497 : vector<1x4x1x1x32xbf16> to vector<4x32xbf16>
    %c0_834 = arith.constant 0 : index
    %c0_835 = arith.constant 0 : index
    %c0_836 = arith.constant 0 : index
    %c9_837 = arith.constant 9 : index
    %c0_838 = arith.constant 0 : index
    %499 = vector.load %arg3[%c0_834, %c0_835, %c0_836, %c9_837, %c0_838] : memref<1x4x1x18x34xbf16, #tpu.memory_space<vmem>>, vector<1x4x1x1x32xbf16>
    %500 = vector.shape_cast %499 : vector<1x4x1x1x32xbf16> to vector<4x32xbf16>
    %c0_839 = arith.constant 0 : index
    %c0_840 = arith.constant 0 : index
    %c0_841 = arith.constant 0 : index
    %c9_842 = arith.constant 9 : index
    %c1_843 = arith.constant 1 : index
    %501 = vector.load %arg3[%c0_839, %c0_840, %c0_841, %c9_842, %c1_843] : memref<1x4x1x18x34xbf16, #tpu.memory_space<vmem>>, vector<1x4x1x1x32xbf16>
    %502 = vector.shape_cast %501 : vector<1x4x1x1x32xbf16> to vector<4x32xbf16>
    %c0_844 = arith.constant 0 : index
    %c0_845 = arith.constant 0 : index
    %c0_846 = arith.constant 0 : index
    %c9_847 = arith.constant 9 : index
    %c2_848 = arith.constant 2 : index
    %503 = vector.load %arg3[%c0_844, %c0_845, %c0_846, %c9_847, %c2_848] : memref<1x4x1x18x34xbf16, #tpu.memory_space<vmem>>, vector<1x4x1x1x32xbf16>
    %504 = vector.shape_cast %503 : vector<1x4x1x1x32xbf16> to vector<4x32xbf16>
    %505 = tpu.concatenate %494, %496, %498, %500, %502, %504 in 0 : vector<4x32xbf16>, vector<4x32xbf16>, vector<4x32xbf16>, vector<4x32xbf16>, vector<4x32xbf16>, vector<4x32xbf16> -> vector<24x32xbf16>
    %cst_849 = arith.constant dense<0.000000e+00> : vector<8x32xf32>
    %506 = tpu.matmul %345, %505, %cst_849 {dimension_numbers = #tpu.dot_dimension_numbers<[1], [0], [0], [1], [0, 0, 1, 1], [], []>} : vector<8x24xbf16>, vector<24x32xbf16>, vector<8x32xf32> -> vector<8x32xf32>
    %507 = arith.mulf %506, %2 : vector<8x32xf32>
    %508 = arith.addf %507, %5 : vector<8x32xf32>
    %cst_850 = arith.constant 0.000000e+00 : f32
    %509 = vector.broadcast %cst_850 : f32 to vector<8x32xf32>
    %510 = arith.maximumf %508, %509 : vector<8x32xf32>
    %c0_851 = arith.constant 0 : index
    %c0_852 = arith.constant 0 : index
    %c7_853 = arith.constant 7 : index
    %c32_854 = arith.constant 32 : index
    %511 = vector.load %arg7[%c0_851, %c0_852, %c7_853, %c32_854] : memref<1x8x16x64xf32, #tpu.memory_space<vmem>>, vector<1x8x1x32xf32>
    %512 = vector.shape_cast %511 : vector<1x8x1x32xf32> to vector<8x32xf32>
    %513 = vector.shape_cast %510 : vector<8x32xf32> to vector<1x8x1x32xf32>
    tpu.vector_store %arg7[%c0_851, %c0_852, %c7_853, %c32_854], %513 {strides = array<i32>} : memref<1x8x16x64xf32, #tpu.memory_space<vmem>>, vector<1x8x1x32xf32>,
    %c0_855 = arith.constant 0 : index
    %c0_856 = arith.constant 0 : index
    %c0_857 = arith.constant 0 : index
    %c9_858 = arith.constant 9 : index
    %c0_859 = arith.constant 0 : index
    %514 = vector.load %arg3[%c0_855, %c0_856, %c0_857, %c9_858, %c0_859] : memref<1x4x1x18x34xbf16, #tpu.memory_space<vmem>>, vector<1x4x1x1x32xbf16>
    %515 = vector.shape_cast %514 : vector<1x4x1x1x32xbf16> to vector<4x32xbf16>
    %c0_860 = arith.constant 0 : index
    %c0_861 = arith.constant 0 : index
    %c0_862 = arith.constant 0 : index
    %c9_863 = arith.constant 9 : index
    %c1_864 = arith.constant 1 : index
    %516 = vector.load %arg3[%c0_860, %c0_861, %c0_862, %c9_863, %c1_864] : memref<1x4x1x18x34xbf16, #tpu.memory_space<vmem>>, vector<1x4x1x1x32xbf16>
    %517 = vector.shape_cast %516 : vector<1x4x1x1x32xbf16> to vector<4x32xbf16>
    %c0_865 = arith.constant 0 : index
    %c0_866 = arith.constant 0 : index
    %c0_867 = arith.constant 0 : index
    %c9_868 = arith.constant 9 : index
    %c2_869 = arith.constant 2 : index
    %518 = vector.load %arg3[%c0_865, %c0_866, %c0_867, %c9_868, %c2_869] : memref<1x4x1x18x34xbf16, #tpu.memory_space<vmem>>, vector<1x4x1x1x32xbf16>
    %519 = vector.shape_cast %518 : vector<1x4x1x1x32xbf16> to vector<4x32xbf16>
    %c0_870 = arith.constant 0 : index
    %c0_871 = arith.constant 0 : index
    %c0_872 = arith.constant 0 : index
    %c10_873 = arith.constant 10 : index
    %c0_874 = arith.constant 0 : index
    %520 = vector.load %arg3[%c0_870, %c0_871, %c0_872, %c10_873, %c0_874] : memref<1x4x1x18x34xbf16, #tpu.memory_space<vmem>>, vector<1x4x1x1x32xbf16>
    %521 = vector.shape_cast %520 : vector<1x4x1x1x32xbf16> to vector<4x32xbf16>
    %c0_875 = arith.constant 0 : index
    %c0_876 = arith.constant 0 : index
    %c0_877 = arith.constant 0 : index
    %c10_878 = arith.constant 10 : index
    %c1_879 = arith.constant 1 : index
    %522 = vector.load %arg3[%c0_875, %c0_876, %c0_877, %c10_878, %c1_879] : memref<1x4x1x18x34xbf16, #tpu.memory_space<vmem>>, vector<1x4x1x1x32xbf16>
    %523 = vector.shape_cast %522 : vector<1x4x1x1x32xbf16> to vector<4x32xbf16>
    %c0_880 = arith.constant 0 : index
    %c0_881 = arith.constant 0 : index
    %c0_882 = arith.constant 0 : index
    %c10_883 = arith.constant 10 : index
    %c2_884 = arith.constant 2 : index
    %524 = vector.load %arg3[%c0_880, %c0_881, %c0_882, %c10_883, %c2_884] : memref<1x4x1x18x34xbf16, #tpu.memory_space<vmem>>, vector<1x4x1x1x32xbf16>
    %525 = vector.shape_cast %524 : vector<1x4x1x1x32xbf16> to vector<4x32xbf16>
    %526 = tpu.concatenate %515, %517, %519, %521, %523, %525 in 0 : vector<4x32xbf16>, vector<4x32xbf16>, vector<4x32xbf16>, vector<4x32xbf16>, vector<4x32xbf16>, vector<4x32xbf16> -> vector<24x32xbf16>
    %cst_885 = arith.constant dense<0.000000e+00> : vector<8x32xf32>
    %527 = tpu.matmul %345, %526, %cst_885 {dimension_numbers = #tpu.dot_dimension_numbers<[1], [0], [0], [1], [0, 0, 1, 1], [], []>} : vector<8x24xbf16>, vector<24x32xbf16>, vector<8x32xf32> -> vector<8x32xf32>
    %528 = arith.mulf %527, %2 : vector<8x32xf32>
    %529 = arith.addf %528, %5 : vector<8x32xf32>
    %cst_886 = arith.constant 0.000000e+00 : f32
    %530 = vector.broadcast %cst_886 : f32 to vector<8x32xf32>
    %531 = arith.maximumf %529, %530 : vector<8x32xf32>
    %c0_887 = arith.constant 0 : index
    %c0_888 = arith.constant 0 : index
    %c8_889 = arith.constant 8 : index
    %c32_890 = arith.constant 32 : index
    %532 = vector.load %arg7[%c0_887, %c0_888, %c8_889, %c32_890] : memref<1x8x16x64xf32, #tpu.memory_space<vmem>>, vector<1x8x1x32xf32>
    %533 = vector.shape_cast %532 : vector<1x8x1x32xf32> to vector<8x32xf32>
    %534 = vector.shape_cast %531 : vector<8x32xf32> to vector<1x8x1x32xf32>
    tpu.vector_store %arg7[%c0_887, %c0_888, %c8_889, %c32_890], %534 {strides = array<i32>} : memref<1x8x16x64xf32, #tpu.memory_space<vmem>>, vector<1x8x1x32xf32>,
    %c0_891 = arith.constant 0 : index
    %c0_892 = arith.constant 0 : index
    %c0_893 = arith.constant 0 : index
    %c10_894 = arith.constant 10 : index
    %c0_895 = arith.constant 0 : index
    %535 = vector.load %arg3[%c0_891, %c0_892, %c0_893, %c10_894, %c0_895] : memref<1x4x1x18x34xbf16, #tpu.memory_space<vmem>>, vector<1x4x1x1x32xbf16>
    %536 = vector.shape_cast %535 : vector<1x4x1x1x32xbf16> to vector<4x32xbf16>
    %c0_896 = arith.constant 0 : index
    %c0_897 = arith.constant 0 : index
    %c0_898 = arith.constant 0 : index
    %c10_899 = arith.constant 10 : index
    %c1_900 = arith.constant 1 : index
    %537 = vector.load %arg3[%c0_896, %c0_897, %c0_898, %c10_899, %c1_900] : memref<1x4x1x18x34xbf16, #tpu.memory_space<vmem>>, vector<1x4x1x1x32xbf16>
    %538 = vector.shape_cast %537 : vector<1x4x1x1x32xbf16> to vector<4x32xbf16>
    %c0_901 = arith.constant 0 : index
    %c0_902 = arith.constant 0 : index
    %c0_903 = arith.constant 0 : index
    %c10_904 = arith.constant 10 : index
    %c2_905 = arith.constant 2 : index
    %539 = vector.load %arg3[%c0_901, %c0_902, %c0_903, %c10_904, %c2_905] : memref<1x4x1x18x34xbf16, #tpu.memory_space<vmem>>, vector<1x4x1x1x32xbf16>
    %540 = vector.shape_cast %539 : vector<1x4x1x1x32xbf16> to vector<4x32xbf16>
    %c0_906 = arith.constant 0 : index
    %c0_907 = arith.constant 0 : index
    %c0_908 = arith.constant 0 : index
    %c11_909 = arith.constant 11 : index
    %c0_910 = arith.constant 0 : index
    %541 = vector.load %arg3[%c0_906, %c0_907, %c0_908, %c11_909, %c0_910] : memref<1x4x1x18x34xbf16, #tpu.memory_space<vmem>>, vector<1x4x1x1x32xbf16>
    %542 = vector.shape_cast %541 : vector<1x4x1x1x32xbf16> to vector<4x32xbf16>
    %c0_911 = arith.constant 0 : index
    %c0_912 = arith.constant 0 : index
    %c0_913 = arith.constant 0 : index
    %c11_914 = arith.constant 11 : index
    %c1_915 = arith.constant 1 : index
    %543 = vector.load %arg3[%c0_911, %c0_912, %c0_913, %c11_914, %c1_915] : memref<1x4x1x18x34xbf16, #tpu.memory_space<vmem>>, vector<1x4x1x1x32xbf16>
    %544 = vector.shape_cast %543 : vector<1x4x1x1x32xbf16> to vector<4x32xbf16>
    %c0_916 = arith.constant 0 : index
    %c0_917 = arith.constant 0 : index
    %c0_918 = arith.constant 0 : index
    %c11_919 = arith.constant 11 : index
    %c2_920 = arith.constant 2 : index
    %545 = vector.load %arg3[%c0_916, %c0_917, %c0_918, %c11_919, %c2_920] : memref<1x4x1x18x34xbf16, #tpu.memory_space<vmem>>, vector<1x4x1x1x32xbf16>
    %546 = vector.shape_cast %545 : vector<1x4x1x1x32xbf16> to vector<4x32xbf16>
    %547 = tpu.concatenate %536, %538, %540, %542, %544, %546 in 0 : vector<4x32xbf16>, vector<4x32xbf16>, vector<4x32xbf16>, vector<4x32xbf16>, vector<4x32xbf16>, vector<4x32xbf16> -> vector<24x32xbf16>
    %cst_921 = arith.constant dense<0.000000e+00> : vector<8x32xf32>
    %548 = tpu.matmul %345, %547, %cst_921 {dimension_numbers = #tpu.dot_dimension_numbers<[1], [0], [0], [1], [0, 0, 1, 1], [], []>} : vector<8x24xbf16>, vector<24x32xbf16>, vector<8x32xf32> -> vector<8x32xf32>
    %549 = arith.mulf %548, %2 : vector<8x32xf32>
    %550 = arith.addf %549, %5 : vector<8x32xf32>
    %cst_922 = arith.constant 0.000000e+00 : f32
    %551 = vector.broadcast %cst_922 : f32 to vector<8x32xf32>
    %552 = arith.maximumf %550, %551 : vector<8x32xf32>
    %c0_923 = arith.constant 0 : index
    %c0_924 = arith.constant 0 : index
    %c9_925 = arith.constant 9 : index
    %c32_926 = arith.constant 32 : index
    %553 = vector.load %arg7[%c0_923, %c0_924, %c9_925, %c32_926] : memref<1x8x16x64xf32, #tpu.memory_space<vmem>>, vector<1x8x1x32xf32>
    %554 = vector.shape_cast %553 : vector<1x8x1x32xf32> to vector<8x32xf32>
    %555 = vector.shape_cast %552 : vector<8x32xf32> to vector<1x8x1x32xf32>
    tpu.vector_store %arg7[%c0_923, %c0_924, %c9_925, %c32_926], %555 {strides = array<i32>} : memref<1x8x16x64xf32, #tpu.memory_space<vmem>>, vector<1x8x1x32xf32>,
    %c0_927 = arith.constant 0 : index
    %c0_928 = arith.constant 0 : index
    %c0_929 = arith.constant 0 : index
    %c11_930 = arith.constant 11 : index
    %c0_931 = arith.constant 0 : index
    %556 = vector.load %arg3[%c0_927, %c0_928, %c0_929, %c11_930, %c0_931] : memref<1x4x1x18x34xbf16, #tpu.memory_space<vmem>>, vector<1x4x1x1x32xbf16>
    %557 = vector.shape_cast %556 : vector<1x4x1x1x32xbf16> to vector<4x32xbf16>
    %c0_932 = arith.constant 0 : index
    %c0_933 = arith.constant 0 : index
    %c0_934 = arith.constant 0 : index
    %c11_935 = arith.constant 11 : index
    %c1_936 = arith.constant 1 : index
    %558 = vector.load %arg3[%c0_932, %c0_933, %c0_934, %c11_935, %c1_936] : memref<1x4x1x18x34xbf16, #tpu.memory_space<vmem>>, vector<1x4x1x1x32xbf16>
    %559 = vector.shape_cast %558 : vector<1x4x1x1x32xbf16> to vector<4x32xbf16>
    %c0_937 = arith.constant 0 : index
    %c0_938 = arith.constant 0 : index
    %c0_939 = arith.constant 0 : index
    %c11_940 = arith.constant 11 : index
    %c2_941 = arith.constant 2 : index
    %560 = vector.load %arg3[%c0_937, %c0_938, %c0_939, %c11_940, %c2_941] : memref<1x4x1x18x34xbf16, #tpu.memory_space<vmem>>, vector<1x4x1x1x32xbf16>
    %561 = vector.shape_cast %560 : vector<1x4x1x1x32xbf16> to vector<4x32xbf16>
    %c0_942 = arith.constant 0 : index
    %c0_943 = arith.constant 0 : index
    %c0_944 = arith.constant 0 : index
    %c12_945 = arith.constant 12 : index
    %c0_946 = arith.constant 0 : index
    %562 = vector.load %arg3[%c0_942, %c0_943, %c0_944, %c12_945, %c0_946] : memref<1x4x1x18x34xbf16, #tpu.memory_space<vmem>>, vector<1x4x1x1x32xbf16>
    %563 = vector.shape_cast %562 : vector<1x4x1x1x32xbf16> to vector<4x32xbf16>
    %c0_947 = arith.constant 0 : index
    %c0_948 = arith.constant 0 : index
    %c0_949 = arith.constant 0 : index
    %c12_950 = arith.constant 12 : index
    %c1_951 = arith.constant 1 : index
    %564 = vector.load %arg3[%c0_947, %c0_948, %c0_949, %c12_950, %c1_951] : memref<1x4x1x18x34xbf16, #tpu.memory_space<vmem>>, vector<1x4x1x1x32xbf16>
    %565 = vector.shape_cast %564 : vector<1x4x1x1x32xbf16> to vector<4x32xbf16>
    %c0_952 = arith.constant 0 : index
    %c0_953 = arith.constant 0 : index
    %c0_954 = arith.constant 0 : index
    %c12_955 = arith.constant 12 : index
    %c2_956 = arith.constant 2 : index
    %566 = vector.load %arg3[%c0_952, %c0_953, %c0_954, %c12_955, %c2_956] : memref<1x4x1x18x34xbf16, #tpu.memory_space<vmem>>, vector<1x4x1x1x32xbf16>
    %567 = vector.shape_cast %566 : vector<1x4x1x1x32xbf16> to vector<4x32xbf16>
    %568 = tpu.concatenate %557, %559, %561, %563, %565, %567 in 0 : vector<4x32xbf16>, vector<4x32xbf16>, vector<4x32xbf16>, vector<4x32xbf16>, vector<4x32xbf16>, vector<4x32xbf16> -> vector<24x32xbf16>
    %cst_957 = arith.constant dense<0.000000e+00> : vector<8x32xf32>
    %569 = tpu.matmul %345, %568, %cst_957 {dimension_numbers = #tpu.dot_dimension_numbers<[1], [0], [0], [1], [0, 0, 1, 1], [], []>} : vector<8x24xbf16>, vector<24x32xbf16>, vector<8x32xf32> -> vector<8x32xf32>
    %570 = arith.mulf %569, %2 : vector<8x32xf32>
    %571 = arith.addf %570, %5 : vector<8x32xf32>
    %cst_958 = arith.constant 0.000000e+00 : f32
    %572 = vector.broadcast %cst_958 : f32 to vector<8x32xf32>
    %573 = arith.maximumf %571, %572 : vector<8x32xf32>
    %c0_959 = arith.constant 0 : index
    %c0_960 = arith.constant 0 : index
    %c10_961 = arith.constant 10 : index
    %c32_962 = arith.constant 32 : index
    %574 = vector.load %arg7[%c0_959, %c0_960, %c10_961, %c32_962] : memref<1x8x16x64xf32, #tpu.memory_space<vmem>>, vector<1x8x1x32xf32>
    %575 = vector.shape_cast %574 : vector<1x8x1x32xf32> to vector<8x32xf32>
    %576 = vector.shape_cast %573 : vector<8x32xf32> to vector<1x8x1x32xf32>
    tpu.vector_store %arg7[%c0_959, %c0_960, %c10_961, %c32_962], %576 {strides = array<i32>} : memref<1x8x16x64xf32, #tpu.memory_space<vmem>>, vector<1x8x1x32xf32>,
    %c0_963 = arith.constant 0 : index
    %c0_964 = arith.constant 0 : index
    %c0_965 = arith.constant 0 : index
    %c12_966 = arith.constant 12 : index
    %c0_967 = arith.constant 0 : index
    %577 = vector.load %arg3[%c0_963, %c0_964, %c0_965, %c12_966, %c0_967] : memref<1x4x1x18x34xbf16, #tpu.memory_space<vmem>>, vector<1x4x1x1x32xbf16>
    %578 = vector.shape_cast %577 : vector<1x4x1x1x32xbf16> to vector<4x32xbf16>
    %c0_968 = arith.constant 0 : index
    %c0_969 = arith.constant 0 : index
    %c0_970 = arith.constant 0 : index
    %c12_971 = arith.constant 12 : index
    %c1_972 = arith.constant 1 : index
    %579 = vector.load %arg3[%c0_968, %c0_969, %c0_970, %c12_971, %c1_972] : memref<1x4x1x18x34xbf16, #tpu.memory_space<vmem>>, vector<1x4x1x1x32xbf16>
    %580 = vector.shape_cast %579 : vector<1x4x1x1x32xbf16> to vector<4x32xbf16>
    %c0_973 = arith.constant 0 : index
    %c0_974 = arith.constant 0 : index
    %c0_975 = arith.constant 0 : index
    %c12_976 = arith.constant 12 : index
    %c2_977 = arith.constant 2 : index
    %581 = vector.load %arg3[%c0_973, %c0_974, %c0_975, %c12_976, %c2_977] : memref<1x4x1x18x34xbf16, #tpu.memory_space<vmem>>, vector<1x4x1x1x32xbf16>
    %582 = vector.shape_cast %581 : vector<1x4x1x1x32xbf16> to vector<4x32xbf16>
    %c0_978 = arith.constant 0 : index
    %c0_979 = arith.constant 0 : index
    %c0_980 = arith.constant 0 : index
    %c13_981 = arith.constant 13 : index
    %c0_982 = arith.constant 0 : index
    %583 = vector.load %arg3[%c0_978, %c0_979, %c0_980, %c13_981, %c0_982] : memref<1x4x1x18x34xbf16, #tpu.memory_space<vmem>>, vector<1x4x1x1x32xbf16>
    %584 = vector.shape_cast %583 : vector<1x4x1x1x32xbf16> to vector<4x32xbf16>
    %c0_983 = arith.constant 0 : index
    %c0_984 = arith.constant 0 : index
    %c0_985 = arith.constant 0 : index
    %c13_986 = arith.constant 13 : index
    %c1_987 = arith.constant 1 : index
    %585 = vector.load %arg3[%c0_983, %c0_984, %c0_985, %c13_986, %c1_987] : memref<1x4x1x18x34xbf16, #tpu.memory_space<vmem>>, vector<1x4x1x1x32xbf16>
    %586 = vector.shape_cast %585 : vector<1x4x1x1x32xbf16> to vector<4x32xbf16>
    %c0_988 = arith.constant 0 : index
    %c0_989 = arith.constant 0 : index
    %c0_990 = arith.constant 0 : index
    %c13_991 = arith.constant 13 : index
    %c2_992 = arith.constant 2 : index
    %587 = vector.load %arg3[%c0_988, %c0_989, %c0_990, %c13_991, %c2_992] : memref<1x4x1x18x34xbf16, #tpu.memory_space<vmem>>, vector<1x4x1x1x32xbf16>
    %588 = vector.shape_cast %587 : vector<1x4x1x1x32xbf16> to vector<4x32xbf16>
    %589 = tpu.concatenate %578, %580, %582, %584, %586, %588 in 0 : vector<4x32xbf16>, vector<4x32xbf16>, vector<4x32xbf16>, vector<4x32xbf16>, vector<4x32xbf16>, vector<4x32xbf16> -> vector<24x32xbf16>
    %cst_993 = arith.constant dense<0.000000e+00> : vector<8x32xf32>
    %590 = tpu.matmul %345, %589, %cst_993 {dimension_numbers = #tpu.dot_dimension_numbers<[1], [0], [0], [1], [0, 0, 1, 1], [], []>} : vector<8x24xbf16>, vector<24x32xbf16>, vector<8x32xf32> -> vector<8x32xf32>
    %591 = arith.mulf %590, %2 : vector<8x32xf32>
    %592 = arith.addf %591, %5 : vector<8x32xf32>
    %cst_994 = arith.constant 0.000000e+00 : f32
    %593 = vector.broadcast %cst_994 : f32 to vector<8x32xf32>
    %594 = arith.maximumf %592, %593 : vector<8x32xf32>
    %c0_995 = arith.constant 0 : index
    %c0_996 = arith.constant 0 : index
    %c11_997 = arith.constant 11 : index
    %c32_998 = arith.constant 32 : index
    %595 = vector.load %arg7[%c0_995, %c0_996, %c11_997, %c32_998] : memref<1x8x16x64xf32, #tpu.memory_space<vmem>>, vector<1x8x1x32xf32>
    %596 = vector.shape_cast %595 : vector<1x8x1x32xf32> to vector<8x32xf32>
    %597 = vector.shape_cast %594 : vector<8x32xf32> to vector<1x8x1x32xf32>
    tpu.vector_store %arg7[%c0_995, %c0_996, %c11_997, %c32_998], %597 {strides = array<i32>} : memref<1x8x16x64xf32, #tpu.memory_space<vmem>>, vector<1x8x1x32xf32>,
    %c0_999 = arith.constant 0 : index
    %c0_1000 = arith.constant 0 : index
    %c0_1001 = arith.constant 0 : index
    %c13_1002 = arith.constant 13 : index
    %c0_1003 = arith.constant 0 : index
    %598 = vector.load %arg3[%c0_999, %c0_1000, %c0_1001, %c13_1002, %c0_1003] : memref<1x4x1x18x34xbf16, #tpu.memory_space<vmem>>, vector<1x4x1x1x32xbf16>
    %599 = vector.shape_cast %598 : vector<1x4x1x1x32xbf16> to vector<4x32xbf16>
    %c0_1004 = arith.constant 0 : index
    %c0_1005 = arith.constant 0 : index
    %c0_1006 = arith.constant 0 : index
    %c13_1007 = arith.constant 13 : index
    %c1_1008 = arith.constant 1 : index
    %600 = vector.load %arg3[%c0_1004, %c0_1005, %c0_1006, %c13_1007, %c1_1008] : memref<1x4x1x18x34xbf16, #tpu.memory_space<vmem>>, vector<1x4x1x1x32xbf16>
    %601 = vector.shape_cast %600 : vector<1x4x1x1x32xbf16> to vector<4x32xbf16>
    %c0_1009 = arith.constant 0 : index
    %c0_1010 = arith.constant 0 : index
    %c0_1011 = arith.constant 0 : index
    %c13_1012 = arith.constant 13 : index
    %c2_1013 = arith.constant 2 : index
    %602 = vector.load %arg3[%c0_1009, %c0_1010, %c0_1011, %c13_1012, %c2_1013] : memref<1x4x1x18x34xbf16, #tpu.memory_space<vmem>>, vector<1x4x1x1x32xbf16>
    %603 = vector.shape_cast %602 : vector<1x4x1x1x32xbf16> to vector<4x32xbf16>
    %c0_1014 = arith.constant 0 : index
    %c0_1015 = arith.constant 0 : index
    %c0_1016 = arith.constant 0 : index
    %c14_1017 = arith.constant 14 : index
    %c0_1018 = arith.constant 0 : index
    %604 = vector.load %arg3[%c0_1014, %c0_1015, %c0_1016, %c14_1017, %c0_1018] : memref<1x4x1x18x34xbf16, #tpu.memory_space<vmem>>, vector<1x4x1x1x32xbf16>
    %605 = vector.shape_cast %604 : vector<1x4x1x1x32xbf16> to vector<4x32xbf16>
    %c0_1019 = arith.constant 0 : index
    %c0_1020 = arith.constant 0 : index
    %c0_1021 = arith.constant 0 : index
    %c14_1022 = arith.constant 14 : index
    %c1_1023 = arith.constant 1 : index
    %606 = vector.load %arg3[%c0_1019, %c0_1020, %c0_1021, %c14_1022, %c1_1023] : memref<1x4x1x18x34xbf16, #tpu.memory_space<vmem>>, vector<1x4x1x1x32xbf16>
    %607 = vector.shape_cast %606 : vector<1x4x1x1x32xbf16> to vector<4x32xbf16>
    %c0_1024 = arith.constant 0 : index
    %c0_1025 = arith.constant 0 : index
    %c0_1026 = arith.constant 0 : index
    %c14_1027 = arith.constant 14 : index
    %c2_1028 = arith.constant 2 : index
    %608 = vector.load %arg3[%c0_1024, %c0_1025, %c0_1026, %c14_1027, %c2_1028] : memref<1x4x1x18x34xbf16, #tpu.memory_space<vmem>>, vector<1x4x1x1x32xbf16>
    %609 = vector.shape_cast %608 : vector<1x4x1x1x32xbf16> to vector<4x32xbf16>
    %610 = tpu.concatenate %599, %601, %603, %605, %607, %609 in 0 : vector<4x32xbf16>, vector<4x32xbf16>, vector<4x32xbf16>, vector<4x32xbf16>, vector<4x32xbf16>, vector<4x32xbf16> -> vector<24x32xbf16>
    %cst_1029 = arith.constant dense<0.000000e+00> : vector<8x32xf32>
    %611 = tpu.matmul %345, %610, %cst_1029 {dimension_numbers = #tpu.dot_dimension_numbers<[1], [0], [0], [1], [0, 0, 1, 1], [], []>} : vector<8x24xbf16>, vector<24x32xbf16>, vector<8x32xf32> -> vector<8x32xf32>
    %612 = arith.mulf %611, %2 : vector<8x32xf32>
    %613 = arith.addf %612, %5 : vector<8x32xf32>
    %cst_1030 = arith.constant 0.000000e+00 : f32
    %614 = vector.broadcast %cst_1030 : f32 to vector<8x32xf32>
    %615 = arith.maximumf %613, %614 : vector<8x32xf32>
    %c0_1031 = arith.constant 0 : index
    %c0_1032 = arith.constant 0 : index
    %c12_1033 = arith.constant 12 : index
    %c32_1034 = arith.constant 32 : index
    %616 = vector.load %arg7[%c0_1031, %c0_1032, %c12_1033, %c32_1034] : memref<1x8x16x64xf32, #tpu.memory_space<vmem>>, vector<1x8x1x32xf32>
    %617 = vector.shape_cast %616 : vector<1x8x1x32xf32> to vector<8x32xf32>
    %618 = vector.shape_cast %615 : vector<8x32xf32> to vector<1x8x1x32xf32>
    tpu.vector_store %arg7[%c0_1031, %c0_1032, %c12_1033, %c32_1034], %618 {strides = array<i32>} : memref<1x8x16x64xf32, #tpu.memory_space<vmem>>, vector<1x8x1x32xf32>,
    %c0_1035 = arith.constant 0 : index
    %c0_1036 = arith.constant 0 : index
    %c0_1037 = arith.constant 0 : index
    %c14_1038 = arith.constant 14 : index
    %c0_1039 = arith.constant 0 : index
    %619 = vector.load %arg3[%c0_1035, %c0_1036, %c0_1037, %c14_1038, %c0_1039] : memref<1x4x1x18x34xbf16, #tpu.memory_space<vmem>>, vector<1x4x1x1x32xbf16>
    %620 = vector.shape_cast %619 : vector<1x4x1x1x32xbf16> to vector<4x32xbf16>
    %c0_1040 = arith.constant 0 : index
    %c0_1041 = arith.constant 0 : index
    %c0_1042 = arith.constant 0 : index
    %c14_1043 = arith.constant 14 : index
    %c1_1044 = arith.constant 1 : index
    %621 = vector.load %arg3[%c0_1040, %c0_1041, %c0_1042, %c14_1043, %c1_1044] : memref<1x4x1x18x34xbf16, #tpu.memory_space<vmem>>, vector<1x4x1x1x32xbf16>
    %622 = vector.shape_cast %621 : vector<1x4x1x1x32xbf16> to vector<4x32xbf16>
    %c0_1045 = arith.constant 0 : index
    %c0_1046 = arith.constant 0 : index
    %c0_1047 = arith.constant 0 : index
    %c14_1048 = arith.constant 14 : index
    %c2_1049 = arith.constant 2 : index
    %623 = vector.load %arg3[%c0_1045, %c0_1046, %c0_1047, %c14_1048, %c2_1049] : memref<1x4x1x18x34xbf16, #tpu.memory_space<vmem>>, vector<1x4x1x1x32xbf16>
    %624 = vector.shape_cast %623 : vector<1x4x1x1x32xbf16> to vector<4x32xbf16>
    %c0_1050 = arith.constant 0 : index
    %c0_1051 = arith.constant 0 : index
    %c0_1052 = arith.constant 0 : index
    %c15_1053 = arith.constant 15 : index
    %c0_1054 = arith.constant 0 : index
    %625 = vector.load %arg3[%c0_1050, %c0_1051, %c0_1052, %c15_1053, %c0_1054] : memref<1x4x1x18x34xbf16, #tpu.memory_space<vmem>>, vector<1x4x1x1x32xbf16>
    %626 = vector.shape_cast %625 : vector<1x4x1x1x32xbf16> to vector<4x32xbf16>
    %c0_1055 = arith.constant 0 : index
    %c0_1056 = arith.constant 0 : index
    %c0_1057 = arith.constant 0 : index
    %c15_1058 = arith.constant 15 : index
    %c1_1059 = arith.constant 1 : index
    %627 = vector.load %arg3[%c0_1055, %c0_1056, %c0_1057, %c15_1058, %c1_1059] : memref<1x4x1x18x34xbf16, #tpu.memory_space<vmem>>, vector<1x4x1x1x32xbf16>
    %628 = vector.shape_cast %627 : vector<1x4x1x1x32xbf16> to vector<4x32xbf16>
    %c0_1060 = arith.constant 0 : index
    %c0_1061 = arith.constant 0 : index
    %c0_1062 = arith.constant 0 : index
    %c15_1063 = arith.constant 15 : index
    %c2_1064 = arith.constant 2 : index
    %629 = vector.load %arg3[%c0_1060, %c0_1061, %c0_1062, %c15_1063, %c2_1064] : memref<1x4x1x18x34xbf16, #tpu.memory_space<vmem>>, vector<1x4x1x1x32xbf16>
    %630 = vector.shape_cast %629 : vector<1x4x1x1x32xbf16> to vector<4x32xbf16>
    %631 = tpu.concatenate %620, %622, %624, %626, %628, %630 in 0 : vector<4x32xbf16>, vector<4x32xbf16>, vector<4x32xbf16>, vector<4x32xbf16>, vector<4x32xbf16>, vector<4x32xbf16> -> vector<24x32xbf16>
    %cst_1065 = arith.constant dense<0.000000e+00> : vector<8x32xf32>
    %632 = tpu.matmul %345, %631, %cst_1065 {dimension_numbers = #tpu.dot_dimension_numbers<[1], [0], [0], [1], [0, 0, 1, 1], [], []>} : vector<8x24xbf16>, vector<24x32xbf16>, vector<8x32xf32> -> vector<8x32xf32>
    %633 = arith.mulf %632, %2 : vector<8x32xf32>
    %634 = arith.addf %633, %5 : vector<8x32xf32>
    %cst_1066 = arith.constant 0.000000e+00 : f32
    %635 = vector.broadcast %cst_1066 : f32 to vector<8x32xf32>
    %636 = arith.maximumf %634, %635 : vector<8x32xf32>
    %c0_1067 = arith.constant 0 : index
    %c0_1068 = arith.constant 0 : index
    %c13_1069 = arith.constant 13 : index
    %c32_1070 = arith.constant 32 : index
    %637 = vector.load %arg7[%c0_1067, %c0_1068, %c13_1069, %c32_1070] : memref<1x8x16x64xf32, #tpu.memory_space<vmem>>, vector<1x8x1x32xf32>
    %638 = vector.shape_cast %637 : vector<1x8x1x32xf32> to vector<8x32xf32>
    %639 = vector.shape_cast %636 : vector<8x32xf32> to vector<1x8x1x32xf32>
    tpu.vector_store %arg7[%c0_1067, %c0_1068, %c13_1069, %c32_1070], %639 {strides = array<i32>} : memref<1x8x16x64xf32, #tpu.memory_space<vmem>>, vector<1x8x1x32xf32>,
    %c0_1071 = arith.constant 0 : index
    %c0_1072 = arith.constant 0 : index
    %c0_1073 = arith.constant 0 : index
    %c15_1074 = arith.constant 15 : index
    %c0_1075 = arith.constant 0 : index
    %640 = vector.load %arg3[%c0_1071, %c0_1072, %c0_1073, %c15_1074, %c0_1075] : memref<1x4x1x18x34xbf16, #tpu.memory_space<vmem>>, vector<1x4x1x1x32xbf16>
    %641 = vector.shape_cast %640 : vector<1x4x1x1x32xbf16> to vector<4x32xbf16>
    %c0_1076 = arith.constant 0 : index
    %c0_1077 = arith.constant 0 : index
    %c0_1078 = arith.constant 0 : index
    %c15_1079 = arith.constant 15 : index
    %c1_1080 = arith.constant 1 : index
    %642 = vector.load %arg3[%c0_1076, %c0_1077, %c0_1078, %c15_1079, %c1_1080] : memref<1x4x1x18x34xbf16, #tpu.memory_space<vmem>>, vector<1x4x1x1x32xbf16>
    %643 = vector.shape_cast %642 : vector<1x4x1x1x32xbf16> to vector<4x32xbf16>
    %c0_1081 = arith.constant 0 : index
    %c0_1082 = arith.constant 0 : index
    %c0_1083 = arith.constant 0 : index
    %c15_1084 = arith.constant 15 : index
    %c2_1085 = arith.constant 2 : index
    %644 = vector.load %arg3[%c0_1081, %c0_1082, %c0_1083, %c15_1084, %c2_1085] : memref<1x4x1x18x34xbf16, #tpu.memory_space<vmem>>, vector<1x4x1x1x32xbf16>
    %645 = vector.shape_cast %644 : vector<1x4x1x1x32xbf16> to vector<4x32xbf16>
    %c0_1086 = arith.constant 0 : index
    %c0_1087 = arith.constant 0 : index
    %c0_1088 = arith.constant 0 : index
    %c16_1089 = arith.constant 16 : index
    %c0_1090 = arith.constant 0 : index
    %646 = vector.load %arg3[%c0_1086, %c0_1087, %c0_1088, %c16_1089, %c0_1090] : memref<1x4x1x18x34xbf16, #tpu.memory_space<vmem>>, vector<1x4x1x1x32xbf16>
    %647 = vector.shape_cast %646 : vector<1x4x1x1x32xbf16> to vector<4x32xbf16>
    %c0_1091 = arith.constant 0 : index
    %c0_1092 = arith.constant 0 : index
    %c0_1093 = arith.constant 0 : index
    %c16_1094 = arith.constant 16 : index
    %c1_1095 = arith.constant 1 : index
    %648 = vector.load %arg3[%c0_1091, %c0_1092, %c0_1093, %c16_1094, %c1_1095] : memref<1x4x1x18x34xbf16, #tpu.memory_space<vmem>>, vector<1x4x1x1x32xbf16>
    %649 = vector.shape_cast %648 : vector<1x4x1x1x32xbf16> to vector<4x32xbf16>
    %c0_1096 = arith.constant 0 : index
    %c0_1097 = arith.constant 0 : index
    %c0_1098 = arith.constant 0 : index
    %c16_1099 = arith.constant 16 : index
    %c2_1100 = arith.constant 2 : index
    %650 = vector.load %arg3[%c0_1096, %c0_1097, %c0_1098, %c16_1099, %c2_1100] : memref<1x4x1x18x34xbf16, #tpu.memory_space<vmem>>, vector<1x4x1x1x32xbf16>
    %651 = vector.shape_cast %650 : vector<1x4x1x1x32xbf16> to vector<4x32xbf16>
    %652 = tpu.concatenate %641, %643, %645, %647, %649, %651 in 0 : vector<4x32xbf16>, vector<4x32xbf16>, vector<4x32xbf16>, vector<4x32xbf16>, vector<4x32xbf16>, vector<4x32xbf16> -> vector<24x32xbf16>
    %cst_1101 = arith.constant dense<0.000000e+00> : vector<8x32xf32>
    %653 = tpu.matmul %345, %652, %cst_1101 {dimension_numbers = #tpu.dot_dimension_numbers<[1], [0], [0], [1], [0, 0, 1, 1], [], []>} : vector<8x24xbf16>, vector<24x32xbf16>, vector<8x32xf32> -> vector<8x32xf32>
    %654 = arith.mulf %653, %2 : vector<8x32xf32>
    %655 = arith.addf %654, %5 : vector<8x32xf32>
    %cst_1102 = arith.constant 0.000000e+00 : f32
    %656 = vector.broadcast %cst_1102 : f32 to vector<8x32xf32>
    %657 = arith.maximumf %655, %656 : vector<8x32xf32>
    %c0_1103 = arith.constant 0 : index
    %c0_1104 = arith.constant 0 : index
    %c14_1105 = arith.constant 14 : index
    %c32_1106 = arith.constant 32 : index
    %658 = vector.load %arg7[%c0_1103, %c0_1104, %c14_1105, %c32_1106] : memref<1x8x16x64xf32, #tpu.memory_space<vmem>>, vector<1x8x1x32xf32>
    %659 = vector.shape_cast %658 : vector<1x8x1x32xf32> to vector<8x32xf32>
    %660 = vector.shape_cast %657 : vector<8x32xf32> to vector<1x8x1x32xf32>
    tpu.vector_store %arg7[%c0_1103, %c0_1104, %c14_1105, %c32_1106], %660 {strides = array<i32>} : memref<1x8x16x64xf32, #tpu.memory_space<vmem>>, vector<1x8x1x32xf32>,
    %c0_1107 = arith.constant 0 : index
    %c0_1108 = arith.constant 0 : index
    %c0_1109 = arith.constant 0 : index
    %c16_1110 = arith.constant 16 : index
    %c0_1111 = arith.constant 0 : index
    %661 = vector.load %arg3[%c0_1107, %c0_1108, %c0_1109, %c16_1110, %c0_1111] : memref<1x4x1x18x34xbf16, #tpu.memory_space<vmem>>, vector<1x4x1x1x32xbf16>
    %662 = vector.shape_cast %661 : vector<1x4x1x1x32xbf16> to vector<4x32xbf16>
    %c0_1112 = arith.constant 0 : index
    %c0_1113 = arith.constant 0 : index
    %c0_1114 = arith.constant 0 : index
    %c16_1115 = arith.constant 16 : index
    %c1_1116 = arith.constant 1 : index
    %663 = vector.load %arg3[%c0_1112, %c0_1113, %c0_1114, %c16_1115, %c1_1116] : memref<1x4x1x18x34xbf16, #tpu.memory_space<vmem>>, vector<1x4x1x1x32xbf16>
    %664 = vector.shape_cast %663 : vector<1x4x1x1x32xbf16> to vector<4x32xbf16>
    %c0_1117 = arith.constant 0 : index
    %c0_1118 = arith.constant 0 : index
    %c0_1119 = arith.constant 0 : index
    %c16_1120 = arith.constant 16 : index
    %c2_1121 = arith.constant 2 : index
    %665 = vector.load %arg3[%c0_1117, %c0_1118, %c0_1119, %c16_1120, %c2_1121] : memref<1x4x1x18x34xbf16, #tpu.memory_space<vmem>>, vector<1x4x1x1x32xbf16>
    %666 = vector.shape_cast %665 : vector<1x4x1x1x32xbf16> to vector<4x32xbf16>
    %c0_1122 = arith.constant 0 : index
    %c0_1123 = arith.constant 0 : index
    %c0_1124 = arith.constant 0 : index
    %c17 = arith.constant 17 : index
    %c0_1125 = arith.constant 0 : index
    %667 = vector.load %arg3[%c0_1122, %c0_1123, %c0_1124, %c17, %c0_1125] : memref<1x4x1x18x34xbf16, #tpu.memory_space<vmem>>, vector<1x4x1x1x32xbf16>
    %668 = vector.shape_cast %667 : vector<1x4x1x1x32xbf16> to vector<4x32xbf16>
    %c0_1126 = arith.constant 0 : index
    %c0_1127 = arith.constant 0 : index
    %c0_1128 = arith.constant 0 : index
    %c17_1129 = arith.constant 17 : index
    %c1_1130 = arith.constant 1 : index
    %669 = vector.load %arg3[%c0_1126, %c0_1127, %c0_1128, %c17_1129, %c1_1130] : memref<1x4x1x18x34xbf16, #tpu.memory_space<vmem>>, vector<1x4x1x1x32xbf16>
    %670 = vector.shape_cast %669 : vector<1x4x1x1x32xbf16> to vector<4x32xbf16>
    %c0_1131 = arith.constant 0 : index
    %c0_1132 = arith.constant 0 : index
    %c0_1133 = arith.constant 0 : index
    %c17_1134 = arith.constant 17 : index
    %c2_1135 = arith.constant 2 : index
    %671 = vector.load %arg3[%c0_1131, %c0_1132, %c0_1133, %c17_1134, %c2_1135] : memref<1x4x1x18x34xbf16, #tpu.memory_space<vmem>>, vector<1x4x1x1x32xbf16>
    %672 = vector.shape_cast %671 : vector<1x4x1x1x32xbf16> to vector<4x32xbf16>
    %673 = tpu.concatenate %662, %664, %666, %668, %670, %672 in 0 : vector<4x32xbf16>, vector<4x32xbf16>, vector<4x32xbf16>, vector<4x32xbf16>, vector<4x32xbf16>, vector<4x32xbf16> -> vector<24x32xbf16>
    %cst_1136 = arith.constant dense<0.000000e+00> : vector<8x32xf32>
    %674 = tpu.matmul %345, %673, %cst_1136 {dimension_numbers = #tpu.dot_dimension_numbers<[1], [0], [0], [1], [0, 0, 1, 1], [], []>} : vector<8x24xbf16>, vector<24x32xbf16>, vector<8x32xf32> -> vector<8x32xf32>
    %675 = arith.mulf %674, %2 : vector<8x32xf32>
    %676 = arith.addf %675, %5 : vector<8x32xf32>
    %cst_1137 = arith.constant 0.000000e+00 : f32
    %677 = vector.broadcast %cst_1137 : f32 to vector<8x32xf32>
    %678 = arith.maximumf %676, %677 : vector<8x32xf32>
    %c0_1138 = arith.constant 0 : index
    %c0_1139 = arith.constant 0 : index
    %c15_1140 = arith.constant 15 : index
    %c32_1141 = arith.constant 32 : index
    %679 = vector.load %arg7[%c0_1138, %c0_1139, %c15_1140, %c32_1141] : memref<1x8x16x64xf32, #tpu.memory_space<vmem>>, vector<1x8x1x32xf32>
    %680 = vector.shape_cast %679 : vector<1x8x1x32xf32> to vector<8x32xf32>
    %681 = vector.shape_cast %678 : vector<8x32xf32> to vector<1x8x1x32xf32>
    tpu.vector_store %arg7[%c0_1138, %c0_1139, %c15_1140, %c32_1141], %681 {strides = array<i32>} : memref<1x8x16x64xf32, #tpu.memory_space<vmem>>, vector<1x8x1x32xf32>,
    return
  }
  func.func @transform_0(%arg0: i32, %arg1: i32, %arg2: i32) -> (i32, i32, i32, i32, i32) {
    %c0_i32 = arith.constant 0 : i32
    %c0_i32_0 = arith.constant 0 : i32
    %c0_i32_1 = arith.constant 0 : i32
    %c0_i32_2 = arith.constant 0 : i32
    return %arg0, %c0_i32, %arg1, %c0_i32_0, %c0_i32_1 : i32, i32, i32, i32, i32
  }
  func.func @transform_1(%arg0: i32, %arg1: i32, %arg2: i32) -> (i32, i32, i32) {
    %c0_i32 = arith.constant 0 : i32
    %c0_i32_0 = arith.constant 0 : i32
    %c0_i32_1 = arith.constant 0 : i32
    return %c0_i32, %arg2, %c0_i32_0 : i32, i32, i32
  }
  func.func @transform_2(%arg0: i32, %arg1: i32, %arg2: i32) -> (i32, i32) {
    %c0_i32 = arith.constant 0 : i32
    %c0_i32_0 = arith.constant 0 : i32
    return %arg2, %c0_i32 : i32, i32
  }
  func.func @transform_3(%arg0: i32, %arg1: i32, %arg2: i32) -> (i32, i32) {
    %c0_i32 = arith.constant 0 : i32
    %c0_i32_0 = arith.constant 0 : i32
    return %arg2, %c0_i32 : i32, i32
  }
  func.func @transform_4(%arg0: i32, %arg1: i32, %arg2: i32) -> (i32, i32, i32, i32) {
    %c0_i32 = arith.constant 0 : i32
    %c0_i32_0 = arith.constant 0 : i32
    return %arg0, %arg2, %arg1, %c0_i32 : i32, i32, i32, i32
  }
}

</mosaic_0001>

<bundles_post_ra>
// kernel: tpu_custom_call.1
= control target key start
LH: loop header
LB: loop body
LE: loop exit
PB: predicated region body
PF: predicated region fallthrough
CT: control target
= control target key end

     0   :  { %9 = vsyncpa [#allocation3], 0  ;;  %s11620_s0 = inlined_call_operand.vmem [shape: bf16[2,4,1,18,34], index: 0, kind: input, shape index: {}]   ;;  %s11621_s1 = inlined_call_operand.vmem [shape: bf16[2,8,24], index: 1, kind: input, shape index: {}]   ;;  %s11622_s2 = inlined_call_operand.vmem [shape: f32[8,1], index: 2, kind: input, shape index: {}]   ;;  %s11623_s3 = inlined_call_operand.vmem [shape: f32[8,1], index: 3, kind: input, shape index: {}]   ;;  %s11624_s4 = inlined_call_operand.hbm [shape: f32[2,8,16,64], index: 4, kind: output, shape index: {}]  }
   0x1   :  { %11 = vsyncpa [#allocation3 + $0x1], 0  ;;  %s8386_s15 = smov 0   ;;  %s8388_s16 = smov 0  }
   0x2   :  { %s8390_s17 = smov 0   ;;  %s8392_s18 = smov 0  }
   0x3   :  { %s8394_s19 = smov 0   ;;  %s8396_s20 = smov 0  }
   0x4 LB: > { %s7407_s21 = sadd.s32 4294967295, %s8349_s20   ;;  %s7408_s22 = sadd.s32 4294967294, %s8349_s20   ;;  %s8349_s20 = sphi %s8396_s20, %s17_s20   ;;  %s8345_s19 = sphi %s8394_s19, %s11673_s19   ;;  %s8341_s18 = sphi %s8392_s18, %s11672_s18   ;;  %s8337_s17 = sphi %s8390_s17, %s11671_s17   ;;  %s8333_s16 = sphi %s8388_s16, %s11670_s16   ;;  %s8329_s15 = sphi %s8386_s15, %s11669_s15  }
   0x5   : > { %s36_s23 = sadd.s32 1, %s8345_s19  ;;  %s153_s24 = sadd.s32 1, %s8337_s17 }
   0x6   : > { %p38_p0 = scmp.ge.s32.totalorder %s36_s23, 2  ;;  %p163_p1 = scmp.ne.s32.totalorder %s8337_s17, %s8333_s16 }
   0x7   : > { %p164_p2 = scmp.eq.s32.totalorder %s7407_s21, 1  ;;  %p169_p3 = scmp.ne.s32.totalorder %s8333_s16, %s8329_s15 }
   0x8   : > { %s11675_s23 = smov (%p38_p0, %s36_s23), 0  ;;  %p170_p5 = scmp.eq.s32.totalorder %s7408_s22, 1 }
   0x9   : > { %p8426_p4 = por %p164_p2, %p163_p1  ;;  %s146_s26 = ssub.s32 %s8345_s19, %s11675_s23 }
   0xa   : > { %p7414_p6 = scmp.ge.s32.totalorder %s8349_s20, 1  ;;  %p151_p7 = scmp.eq.s32.totalorder %s146_s26, 0 }
   0xb   : > { %p8433_p8 = por %p170_p5, %p169_p3  ;;  %p221_p9 = scmp.lt.s32.totalorder %s8349_s20, 3 }
   0xc   : > { %s8439_s28 = scalar_select %p151_p7, %s8337_s17, %s153_s24  }
   0xd   : > { %p222_p10 = pnand %p7414_p6, %p221_p9 }
   0xf   : > { %225 = sbr.rel (%p222_p10) target bundleno = 962 (0x3c2), region = 36 }
  0x16   : > { %v287_v0 = vld [vmem:[%s11622_s2] sm:$0xff]  ;;  %p263_p11 = scmp.lt.s32.totalorder %s8341_s18, 1  ;;  %v8351_v1 = vmov 0   ;;  %vm332_vm0 = vcmask 1045509   ;;  %vm335_vm1 = vcmask 1046534   ;;  %vm338_vm2 = vcmask 1047559  }
  0x17   : > { %8065 = vset.pattern.permute.xlu0 %v8351_v1  ;;  %v293_v2 = vld [vmem:[%s11623_s3] sm:$0xff]  ;;  %vm321_vm3 = vcmask 1041409   ;;  %vm324_vm4 = vcmask 1042434   ;;  %vm327_vm5 = vcmask 1043459   ;;  %s8352_s12 = smov 127   ;;  %s8353_s13 = smov 126  }
  0x18   : > { %290 = vperm.xlu0 %8065, %v287_v0   ;;  %s264_s5 = scalar_select %p263_p11, %s8341_s18, 1  ;;  %vm375_vm6 = vcmask 1041408   ;;  %vm379_vm7 = vcmask 1043456   ;;  %vm382_vm8 = vcmask 1045504   ;;  %vm8355_vm9 = vmmov 0  }
  0x19   : > { %vm389_vm10 = vcmask 195584   ;;  %s260_s30 = sand.u32 1, %s8333_s16   ;;  %vm496_vm11 = vcmask 253952   ;;  %s8357_s7 = smov 32   ;;  %vm3643_vm12 = vcmask 516352  }
  0x1a   : > { %s8000_s8 = smul.u32 48, %s264_s5  ;;  %s7415_s5 = sshll.u32 %s260_s30, 7 }
  0x1b   : > { %s10417_s6 = scalar_lea.vmem [#allocation2], %s7415_s5  ;;  %s8358_s14 = smov [#allocation2]  }
  0x1c   : > { %296 = vperm.xlu0 %8065, %v293_v2   ;;  %s8452_s11 = scalar_lea.vmem %s11620_s0, %s8000_s8  ;;  %s7647_s8 = sshll.u32 %s8341_s18, 11 }
  0x1d   : > { %v8066_v3 = vld [vmem:[%s8452_s11] ss:$0 sps:$4 sm:$0x11]   ;;  %v8067_v4 = vld [vmem:[%s8452_s11 + $0xc] ss:$0 sps:$4 sm:$0x11]  }
  0x1e   : > { %v8068_v5 = vld [vmem:[%s8452_s11 + $0x18] ss:$0 sps:$4 sm:$0x11]   ;;  %v8069_v6 = vld [vmem:[%s8452_s11 + $0x24] ss:$0 sps:$4 sm:$0x11]   ;;  %v8458_v7 = vunpack.c.l.b16 %v8066_v3  ;;  %v343_v8 = vunpack.c.h.b16 %v8066_v3  ;;  %v8460_v9 = vunpack.c.l.b16 %v8067_v4  ;;  %v344_v11 = vunpack.c.h.b16 %v8067_v4 }
  0x1f   : > { %v8462_v10 = vunpack.c.l.b16 %v8068_v5  ;;  %v345_v12 = vunpack.c.h.b16 %v8068_v5  ;;  %v8464_v13 = vunpack.c.l.b16 %v8069_v6  ;;  %v346_v15 = vunpack.c.h.b16 %v8069_v6  ;;  %v8070_v21 = vld [vmem:[%s8452_s11] ss:$0 sps:$4 sm:$0x11]   ;;  %v8071_v26 = vld [vmem:[%s8452_s11 + $0xc] ss:$0 sps:$4 sm:$0x11]  }
  0x20   : > { %v330_v14 = vrot.slane %v8458_v7, 4  ;;  %v364_v16 = vrot.slane %v8458_v7, 1  ;;  %v331_v17 = vrot.slane %v8460_v9, 3  ;;  %v347_v19 = vrot.slane %v344_v11, 7  ;;  %s7275_s9 = sshll.u32 %s10417_s6, 4  ;;  %s11574_s18 = scalar_lea.sflag [#allocation3], %s260_s30  ;;  %s11566_s9 = int_to_ptr.vmem [resolvable:$true] %s7275_s9 }
  0x21   : > { %v334_v18 = vrot.slane %v8462_v10, 2  ;;  %v349_v20 = vrot.slane %v345_v12, 6  ;;  %v337_v22 = vrot.slane %v8464_v13, 1  ;;  %v351_v23 = vrot.slane %v346_v15, 5  ;;  %s8275_s21 = sshll.u32 %s8358_s14, 4  ;;  %s8276_s21 = int_to_ptr.vmem [resolvable:$false] %s8275_s21 }
  0x22   : > { %v365_v24 = vsel %vm321_vm3, %v8460_v9, %v364_v16  ;;  %v366_v25 = vrot.slane %v8462_v10, 7  ;;  %v333_v27 = vsel %vm332_vm0, %v331_v17, %v330_v14  ;;  %v348_v28 = vsel %vm321_vm3, %v347_v19, %v343_v8  ;;  %v8072_v31 = vld [vmem:[%s8452_s11 + $0x18] ss:$0 sps:$4 sm:$0x11]   ;;  %s8277_s22 = scalar_lea.vmem %s8276_s21, 4096  ;;  %p8278_p1 = scmp.lt.s32.totalorder %s11566_s9, %s8276_s21 }
  0x23   : > { %v368_v29 = vrot.slane %v8464_v13, 6  ;;  %v356_v30 = vrot.slane %v8458_v7, 5  ;;  %v336_v32 = vsel %vm335_vm1, %v334_v18, %v333_v27  ;;  %v350_v33 = vsel %vm324_vm4, %v349_v20, %v348_v28  ;;  %v8073_v36 = vld [vmem:[%s8452_s11 + $0x24] ss:$0 sps:$4 sm:$0x11]  }
  0x24   : > { %v367_v34 = vsel %vm324_vm4, %v366_v25, %v365_v24  ;;  %v357_v35 = vrot.slane %v8460_v9, 4  ;;  %v339_v37 = vsel %vm338_vm2, %v337_v22, %v336_v32  ;;  %v352_v38 = vsel %vm327_vm5, %v351_v23, %v350_v33  ;;  %v8074_v45 = vld [vmem:[%s8452_s11] ss:$0 sps:$4 sm:$0x22]  }
  0x25   : > { %v369_v39 = vsel %vm327_vm5, %v368_v29, %v367_v34  ;;  %v359_v40 = vrot.slane %v8462_v10, 3  ;;  %v340_v41 = vpack.c.b16 %v339_v37, %v339_v37  ;;  %v353_v42 = vpack.c.b16 %v352_v38, %v352_v38  ;;  %v8075_v46 = vld [vmem:[%s8452_s11 + $0xc] ss:$0 sps:$4 sm:$0x22]  }
  0x26   : > { %v370_v43 = vpack.c.b16 %v369_v39, %v369_v39  ;;  %v358_v44 = vsel %vm332_vm0, %v357_v35, %v356_v30  ;;  %v361_v48 = vrot.slane %v8464_v13, 2  ;;  %v525_v49 = vunpack.c.l.b16 %v8070_v21  ;;  %v8076_v51 = vld [vmem:[%s8452_s11 + $0x18] ss:$0 sps:$4 sm:$0x22]  }
  0x27   : > { %v360_v47 = vsel %vm335_vm1, %v359_v40, %v358_v44  ;;  %v526_v50 = vunpack.c.l.b16 %v8071_v26  ;;  %341 = vrot.lane.b32.xlu1 %v340_v41, %s8352_s12  ;;  %v527_v52 = vunpack.c.l.b16 %v8072_v31  ;;  %v528_v53 = vunpack.c.l.b16 %v8073_v36  ;;  %v8077_v54 = vld [vmem:[%s8452_s11 + $0x24] ss:$0 sps:$4 sm:$0x22]   ;;  %v8078_v5 = vld [vmem:[%s8452_s11] ss:$0 sps:$4 sm:$0x22]  }
  0x28   : > { %371 = vrot.lane.b32.xlu0 %v370_v43, %s8352_s12  ;;  %v560_v55 = vunpack.c.l.b16 %v8074_v45  ;;  %v561_v56 = vunpack.c.l.b16 %v8075_v46  ;;  %v362_v57 = vsel %vm338_vm2, %v361_v48, %v360_v47  ;;  %v536_v58 = vrot.slane %v525_v49, 5  ;;  %v8079_v14 = vld [vmem:[%s8452_s11 + $0xc] ss:$0 sps:$4 sm:$0x22]  }
  0x29   : > { %v537_v59 = vrot.slane %v526_v50, 4  ;;  %v529_v60 = vrot.slane %v525_v49, 1  ;;  %v8500_v61 = vpack.c.b16 %v362_v57, %v362_v57  ;;  %v539_v62 = vrot.slane %v527_v52, 3  ;;  %v8080_v19 = vld [vmem:[%s8452_s11 + $0x18] ss:$0 sps:$4 sm:$0x22]  }
  0x2a   : > { %v541_v63 = vrot.slane %v528_v53, 2  ;;  %v531_v0 = vrot.slane %v527_v52, 7  ;;  %v533_v3 = vrot.slane %v528_v53, 6  ;;  %v562_v4 = vunpack.c.l.b16 %v8076_v51  ;;  %v8081_v24 = vld [vmem:[%s8452_s11 + $0x24] ss:$0 sps:$4 sm:$0x22]  }
  0x2b   : > { %v538_v1 = vsel %vm332_vm0, %v537_v59, %v536_v58  ;;  %v530_v2 = vsel %vm321_vm3, %v526_v50, %v529_v60  ;;  %354 = vrot.lane.b32.xlu1 %v353_v42, %s8353_s13  ;;  %v563_v11 = vunpack.c.l.b16 %v8077_v54  ;;  %v572_v12 = vrot.slane %v560_v55, 2  ;;  %v8082_v45 = vld [vmem:[%s8452_s11] ss:$0 sps:$4 sm:$0x22]  }
  0x2c   : > { %v540_v6 = vsel %vm335_vm1, %v539_v62, %v538_v1  ;;  %v532_v8 = vsel %vm324_vm4, %v531_v0, %v530_v2  ;;  %v573_v17 = vrot.slane %v561_v56, 1  ;;  %v564_v18 = vrot.slane %v560_v55, 6  ;;  %v8083_v46 = vld [vmem:[%s8452_s11 + $0xc] ss:$0 sps:$4 sm:$0x22]  }
  0x2d   : > { %v542_v15 = vsel %vm338_vm2, %v541_v63, %v540_v6  ;;  %v534_v16 = vsel %vm327_vm5, %v533_v3, %v532_v8  ;;  %v576_v22 = vrot.slane %v563_v11, 7  ;;  %v565_v23 = vrot.slane %v561_v56, 5  ;;  %v8084_v51 = vld [vmem:[%s8452_s11 + $0x18] ss:$0 sps:$4 sm:$0x22]  }
  0x2e   : > { %v543_v20 = vpack.c.b16 %v542_v15, %v542_v15  ;;  %v8512_v21 = vpack.c.b16 %v534_v16, %v534_v16  ;;  %v574_v25 = vsel %vm321_vm3, %v573_v17, %v572_v12  ;;  %v567_v26 = vrot.slane %v562_v4, 4  ;;  %v8085_v52 = vld [vmem:[%s8452_s11 + $0x24] ss:$0 sps:$4 sm:$0x22]  }
  0x2f   : > { %v569_v27 = vrot.slane %v563_v11, 3  ;;  %v721_v28 = vunpack.c.l.b16 %v8078_v5  ;;  %373 = vrot.lane.b32.xlu1 %v8500_v61, %s8353_s13  ;;  %v575_v29 = vsel %vm324_vm4, %v562_v4, %v574_v25  ;;  %v566_v30 = vsel %vm332_vm0, %v565_v23, %v564_v18  ;;  %v8086_v62 = vld [vmem:[%s8452_s11] ss:$0 sps:$4 sm:$0x44]  }
  0x30   : > { %544 = vrot.lane.b32.xlu0 %v543_v20, %s8352_s12  ;;  %v722_v31 = vunpack.c.l.b16 %v8079_v14  ;;  %v723_v32 = vunpack.c.l.b16 %v8080_v19  ;;  %v577_v33 = vsel %vm327_vm5, %v576_v22, %v575_v29  ;;  %v568_v34 = vsel %vm335_vm1, %v567_v26, %v566_v30  ;;  %v8087_v8 = vld [vmem:[%s8452_s11 + $0xc] ss:$0 sps:$4 sm:$0x44]   ;;  %v8088_v16 = vld [vmem:[%s8452_s11 + $0x18] ss:$0 sps:$4 sm:$0x44]  }
  0x31   : > { %v724_v35 = vunpack.c.l.b16 %v8081_v24  ;;  %v732_v36 = vrot.slane %v721_v28, 6  ;;  %v578_v37 = vpack.c.b16 %v577_v33, %v577_v33  ;;  %v570_v38 = vsel %vm338_vm2, %v569_v27, %v568_v34  ;;  %v8089_v17 = vld [vmem:[%s8452_s11 + $0x24] ss:$0 sps:$4 sm:$0x44]  }
  0x32   : > { %v733_v39 = vrot.slane %v722_v31, 5  ;;  %v735_v40 = vrot.slane %v723_v32, 4  ;;  %v8524_v41 = vpack.c.b16 %v570_v38, %v570_v38  ;;  %v725_v43 = vrot.slane %v721_v28, 2  ;;  %v8090_v23 = vld [vmem:[%s8452_s11] ss:$0 sps:$4 sm:$0x44]  }
  0x33   : > { %v737_v42 = vrot.slane %v724_v35, 3  ;;  %v726_v44 = vrot.slane %v722_v31, 1  ;;  %546 = vrot.lane.b32.xlu1 %v8512_v21, %s8353_s13  ;;  %v729_v48 = vrot.slane %v724_v35, 7  ;;  %v752_v49 = vrot.slane %v721_v28, 3 }
  0x34   : > { %579 = vrot.lane.b32.xlu0 %v578_v37, %s8352_s12  ;;  %v734_v47 = vsel %vm332_vm0, %v733_v39, %v732_v36  ;;  %v753_v50 = vrot.slane %v722_v31, 2  ;;  %v755_v55 = vrot.slane %v723_v32, 1  ;;  %v744_v56 = vrot.slane %v721_v28, 7 }
  0x35   : > { %v736_v53 = vsel %vm335_vm1, %v735_v40, %v734_v47  ;;  %v727_v54 = vsel %vm321_vm3, %v726_v44, %v725_v43  ;;  %v745_v60 = vrot.slane %v722_v31, 6  ;;  %v747_v2 = vrot.slane %v723_v32, 5  ;;  %v8092_v40 = vld [vmem:[%s8452_s11 + $0x18] ss:$0 sps:$4 sm:$0x44]  }
  0x36   : > { %v738_v57 = vsel %vm338_vm2, %v737_v42, %v736_v53  ;;  %v728_v58 = vsel %vm324_vm4, %v723_v32, %v727_v54  ;;  %v754_v59 = vsel %vm321_vm3, %v753_v50, %v752_v49  ;;  %v749_v6 = vrot.slane %v724_v35, 4  ;;  %v8091_v32 = vld [vmem:[%s8452_s11 + $0xc] ss:$0 sps:$4 sm:$0x44]  }
  0x37   : > { %v739_v63 = vpack.c.b16 %v738_v57, %v738_v57  ;;  %v730_v0 = vsel %vm327_vm5, %v729_v48, %v728_v58  ;;  %v756_v1 = vsel %vm324_vm4, %v755_v55, %v754_v59  ;;  %581 = vrot.lane.b32.xlu1 %v8524_v41, %s8353_s13  ;;  %v746_v5 = vsel %vm332_vm0, %v745_v60, %v744_v56  ;;  %v8093_v47 = vld [vmem:[%s8452_s11 + $0x24] ss:$0 sps:$4 sm:$0x44]  }
  0x38   : > { %v8544_v3 = vpack.c.b16 %v730_v0, %v730_v0  ;;  %v757_v4 = vsel %vm327_vm5, %v724_v35, %v756_v1  ;;  %v748_v12 = vsel %vm335_vm1, %v747_v2, %v746_v5  ;;  %v905_v14 = vunpack.c.l.b16 %v8082_v45 }
  0x39   : > { %740 = vrot.lane.b32.xlu0 %v739_v63, %s8352_s12  ;;  %v758_v11 = vpack.c.b16 %v757_v4, %v757_v4  ;;  %v906_v15 = vunpack.c.l.b16 %v8083_v46  ;;  %v750_v18 = vsel %vm338_vm2, %v749_v6, %v748_v12  ;;  %v907_v19 = vunpack.c.l.b16 %v8084_v51 }
  0x3a   : > { %v908_v20 = vunpack.c.l.b16 %v8085_v52  ;;  %v951_v22 = vunpack.c.l.b16 %v8086_v62  ;;  %v8555_v24 = vpack.c.b16 %v750_v18, %v750_v18  ;;  %v916_v25 = vrot.slane %v905_v14, 7 }
  0x3b   : > { %v917_v26 = vrot.slane %v906_v15, 6  ;;  %v909_v27 = vrot.slane %v905_v14, 3  ;;  %742 = vrot.lane.b32.xlu1 %v8544_v3, %s8353_s13  ;;  %v919_v28 = vrot.slane %v907_v19, 5  ;;  %v910_v30 = vrot.slane %v906_v15, 2 }
  0x3c   : > { %v921_v29 = vrot.slane %v908_v20, 4  ;;  %v912_v31 = vrot.slane %v907_v19, 1  ;;  %v952_v34 = vunpack.c.l.b16 %v8087_v8  ;;  %v953_v35 = vunpack.c.l.b16 %v8088_v16  ;;  %v8094_v14 = vld [vmem:[%s8452_s11] ss:$0 sps:$4 sm:$0x44]  }
  0x3d   : > { %759 = vrot.lane.b32.xlu0 %v758_v11, %s8352_s12  ;;  %v918_v33 = vsel %vm332_vm0, %v917_v26, %v916_v25  ;;  %v954_v36 = vunpack.c.l.b16 %v8089_v17  ;;  %v911_v38 = vsel %vm321_vm3, %v910_v30, %v909_v27  ;;  %v955_v39 = vrot.slane %v951_v22, 4  ;;  %v8095_v15 = vld [vmem:[%s8452_s11 + $0xc] ss:$0 sps:$4 sm:$0x44]  }
  0x3e   : > { %v920_v37 = vsel %vm335_vm1, %v919_v28, %v918_v33  ;;  %v1112_v42 = vunpack.c.l.b16 %v8090_v23  ;;  %v913_v44 = vsel %vm324_vm4, %v912_v31, %v911_v38  ;;  %v956_v45 = vrot.slane %v952_v34, 3 }
  0x3f   : > { %v922_v43 = vsel %vm338_vm2, %v921_v29, %v920_v37  ;;  %v958_v46 = vrot.slane %v953_v35, 2  ;;  %761 = vrot.lane.b32.xlu1 %v8555_v24, %s8353_s13  ;;  %v914_v49 = vsel %vm327_vm5, %v908_v20, %v913_v44  ;;  %v960_v50 = vrot.slane %v954_v36, 1  ;;  %v8096_v20 = vld [vmem:[%s8452_s11 + $0x18] ss:$0 sps:$4 sm:$0x44]  }
  0x40   : > { %v923_v48 = vpack.c.b16 %v922_v43, %v922_v43  ;;  %v965_v51 = vrot.slane %v952_v34, 7  ;;  %v8571_v52 = vpack.c.b16 %v914_v49, %v914_v49  ;;  %v957_v53 = vsel %vm321_vm3, %v956_v45, %v955_v39  ;;  %v8099_v43 = vld [vmem:[%s8452_s11 + $0xc] ss:$0 sps:$4 sm:$0x88]  }
  0x41   : > { %v967_v54 = vrot.slane %v953_v35, 6  ;;  %v969_v55 = vrot.slane %v954_v36, 5  ;;  %v959_v56 = vsel %vm324_vm4, %v958_v46, %v957_v53  ;;  %v1113_v58 = vunpack.c.l.b16 %v8091_v32  ;;  %v8098_v32 = vld [vmem:[%s8452_s11] ss:$0 sps:$4 sm:$0x88]  }
  0x42   : > { %924 = vrot.lane.b32.xlu0 %v923_v48, %s8352_s12  ;;  %v966_v57 = vsel %vm332_vm0, %v965_v51, %v951_v22  ;;  %v1114_v59 = vunpack.c.l.b16 %v8092_v40  ;;  %v961_v60 = vsel %vm327_vm5, %v960_v50, %v959_v56  ;;  %v1115_v63 = vunpack.c.l.b16 %v8093_v47  ;;  %v8097_v22 = vld [vmem:[%s8452_s11 + $0x24] ss:$0 sps:$4 sm:$0x44]   ;;  %v8100_v47 = vld [vmem:[%s8452_s11 + $0x18] ss:$0 sps:$4 sm:$0x88]  }
  0x43   : > { %v968_v62 = vsel %vm335_vm1, %v967_v54, %v966_v57  ;;  %v1116_v0 = vrot.slane %v1112_v42, 4  ;;  %926 = vrot.lane.b32.xlu1 %v8571_v52, %s8353_s13  ;;  %v962_v1 = vpack.c.b16 %v961_v60, %v961_v60  ;;  %v1124_v4 = vrot.slane %v1113_v58, 7  ;;  %v8101_v51 = vld [vmem:[%s8452_s11 + $0x24] ss:$0 sps:$4 sm:$0x88]  }
  0x44   : > { %v970_v2 = vsel %vm338_vm2, %v969_v55, %v968_v62  ;;  %v1126_v5 = vrot.slane %v1114_v59, 6  ;;  %v1128_v8 = vrot.slane %v1115_v63, 5  ;;  %v1117_v11 = vrot.slane %v1113_v58, 3 }
  0x45   : > { %v971_v6 = vpack.c.b16 %v970_v2, %v970_v2  ;;  %v1119_v12 = vrot.slane %v1114_v59, 2  ;;  %v1125_v16 = vsel %vm332_vm0, %v1124_v4, %v1112_v42  ;;  %v1121_v17 = vrot.slane %v1115_v63, 1 }
  0x46   : > { %963 = vrot.lane.b32.xlu0 %v962_v1, %s8352_s12  ;;  %v1142_v18 = vrot.slane %v1112_v42, 5  ;;  %v1143_v19 = vrot.slane %v1113_v58, 4  ;;  %v1127_v23 = vsel %vm335_vm1, %v1126_v5, %v1125_v16  ;;  %v1118_v25 = vsel %vm321_vm3, %v1117_v11, %v1116_v0  ;;  %v8103_v0 = vld [vmem:[%s8452_s11 + $0xc] ss:$0 sps:$4 sm:$0x88]  }
  0x47   : > { %v1145_v26 = vrot.slane %v1114_v59, 3  ;;  %v1147_v27 = vrot.slane %v1115_v63, 2  ;;  %972 = vrot.lane.b32.xlu1 %v971_v6, %s8353_s13  ;;  %v1129_v28 = vsel %vm338_vm2, %v1128_v8, %v1127_v23  ;;  %v1120_v29 = vsel %vm324_vm4, %v1119_v12, %v1118_v25  ;;  %v8104_v6 = vld [vmem:[%s8452_s11 + $0x18] ss:$0 sps:$4 sm:$0x88]  }
  0x48   : > { %v1144_v30 = vsel %vm321_vm3, %v1143_v19, %v1142_v18  ;;  %v1135_v31 = vrot.slane %v1112_v42, 1  ;;  %v1130_v33 = vpack.c.b16 %v1129_v28, %v1129_v28  ;;  %v1122_v34 = vsel %vm327_vm5, %v1121_v17, %v1120_v29  ;;  %v8105_v8 = vld [vmem:[%s8452_s11 + $0x24] ss:$0 sps:$4 sm:$0x88]  }
  0x49   : > { %v1146_v35 = vsel %vm324_vm4, %v1145_v26, %v1144_v30  ;;  %v1137_v36 = vrot.slane %v1114_v59, 7  ;;  %v8597_v37 = vpack.c.b16 %v1122_v34, %v1122_v34  ;;  %v1139_v40 = vrot.slane %v1115_v63, 6 }
  0x4a   : > { %v1148_v38 = vsel %vm327_vm5, %v1147_v27, %v1146_v35  ;;  %v1136_v39 = vsel %vm332_vm0, %v1113_v58, %v1135_v31  ;;  %1131 = vrot.lane.b32.xlu0 %v1130_v33, %s8352_s12  ;;  %v1296_v45 = vunpack.c.l.b16 %v8094_v14  ;;  %v1297_v46 = vunpack.c.l.b16 %v8095_v15  ;;  %v8102_v58 = vld [vmem:[%s8452_s11] ss:$0 sps:$4 sm:$0x88]  }
  0x4b   : > { %v1149_v42 = vpack.c.b16 %v1148_v38, %v1148_v38  ;;  %v1138_v44 = vsel %vm335_vm1, %v1137_v36, %v1136_v39  ;;  %1133 = vrot.lane.b32.xlu1 %v8597_v37, %s8353_s13  ;;  %v1298_v49 = vunpack.c.l.b16 %v8096_v20  ;;  %v1299_v50 = vunpack.c.l.b16 %v8097_v22 }
  0x4c   : > { %v1140_v48 = vsel %vm338_vm2, %v1139_v40, %v1138_v44  ;;  %v1331_v53 = vunpack.c.l.b16 %v8098_v32  ;;  %v1308_v55 = vrot.slane %v1296_v45, 1  ;;  %v1300_v56 = vrot.slane %v1296_v45, 5 }
  0x4d   : > { %v8609_v54 = vpack.c.b16 %v1140_v48, %v1140_v48  ;;  %v1301_v57 = vrot.slane %v1297_v46, 4  ;;  %v1310_v59 = vrot.slane %v1298_v49, 7  ;;  %v1312_v60 = vrot.slane %v1299_v50, 6  ;;  %v8106_v48 = vld [vmem:[%s8452_s11] ss:$0 sps:$4 sm:$0x88]  }
  0x4e   : > { %v1303_v62 = vrot.slane %v1298_v49, 3  ;;  %v1305_v63 = vrot.slane %v1299_v50, 2  ;;  %1150 = vrot.lane.b32.xlu0 %v1149_v42, %s8352_s12  ;;  %v1309_v1 = vsel %vm332_vm0, %v1297_v46, %v1308_v55  ;;  %v1332_v4 = vunpack.c.l.b16 %v8099_v43  ;;  %v8107_v55 = vld [vmem:[%s8452_s11 + $0xc] ss:$0 sps:$4 sm:$0x88]  }
  0x4f   : > { %v1302_v2 = vsel %vm321_vm3, %v1301_v57, %v1300_v56  ;;  %v1333_v5 = vunpack.c.l.b16 %v8100_v47  ;;  %1152 = vrot.lane.b32.xlu1 %v8609_v54, %s8353_s13  ;;  %v1311_v11 = vsel %vm335_vm1, %v1310_v59, %v1309_v1  ;;  %v1334_v14 = vunpack.c.l.b16 %v8101_v51 }
  0x50   : > { %v1304_v12 = vsel %vm324_vm4, %v1303_v62, %v1302_v2  ;;  %v1342_v15 = vrot.slane %v1331_v53, 6  ;;  %v1313_v16 = vsel %vm338_vm2, %v1312_v60, %v1311_v11  ;;  %v1343_v18 = vrot.slane %v1332_v4, 5  ;;  %v8108_v60 = vld [vmem:[%s8452_s11 + $0x18] ss:$0 sps:$4 sm:$0x88]  }
  0x51   : > { %v1306_v17 = vsel %vm327_vm5, %v1305_v63, %v1304_v12  ;;  %v1345_v19 = vrot.slane %v1333_v5, 4  ;;  %v1314_v20 = vpack.c.b16 %v1313_v16, %v1313_v16  ;;  %v1347_v23 = vrot.slane %v1334_v14, 3  ;;  %v8109_v2 = vld [vmem:[%s8452_s11 + $0x24] ss:$0 sps:$4 sm:$0x88]  }
  0x52   : > { %v8624_v22 = vpack.c.b16 %v1306_v17, %v1306_v17  ;;  %v1335_v25 = vrot.slane %v1331_v53, 2  ;;  %v1344_v26 = vsel %vm321_vm3, %v1343_v18, %v1342_v15  ;;  %v1336_v27 = vrot.slane %v1332_v4, 1  ;;  %v8110_v16 = vld [vmem:[%s8452_s11 + $0x4] ss:$0 sps:$4 sm:$0x11]  }
  0x53   : > { %v1339_v28 = vrot.slane %v1334_v14, 7  ;;  %v1492_v29 = vunpack.c.l.b16 %v8102_v58  ;;  %1315 = vrot.lane.b32.xlu0 %v1314_v20, %s8352_s12  ;;  %v1346_v30 = vsel %vm324_vm4, %v1345_v19, %v1344_v26  ;;  %v1493_v31 = vunpack.c.l.b16 %v8103_v0 }
  0x54   : > { %1317 = vrot.lane.b32.xlu1 %v8624_v22, %s8353_s13  ;;  %v1494_v32 = vunpack.c.l.b16 %v8104_v6  ;;  %v1495_v33 = vunpack.c.l.b16 %v8105_v8  ;;  %v1348_v34 = vsel %vm327_vm5, %v1347_v23, %v1346_v30  ;;  %v1337_v35 = vsel %vm332_vm0, %v1336_v27, %v1335_v25  ;;  %v8111_v23 = vld [vmem:[%s8452_s11 + $0x10] ss:$0 sps:$4 sm:$0x11]   ;;  %v8112_v25 = vld [vmem:[%s8452_s11 + $0x1c] ss:$0 sps:$4 sm:$0x11]  }
  0x55   : > { %v1504_v36 = vrot.slane %v1492_v29, 2  ;;  %v1496_v38 = vrot.slane %v1492_v29, 6  ;;  %v1349_v39 = vpack.c.b16 %v1348_v34, %v1348_v34  ;;  %v1338_v40 = vsel %vm335_vm1, %v1333_v5, %v1337_v35  ;;  %v8113_v30 = vld [vmem:[%s8452_s11 + $0x28] ss:$0 sps:$4 sm:$0x11]  }
  0x56   : > { %v1505_v43 = vrot.slane %v1493_v31, 1  ;;  %v1508_v42 = vrot.slane %v1495_v33, 7  ;;  %v1340_v44 = vsel %vm338_vm2, %v1339_v28, %v1338_v40  ;;  %v1497_v45 = vrot.slane %v1493_v31, 5 }
  0x57   : > { %v1499_v46 = vrot.slane %v1494_v32, 4  ;;  %v1501_v47 = vrot.slane %v1495_v33, 3  ;;  %1350 = vrot.lane.b32.xlu0 %v1349_v39, %s8352_s12  ;;  %v8637_v49 = vpack.c.b16 %v1340_v44, %v1340_v44  ;;  %v1522_v51 = vrot.slane %v1492_v29, 7 }
  0x58   : > { %v1506_v50 = vsel %vm332_vm0, %v1505_v43, %v1504_v36  ;;  %v1523_v53 = vrot.slane %v1493_v31, 6  ;;  %v1498_v57 = vsel %vm321_vm3, %v1497_v45, %v1496_v38  ;;  %v1525_v58 = vrot.slane %v1494_v32, 5 }
  0x59   : > { %v1507_v56 = vsel %vm335_vm1, %v1494_v32, %v1506_v50  ;;  %v1527_v59 = vrot.slane %v1495_v33, 4  ;;  %1352 = vrot.lane.b32.xlu1 %v8637_v49, %s8353_s13  ;;  %v1500_v63 = vsel %vm324_vm4, %v1499_v46, %v1498_v57  ;;  %v1515_v1 = vrot.slane %v1492_v29, 3  ;;  %v8114_v46 = vld [vmem:[%s8452_s11 + $0x4] ss:$0 sps:$4 sm:$0x11]  }
  0x5a   : > { %v1509_v62 = vsel %vm338_vm2, %v1508_v42, %v1507_v56  ;;  %v1524_v0 = vsel %vm321_vm3, %v1523_v53, %v1522_v51  ;;  %v1502_v5 = vsel %vm327_vm5, %v1501_v47, %v1500_v63  ;;  %v1516_v8 = vrot.slane %v1493_v31, 2  ;;  %v8116_v53 = vld [vmem:[%s8452_s11 + $0x1c] ss:$0 sps:$4 sm:$0x11]  }
  0x5b   : > { %v1510_v4 = vpack.c.b16 %v1509_v62, %v1509_v62  ;;  %v1526_v6 = vsel %vm324_vm4, %v1525_v58, %v1524_v0  ;;  %v8652_v11 = vpack.c.b16 %v1502_v5, %v1502_v5  ;;  %v1518_v14 = vrot.slane %v1494_v32, 1 }
  0x5c   : > { %v1528_v12 = vsel %vm327_vm5, %v1527_v59, %v1526_v6  ;;  %v1676_v15 = vunpack.c.l.b16 %v8106_v48  ;;  %v1517_v18 = vsel %vm332_vm0, %v1516_v8, %v1515_v1  ;;  %v1677_v19 = vunpack.c.l.b16 %v8107_v55  ;;  %v8117_v59 = vld [vmem:[%s8452_s11 + $0x28] ss:$0 sps:$4 sm:$0x11]  }
  0x5d   : > { %1511 = vrot.lane.b32.xlu0 %v1510_v4, %s8352_s12  ;;  %v1529_v17 = vpack.c.b16 %v1528_v12, %v1528_v12  ;;  %v1678_v20 = vunpack.c.l.b16 %v8108_v60  ;;  %1513 = vrot.lane.b32.xlu1 %v8652_v11, %s8353_s13  ;;  %v1519_v26 = vsel %vm335_vm1, %v1518_v14, %v1517_v18  ;;  %v1679_v27 = vunpack.c.l.b16 %v8109_v2 }
  0x5e   : > { %v1688_v28 = vrot.slane %v1676_v15, 3  ;;  %v1680_v29 = vrot.slane %v1676_v15, 7  ;;  %v1520_v31 = vsel %vm338_vm2, %v1495_v33, %v1519_v26  ;;  %v1689_v32 = vrot.slane %v1677_v19, 2  ;;  %v8115_v33 = vld [vmem:[%s8452_s11 + $0x10] ss:$0 sps:$4 sm:$0x11]  }
  0x5f   : > { %v1691_v34 = vrot.slane %v1678_v20, 1  ;;  %v1681_v35 = vrot.slane %v1677_v19, 6  ;;  %v8665_v36 = vpack.c.b16 %v1520_v31, %v1520_v31  ;;  %v1683_v38 = vrot.slane %v1678_v20, 5  ;;  %v8118_v15 = vld [vmem:[%s8452_s11 + $0x4] ss:$0 sps:$4 sm:$0x11]  }
  0x60   : > { %v1685_v39 = vrot.slane %v1679_v27, 4  ;;  %v1711_v40 = vunpack.c.l.b16 %v8110_v16  ;;  %v1690_v43 = vsel %vm332_vm0, %v1689_v32, %v1688_v28  ;;  %v1712_v44 = vunpack.c.l.b16 %v8111_v23  ;;  %v8119_v16 = vld [vmem:[%s8452_s11 + $0x10] ss:$0 sps:$4 sm:$0x11]  }
  0x61   : > { %1530 = vrot.lane.b32.xlu0 %v1529_v17, %s8352_s12  ;;  %v1682_v42 = vsel %vm321_vm3, %v1681_v35, %v1680_v29  ;;  %v1713_v45 = vunpack.c.l.b16 %v8112_v25  ;;  %1532 = vrot.lane.b32.xlu1 %v8665_v36, %s8353_s13  ;;  %v1692_v47 = vsel %vm335_vm1, %v1691_v34, %v1690_v43  ;;  %v1714_v50 = vunpack.c.l.b16 %v8113_v30  ;;  %v8120_v23 = vld [vmem:[%s8452_s11 + $0x1c] ss:$0 sps:$4 sm:$0x11]   ;;  %v8121_v29 = vld [vmem:[%s8452_s11 + $0x28] ss:$0 sps:$4 sm:$0x11]  }
  0x62   : > { %v1684_v48 = vsel %vm324_vm4, %v1683_v38, %v1682_v42  ;;  %v1715_v51 = vrot.slane %v1711_v40, 4  ;;  %v1693_v55 = vsel %vm338_vm2, %v1679_v27, %v1692_v47  ;;  %v1723_v57 = vrot.slane %v1712_v44, 7 }
  0x63   : > { %v1686_v56 = vsel %vm327_vm5, %v1685_v39, %v1684_v48  ;;  %v1725_v58 = vrot.slane %v1713_v45, 6  ;;  %v1694_v60 = vpack.c.b16 %v1693_v55, %v1693_v55  ;;  %v1727_v63 = vrot.slane %v1714_v50, 5 }
  0x64   : > { %v8680_v62 = vpack.c.b16 %v1686_v56, %v1686_v56  ;;  %v1716_v0 = vrot.slane %v1712_v44, 3  ;;  %v1724_v1 = vsel %vm321_vm3, %v1723_v57, %v1711_v40  ;;  %v1718_v2 = vrot.slane %v1713_v45, 2 }
  0x65   : > { %v1720_v4 = vrot.slane %v1714_v50, 1  ;;  %v8683_v5 = vunpack.c.l.b16 %v8114_v46  ;;  %1695 = vrot.lane.b32.xlu0 %v1694_v60, %s8352_s12  ;;  %v1726_v6 = vsel %vm324_vm4, %v1725_v58, %v1724_v1  ;;  %v8690_v12 = vunpack.c.l.b16 %v8115_v33  ;;  %v8122_v60 = vld [vmem:[%s8452_s11 + $0x4] ss:$0 sps:$4 sm:$0x22]  }
  0x66   : > { %1697 = vrot.lane.b32.xlu1 %v8680_v62, %s8353_s13  ;;  %v1717_v8 = vsel %vm332_vm0, %v1716_v0, %v1715_v51  ;;  %v8692_v14 = vunpack.c.l.b16 %v8116_v53  ;;  %v1728_v17 = vsel %vm327_vm5, %v1727_v63, %v1726_v6  ;;  %v8698_v19 = vunpack.c.l.b16 %v8117_v59 }
  0x67   : > { %v1719_v18 = vsel %vm335_vm1, %v1718_v2, %v1717_v8  ;;  %v1883_v20 = vrot.slane %v8683_v5, 4  ;;  %v1729_v25 = vpack.c.b16 %v1728_v17, %v1728_v17  ;;  %v1884_v27 = vrot.slane %v8690_v12, 3  ;;  %v8124_v17 = vld [vmem:[%s8452_s11 + $0x1c] ss:$0 sps:$4 sm:$0x22]  }
  0x68   : > { %v1721_v26 = vsel %vm338_vm2, %v1720_v4, %v1719_v18  ;;  %v1886_v28 = vrot.slane %v8692_v14, 2  ;;  %v1888_v31 = vrot.slane %v8698_v19, 1  ;;  %v1893_v32 = vunpack.c.h.b16 %v8114_v46  ;;  %v8123_v4 = vld [vmem:[%s8452_s11 + $0x10] ss:$0 sps:$4 sm:$0x22]  }
  0x69   : > { %v8706_v30 = vpack.c.b16 %v1721_v26, %v1721_v26  ;;  %v1894_v34 = vunpack.c.h.b16 %v8115_v33  ;;  %1730 = vrot.lane.b32.xlu0 %v1729_v25, %s8352_s12  ;;  %v1885_v35 = vsel %vm332_vm0, %v1884_v27, %v1883_v20  ;;  %v1895_v38 = vunpack.c.h.b16 %v8116_v53  ;;  %v8125_v26 = vld [vmem:[%s8452_s11 + $0x28] ss:$0 sps:$4 sm:$0x22]  }
  0x6a   : > { %v1896_v39 = vunpack.c.h.b16 %v8117_v59  ;;  %v2067_v40 = vunpack.c.l.b16 %v8118_v15  ;;  %v1887_v43 = vsel %vm335_vm1, %v1886_v28, %v1885_v35  ;;  %v2068_v44 = vunpack.c.l.b16 %v8119_v16 }
  0x6b   : > { %1732 = vrot.lane.b32.xlu1 %v8706_v30, %s8353_s13  ;;  %v1897_v42 = vrot.slane %v1894_v34, 7  ;;  %v2069_v45 = vunpack.c.l.b16 %v8120_v23  ;;  %v1889_v47 = vsel %vm338_vm2, %v1888_v31, %v1887_v43  ;;  %v1899_v46 = vrot.slane %v1895_v38, 6 }
  0x6c   : > { %v1901_v33 = vrot.slane %v1896_v39, 5  ;;  %v2070_v48 = vunpack.c.l.b16 %v8121_v29  ;;  %v1890_v50 = vpack.c.b16 %v1889_v47, %v1889_v47  ;;  %v2078_v53 = vrot.slane %v2067_v40, 5 }
  0x6d   : > { %v1898_v51 = vsel %vm321_vm3, %v1897_v42, %v1893_v32  ;;  %v2079_v55 = vrot.slane %v2068_v44, 4  ;;  %v2081_v57 = vrot.slane %v2069_v45, 3  ;;  %v2071_v59 = vrot.slane %v2067_v40, 1  ;;  %v8126_v32 = vld [vmem:[%s8452_s11 + $0x4] ss:$0 sps:$4 sm:$0x22]  }
  0x6e   : > { %v1900_v56 = vsel %vm324_vm4, %v1899_v46, %v1898_v51  ;;  %v2083_v58 = vrot.slane %v2070_v48, 2  ;;  %1891 = vrot.lane.b32.xlu0 %v1890_v50, %s8352_s12  ;;  %v2073_v1 = vrot.slane %v2069_v45, 7  ;;  %v2075_v2 = vrot.slane %v2070_v48, 6  ;;  %v8127_v45 = vld [vmem:[%s8452_s11 + $0x10] ss:$0 sps:$4 sm:$0x22]  }
  0x6f   : > { %v1902_v63 = vsel %vm327_vm5, %v1901_v33, %v1900_v56  ;;  %v2080_v0 = vsel %vm332_vm0, %v2079_v55, %v2078_v53  ;;  %v2072_v15 = vsel %vm321_vm3, %v2068_v44, %v2071_v59  ;;  %v1914_v16 = vrot.slane %v8683_v5, 1  ;;  %v8128_v50 = vld [vmem:[%s8452_s11 + $0x1c] ss:$0 sps:$4 sm:$0x22]  }
  0x70   : > { %v1903_v6 = vpack.c.b16 %v1902_v63, %v1902_v63  ;;  %v2082_v8 = vsel %vm335_vm1, %v2081_v57, %v2080_v0  ;;  %v2074_v20 = vsel %vm324_vm4, %v2073_v1, %v2072_v15  ;;  %v1916_v23 = vrot.slane %v8692_v14, 7  ;;  %v8129_v51 = vld [vmem:[%s8452_s11 + $0x28] ss:$0 sps:$4 sm:$0x22]  }
  0x71   : > { %v2084_v18 = vsel %vm338_vm2, %v2083_v58, %v2082_v8  ;;  %v1918_v25 = vrot.slane %v8698_v19, 6  ;;  %v2076_v28 = vsel %vm327_vm5, %v2075_v2, %v2074_v20  ;;  %v1915_v29 = vsel %vm321_vm3, %v8690_v12, %v1914_v16  ;;  %v8130_v58 = vld [vmem:[%s8452_s11 + $0x4] ss:$0 sps:$4 sm:$0x22]  }
  0x72   : > { %1904 = vrot.lane.b32.xlu1 %v1903_v6, %s8353_s13  ;;  %v2085_v27 = vpack.c.b16 %v2084_v18, %v2084_v18  ;;  %v1906_v31 = vrot.slane %v8683_v5, 5  ;;  %v8737_v34 = vpack.c.b16 %v2076_v28, %v2076_v28  ;;  %v1917_v35 = vsel %vm324_vm4, %v1916_v23, %v1915_v29  ;;  %v8131_v59 = vld [vmem:[%s8452_s11 + $0x10] ss:$0 sps:$4 sm:$0x22]  }
  0x73   : > { %v1907_v38 = vrot.slane %v8690_v12, 4  ;;  %v1909_v39 = vrot.slane %v8692_v14, 3  ;;  %v1919_v40 = vsel %vm327_vm5, %v1918_v25, %v1917_v35  ;;  %v1911_v43 = vrot.slane %v8698_v19, 2  ;;  %v8132_v20 = vld [vmem:[%s8452_s11 + $0x1c] ss:$0 sps:$4 sm:$0x22]  }
  0x74   : > { %2086 = vrot.lane.b32.xlu0 %v2085_v27, %s8352_s12  ;;  %v2102_v42 = vunpack.c.l.b16 %v8122_v60  ;;  %v2103_v44 = vunpack.c.l.b16 %v8123_v4  ;;  %v1920_v47 = vpack.c.b16 %v1919_v40, %v1919_v40  ;;  %v2104_v33 = vunpack.c.l.b16 %v8124_v17  ;;  %v8133_v23 = vld [vmem:[%s8452_s11 + $0x28] ss:$0 sps:$4 sm:$0x22]  }
  0x75   : > { %v1908_v46 = vsel %vm332_vm0, %v1907_v38, %v1906_v31  ;;  %v2105_v48 = vunpack.c.l.b16 %v8125_v26  ;;  %v8759_v8 = vunpack.c.l.b16 %v8126_v32  ;;  %v8763_v17 = vunpack.c.l.b16 %v8127_v45 }
  0x76   : > { %2088 = vrot.lane.b32.xlu1 %v8737_v34, %s8353_s13  ;;  %v1910_v53 = vsel %vm335_vm1, %v1909_v39, %v1908_v46  ;;  %v2114_v55 = vrot.slane %v2102_v42, 2  ;;  %v2115_v56 = vrot.slane %v2103_v44, 1  ;;  %v2106_v57 = vrot.slane %v2102_v42, 6 }
  0x77   : > { %v1912_v60 = vsel %vm338_vm2, %v1911_v43, %v1910_v53  ;;  %v2118_v63 = vrot.slane %v2105_v48, 7  ;;  %v2107_v0 = vrot.slane %v2103_v44, 5  ;;  %v2109_v1 = vrot.slane %v2104_v33, 4 }
  0x78   : > { %1921 = vrot.lane.b32.xlu0 %v1920_v47, %s8352_s12  ;;  %v8756_v2 = vpack.c.b16 %v1912_v60, %v1912_v60  ;;  %v2116_v4 = vsel %vm321_vm3, %v2115_v56, %v2114_v55  ;;  %v2111_v6 = vrot.slane %v2105_v48, 3  ;;  %v8765_v18 = vunpack.c.l.b16 %v8128_v50 }
  0x79   : > { %v2117_v15 = vsel %vm324_vm4, %v2104_v33, %v2116_v4  ;;  %v2108_v16 = vsel %vm332_vm0, %v2107_v0, %v2106_v57  ;;  %v8773_v27 = vunpack.c.l.b16 %v8129_v51  ;;  %v2274_v28 = vrot.slane %v8759_v8, 6 }
  0x7a   : > { %1923 = vrot.lane.b32.xlu1 %v8756_v2, %s8353_s13  ;;  %v2119_v25 = vsel %vm327_vm5, %v2118_v63, %v2117_v15  ;;  %v2110_v26 = vsel %vm335_vm1, %v2109_v1, %v2108_v16  ;;  %v2275_v32 = vrot.slane %v8763_v17, 5  ;;  %v2277_v35 = vrot.slane %v8765_v18, 4  ;;  %v8134_v63 = vld [vmem:[%s8452_s11 + $0x4] ss:$0 sps:$4 sm:$0x44]  }
  0x7b   : > { %v2120_v29 = vpack.c.b16 %v2119_v25, %v2119_v25  ;;  %v2112_v31 = vsel %vm338_vm2, %v2111_v6, %v2110_v26  ;;  %v2279_v39 = vrot.slane %v8773_v27, 3  ;;  %v2447_v40 = vunpack.c.l.b16 %v8130_v58  ;;  %v8135_v15 = vld [vmem:[%s8452_s11 + $0x10] ss:$0 sps:$4 sm:$0x44]  }
  0x7c   : > { %v8779_v38 = vpack.c.b16 %v2112_v31, %v2112_v31  ;;  %v2448_v43 = vunpack.c.l.b16 %v8131_v59  ;;  %v2276_v42 = vsel %vm332_vm0, %v2275_v32, %v2274_v28  ;;  %v2449_v44 = vunpack.c.l.b16 %v8132_v20  ;;  %v8136_v16 = vld [vmem:[%s8452_s11 + $0x1c] ss:$0 sps:$4 sm:$0x44]   ;;  %v8137_v28 = vld [vmem:[%s8452_s11 + $0x28] ss:$0 sps:$4 sm:$0x44]  }
  0x7d   : > { %2121 = vrot.lane.b32.xlu0 %v2120_v29, %s8352_s12  ;;  %v2450_v45 = vunpack.c.l.b16 %v8133_v23  ;;  %v2267_v47 = vrot.slane %v8759_v8, 2  ;;  %v2278_v46 = vsel %vm335_vm1, %v2277_v35, %v2276_v42  ;;  %v2458_v33 = vrot.slane %v2447_v40, 7 }
  0x7e   : > { %2123 = vrot.lane.b32.xlu1 %v8779_v38, %s8353_s13  ;;  %v2459_v48 = vrot.slane %v2448_v43, 6  ;;  %v2268_v50 = vrot.slane %v8763_v17, 1  ;;  %v2280_v51 = vsel %vm338_vm2, %v2279_v39, %v2278_v46  ;;  %v2461_v53 = vrot.slane %v2449_v44, 5  ;;  %v8138_v39 = vld [vmem:[%s8452_s11 + $0x4] ss:$0 sps:$4 sm:$0x44]  }
  0x7f   : > { %v2463_v55 = vrot.slane %v2450_v45, 4  ;;  %v2271_v56 = vrot.slane %v8773_v27, 7  ;;  %v2281_v57 = vpack.c.b16 %v2280_v51, %v2280_v51  ;;  %v2451_v60 = vrot.slane %v2447_v40, 3  ;;  %v8140_v51 = vld [vmem:[%s8452_s11 + $0x1c] ss:$0 sps:$4 sm:$0x44]  }
  0x80   : > { %v2460_v58 = vsel %vm332_vm0, %v2459_v48, %v2458_v33  ;;  %v2269_v59 = vsel %vm321_vm3, %v2268_v50, %v2267_v47  ;;  %v2452_v4 = vrot.slane %v2448_v43, 2  ;;  %v2454_v6 = vrot.slane %v2449_v44, 1  ;;  %v8139_v47 = vld [vmem:[%s8452_s11 + $0x10] ss:$0 sps:$4 sm:$0x44]  }
  0x81   : > { %v2462_v0 = vsel %vm335_vm1, %v2461_v53, %v2460_v58  ;;  %v2270_v1 = vsel %vm324_vm4, %v8765_v18, %v2269_v59  ;;  %2282 = vrot.lane.b32.xlu0 %v2281_v57, %s8352_s12  ;;  %v2294_v25 = vrot.slane %v8759_v8, 3  ;;  %v2295_v26 = vrot.slane %v8763_v17, 2  ;;  %v8142_v59 = vld [vmem:[%s8452_s11 + $0x4] ss:$0 sps:$4 sm:$0x44]  }
  0x82   : > { %v2464_v20 = vsel %vm338_vm2, %v2463_v55, %v2462_v0  ;;  %v2272_v23 = vsel %vm327_vm5, %v2271_v56, %v2270_v1  ;;  %v2453_v32 = vsel %vm321_vm3, %v2452_v4, %v2451_v60  ;;  %v2297_v35 = vrot.slane %v8765_v18, 1 }
  0x83   : > { %v2465_v29 = vpack.c.b16 %v2464_v20, %v2464_v20  ;;  %v8805_v31 = vpack.c.b16 %v2272_v23, %v2272_v23  ;;  %v2455_v40 = vsel %vm324_vm4, %v2454_v6, %v2453_v32  ;;  %v2296_v43 = vsel %vm321_vm3, %v2295_v26, %v2294_v25  ;;  %v8143_v6 = vld [vmem:[%s8452_s11 + $0x10] ss:$0 sps:$4 sm:$0x44]   ;;  %v8144_v25 = vld [vmem:[%s8452_s11 + $0x1c] ss:$0 sps:$4 sm:$0x44]  }
  0x84   : > { %v2286_v42 = vrot.slane %v8759_v8, 7  ;;  %v2287_v44 = vrot.slane %v8763_v17, 6  ;;  %v2456_v46 = vsel %vm327_vm5, %v2450_v45, %v2455_v40  ;;  %v2298_v33 = vsel %vm324_vm4, %v2297_v35, %v2296_v43  ;;  %v8141_v45 = vld [vmem:[%s8452_s11 + $0x28] ss:$0 sps:$4 sm:$0x44]  }
  0x85   : > { %2466 = vrot.lane.b32.xlu1 %v2465_v29, %s8352_s12  ;;  %v2289_v48 = vrot.slane %v8765_v18, 5  ;;  %v2291_v50 = vrot.slane %v8773_v27, 4  ;;  %2284 = vrot.lane.b32.xlu0 %v8805_v31, %s8353_s13  ;;  %v8823_v8 = vpack.c.b16 %v2456_v46, %v2456_v46  ;;  %v2299_v17 = vsel %vm327_vm5, %v8773_v27, %v2298_v33 }
  0x86   : > { %v2288_v53 = vsel %vm332_vm0, %v2287_v44, %v2286_v42  ;;  %v2493_v55 = vunpack.c.l.b16 %v8134_v63  ;;  %v2300_v56 = vpack.c.b16 %v2299_v17, %v2299_v17  ;;  %v2494_v57 = vunpack.c.l.b16 %v8135_v15 }
  0x87   : > { %v2290_v18 = vsel %vm335_vm1, %v2289_v48, %v2288_v53  ;;  %v2495_v58 = vunpack.c.l.b16 %v8136_v16  ;;  %v2496_v0 = vunpack.c.l.b16 %v8137_v28  ;;  %v8832_v4 = vunpack.c.l.b16 %v8138_v39  ;;  %v8145_v28 = vld [vmem:[%s8452_s11 + $0x28] ss:$0 sps:$4 sm:$0x44]  }
  0x88   : > { %v2292_v60 = vsel %vm338_vm2, %v2291_v50, %v2290_v18  ;;  %v2497_v1 = vrot.slane %v2493_v55, 4  ;;  %v2498_v63 = vrot.slane %v2494_v57, 3  ;;  %v2507_v23 = vrot.slane %v2494_v57, 7 }
  0x89   : > { %2468 = vrot.lane.b32.xlu1 %v8823_v8, %s8353_s13  ;;  %v8837_v27 = vpack.c.b16 %v2292_v60, %v2292_v60  ;;  %v2500_v20 = vrot.slane %v2495_v58, 2  ;;  %2301 = vrot.lane.b32.xlu0 %v2300_v56, %s8352_s12  ;;  %v2502_v15 = vrot.slane %v2496_v0, 1  ;;  %v2509_v16 = vrot.slane %v2495_v58, 6 }
  0x8a   : > { %v2511_v26 = vrot.slane %v2496_v0, 5  ;;  %v8841_v29 = vunpack.c.l.b16 %v8139_v47  ;;  %v2499_v32 = vsel %vm321_vm3, %v2498_v63, %v2497_v1  ;;  %v2508_v35 = vsel %vm332_vm0, %v2507_v23, %v2493_v55 }
  0x8b   : > { %v8846_v39 = vunpack.c.l.b16 %v8140_v51  ;;  %v8848_v40 = vunpack.c.l.b16 %v8141_v45  ;;  %v2501_v43 = vsel %vm324_vm4, %v2500_v20, %v2499_v32  ;;  %v2510_v42 = vsel %vm335_vm1, %v2509_v16, %v2508_v35 }
  0x8c   : > { %v2666_v44 = vrot.slane %v8841_v29, 7  ;;  %v2838_v46 = vunpack.c.l.b16 %v8142_v59  ;;  %v2503_v47 = vsel %vm327_vm5, %v2502_v15, %v2501_v43  ;;  %v2512_v33 = vsel %vm338_vm2, %v2511_v26, %v2510_v42  ;;  %v8146_v26 = vld [vmem:[%s8452_s11 + $0x4] ss:$0 sps:$4 sm:$0x88]  }
  0x8d   : > { %2303 = vrot.lane.b32.xlu1 %v8837_v27, %s8353_s13  ;;  %v2668_v48 = vrot.slane %v8846_v39, 6  ;;  %v2670_v50 = vrot.slane %v8848_v40, 5  ;;  %v2504_v51 = vpack.c.b16 %v2503_v47, %v2503_v47  ;;  %v2513_v17 = vpack.c.b16 %v2512_v33, %v2512_v33  ;;  %v8147_v42 = vld [vmem:[%s8452_s11 + $0x10] ss:$0 sps:$4 sm:$0x88]  }
  0x8e   : > { %v2667_v53 = vsel %vm332_vm0, %v2666_v44, %v8832_v4  ;;  %v2839_v55 = vunpack.c.l.b16 %v8143_v6  ;;  %v2840_v56 = vunpack.c.l.b16 %v8144_v25  ;;  %v2841_v18 = vunpack.c.l.b16 %v8145_v28 }
  0x8f   : > { %v2669_v45 = vsel %vm335_vm1, %v2668_v48, %v2667_v53  ;;  %v2850_v57 = vrot.slane %v2838_v46, 1  ;;  %2505 = vrot.lane.b32.xlu0 %v2504_v51, %s8352_s12  ;;  %v2658_v59 = vrot.slane %v8832_v4, 4  ;;  %v2659_v60 = vrot.slane %v8841_v29, 3  ;;  %v8881_v48 = vld [vmem:[%s8452_s11 + $0x1c] ss:$0 sps:$4 sm:$0x88]  }
  0x90   : > { %v2671_v58 = vsel %vm338_vm2, %v2670_v50, %v2669_v45  ;;  %v2661_v0 = vrot.slane %v8846_v39, 2  ;;  %v2852_v63 = vrot.slane %v2840_v56, 7  ;;  %v2854_v20 = vrot.slane %v2841_v18, 6 }
  0x91   : > { %2514 = vrot.lane.b32.xlu1 %v2513_v17, %s8353_s13  ;;  %v2672_v1 = vpack.c.b16 %v2671_v58, %v2671_v58  ;;  %v2851_v6 = vsel %vm332_vm0, %v2839_v55, %v2850_v57  ;;  %v2660_v23 = vsel %vm321_vm3, %v2659_v60, %v2658_v59  ;;  %v2663_v25 = vrot.slane %v8848_v40, 1 }
  0x92   : > { %v2842_v15 = vrot.slane %v2838_v46, 5  ;;  %v2843_v16 = vrot.slane %v2839_v55, 4  ;;  %v2853_v28 = vsel %vm335_vm1, %v2852_v63, %v2851_v6  ;;  %v2662_v32 = vsel %vm324_vm4, %v2661_v0, %v2660_v23  ;;  %v8149_v55 = vld [vmem:[%s8452_s11 + $0x28] ss:$0 sps:$4 sm:$0x88]  }
  0x93   : > { %v2845_v35 = vrot.slane %v2840_v56, 3  ;;  %v2847_v43 = vrot.slane %v2841_v18, 2  ;;  %2673 = vrot.lane.b32.xlu0 %v2672_v1, %s8352_s12  ;;  %v2855_v44 = vsel %vm338_vm2, %v2854_v20, %v2853_v28  ;;  %v2664_v47 = vsel %vm327_vm5, %v2663_v25, %v2662_v32  ;;  %v8150_v6 = vld [vmem:[%s8452_s11 + $0x4] ss:$0 sps:$4 sm:$0x88]  }
  0x94   : > { %v2844_v33 = vsel %vm321_vm3, %v2843_v16, %v2842_v15  ;;  %v2684_v46 = vrot.slane %v8832_v4, 5  ;;  %v2856_v50 = vpack.c.b16 %v2855_v44, %v2855_v44  ;;  %v8883_v51 = vpack.c.b16 %v2664_v47, %v2664_v47  ;;  %v8151_v25 = vld [vmem:[%s8452_s11 + $0x10] ss:$0 sps:$4 sm:$0x88]  }
  0x95   : > { %v2846_v17 = vsel %vm324_vm4, %v2845_v35, %v2844_v33  ;;  %v2685_v53 = vrot.slane %v8841_v29, 4  ;;  %v2687_v18 = vrot.slane %v8846_v39, 3  ;;  %v2689_v57 = vrot.slane %v8848_v40, 2  ;;  %v8152_v15 = vld [vmem:[%s8452_s11 + $0x1c] ss:$0 sps:$4 sm:$0x88]  }
  0x96   : > { %v2848_v56 = vsel %vm327_vm5, %v2847_v43, %v2846_v17  ;;  %v2677_v58 = vrot.slane %v8832_v4, 1  ;;  %2857 = vrot.lane.b32.xlu1 %v2856_v50, %s8352_s12  ;;  %v2679_v0 = vrot.slane %v8846_v39, 7  ;;  %v2681_v1 = vrot.slane %v8848_v40, 6  ;;  %v8153_v32 = vld [vmem:[%s8452_s11 + $0x28] ss:$0 sps:$4 sm:$0x88]  }
  0x97   : > { %v8888_v45 = vpop.permute.xlu0 %290  ;;  %v8895_v59 = vpack.c.b16 %v2848_v56, %v2848_v56  ;;  %v2686_v60 = vsel %vm321_vm3, %v2685_v53, %v2684_v46  ;;  %2675 = vrot.lane.b32.xlu0 %v8883_v51, %s8353_s13  ;;  %v2873_v20 = vunpack.c.l.b16 %v8146_v26  ;;  %v2874_v23 = vunpack.c.l.b16 %v8147_v42  ;;  %v8154_v56 = vld [vmem:[%s8452_s11 + $0x4] ss:$0 sps:$4 sm:$0x88]  }
  0x98   : > { %11642 = vst [vmem:[#allocation5_spill] sm:$0xff] %v8888_v45  ;;  %v2688_v63 = vsel %vm324_vm4, %v2687_v18, %v2686_v60  ;;  %v2678_v4 = vsel %vm332_vm0, %v8841_v29, %v2677_v58  ;;  %v2875_v39 = vunpack.c.l.b16 %v8881_v48  ;;  %v2876_v40 = vunpack.c.l.b16 %v8149_v55 }
  0x99   : > { %v2690_v16 = vsel %vm327_vm5, %v2689_v57, %v2688_v63  ;;  %v2680_v28 = vsel %vm335_vm1, %v2679_v0, %v2678_v4  ;;  %v2884_v47 = vrot.slane %v2873_v20, 6  ;;  %v2885_v29 = vrot.slane %v2874_v23, 5  ;;  %v342_v26 = vpop.permute.xlu1 %341  ;;  %v8155_v0 = vld [vmem:[%s8452_s11 + $0x10] ss:$0 sps:$4 sm:$0x88]  }
  0x9a   : > { %v2691_v43 = vpack.c.b16 %v2690_v16, %v2690_v16  ;;  %v2682_v44 = vsel %vm338_vm2, %v2681_v1, %v2680_v28  ;;  %2859 = vrot.lane.b32.xlu1 %v8895_v59, %s8353_s13  ;;  %v2887_v33 = vrot.slane %v2875_v39, 4  ;;  %v2889_v46 = vrot.slane %v2876_v40, 3  ;;  %v8156_v1 = vld [vmem:[%s8452_s11 + $0x1c] ss:$0 sps:$4 sm:$0x88]  }
  0x9b   : > { %v8912_v35 = vpop.permute.xlu0 %296  ;;  %v8917_v42 = vpack.c.b16 %v2682_v44, %v2682_v44  ;;  %v2877_v48 = vrot.slane %v2873_v20, 2  ;;  %v2886_v50 = vsel %vm321_vm3, %v2885_v29, %v2884_v47  ;;  %v2878_v17 = vrot.slane %v2874_v23, 1  ;;  %v8157_v16 = vld [vmem:[%s8452_s11 + $0x28] ss:$0 sps:$4 sm:$0x88]  }
  0x9c   : > { %11643 = vst [vmem:[#allocation6_spill] sm:$0xff] %v8912_v35  ;;  %2692 = vrot.lane.b32.xlu0 %v2691_v43, %s8352_s12  ;;  %v2881_v53 = vrot.slane %v2876_v40, 7  ;;  %v8921_v55 = vunpack.c.l.b16 %v8150_v6  ;;  %v2888_v18 = vsel %vm324_vm4, %v2887_v33, %v2886_v50  ;;  %v8925_v57 = vunpack.c.l.b16 %v8151_v25 }
  0x9d   : > { %v8927_v58 = vunpack.c.l.b16 %v8152_v15  ;;  %v8929_v60 = vunpack.c.l.b16 %v8153_v32  ;;  %v2890_v4 = vsel %vm327_vm5, %v2889_v46, %v2888_v18  ;;  %v2879_v20 = vsel %vm332_vm0, %v2878_v17, %v2877_v48  ;;  %v355_v28 = vpop.permute.xlu1 %354 }
  0x9e   : > { %v3046_v6 = vrot.slane %v8921_v55, 2  ;;  %v320_v23 = vrot.slane %v8460_v9, 7  ;;  %2694 = vrot.lane.b32.xlu1 %v8917_v42, %s8353_s13  ;;  %v2891_v25 = vpack.c.b16 %v2890_v4, %v2890_v4  ;;  %v2880_v15 = vsel %vm335_vm1, %v2875_v39, %v2879_v20 }
  0x9f   : > { %v8933_v63 = vpop.permute.xlu0 %371  ;;  %v3047_v40 = vrot.slane %v8925_v57, 1  ;;  %v3050_v32 = vrot.slane %v8929_v60, 7  ;;  %v2882_v43 = vsel %vm338_vm2, %v2881_v53, %v2880_v15  ;;  %v323_v44 = vrot.slane %v8462_v10, 6 }
  0xa0   : > { %v326_v47 = vrot.slane %v8464_v13, 5  ;;  %2892 = vrot.lane.b32.xlu0 %v2891_v25, %s8352_s12  ;;  %v8949_v9 = vpack.c.b16 %v2882_v43, %v2882_v43  ;;  %v322_v39 = vsel %vm321_vm3, %v320_v23, %v8458_v7  ;;  %v3218_v33 = vunpack.c.l.b16 %v8154_v56 }
  0xa1   : > { %v3048_v29 = vsel %vm332_vm0, %v3047_v40, %v3046_v6  ;;  %v325_v48 = vsel %vm324_vm4, %v323_v44, %v322_v39  ;;  %v3219_v50 = vunpack.c.l.b16 %v8155_v0  ;;  %v3220_v10 = vunpack.c.l.b16 %v8156_v1  ;;  %v374_v17 = vpop.permute.xlu1 %373 }
  0xa2   : > { %v3049_v46 = vsel %vm335_vm1, %v8927_v58, %v3048_v29  ;;  %2894 = vrot.lane.b32.xlu1 %v8949_v9, %s8353_s13  ;;  %v328_v18 = vsel %vm327_vm5, %v326_v47, %v325_v48  ;;  %v3221_v4 = vunpack.c.l.b16 %v8157_v16  ;;  %v3230_v20 = vrot.slane %v3218_v33, 3 }
  0xa3   : > { %v545_v13 = vpop.permute.xlu0 %544  ;;  %v3051_v53 = vsel %vm338_vm2, %v3050_v32, %v3049_v46  ;;  %v329_v56 = vpack.c.b16 %v328_v18, %v328_v18  ;;  %v3231_v6 = vrot.slane %v3219_v50, 2  ;;  %v3233_v23 = vrot.slane %v3220_v10, 1 }
  0xa4   : > { %v3052_v7 = vpack.c.b16 %v3051_v53, %v3051_v53  ;;  %v3038_v25 = vrot.slane %v8921_v55, 6  ;;  %v3039_v0 = vrot.slane %v8925_v57, 5  ;;  %v3041_v1 = vrot.slane %v8927_v58, 4 }
  0xa5   : > { %v3043_v15 = vrot.slane %v8929_v60, 3  ;;  %v378_v40 = vsel %vm375_vm6, %v329_v56, %v342_v26  ;;  %v3232_v16 = vsel %vm332_vm0, %v3231_v6, %v3230_v20  ;;  %v547_v32 = vpop.permute.xlu1 %546  ;;  %v11625_v39 = vmov 0.0   ;;  %v8158_v20 = vld [vmem:[%s8452_s11 + $0x8] ss:$0 sps:$4 sm:$0x11]  }
  0xa6   : > { %3053 = vrot.lane.b32.xlu0 %v3052_v7, %s8352_s12  ;;  %v3234_v44 = vsel %vm335_vm1, %v3233_v23, %v3232_v16  ;;  %v3040_v47 = vsel %vm321_vm3, %v3039_v0, %v3038_v25  ;;  %v381_v29 = vsel %vm379_vm7, %v378_v40, %v355_v28  ;;  %7744 = vmatprep.subr.bf16.mxu0 %v11625_v39  ;;  %v3222_v26 = vrot.slane %v3218_v33, 7  ;;  %v8159_v7 = vld [vmem:[%s8452_s11 + $0x14] ss:$0 sps:$4 sm:$0x11]  }
  0xa7   : > { %v8968_v43 = vpop.permute.xlu0 %579  ;;  %7752 = vmatprep.subr.bf16.mxu1 %v11625_v39  ;;  %v3235_v46 = vsel %vm338_vm2, %v3221_v4, %v3234_v44  ;;  %v3042_v48 = vsel %vm324_vm4, %v3041_v1, %v3040_v47  ;;  %v3223_v53 = vrot.slane %v3219_v50, 6  ;;  %v3225_v18 = vrot.slane %v3220_v10, 5  ;;  %v8160_v25 = vld [vmem:[%s8452_s11 + $0x20] ss:$0 sps:$4 sm:$0x11]   ;;  %7748 = vmatprep.mubr.msk.bf16.mxu0 %vm8355_vm9, %v11625_v39 }
  0xa8   : > { %v3236_v56 = vpack.c.b16 %v3235_v46, %v3235_v46  ;;  %v3044_v6 = vsel %vm327_vm5, %v3043_v15, %v3042_v48  ;;  %v3227_v23 = vrot.slane %v3221_v4, 4  ;;  %v3064_v28 = vrot.slane %v8921_v55, 7  ;;  %v8161_v0 = vld [vmem:[%s8452_s11 + $0x2c] ss:$0 sps:$4 sm:$0x11]   ;;  %7756 = vmatprep.mubr.msk.bf16.mxu1 %vm8355_vm9, %v11625_v39 }
  0xa9   : > { %v8983_v40 = vpack.c.b16 %v3044_v6, %v3044_v6  ;;  %v3224_v33 = vsel %vm321_vm3, %v3223_v53, %v3222_v26  ;;  %v3065_v16 = vrot.slane %v8925_v57, 6  ;;  %v3067_v1 = vrot.slane %v8927_v58, 5  ;;  %v8988_v50 = vpop.permute.xlu1 %581 }
  0xaa   : > { %3237 = vrot.lane.b32.xlu1 %v3236_v56, %s8352_s12  ;;  %v3226_v10 = vsel %vm324_vm4, %v3225_v18, %v3224_v33  ;;  %v3069_v4 = vrot.slane %v8929_v60, 4  ;;  %v388_v15 = vsel %vm375_vm6, %v8933_v63, %v374_v17  ;;  %v384_v46 = vsel %vm382_vm8, %v381_v29, %v8500_v61  ;;  %v9014_v29 = vld [vmem:[%s8452_s11] ss:$0 sps:$4 sm:$0x11]  }
  0xab   : > { %v8995_v44 = vpop.permute.xlu0 %740  ;;  %3055 = vrot.lane.b32.xlu0 %v8983_v40, %s8353_s13  ;;  %v3228_v47 = vsel %vm327_vm5, %v3227_v23, %v3226_v10  ;;  %v3066_v26 = vsel %vm321_vm3, %v3065_v16, %v3064_v28  ;;  %v585_v48 = vsel %vm375_vm6, %v8512_v21, %v545_v13  ;;  %7745 = vmatpush3.bf16.msra.mxu0 %v384_v46  ;;  %v3057_v17 = vrot.slane %v8921_v55, 3  ;;  %v9017_v21 = vld [vmem:[%s8452_s11 + $0xc] ss:$0 sps:$4 sm:$0x11]  }
  0xac   : > { %v9005_v53 = vpack.c.b16 %v3228_v47, %v3228_v47  ;;  %v3068_v63 = vsel %vm324_vm4, %v3067_v1, %v3066_v26  ;;  %v3058_v18 = vrot.slane %v8925_v57, 2  ;;  %v3060_v6 = vrot.slane %v8927_v58, 1  ;;  %7746 = vmatprep.subr.bf16.mxu0 %v11625_v39  ;;  %v9039_v26 = vld [vmem:[%s8452_s11 + $0x24] ss:$0 sps:$4 sm:$0x11]  }
  0xad   : > { %v3070_v56 = vsel %vm327_vm5, %v3069_v4, %v3068_v63  ;;  %v3253_v23 = vunpack.c.l.b16 %v8158_v20  ;;  %v3254_v61 = vunpack.c.l.b16 %v8159_v7  ;;  %v9019_v13 = vpop.permute.xlu1 %742  ;;  %v3255_v28 = vunpack.c.l.b16 %v8160_v25  ;;  %v9027_v20 = vld [vmem:[%s11621_s1] sm:$0xf]  ;;  %v8164_v4 = vld [vmem:[%s8452_s11 + $0x18] ss:$0 sps:$4 sm:$0x11]  }
  0xae   : > { %3239 = vrot.lane.b32.xlu1 %v9005_v53, %s8353_s13  ;;  %v3071_v55 = vpack.c.b16 %v3070_v56, %v3070_v56  ;;  %v3059_v57 = vsel %vm332_vm0, %v3058_v18, %v3057_v17  ;;  %v3256_v58 = vunpack.c.l.b16 %v8161_v0  ;;  %v393_v1 = vsel %vm379_vm7, %v388_v15, 0 }
  0xaf   : > { %v9029_v7 = vpop.permute.xlu0 %759  ;;  %v3061_v33 = vsel %vm335_vm1, %v3060_v6, %v3059_v57  ;;  %v3265_v16 = vrot.slane %v3254_v61, 7  ;;  %v587_v10 = vsel %vm379_vm7, %v585_v48, %v547_v32  ;;  %v3267_v0 = vrot.slane %v3255_v28, 6  ;;  %7747 = vmatpush3.bf16.msra.mxu0 %v393_v1  ;;  %v8166_v48 = vld [vmem:[%s8452_s11] ss:$0 sps:$4 sm:$0x22]  }
  0xb0   : > { %3072 = vrot.lane.b32.xlu0 %v3071_v55, %s8352_s12  ;;  %v3062_v25 = vsel %vm338_vm2, %v8929_v60, %v3061_v33  ;;  %v3269_v47 = vrot.slane %v3256_v58, 5  ;;  %v3257_v32 = vrot.slane %v3253_v23, 4  ;;  %v3258_v15 = vrot.slane %v3254_v61, 3  ;;  %v8167_v6 = vld [vmem:[%s8452_s11 + $0xc] ss:$0 sps:$4 sm:$0x22]   ;;  %7760 = vmatprep.subr.bf16.mxu0 %v11625_v39 }
  0xb1   : > { %v9041_v46 = vpack.c.b16 %v3062_v25, %v3062_v25  ;;  %v3266_v63 = vsel %vm321_vm3, %v3265_v16, %v3253_v23  ;;  %v9049_v60 = vpop.permute.xlu1 %761  ;;  %v3260_v18 = vrot.slane %v3255_v28, 2  ;;  %v3262_v56 = vrot.slane %v3256_v58, 1  ;;  %v8168_v25 = vld [vmem:[%s8452_s11 + $0x18] ss:$0 sps:$4 sm:$0x22]  }
  0xb2   : > { %v3268_v17 = vsel %vm324_vm4, %v3267_v0, %v3266_v63  ;;  %v3259_v61 = vsel %vm332_vm0, %v3258_v15, %v3257_v32  ;;  %7749 = vmatmul.mubr.msk.bf16.vlgmr.msra.gmra.mrb[0].mxu0 %vm389_vm10, %v9027_v20  ;;  %v3420_v55 = vunpack.c.l.b16 %v9014_v29  ;;  %v3421_v57 = vunpack.c.l.b16 %v9017_v21  ;;  %v8169_v0 = vld [vmem:[%s8452_s11 + $0x24] ss:$0 sps:$4 sm:$0x22]  }
  0xb3   : > { %3074 = vrot.lane.b32.xlu1 %v9041_v46, %s8353_s13  ;;  %v3270_v23 = vsel %vm327_vm5, %v3269_v47, %v3268_v17  ;;  %v3261_v33 = vsel %vm335_vm1, %v3260_v18, %v3259_v61  ;;  %v3422_v16 = vunpack.c.l.b16 %v8164_v4  ;;  %v3423_v1 = vunpack.c.l.b16 %v9039_v26  ;;  %7764 = vmatprep.mubr.msk.bf16.mxu0 %vm8355_vm9, %v11625_v39 }
  0xb4   : > { %v9062_v28 = vpop.permute.xlu0 %924  ;;  %v3271_v58 = vpack.c.b16 %v3270_v23, %v3270_v23  ;;  %v3263_v47 = vsel %vm338_vm2, %v3262_v56, %v3261_v33  ;;  %v3431_v63 = vrot.slane %v3420_v55, 5  ;;  %v3432_v32 = vrot.slane %v3421_v57, 4  ;;  %v8170_v33 = vld [vmem:[%s8452_s11] ss:$0 sps:$4 sm:$0x22]  }
  0xb5   : > { %v589_v29 = vsel %vm382_vm8, %v587_v10, %v8524_v41  ;;  %v9073_v21 = vpop.permute.xlu1 %926  ;;  %v9076_v15 = vpack.c.b16 %v3263_v47, %v3263_v47  ;;  %v3434_v4 = vrot.slane %v3422_v16, 3  ;;  %v3436_v26 = vrot.slane %v3423_v1, 2 }
  0xb6   : > { %3272 = vrot.lane.b32.xlu0 %v3271_v58, %s8352_s12  ;;  %7753 = vmatpush3.bf16.msra.mxu1 %v589_v29  ;;  %v593_v17 = vsel %vm375_vm6, %v8968_v43, %v8988_v50  ;;  %v3433_v18 = vsel %vm332_vm0, %v3432_v32, %v3431_v63  ;;  %v765_v41 = vsel %vm375_vm6, %v8544_v3, %v8995_v44  ;;  %v9085_v10 = vunpack.c.l.b16 %v8166_v48  ;;  %v8171_v29 = vld [vmem:[%s8452_s11 + $0xc] ss:$0 sps:$4 sm:$0x22]  }
  0xb7   : > { %v9087_v56 = vunpack.c.l.b16 %v8167_v6  ;;  %7754 = vmatprep.subr.bf16.mxu1 %v11625_v39  ;;  %3274 = vrot.lane.b32.xlu1 %v9076_v15, %s8353_s13  ;;  %v3435_v43 = vsel %vm335_vm1, %v3434_v4, %v3433_v18  ;;  %v9095_v50 = vunpack.c.l.b16 %v8168_v25  ;;  %v9097_v61 = vunpack.c.l.b16 %v8169_v0 }
  0xb8   : > { %v9090_v23 = vpop.permute.xlu0 %963  ;;  %v3424_v3 = vrot.slane %v3420_v55, 1  ;;  %v3437_v44 = vsel %vm338_vm2, %v3436_v26, %v3435_v43  ;;  %v3679_v48 = vrot.slane %v9085_v10, 6  ;;  %v3426_v58 = vrot.slane %v3422_v16, 7  ;;  %v8172_v55 = vld [vmem:[%s8452_s11 + $0x18] ss:$0 sps:$4 sm:$0x22]  }
  0xb9   : > { %v3680_v6 = vrot.slane %v9087_v56, 5  ;;  %v9103_v47 = vpop.permute.xlu1 %972  ;;  %v3438_v63 = vpack.c.b16 %v3437_v44, %v3437_v44  ;;  %v3682_v32 = vrot.slane %v9095_v50, 4  ;;  %v3684_v25 = vrot.slane %v9097_v61, 3  ;;  %v8173_v16 = vld [vmem:[%s8452_s11 + $0x24] ss:$0 sps:$4 sm:$0x22]  }
  0xba   : > { %v3425_v0 = vsel %vm321_vm3, %v3421_v57, %v3424_v3  ;;  %v3428_v18 = vrot.slane %v3423_v1, 6  ;;  %v594_v43 = vsel %vm379_vm7, %v593_v17, 0  ;;  %v767_v39 = vsel %vm379_vm7, %v765_v41, %v9019_v13 }
  0xbb   : > { %v3681_v4 = vsel %vm332_vm0, %v3680_v6, %v3679_v48  ;;  %v3427_v26 = vsel %vm324_vm4, %v3426_v58, %v3425_v0  ;;  %3439 = vrot.lane.b32.xlu0 %v3438_v63, %s8352_s12  ;;  %7755 = vmatpush3.bf16.msra.mxu1 %v594_v43  ;;  %v3672_v57 = vrot.slane %v9085_v10, 2  ;;  %v3673_v3 = vrot.slane %v9087_v56, 1 }
  0xbc   : > { %v3683_v44 = vsel %vm335_vm1, %v3682_v32, %v3681_v4  ;;  %v9120_v35 = vpop.permute.xlu0 %1131  ;;  %v3429_v1 = vsel %vm327_vm5, %v3428_v18, %v3427_v26  ;;  %v3676_v17 = vrot.slane %v9097_v61, 7  ;;  %v769_v6 = vsel %vm382_vm8, %v767_v39, %v8555_v24 }
  0xbd   : > { %v3685_v48 = vsel %vm338_vm2, %v3684_v25, %v3683_v44  ;;  %v11644_v58 = vmov 0.0   ;;  %v9128_v63 = vpop.permute.xlu1 %1133  ;;  %v9130_v41 = vpack.c.b16 %v3429_v1, %v3429_v1  ;;  %v3674_v32 = vsel %vm321_vm3, %v3673_v3, %v3672_v57  ;;  %7761 = vmatpush3.bf16.msra.mxu0 %v769_v6 }
  0xbe   : > { %7768 = vmatprep.subr.bf16.mxu1 %v11644_v58  ;;  %v3686_v13 = vpack.c.b16 %v3685_v48, %v3685_v48  ;;  %v773_v25 = vsel %vm375_vm6, %v9029_v7, %v9049_v60  ;;  %v3675_v0 = vsel %vm324_vm4, %v9095_v50, %v3674_v32  ;;  %7757 = vmatmul.mubr.msk.bf16.vlgmr.msra.gmra.mrb[0].mxu1 %vm389_vm10, %v9027_v20  ;;  %v3455_v4 = vunpack.c.l.b16 %v8170_v33 }
  0xbf   : > { %v774_v24 = vsel %vm379_vm7, %v773_v25, 0  ;;  %v976_v39 = vsel %vm375_vm6, %v8571_v52, %v9062_v28  ;;  %7762 = vmatprep.subr.bf16.mxu0 %v11644_v58  ;;  %3441 = vrot.lane.b32.xlu0 %v9130_v41, %s8353_s13  ;;  %v3677_v7 = vsel %vm327_vm5, %v3676_v17, %v3675_v0  ;;  %v3456_v60 = vunpack.c.l.b16 %v8171_v29  ;;  %v9172_v0 = vld [vmem:[%s8452_s11] ss:$0 sps:$4 sm:$0x22]  }
  0xc0   : > { %3687 = vrot.lane.b32.xlu1 %v3686_v13, %s8352_s12  ;;  %v3457_v26 = vunpack.c.l.b16 %v8172_v55  ;;  %v3458_v18 = vunpack.c.l.b16 %v8173_v16  ;;  %v9149_v43 = vpop.permute.xlu0 %1150  ;;  %v9151_v44 = vpack.c.b16 %v3677_v7, %v3677_v7  ;;  %v3467_v57 = vrot.slane %v3455_v4, 2  ;;  %7772 = vmatprep.mubr.msk.bf16.mxu1 %vm8355_vm9, %v11644_v58 }
  0xc1   : > { %v3459_v3 = vrot.slane %v3455_v4, 6  ;;  %v9155_v52 = vsel %vm379_vm7, %v976_v39, %v9073_v21  ;;  %v9159_v28 = vpop.permute.xlu1 %1152  ;;  %v3468_v33 = vrot.slane %v3456_v60, 1  ;;  %v3460_v55 = vrot.slane %v3456_v60, 5  ;;  %7763 = vmatpush3.bf16.msra.mxu0 %v774_v24  ;;  %v9181_v60 = vld [vmem:[%s8452_s11 + $0xc] ss:$0 sps:$4 sm:$0x22]  }
  0xc2   : > { %11645 = vst [vmem:[#allocation7_spill] sm:$0xff] %v9151_v44  ;;  %v3471_v29 = vrot.slane %v3458_v18, 7  ;;  %v3462_v16 = vrot.slane %v3457_v26, 4  ;;  %v3464_v48 = vrot.slane %v3458_v18, 3  ;;  %v3699_v1 = vrot.slane %v9085_v10, 3  ;;  %7776 = vmatprep.subr.bf16.mxu0 %v11644_v58 }
  0xc3   : > { %v3700_v17 = vrot.slane %v9087_v56, 2  ;;  %v3702_v21 = vrot.slane %v9095_v50, 1  ;;  %v3469_v6 = vsel %vm321_vm3, %v3468_v33, %v3467_v57  ;;  %v3461_v13 = vsel %vm332_vm0, %v3460_v55, %v3459_v3  ;;  %v9192_v3 = vld [vmem:[%s8452_s11 + $0x18] ss:$0 sps:$4 sm:$0x22]  }
  0xc4   : > { %3689 = vrot.lane.b32.xlu1 %v9151_v44, %s8353_s13  ;;  %v3691_v32 = vrot.slane %v9085_v10, 7  ;;  %v3692_v25 = vrot.slane %v9087_v56, 6  ;;  %v3470_v24 = vsel %vm324_vm4, %v3457_v26, %v3469_v6  ;;  %v3463_v39 = vsel %vm335_vm1, %v3462_v16, %v3461_v13  ;;  %7765 = vmatmul.mubr.msk.bf16.vlgmr.msra.gmra.mrb[4].mxu0 %vm389_vm10, %v9027_v20  ;;  %v9195_v33 = vld [vmem:[%s8452_s11 + $0x24] ss:$0 sps:$4 sm:$0x22]  }
  0xc5   : > { %v3701_v4 = vsel %vm321_vm3, %v3700_v17, %v3699_v1  ;;  %v3694_v7 = vrot.slane %v9095_v50, 5  ;;  %v9183_v10 = vpop.permute.xlu0 %1315  ;;  %v3472_v18 = vsel %vm327_vm5, %v3471_v29, %v3470_v24  ;;  %v3465_v26 = vsel %vm338_vm2, %v3464_v48, %v3463_v39  ;;  %7780 = vmatprep.mubr.msk.bf16.mxu0 %vm8355_vm9, %v11644_v58  ;;  %v8178_v1 = vld [vmem:[%s8452_s11] ss:$0 sps:$4 sm:$0x44]  }
  0xc6   : > { %v9185_v56 = vpop.permute.xlu1 %1317  ;;  %v3703_v57 = vsel %vm324_vm4, %v3702_v21, %v3701_v4  ;;  %v3693_v50 = vsel %vm332_vm0, %v3692_v25, %v3691_v32  ;;  %v3473_v55 = vpack.c.b16 %v3472_v18, %v3472_v18  ;;  %v9199_v16 = vpack.c.b16 %v3465_v26, %v3465_v26  ;;  %v8258_v6 = vld [vmem:[%s8452_s11] ss:$0 sps:$4 sm:$0x44]   ;;  %v8259_v32 = vld [vmem:[%s8452_s11 + $0xc] ss:$0 sps:$4 sm:$0x44]  }
  0xc7   : > { %v3704_v29 = vsel %vm327_vm5, %v9097_v61, %v3703_v57  ;;  %v3695_v48 = vsel %vm335_vm1, %v3694_v7, %v3693_v50  ;;  %v3696_v21 = vrot.slane %v9097_v61, 4  ;;  %v940_v13 = vunpack.c.h.b16 %v8258_v6  ;;  %v8179_v24 = vld [vmem:[%s8452_s11 + $0xc] ss:$0 sps:$4 sm:$0x44]  }
  0xc8   : > { %11646 = vst [vmem:[#allocation8_spill] sm:$0xff] %v9199_v16  ;;  %v3705_v17 = vpack.c.b16 %v3704_v29, %v3704_v29  ;;  %v941_v25 = vunpack.c.h.b16 %v8259_v32  ;;  %3474 = vrot.lane.b32.xlu0 %v3473_v55, %s8352_s12  ;;  %3476 = vrot.lane.b32.xlu1 %v9199_v16, %s8353_s13  ;;  %v8260_v39 = vld [vmem:[%s8452_s11 + $0x18] ss:$0 sps:$4 sm:$0x44]   ;;  %v984_v26 = vsel %vm375_vm6, %v9090_v23, %v9103_v47  ;;  %v3901_v23 = vunpack.c.l.b16 %v9181_v60 }
  0xc9   : > { %v942_v4 = vunpack.c.h.b16 %v8260_v39  ;;  %v8261_v18 = vld [vmem:[%s8452_s11 + $0x24] ss:$0 sps:$4 sm:$0x44]   ;;  %v1156_v61 = vsel %vm375_vm6, %v8597_v37, %v9120_v35  ;;  %v8180_v57 = vld [vmem:[%s8452_s11 + $0x18] ss:$0 sps:$4 sm:$0x44]   ;;  %v9222_v29 = vpop.permute.xlu0 %1350  ;;  %v3697_v55 = vsel %vm338_vm2, %v3696_v21, %v3695_v48  ;;  %v3900_v39 = vunpack.c.l.b16 %v9172_v0 }
  0xca   : > { %v943_v7 = vunpack.c.h.b16 %v8261_v18  ;;  %v8181_v50 = vld [vmem:[%s8452_s11 + $0x24] ss:$0 sps:$4 sm:$0x44]   ;;  %v944_v6 = vrot.slane %v941_v25, 7  ;;  %v985_v32 = vsel %vm379_vm7, %v984_v26, 0  ;;  %v9227_v18 = vpack.c.b16 %v3697_v55, %v3697_v55 }
  0xcb   : > { %v946_v45 = vrot.slane %v942_v4, 6  ;;  %v9230_v47 = vpop.permute.xlu1 %1352  ;;  %v3902_v35 = vunpack.c.l.b16 %v9192_v3  ;;  %v3903_v44 = vunpack.c.l.b16 %v9195_v33  ;;  %v3911_v48 = vrot.slane %v3900_v39, 7 }
  0xcc   : > { %11647 = vst [vmem:[#allocation9_spill] sm:$0xff] %v9227_v18  ;;  %v948_v16 = vrot.slane %v943_v7, 5  ;;  %v945_v37 = vsel %vm332_vm0, %v944_v6, %v940_v13  ;;  %3706 = vrot.lane.b32.xlu0 %v3705_v17, %s8352_s12  ;;  %3708 = vrot.lane.b32.xlu1 %v9227_v18, %s8353_s13  ;;  %v3912_v21 = vrot.slane %v3901_v23, 6  ;;  %v9239_v25 = vunpack.c.l.b16 %v8178_v1 }
  0xcd   : > { %v947_v0 = vsel %vm335_vm1, %v946_v45, %v945_v37  ;;  %v9241_v60 = vunpack.c.l.b16 %v8179_v24  ;;  %v3914_v4 = vrot.slane %v3902_v35, 5  ;;  %v3916_v3 = vrot.slane %v3903_v44, 4  ;;  %v9259_v37 = vld [vmem:[%s8452_s11] ss:$0 sps:$4 sm:$0x44]  }
  0xce   : > { %v949_v13 = vsel %vm338_vm2, %v948_v16, %v947_v0  ;;  %v9244_v7 = vunpack.c.l.b16 %v8180_v57  ;;  %v3913_v26 = vsel %vm332_vm0, %v3912_v21, %v3911_v48  ;;  %v9249_v55 = vunpack.c.l.b16 %v8181_v50 }
  0xcf   : > { %v9246_v33 = vpop.permute.xlu0 %1511  ;;  %v950_v17 = vpack.c.b16 %v949_v13, %v949_v13  ;;  %v4167_v45 = vrot.slane %v9241_v60, 7  ;;  %v9252_v1 = vpop.permute.xlu1 %1513  ;;  %v3915_v24 = vsel %vm335_vm1, %v3914_v4, %v3913_v26  ;;  %v1158_v57 = vsel %vm379_vm7, %v1156_v61, %v9128_v63  ;;  %v8183_v13 = vld [vmem:[%s8452_s11 + $0xc] ss:$0 sps:$4 sm:$0x44]  }
  0xd0   : > { %v4169_v16 = vrot.slane %v9244_v7, 6  ;;  %v3904_v6 = vrot.slane %v3900_v39, 3  ;;  %v3917_v50 = vsel %vm338_vm2, %v3916_v3, %v3915_v24  ;;  %v4171_v21 = vrot.slane %v9249_v55, 5  ;;  %v8184_v39 = vld [vmem:[%s8452_s11 + $0x18] ss:$0 sps:$4 sm:$0x44]  }
  0xd1   : > { %v980_v48 = vsel %vm382_vm8, %v9155_v52, %v950_v17  ;;  %v4168_v0 = vsel %vm332_vm0, %v4167_v45, %v9239_v25  ;;  %v3918_v4 = vpack.c.b16 %v3917_v50, %v3917_v50  ;;  %v3905_v63 = vrot.slane %v3901_v23, 2  ;;  %v8185_v24 = vld [vmem:[%s8452_s11 + $0x24] ss:$0 sps:$4 sm:$0x44]  }
  0xd2   : > { %7769 = vmatpush3.bf16.msra.mxu1 %v980_v48  ;;  %v4170_v26 = vsel %vm335_vm1, %v4169_v16, %v4168_v0  ;;  %v3907_v61 = vrot.slane %v3902_v35, 1  ;;  %v4159_v3 = vrot.slane %v9239_v25, 4  ;;  %v4160_v17 = vrot.slane %v9241_v60, 3 }
  0xd3   : > { %v9270_v18 = vpop.permute.xlu0 %1530  ;;  %v4172_v52 = vsel %vm338_vm2, %v4171_v21, %v4170_v26  ;;  %7770 = vmatprep.subr.bf16.mxu1 %v11644_v58  ;;  %v4162_v45 = vrot.slane %v9244_v7, 2  ;;  %v9278_v48 = vpop.permute.xlu1 %1532  ;;  %3919 = vrot.lane.b32.xlu0 %v3918_v4, %s8352_s12  ;;  %v3906_v35 = vsel %vm321_vm3, %v3905_v63, %v3904_v6  ;;  %v4164_v16 = vrot.slane %v9249_v55, 1 }
  0xd4   : > { %v4173_v23 = vpack.c.b16 %v4172_v52, %v4172_v52  ;;  %v1160_v50 = vsel %vm382_vm8, %v1158_v57, %v8609_v54  ;;  %v3908_v0 = vsel %vm324_vm4, %v3907_v61, %v3906_v35  ;;  %v4161_v21 = vsel %vm321_vm3, %v4160_v17, %v4159_v3 }
  0xd5   : > { %7777 = vmatpush3.bf16.msra.mxu0 %v1160_v50  ;;  %v1164_v26 = vsel %vm375_vm6, %v9149_v43, %v9159_v28  ;;  %v1356_v4 = vsel %vm375_vm6, %v8624_v22, %v9183_v10  ;;  %v3909_v6 = vsel %vm327_vm5, %v3903_v44, %v3908_v0  ;;  %v4163_v54 = vsel %vm324_vm4, %v4162_v45, %v4161_v21  ;;  %v9323_v50 = vld [vmem:[%s8452_s11 + $0xc] ss:$0 sps:$4 sm:$0x44]  }
  0xd6   : > { %4174 = vrot.lane.b32.xlu1 %v4173_v23, %s8352_s12  ;;  %7771 = vmatpush3.bf16.msra.mxu1 %v985_v32  ;;  %v1165_v57 = vsel %vm379_vm7, %v1164_v26, 0  ;;  %v3946_v63 = vunpack.c.l.b16 %v9259_v37  ;;  %v9298_v61 = vpack.c.b16 %v3909_v6, %v3909_v6  ;;  %v4165_v52 = vsel %vm327_vm5, %v4164_v16, %v4163_v54  ;;  %v9320_v16 = vld [vmem:[%s8452_s11] ss:$0 sps:$4 sm:$0x44]  }
  0xd7   : > { %v3947_v43 = vunpack.c.l.b16 %v8183_v13  ;;  %v3948_v28 = vunpack.c.l.b16 %v8184_v39  ;;  %7778 = vmatprep.subr.bf16.mxu0 %v11644_v58  ;;  %7784 = vmatprep.subr.bf16.mxu1 %v11644_v58  ;;  %v9303_v22 = vpop.permute.xlu0 %1695  ;;  %v9307_v44 = vpack.c.b16 %v4165_v52, %v4165_v52  ;;  %v3949_v32 = vunpack.c.l.b16 %v8185_v24  ;;  %v9330_v6 = vld [vmem:[%s8452_s11 + $0x18] ss:$0 sps:$4 sm:$0x44]   ;;  %v9333_v54 = vld [vmem:[%s8452_s11 + $0x24] ss:$0 sps:$4 sm:$0x44]  }
  0xd8   : > { %11648 = vst [vmem:[#allocation10_spill] sm:$0xff] %v9298_v61  ;;  %v9305_v10 = vpop.permute.xlu1 %1697  ;;  %v3950_v37 = vrot.slane %v3946_v63, 4  ;;  %v1358_v3 = vsel %vm379_vm7, %v1356_v4, %v9185_v56  ;;  %3921 = vrot.lane.b32.xlu0 %v9298_v61, %s8353_s13  ;;  %v4185_v56 = vrot.slane %v9239_v25, 5  ;;  %v4186_v35 = vrot.slane %v9241_v60, 4 }
  0xd9   : > { %7773 = vmatmul.mubr.msk.bf16.vlgmr.msra.gmra.mrb[4].mxu1 %vm389_vm10, %v9027_v20  ;;  %v3951_v13 = vrot.slane %v3947_v43, 3  ;;  %v3953_v39 = vrot.slane %v3948_v28, 2  ;;  %v3960_v17 = vrot.slane %v3947_v43, 7  ;;  %v3962_v45 = vrot.slane %v3948_v28, 6  ;;  %7779 = vmatpush3.bf16.msra.mxu0 %v1165_v57 }
  0xda   : > { %4176 = vrot.lane.b32.xlu1 %v9307_v44, %s8353_s13  ;;  %v3955_v24 = vrot.slane %v3949_v32, 1  ;;  %v3964_v23 = vrot.slane %v3949_v32, 5  ;;  %v4188_v26 = vrot.slane %v9244_v7, 3  ;;  %v4190_v4 = vrot.slane %v9249_v55, 2  ;;  %7788 = vmatprep.mubr.msk.bf16.mxu1 %vm8355_vm9, %v11644_v58 }
  0xdb   : > { %v3952_v0 = vsel %vm321_vm3, %v3951_v13, %v3950_v37  ;;  %v3961_v21 = vsel %vm332_vm0, %v3960_v17, %v3946_v63  ;;  %7792 = vmatprep.subr.bf16.mxu0 %v11644_v58  ;;  %v9338_v57 = vpop.permute.xlu0 %1730  ;;  %v4187_v43 = vsel %vm321_vm3, %v4186_v35, %v4185_v56  ;;  %v4178_v28 = vrot.slane %v9239_v25, 1  ;;  %v8190_v32 = vld [vmem:[%s8452_s11] ss:$0 sps:$4 sm:$0x88]  }
  0xdc   : > { %v3954_v52 = vsel %vm324_vm4, %v3953_v39, %v3952_v0  ;;  %v3963_v63 = vsel %vm335_vm1, %v3962_v45, %v3961_v21  ;;  %v4189_v17 = vsel %vm324_vm4, %v4188_v26, %v4187_v43  ;;  %v4180_v61 = vrot.slane %v9244_v7, 7  ;;  %7781 = vmatmul.mubr.msk.bf16.vlgmr.msra.gmra.mrb[8].mxu0 %vm389_vm10, %v9027_v20  ;;  %v8191_v39 = vld [vmem:[%s8452_s11 + $0xc] ss:$0 sps:$4 sm:$0x88]  }
  0xdd   : > { %v3956_v37 = vsel %vm327_vm5, %v3955_v24, %v3954_v52  ;;  %v3965_v13 = vsel %vm338_vm2, %v3964_v23, %v3963_v63  ;;  %v9352_v0 = vpop.permute.xlu1 %1732  ;;  %v4191_v25 = vsel %vm327_vm5, %v4190_v4, %v4189_v17  ;;  %v4179_v24 = vsel %vm332_vm0, %v9241_v60, %v4178_v28  ;;  %v8192_v35 = vld [vmem:[%s8452_s11 + $0x18] ss:$0 sps:$4 sm:$0x88]   ;;  %7796 = vmatprep.mubr.msk.bf16.mxu0 %vm8355_vm9, %v11644_v58  ;;  %v8193_v52 = vld [vmem:[%s8452_s11 + $0x24] ss:$0 sps:$4 sm:$0x88]  }
  0xde   : > { %v3957_v45 = vpack.c.b16 %v3956_v37, %v3956_v37  ;;  %v3966_v56 = vpack.c.b16 %v3965_v13, %v3965_v13  ;;  %v4192_v23 = vpack.c.b16 %v4191_v25, %v4191_v25  ;;  %v4181_v7 = vsel %vm335_vm1, %v4180_v61, %v4179_v24 }
  0xdf   : > { %v4182_v21 = vrot.slane %v9249_v55, 6  ;;  %v1360_v26 = vsel %vm382_vm8, %v1358_v3, %v8637_v49  ;;  %v1364_v60 = vsel %vm375_vm6, %v9222_v29, %v9230_v47  ;;  %v1536_v4 = vsel %vm375_vm6, %v8652_v11, %v9246_v33 }
  0xe0   : > { %3958 = vrot.lane.b32.xlu0 %v3957_v45, %s8352_s12  ;;  %3967 = vrot.lane.b32.xlu1 %v3966_v56, %s8353_s13  ;;  %v4387_v61 = vunpack.c.l.b16 %v9320_v16  ;;  %v4388_v55 = vunpack.c.l.b16 %v9323_v50  ;;  %v9375_v63 = vpop.permute.xlu0 %1891  ;;  %v1365_v3 = vsel %vm379_vm7, %v1364_v60, 0  ;;  %v4389_v43 = vunpack.c.l.b16 %v9330_v6 }
  0xe1   : > { %v4183_v49 = vsel %vm338_vm2, %v4182_v21, %v4181_v7  ;;  %7785 = vmatpush3.bf16.msra.mxu1 %v1360_v26  ;;  %v4390_v28 = vunpack.c.l.b16 %v9333_v54  ;;  %v9383_v37 = vunpack.c.l.b16 %v8190_v32  ;;  %v9385_v11 = vunpack.c.l.b16 %v8191_v39 }
  0xe2   : > { %v9381_v29 = vpack.c.b16 %v4183_v49, %v4183_v49  ;;  %v4399_v47 = vrot.slane %v4387_v61, 1  ;;  %7786 = vmatprep.subr.bf16.mxu1 %v11644_v58  ;;  %v4401_v33 = vrot.slane %v4389_v43, 7  ;;  %v9388_v50 = vunpack.c.l.b16 %v8192_v35  ;;  %v8194_v35 = vld [vmem:[%s8452_s11] ss:$0 sps:$4 sm:$0x88]  }
  0xe3   : > { %v4403_v16 = vrot.slane %v4390_v28, 6  ;;  %v9390_v13 = vunpack.c.l.b16 %v8193_v52  ;;  %v4643_v32 = vrot.slane %v9383_v37, 2  ;;  %v4644_v17 = vrot.slane %v9385_v11, 1  ;;  %v9411_v49 = vld [vmem:[%s8452_s11 + $0x18] ss:$0 sps:$4 sm:$0x88]  }
  0xe4   : > { %v9392_v6 = vpop.permute.xlu1 %1904  ;;  %4193 = vrot.lane.b32.xlu0 %v4192_v23, %s8352_s12  ;;  %4195 = vrot.lane.b32.xlu1 %v9381_v29, %s8353_s13  ;;  %v4400_v54 = vsel %vm332_vm0, %v4388_v55, %v4399_v47  ;;  %v1538_v39 = vsel %vm379_vm7, %v1536_v4, %v9252_v1  ;;  %v4391_v25 = vrot.slane %v4387_v61, 5  ;;  %v4392_v24 = vrot.slane %v4388_v55, 4  ;;  %v8195_v23 = vld [vmem:[%s8452_s11 + $0xc] ss:$0 sps:$4 sm:$0x88]  }
  0xe5   : > { %v4402_v45 = vsel %vm335_vm1, %v4401_v33, %v4400_v54  ;;  %v4647_v56 = vrot.slane %v9390_v13, 7  ;;  %7787 = vmatpush3.bf16.msra.mxu1 %v1365_v3  ;;  %v4645_v26 = vsel %vm332_vm0, %v4644_v17, %v4643_v32  ;;  %v4394_v52 = vrot.slane %v4389_v43, 3  ;;  %v8197_v1 = vld [vmem:[%s8452_s11 + $0x24] ss:$0 sps:$4 sm:$0x88]  }
  0xe6   : > { %v9406_v7 = vpop.permute.xlu0 %2086  ;;  %v4404_v21 = vsel %vm338_vm2, %v4403_v16, %v4402_v45  ;;  %v4396_v60 = vrot.slane %v4390_v28, 2  ;;  %7800 = vmatprep.subr.bf16.mxu1 %v11644_v58  ;;  %v4646_v61 = vsel %vm335_vm1, %v9388_v50, %v4645_v26  ;;  %v4393_v55 = vsel %vm321_vm3, %v4392_v24, %v4391_v25 }
  0xe7   : > { %v4405_v4 = vpack.c.b16 %v4404_v21, %v4404_v21  ;;  %v4635_v3 = vrot.slane %v9383_v37, 6  ;;  %v4648_v33 = vsel %vm338_vm2, %v4647_v56, %v4646_v61  ;;  %v4395_v43 = vsel %vm324_vm4, %v4394_v52, %v4393_v55 }
  0xe8   : > { %v9419_v47 = vpop.permute.xlu1 %2088  ;;  %v4636_v28 = vrot.slane %v9385_v11, 5  ;;  %v4638_v16 = vrot.slane %v9388_v50, 4  ;;  %7789 = vmatmul.mubr.msk.bf16.vlgmr.msra.gmra.mrb[8].mxu1 %vm389_vm10, %v9027_v20  ;;  %v4649_v54 = vpack.c.b16 %v4648_v33, %v4648_v33  ;;  %v4397_v32 = vsel %vm327_vm5, %v4396_v60, %v4395_v43 }
  0xe9   : > { %4406 = vrot.lane.b32.xlu0 %v4405_v4, %s8352_s12  ;;  %v4640_v17 = vrot.slane %v9390_v13, 3  ;;  %v1540_v45 = vsel %vm382_vm8, %v1538_v39, %v8665_v36  ;;  %7804 = vmatprep.mubr.msk.bf16.mxu1 %vm8355_vm9, %v11644_v58  ;;  %v9436_v25 = vpack.c.b16 %v4397_v32, %v4397_v32  ;;  %v1544_v21 = vsel %vm375_vm6, %v9270_v18, %v9278_v48 }
  0xea   : > { %v9434_v56 = vpop.permute.xlu0 %1921  ;;  %v4637_v24 = vsel %vm321_vm3, %v4636_v28, %v4635_v3  ;;  %7793 = vmatpush3.bf16.msra.mxu0 %v1540_v45  ;;  %v1736_v26 = vsel %vm375_vm6, %v8680_v62, %v9303_v22  ;;  %4650 = vrot.lane.b32.xlu1 %v4649_v54, %s8352_s12  ;;  %v1545_v39 = vsel %vm379_vm7, %v1544_v21, 0  ;;  %v4422_v52 = vunpack.c.l.b16 %v8194_v35  ;;  %v9473_v21 = vld [vmem:[%s8452_s11] ss:$0 sps:$4 sm:$0x88]  }
  0xeb   : > { %v4639_v36 = vsel %vm324_vm4, %v4638_v16, %v4637_v24  ;;  %v4423_v60 = vunpack.c.l.b16 %v8195_v23  ;;  %7794 = vmatprep.subr.bf16.mxu0 %v11644_v58  ;;  %v4424_v18 = vunpack.c.l.b16 %v9411_v49  ;;  %v4425_v48 = vunpack.c.l.b16 %v8197_v1 }
  0xec   : > { %v9449_v4 = vpop.permute.xlu1 %1923  ;;  %v4641_v61 = vsel %vm327_vm5, %v4640_v17, %v4639_v36  ;;  %v1738_v62 = vsel %vm379_vm7, %v1736_v26, %v9305_v10  ;;  %v4433_v55 = vrot.slane %v4422_v52, 6  ;;  %v4426_v23 = vrot.slane %v4422_v52, 2  ;;  %v9476_v26 = vld [vmem:[%s8452_s11 + $0xc] ss:$0 sps:$4 sm:$0x88]  }
  0xed   : > { %4408 = vrot.lane.b32.xlu0 %v9436_v25, %s8353_s13  ;;  %v9457_v22 = vpack.c.b16 %v4641_v61, %v4641_v61  ;;  %v4434_v35 = vrot.slane %v4423_v60, 5  ;;  %v4436_v3 = vrot.slane %v4424_v18, 4  ;;  %v4438_v33 = vrot.slane %v4425_v48, 3 }
  0xee   : > { %v4427_v43 = vrot.slane %v4423_v60, 1  ;;  %v4430_v28 = vrot.slane %v4425_v48, 7  ;;  %7795 = vmatpush3.bf16.msra.mxu0 %v1545_v39  ;;  %v4661_v1 = vrot.slane %v9383_v37, 7  ;;  %v4662_v16 = vrot.slane %v9385_v11, 6 }
  0xef   : > { %v9459_v49 = vpop.permute.xlu0 %2121  ;;  %4652 = vrot.lane.b32.xlu1 %v9457_v22, %s8353_s13  ;;  %v4435_v10 = vsel %vm321_vm3, %v4434_v35, %v4433_v55  ;;  %v4664_v54 = vrot.slane %v9388_v50, 5  ;;  %7808 = vmatprep.subr.bf16.mxu0 %v11644_v58  ;;  %v4666_v45 = vrot.slane %v9390_v13, 4  ;;  %v4654_v24 = vrot.slane %v9383_v37, 3  ;;  %v9487_v37 = vld [vmem:[%s8452_s11 + $0x18] ss:$0 sps:$4 sm:$0x88]  }
  0xf0   : > { %v4437_v32 = vsel %vm324_vm4, %v4436_v3, %v4435_v10  ;;  %v4428_v17 = vsel %vm332_vm0, %v4427_v43, %v4426_v23  ;;  %v9478_v36 = vpop.permute.xlu1 %2123  ;;  %v4663_v60 = vsel %vm321_vm3, %v4662_v16, %v4661_v1  ;;  %v4655_v61 = vrot.slane %v9385_v11, 2  ;;  %v9490_v48 = vld [vmem:[%s8452_s11 + $0x24] ss:$0 sps:$4 sm:$0x88]  }
  0xf1   : > { %v4439_v39 = vsel %vm327_vm5, %v4438_v33, %v4437_v32  ;;  %v4429_v52 = vsel %vm335_vm1, %v4424_v18, %v4428_v17  ;;  %7797 = vmatmul.mubr.msk.bf16.vlgmr.msra.gmra.mrb[12].mxu0 %vm389_vm10, %v9027_v20  ;;  %v4665_v23 = vsel %vm324_vm4, %v4664_v54, %v4663_v60  ;;  %v4657_v18 = vrot.slane %v9388_v50, 1  ;;  %v9496_v3 = vld [vmem:[%s8452_s11 + $0x4] ss:$0 sps:$4 sm:$0x11]  }
  0xf2   : > { %v4440_v55 = vpack.c.b16 %v4439_v39, %v4439_v39  ;;  %v4431_v35 = vsel %vm338_vm2, %v4430_v28, %v4429_v52  ;;  %7812 = vmatprep.mubr.msk.bf16.mxu0 %vm8355_vm9, %v11644_v58  ;;  %v4667_v20 = vsel %vm327_vm5, %v4666_v45, %v4665_v23  ;;  %v4656_v33 = vsel %vm332_vm0, %v4655_v61, %v4654_v24  ;;  %v9507_v28 = vld [vmem:[%s8452_s11 + $0x10] ss:$0 sps:$4 sm:$0x11]   ;;  %v9510_v10 = vld [vmem:[%s8452_s11 + $0x1c] ss:$0 sps:$4 sm:$0x11]  }
  0xf3   : > { %v9500_v11 = vpack.c.b16 %v4431_v35, %v4431_v35  ;;  %v1740_v43 = vsel %vm382_vm8, %v1738_v62, %v8706_v30  ;;  %v9512_v50 = vpop.permute.xlu0 %2282  ;;  %v4668_v1 = vpack.c.b16 %v4667_v20, %v4667_v20  ;;  %v4658_v16 = vsel %vm335_vm1, %v4657_v18, %v4656_v33  ;;  %v9521_v17 = vld [vmem:[%s8452_s11 + $0x28] ss:$0 sps:$4 sm:$0x11]  }
  0xf4   : > { %4441 = vrot.lane.b32.xlu0 %v4440_v55, %s8352_s12  ;;  %7801 = vmatpush3.bf16.msra.mxu1 %v1740_v43  ;;  %v1744_v54 = vsel %vm375_vm6, %v9338_v57, %v9352_v0  ;;  %v1876_v32 = vrot.slane %v8690_v12, 7  ;;  %v4659_v30 = vsel %vm338_vm2, %v9390_v13, %v4658_v16  ;;  %v1878_v45 = vrot.slane %v8692_v14, 6 }
  0xf5   : > { %11649 = vst [vmem:[#allocation11_spill] sm:$0xff] %v9500_v11  ;;  %4443 = vrot.lane.b32.xlu1 %v9500_v11, %s8353_s13  ;;  %v1745_v62 = vsel %vm379_vm7, %v1744_v54, 0  ;;  %v1880_v24 = vrot.slane %v8698_v19, 5  ;;  %7802 = vmatprep.subr.bf16.mxu1 %v11644_v58  ;;  %v9531_v39 = vpack.c.b16 %v4659_v30, %v4659_v30  ;;  %v4863_v57 = vunpack.c.l.b16 %v9473_v21 }
  0xf6   : > { %v1877_v12 = vsel %vm321_vm3, %v1876_v32, %v8683_v5  ;;  %v4864_v0 = vunpack.c.l.b16 %v9476_v26  ;;  %v4865_v60 = vunpack.c.l.b16 %v9487_v37  ;;  %v4866_v14 = vunpack.c.l.b16 %v9490_v48 }
  0xf7   : > { %v9537_v52 = vpop.permute.xlu1 %2466  ;;  %v1879_v13 = vsel %vm324_vm4, %v1878_v45, %v1877_v12  ;;  %v9543_v19 = vunpack.c.l.b16 %v9496_v3  ;;  %v9545_v61 = vpop.permute.xlu0 %2284  ;;  %v4875_v21 = vrot.slane %v4863_v57, 3  ;;  %v9550_v26 = vunpack.c.l.b16 %v9507_v28 }
  0xf8   : > { %4669 = vrot.lane.b32.xlu0 %v4668_v1, %s8352_s12  ;;  %v1881_v5 = vsel %vm327_vm5, %v1880_v24, %v1879_v13  ;;  %v4876_v55 = vrot.slane %v4864_v0, 2  ;;  %7803 = vmatpush3.bf16.msra.mxu1 %v1745_v62  ;;  %v4878_v48 = vrot.slane %v4865_v60, 1  ;;  %v9555_v35 = vunpack.c.l.b16 %v9510_v10  ;;  %v9577_v62 = vld [vmem:[%s11621_s1] sm:$0xf] }
  0xf9   : > { %4671 = vrot.lane.b32.xlu1 %v9531_v39, %s8353_s13  ;;  %v1882_v37 = vpack.c.b16 %v1881_v5, %v1881_v5  ;;  %v9558_v23 = vunpack.c.l.b16 %v9521_v17  ;;  %7816 = vmatprep.subr.bf16.mxu1 %v11644_v58  ;;  %v5118_v20 = vrot.slane %v9543_v19, 4  ;;  %v5119_v33 = vrot.slane %v9550_v26, 3  ;;  %v8207_v13 = vld [vmem:[%s8452_s11 + $0x10] ss:$0 sps:$4 sm:$0x11]  }
  0xfa   : > { %v4877_v18 = vsel %vm332_vm0, %v4876_v55, %v4875_v21  ;;  %v2127_v43 = vsel %vm375_vm6, %v8737_v34, %v9406_v7  ;;  %v5121_v32 = vrot.slane %v9555_v35, 2  ;;  %v8206_v34 = vld [vmem:[%s8452_s11 + $0x4] ss:$0 sps:$4 sm:$0x11]   ;;  %v4867_v12 = vrot.slane %v4863_v57, 7 }
  0xfb   : > { %v9567_v1 = vpop.permute.xlu1 %2468  ;;  %v1927_v16 = vsel %vm375_vm6, %v1882_v37, %v9375_v63  ;;  %v4879_v54 = vsel %vm335_vm1, %v4878_v48, %v4877_v18  ;;  %v5123_v30 = vrot.slane %v9558_v23, 1  ;;  %7805 = vmatmul.mubr.msk.bf16.vlgmr.msra.gmra.mrb[12].mxu1 %vm389_vm10, %v9577_v62  ;;  %v9582_v7 = vpop.permute.xlu0 %2301  ;;  %v5120_v45 = vsel %vm332_vm0, %v5119_v33, %v5118_v20  ;;  %v8208_v48 = vld [vmem:[%s8452_s11 + $0x1c] ss:$0 sps:$4 sm:$0x11]  }
  0xfc   : > { %v4880_v63 = vsel %vm338_vm2, %v4866_v14, %v4879_v54  ;;  %v1929_v24 = vsel %vm379_vm7, %v1927_v16, %v9392_v6  ;;  %7820 = vmatprep.mubr.msk.bf16.mxu1 %vm8355_vm9, %v11644_v58  ;;  %v5122_v21 = vsel %vm335_vm1, %v5121_v32, %v5120_v45  ;;  %v4868_v55 = vrot.slane %v4864_v0, 6  ;;  %v8209_v33 = vld [vmem:[%s8452_s11 + $0x28] ss:$0 sps:$4 sm:$0x11]  }
  0xfd   : > { %v4881_v5 = vpack.c.b16 %v4880_v63, %v4880_v63  ;;  %v4870_v37 = vrot.slane %v4865_v60, 5  ;;  %v5124_v18 = vsel %vm338_vm2, %v5123_v30, %v5122_v21  ;;  %v4872_v11 = vrot.slane %v4866_v14, 4 }
  0xfe   : > { %v5128_v54 = vunpack.c.h.b16 %v9496_v3  ;;  %v5129_v20 = vunpack.c.h.b16 %v9507_v28  ;;  %v5125_v57 = vpack.c.b16 %v5124_v18, %v5124_v18  ;;  %v4869_v16 = vsel %vm321_vm3, %v4868_v55, %v4867_v12 }
  0xff   : > { %v9597_v6 = vpop.permute.xlu1 %2303  ;;  %4882 = vrot.lane.b32.xlu0 %v4881_v5, %s8352_s12  ;;  %v5130_v32 = vunpack.c.h.b16 %v9510_v10  ;;  %v5131_v0 = vunpack.c.h.b16 %v9521_v17  ;;  %v4871_v60 = vsel %vm324_vm4, %v4870_v37, %v4869_v16  ;;  %v1931_v3 = vsel %vm382_vm8, %v1929_v24, %v8756_v2 }
 0x100   : > { %v5132_v30 = vrot.slane %v5129_v20, 7  ;;  %v2129_v28 = vsel %vm379_vm7, %v2127_v43, %v9419_v47  ;;  %5126 = vrot.lane.b32.xlu1 %v5125_v57, %s8352_s12  ;;  %v4873_v14 = vsel %vm327_vm5, %v4872_v11, %v4871_v60  ;;  %7809 = vmatpush3.bf16.msra.mxu0 %v1931_v3  ;;  %v4898_v12 = vunpack.c.l.b16 %v8206_v34 }
 0x101   : > { %v5134_v63 = vrot.slane %v5130_v32, 6  ;;  %v5136_v45 = vrot.slane %v5131_v0, 5  ;;  %v9610_v10 = vpop.permute.xlu0 %2505  ;;  %v9612_v17 = vpack.c.b16 %v4873_v14, %v4873_v14  ;;  %v4899_v21 = vunpack.c.l.b16 %v8207_v13  ;;  %7810 = vmatprep.subr.bf16.mxu0 %v11644_v58 }
 0x102   : > { %v5133_v5 = vsel %vm321_vm3, %v5132_v30, %v5128_v54  ;;  %v4900_v55 = vunpack.c.l.b16 %v8208_v48  ;;  %v4901_v11 = vunpack.c.l.b16 %v8209_v33  ;;  %v4902_v43 = vrot.slane %v4898_v12, 4  ;;  %v9625_v33 = vld [vmem:[%s8452_s11 + $0x4] ss:$0 sps:$4 sm:$0x11]  }
 0x103   : > { %v9616_v2 = vpop.permute.xlu1 %2514  ;;  %v5135_v47 = vsel %vm324_vm4, %v5134_v63, %v5133_v5  ;;  %v2131_v34 = vsel %vm382_vm8, %v2129_v28, %v8779_v38  ;;  %4884 = vrot.lane.b32.xlu0 %v9612_v17, %s8353_s13  ;;  %v4910_v13 = vrot.slane %v4899_v21, 7  ;;  %v4903_v48 = vrot.slane %v4899_v21, 3  ;;  %v9637_v30 = vld [vmem:[%s8452_s11 + $0x10] ss:$0 sps:$4 sm:$0x11]  }
 0x104   : > { %v5137_v24 = vsel %vm327_vm5, %v5136_v45, %v5135_v47  ;;  %v4912_v37 = vrot.slane %v4900_v55, 6  ;;  %7817 = vmatpush3.bf16.msra.mxu1 %v2131_v34  ;;  %v4914_v54 = vrot.slane %v4901_v11, 5  ;;  %v4905_v20 = vrot.slane %v4900_v55, 2  ;;  %v9645_v45 = vld [vmem:[%s8452_s11 + $0x1c] ss:$0 sps:$4 sm:$0x11]  }
 0x105   : > { %v5138_v18 = vpack.c.b16 %v5137_v24, %v5137_v24  ;;  %v4907_v57 = vrot.slane %v4901_v11, 1  ;;  %7818 = vmatprep.subr.bf16.mxu1 %v11644_v58  ;;  %v9628_v38 = vpop.permute.xlu0 %2673  ;;  %v4911_v16 = vsel %vm321_vm3, %v4910_v13, %v4898_v12  ;;  %v4904_v32 = vsel %vm332_vm0, %v4903_v48, %v4902_v43  ;;  %v9653_v21 = vld [vmem:[%s8452_s11 + $0x28] ss:$0 sps:$4 sm:$0x11]  }
 0x106   : > { %v1935_v0 = vsel %vm375_vm6, %v9434_v56, %v9449_v4  ;;  %v5149_v60 = vrot.slane %v9543_v19, 1  ;;  %v4913_v3 = vsel %vm324_vm4, %v4912_v37, %v4911_v16  ;;  %v4906_v28 = vsel %vm335_vm1, %v4905_v20, %v4904_v32  ;;  %v8214_v24 = vld [vmem:[%s8452_s11 + $0x4] ss:$0 sps:$4 sm:$0x22]  }
 0x107   : > { %5139 = vrot.lane.b32.xlu1 %v5138_v18, %s8353_s13  ;;  %v1936_v14 = vsel %vm379_vm7, %v1935_v0, 0  ;;  %v5151_v63 = vrot.slane %v9555_v35, 7  ;;  %v4915_v12 = vsel %vm327_vm5, %v4914_v54, %v4913_v3  ;;  %v4908_v56 = vsel %vm338_vm2, %v4907_v57, %v4906_v28  ;;  %v8215_v20 = vld [vmem:[%s8452_s11 + $0x10] ss:$0 sps:$4 sm:$0x22]  }
 0x108   : > { %v5150_v4 = vsel %vm321_vm3, %v9550_v26, %v5149_v60  ;;  %v5153_v5 = vrot.slane %v9558_v23, 6  ;;  %7811 = vmatpush3.bf16.msra.mxu0 %v1936_v14  ;;  %v9655_v55 = vpop.permute.xlu1 %2857  ;;  %v4916_v47 = vpack.c.b16 %v4915_v12, %v4915_v12  ;;  %v9657_v11 = vpack.c.b16 %v4908_v56, %v4908_v56  ;;  %v8216_v60 = vld [vmem:[%s8452_s11 + $0x1c] ss:$0 sps:$4 sm:$0x22]  }
 0x109   : > { %v5152_v43 = vsel %vm324_vm4, %v5151_v63, %v5150_v4  ;;  %v5141_v34 = vrot.slane %v9543_v19, 5  ;;  %7824 = vmatprep.subr.bf16.mxu0 %v11644_v58  ;;  %v9663_v13 = vpop.permute.xlu0 %2675  ;;  %v5142_v48 = vrot.slane %v9550_v26, 4  ;;  %v5144_v18 = vrot.slane %v9555_v35, 3  ;;  %v8217_v3 = vld [vmem:[%s8452_s11 + $0x28] ss:$0 sps:$4 sm:$0x22]  }
 0x10a   : > { %11650 = vst [vmem:[#allocation12_spill] sm:$0xff] %v9657_v11  ;;  %v5154_v37 = vsel %vm327_vm5, %v5153_v5, %v5152_v43  ;;  %v5146_v54 = vrot.slane %v9558_v23, 2  ;;  %4917 = vrot.lane.b32.xlu0 %v4916_v47, %s8352_s12  ;;  %v2135_v16 = vsel %vm375_vm6, %v9459_v49, %v9478_v36  ;;  %v2307_v32 = vsel %vm375_vm6, %v8805_v31, %v9512_v50 }
 0x10b   : > { %4919 = vrot.lane.b32.xlu1 %v9657_v11, %s8353_s13  ;;  %v5155_v57 = vpack.c.b16 %v5154_v37, %v5154_v37  ;;  %v5350_v0 = vunpack.c.l.b16 %v9625_v33  ;;  %v5143_v28 = vsel %vm332_vm0, %v5142_v48, %v5141_v34  ;;  %v2136_v14 = vsel %vm379_vm7, %v2135_v16, 0  ;;  %7813 = vmatmul.mubr.msk.bf16.vlgmr.msra.gmra.mrb[16].mxu0 %vm389_vm10, %v9577_v62 }
 0x10c   : > { %v5351_v63 = vunpack.c.l.b16 %v9637_v30  ;;  %v5352_v12 = vunpack.c.l.b16 %v9645_v45  ;;  %v9688_v49 = vpop.permute.xlu1 %2859  ;;  %v5145_v36 = vsel %vm335_vm1, %v5144_v18, %v5143_v28  ;;  %v5353_v31 = vunpack.c.l.b16 %v9653_v21  ;;  %7819 = vmatpush3.bf16.msra.mxu1 %v2136_v14  ;;  %7828 = vmatprep.mubr.msk.bf16.mxu0 %vm8355_vm9, %v11644_v58 }
 0x10d   : > { %v5361_v50 = vrot.slane %v5350_v0, 5  ;;  %v9692_v33 = vunpack.c.l.b16 %v8214_v24  ;;  %v5147_v30 = vsel %vm338_vm2, %v5146_v54, %v5145_v36  ;;  %v9699_v5 = vunpack.c.l.b16 %v8215_v20  ;;  %7832 = vmatprep.subr.bf16.mxu1 %v11644_v58  ;;  %v8218_v54 = vld [vmem:[%s8452_s11 + $0x4] ss:$0 sps:$4 sm:$0x22]  }
 0x10e   : > { %v9696_v56 = vpop.permute.xlu0 %2692  ;;  %v5362_v45 = vrot.slane %v5351_v63, 4  ;;  %v5364_v4 = vrot.slane %v5352_v12, 3  ;;  %5156 = vrot.lane.b32.xlu0 %v5155_v57, %s8352_s12  ;;  %v9703_v21 = vpack.c.b16 %v5147_v30, %v5147_v30  ;;  %v5366_v47 = vrot.slane %v5353_v31, 2 }
 0x10f   : > { %v9705_v43 = vunpack.c.l.b16 %v8216_v60  ;;  %v9707_v34 = vunpack.c.l.b16 %v8217_v3  ;;  %v5605_v37 = vrot.slane %v9692_v33, 6  ;;  %v5606_v48 = vrot.slane %v9699_v5, 5  ;;  %7821 = vmatmul.mubr.msk.bf16.vlgmr.msra.gmra.mrb[16].mxu1 %vm389_vm10, %v9577_v62 }
 0x110   : > { %11651 = vst [vmem:[#allocation13_spill] sm:$0xff] %v9703_v21  ;;  %v5363_v24 = vsel %vm332_vm0, %v5362_v45, %v5361_v50  ;;  %v2518_v18 = vsel %vm375_vm6, %v8823_v8, %v9537_v52  ;;  %v9718_v20 = vpop.permute.xlu1 %2694  ;;  %5158 = vrot.lane.b32.xlu1 %v9703_v21, %s8353_s13  ;;  %v2309_v3 = vsel %vm379_vm7, %v2307_v32, %v9545_v61  ;;  %v8219_v8 = vld [vmem:[%s8452_s11 + $0x10] ss:$0 sps:$4 sm:$0x22]   ;;  %v5354_v14 = vrot.slane %v5350_v0, 1 }
 0x111   : > { %v5365_v57 = vsel %vm335_vm1, %v5364_v4, %v5363_v24  ;;  %v5608_v16 = vrot.slane %v9705_v43, 4  ;;  %v5610_v60 = vrot.slane %v9707_v34, 3  ;;  %7836 = vmatprep.mubr.msk.bf16.mxu1 %vm8355_vm9, %v11644_v58  ;;  %v5607_v28 = vsel %vm332_vm0, %v5606_v48, %v5605_v37  ;;  %v8220_v50 = vld [vmem:[%s8452_s11 + $0x1c] ss:$0 sps:$4 sm:$0x22]  }
 0x112   : > { %v5367_v52 = vsel %vm338_vm2, %v5366_v47, %v5365_v57  ;;  %v5356_v36 = vrot.slane %v5352_v12, 7  ;;  %v5358_v4 = vrot.slane %v5353_v31, 6  ;;  %v5598_v24 = vrot.slane %v9692_v33, 2  ;;  %v8221_v21 = vld [vmem:[%s8452_s11 + $0x28] ss:$0 sps:$4 sm:$0x22]   ;;  %v9736_v11 = vpop.permute.xlu0 %2892 }
 0x113   : > { %v5368_v30 = vpack.c.b16 %v5367_v52, %v5367_v52  ;;  %v5609_v45 = vsel %vm335_vm1, %v5608_v16, %v5607_v28  ;;  %v5355_v32 = vsel %vm321_vm3, %v5351_v63, %v5354_v14  ;;  %v5599_v47 = vrot.slane %v9699_v5, 1 }
 0x114   : > { %v5611_v61 = vsel %vm338_vm2, %v5610_v60, %v5609_v45  ;;  %v5602_v37 = vrot.slane %v9707_v34, 7  ;;  %v5357_v12 = vsel %vm324_vm4, %v5356_v36, %v5355_v32  ;;  %v9746_v31 = vsel %vm379_vm7, %v2518_v18, %v9567_v1  ;;  %v9752_v52 = vpop.permute.xlu1 %2894 }
 0x115   : > { %5369 = vrot.lane.b32.xlu0 %v5368_v30, %s8352_s12  ;;  %v5612_v0 = vpack.c.b16 %v5611_v61, %v5611_v61  ;;  %v2311_v48 = vsel %vm382_vm8, %v2309_v3, %v8837_v27  ;;  %v5359_v57 = vsel %vm327_vm5, %v5358_v4, %v5357_v12  ;;  %v5600_v63 = vsel %vm321_vm3, %v5599_v47, %v5598_v24  ;;  %v8263_v61 = vld [vmem:[%s8452_s11 + $0x4] ss:$0 sps:$4 sm:$0x44]   ;;  %v8264_v47 = vld [vmem:[%s8452_s11 + $0x10] ss:$0 sps:$4 sm:$0x44]  }
 0x116   : > { %7825 = vmatpush3.bf16.msra.mxu0 %v2311_v48  ;;  %v5385_v16 = vunpack.c.l.b16 %v8218_v54  ;;  %v5386_v60 = vunpack.c.l.b16 %v8219_v8  ;;  %v9755_v28 = vpack.c.b16 %v5359_v57, %v5359_v57  ;;  %v5601_v1 = vsel %vm324_vm4, %v9705_v43, %v5600_v63  ;;  %v8265_v48 = vld [vmem:[%s8452_s11 + $0x1c] ss:$0 sps:$4 sm:$0x44]   ;;  %v8266_v63 = vld [vmem:[%s8452_s11 + $0x28] ss:$0 sps:$4 sm:$0x44]  }
 0x117   : > { %5613 = vrot.lane.b32.xlu1 %v5612_v0, %s8352_s12  ;;  %v5387_v18 = vunpack.c.l.b16 %v8220_v50  ;;  %v5388_v14 = vunpack.c.l.b16 %v8221_v21  ;;  %7826 = vmatprep.subr.bf16.mxu0 %v11644_v58  ;;  %v5603_v27 = vsel %vm327_vm5, %v5602_v37, %v5601_v1  ;;  %v2482_v32 = vunpack.c.h.b16 %v8263_v61 }
 0x118   : > { %v5397_v3 = vrot.slane %v5385_v16, 2  ;;  %v5398_v54 = vrot.slane %v5386_v60, 1  ;;  %v5389_v8 = vrot.slane %v5385_v16, 6  ;;  %v9763_v36 = vpack.c.b16 %v5603_v27, %v5603_v27  ;;  %v9765_v50 = vpop.permute.xlu0 %3053 }
 0x119   : > { %5371 = vrot.lane.b32.xlu0 %v9755_v28, %s8353_s13  ;;  %v5401_v30 = vrot.slane %v5388_v14, 7  ;;  %v5390_v45 = vrot.slane %v5386_v60, 5  ;;  %v5392_v4 = vrot.slane %v5387_v18, 4  ;;  %v5394_v24 = vrot.slane %v5388_v14, 3 }
 0x11a   : > { %v5399_v21 = vsel %vm321_vm3, %v5398_v54, %v5397_v3  ;;  %v2483_v37 = vunpack.c.h.b16 %v8264_v47  ;;  %v2484_v57 = vunpack.c.h.b16 %v8265_v48  ;;  %v2485_v16 = vunpack.c.h.b16 %v8266_v63 }
 0x11b   : > { %5615 = vrot.lane.b32.xlu1 %v9763_v36, %s8353_s13  ;;  %v5400_v0 = vsel %vm324_vm4, %v5387_v18, %v5399_v21  ;;  %v5391_v12 = vsel %vm332_vm0, %v5390_v45, %v5389_v8  ;;  %v2315_v27 = vsel %vm375_vm6, %v9582_v7, %v9597_v6  ;;  %v9785_v21 = vld [vmem:[%s8452_s11 + $0x4] ss:$0 sps:$4 sm:$0x22]   ;;  %v5625_v47 = vrot.slane %v9692_v33, 3 }
 0x11c   : > { %v5402_v60 = vsel %vm327_vm5, %v5401_v30, %v5400_v0  ;;  %v5393_v1 = vsel %vm335_vm1, %v5392_v4, %v5391_v12  ;;  %v2486_v14 = vrot.slane %v2483_v37, 7  ;;  %v9781_v3 = vpop.permute.xlu1 %3237  ;;  %v2488_v8 = vrot.slane %v2484_v57, 6  ;;  %v9793_v7 = vld [vmem:[%s8452_s11 + $0x10] ss:$0 sps:$4 sm:$0x22]  }
 0x11d   : > { %v5403_v54 = vpack.c.b16 %v5402_v60, %v5402_v60  ;;  %v5395_v18 = vsel %vm338_vm2, %v5394_v24, %v5393_v1  ;;  %v2490_v45 = vrot.slane %v2485_v16, 5  ;;  %v2316_v4 = vsel %vm379_vm7, %v2315_v27, 0  ;;  %v9801_v12 = vpop.permute.xlu0 %3055  ;;  %v9810_v60 = vld [vmem:[%s8452_s11 + $0x28] ss:$0 sps:$4 sm:$0x22]  }
 0x11e   : > { %v9787_v61 = vpack.c.b16 %v5395_v18, %v5395_v18  ;;  %v2487_v30 = vsel %vm332_vm0, %v2486_v14, %v2482_v32  ;;  %v5626_v24 = vrot.slane %v9699_v5, 2  ;;  %v5628_v37 = vrot.slane %v9705_v43, 1  ;;  %7827 = vmatpush3.bf16.msra.mxu0 %v2316_v4  ;;  %v8224_v32 = vld [vmem:[%s8452_s11 + $0x1c] ss:$0 sps:$4 sm:$0x22]  }
 0x11f   : > { %5404 = vrot.lane.b32.xlu0 %v5403_v54, %s8352_s12  ;;  %v2489_v6 = vsel %vm335_vm1, %v2488_v8, %v2487_v30  ;;  %v5617_v0 = vrot.slane %v9692_v33, 7  ;;  %v5618_v57 = vrot.slane %v9699_v5, 6  ;;  %v5620_v63 = vrot.slane %v9705_v43, 5  ;;  %7840 = vmatprep.subr.bf16.mxu0 %v11644_v58  ;;  %v8226_v43 = vld [vmem:[%s8452_s11 + $0x4] ss:$0 sps:$4 sm:$0x44]  }
 0x120   : > { %5406 = vrot.lane.b32.xlu1 %v9787_v61, %s8353_s13  ;;  %v2491_v48 = vsel %vm338_vm2, %v2490_v45, %v2489_v6  ;;  %v5622_v16 = vrot.slane %v9707_v34, 4  ;;  %v9813_v33 = vpop.permute.xlu1 %3239  ;;  %v5627_v14 = vsel %vm321_vm3, %v5626_v24, %v5625_v47  ;;  %v2526_v27 = vsel %vm375_vm6, %v9610_v10, %v9616_v2  ;;  %v8227_v54 = vld [vmem:[%s8452_s11 + $0x10] ss:$0 sps:$4 sm:$0x44]  }
 0x121   : > { %v2492_v1 = vpack.c.b16 %v2491_v48, %v2491_v48  ;;  %v2698_v5 = vsel %vm375_vm6, %v8883_v51, %v9628_v38  ;;  %v5629_v18 = vsel %vm324_vm4, %v5628_v37, %v5627_v14  ;;  %v5619_v8 = vsel %vm332_vm0, %v5618_v57, %v5617_v0  ;;  %v8228_v4 = vld [vmem:[%s8452_s11 + $0x1c] ss:$0 sps:$4 sm:$0x44]   ;;  %7829 = vmatmul.mubr.msk.bf16.vlgmr.msra.gmra.mrb[20].mxu0 %vm389_vm10, %v9577_v62  ;;  %v8229_v47 = vld [vmem:[%s8452_s11 + $0x28] ss:$0 sps:$4 sm:$0x44]  }
 0x122   : > { %v2527_v45 = vsel %vm379_vm7, %v2526_v27, 0  ;;  %v5826_v30 = vunpack.c.l.b16 %v9785_v21  ;;  %v5630_v51 = vsel %vm327_vm5, %v9707_v34, %v5629_v18  ;;  %v5621_v2 = vsel %vm335_vm1, %v5620_v63, %v5619_v8  ;;  %7844 = vmatprep.mubr.msk.bf16.mxu0 %vm8355_vm9, %v11644_v58 }
 0x123   : > { %v2522_v10 = vsel %vm382_vm8, %v9746_v31, %v2492_v1  ;;  %v5827_v38 = vunpack.c.l.b16 %v9793_v7  ;;  %v5631_v21 = vpack.c.b16 %v5630_v51, %v5630_v51  ;;  %v5623_v6 = vsel %vm338_vm2, %v5622_v16, %v5621_v2  ;;  %v9847_v7 = vpop.permute.xlu0 %3072 }
 0x124   : > { %7833 = vmatpush3.bf16.msra.mxu1 %v2522_v10  ;;  %v5828_v24 = vunpack.c.l.b16 %v8224_v32  ;;  %v5829_v37 = vunpack.c.l.b16 %v9810_v60  ;;  %v9842_v0 = vpack.c.b16 %v5623_v6, %v5623_v6  ;;  %v5837_v31 = vrot.slane %v5826_v30, 7  ;;  %v9870_v10 = vld [vmem:[%s8452_s11 + $0x4] ss:$0 sps:$4 sm:$0x44]  }
 0x125   : > { %v5838_v48 = vrot.slane %v5827_v38, 6  ;;  %v9844_v34 = vunpack.c.l.b16 %v8226_v43  ;;  %7834 = vmatprep.subr.bf16.mxu1 %v11644_v58  ;;  %5632 = vrot.lane.b32.xlu0 %v5631_v21, %s8352_s12  ;;  %v9850_v1 = vunpack.c.l.b16 %v8227_v54  ;;  %v9852_v32 = vunpack.c.l.b16 %v8228_v4  ;;  %v9854_v16 = vpop.permute.xlu1 %3074  ;;  %v9883_v21 = vld [vmem:[%s8452_s11 + $0x1c] ss:$0 sps:$4 sm:$0x44]  }
 0x126   : > { %v5840_v57 = vrot.slane %v5828_v24, 5  ;;  %v5842_v63 = vrot.slane %v5829_v37, 4  ;;  %5634 = vrot.lane.b32.xlu1 %v9842_v0, %s8353_s13  ;;  %v9859_v14 = vunpack.c.l.b16 %v8229_v47  ;;  %v2898_v27 = vsel %vm375_vm6, %v8895_v59, %v9655_v55  ;;  %v9875_v47 = vld [vmem:[%s8452_s11 + $0x10] ss:$0 sps:$4 sm:$0x44]  }
 0x127   : > { %v5839_v60 = vsel %vm332_vm0, %v5838_v48, %v5837_v31  ;;  %v2700_v43 = vsel %vm379_vm7, %v2698_v5, %v9663_v13  ;;  %v6093_v18 = vrot.slane %v9850_v1, 7  ;;  %v6095_v8 = vrot.slane %v9852_v32, 6  ;;  %v9892_v48 = vld [vmem:[%s8452_s11 + $0x28] ss:$0 sps:$4 sm:$0x44]  }
 0x128   : > { %v5841_v54 = vsel %vm335_vm1, %v5840_v57, %v5839_v60  ;;  %7835 = vmatpush3.bf16.msra.mxu1 %v2527_v45  ;;  %v5830_v4 = vrot.slane %v5826_v30, 3  ;;  %v6097_v2 = vrot.slane %v9859_v14, 5  ;;  %v5831_v59 = vrot.slane %v5827_v38, 2  ;;  %v9894_v57 = vpop.permute.xlu0 %3272 }
 0x129   : > { %v5843_v51 = vsel %vm338_vm2, %v5842_v63, %v5841_v54  ;;  %v5833_v55 = vrot.slane %v5828_v24, 1  ;;  %7848 = vmatprep.subr.bf16.mxu1 %v11644_v58  ;;  %v6094_v5 = vsel %vm332_vm0, %v6093_v18, %v9844_v34  ;;  %v6085_v45 = vrot.slane %v9844_v34, 4 }
 0x12a   : > { %v5844_v13 = vpack.c.b16 %v5843_v51, %v5843_v51  ;;  %v6086_v30 = vrot.slane %v9850_v1, 3  ;;  %v6096_v6 = vsel %vm335_vm1, %v6095_v8, %v6094_v5  ;;  %v5832_v31 = vsel %vm321_vm3, %v5831_v59, %v5830_v4  ;;  %v9902_v8 = vpop.permute.xlu1 %3274 }
 0x12b   : > { %v6088_v38 = vrot.slane %v9852_v32, 2  ;;  %v6090_v24 = vrot.slane %v9859_v14, 1  ;;  %7837 = vmatmul.mubr.msk.bf16.vlgmr.msra.gmra.mrb[20].mxu1 %vm389_vm10, %v9577_v62  ;;  %v6098_v63 = vsel %vm338_vm2, %v6097_v2, %v6096_v6  ;;  %v5834_v60 = vsel %vm324_vm4, %v5833_v55, %v5832_v31 }
 0x12c   : > { %5845 = vrot.lane.b32.xlu0 %v5844_v13, %s8352_s12  ;;  %v6087_v54 = vsel %vm321_vm3, %v6086_v30, %v6085_v45  ;;  %v2900_v18 = vsel %vm379_vm7, %v2898_v27, %v9688_v49  ;;  %v6099_v4 = vpack.c.b16 %v6098_v63, %v6098_v63  ;;  %v5835_v51 = vsel %vm327_vm5, %v5829_v37, %v5834_v60 }
 0x12d   : > { %v6089_v59 = vsel %vm324_vm4, %v6088_v38, %v6087_v54  ;;  %v2702_v5 = vsel %vm382_vm8, %v2700_v43, %v8917_v42  ;;  %7852 = vmatprep.mubr.msk.bf16.mxu1 %vm8355_vm9, %v11644_v58  ;;  %v9910_v2 = vpack.c.b16 %v5835_v51, %v5835_v51  ;;  %v5872_v49 = vunpack.c.l.b16 %v9870_v10 }
 0x12e   : > { %v6091_v55 = vsel %vm327_vm5, %v6090_v24, %v6089_v59  ;;  %7841 = vmatpush3.bf16.msra.mxu0 %v2702_v5  ;;  %v5873_v27 = vunpack.c.l.b16 %v9875_v47  ;;  %6100 = vrot.lane.b32.xlu1 %v6099_v4, %s8352_s12  ;;  %v5874_v13 = vunpack.c.l.b16 %v9883_v21  ;;  %v5875_v42 = vunpack.c.l.b16 %v9892_v48 }
 0x12f   : > { %11652 = vst [vmem:[#allocation14_spill] sm:$0xff] %v9910_v2  ;;  %v9916_v37 = vpack.c.b16 %v6091_v55, %v6091_v55  ;;  %v2902_v43 = vsel %vm382_vm8, %v2900_v18, %v8949_v9  ;;  %7842 = vmatprep.subr.bf16.mxu0 %v11644_v58  ;;  %v5876_v45 = vrot.slane %v5872_v49, 4  ;;  %v2706_v31 = vsel %vm375_vm6, %v9696_v56, %v9718_v20  ;;  %v9929_v9 = vpop.permute.xlu0 %3439  ;;  %v9936_v56 = vld [vmem:[%s8452_s11 + $0x4] ss:$0 sps:$4 sm:$0x44]  }
 0x130   : > { %5847 = vrot.lane.b32.xlu0 %v9910_v2, %s8353_s13  ;;  %v5877_v30 = vrot.slane %v5873_v27, 3  ;;  %v5886_v6 = vrot.slane %v5873_v27, 7  ;;  %7849 = vmatpush3.bf16.msra.mxu1 %v2902_v43  ;;  %v5879_v38 = vrot.slane %v5874_v13, 2  ;;  %v5881_v24 = vrot.slane %v5875_v42, 1 }
 0x131   : > { %11653 = vst [vmem:[#allocation15_spill] sm:$0xff] %v9916_v37  ;;  %v5888_v63 = vrot.slane %v5874_v13, 6  ;;  %v5890_v60 = vrot.slane %v5875_v42, 5  ;;  %7850 = vmatprep.subr.bf16.mxu1 %v11644_v58  ;;  %v2707_v4 = vsel %vm379_vm7, %v2706_v31, 0  ;;  %v6111_v51 = vrot.slane %v9844_v34, 5 }
 0x132   : > { %v5878_v54 = vsel %vm321_vm3, %v5877_v30, %v5876_v45  ;;  %v5887_v18 = vsel %vm332_vm0, %v5886_v6, %v5872_v49  ;;  %v9939_v20 = vld [vmem:[%s8452_s11 + $0x10] ss:$0 sps:$4 sm:$0x44]   ;;  %v9941_v59 = vpop.permute.xlu1 %3687  ;;  %6102 = vrot.lane.b32.xlu1 %v9916_v37, %s8353_s13  ;;  %v6112_v49 = vrot.slane %v9850_v1, 4  ;;  %v6114_v27 = vrot.slane %v9852_v32, 3  ;;  %7843 = vmatpush3.bf16.msra.mxu0 %v2707_v4 }
 0x133   : > { %v5880_v5 = vsel %vm324_vm4, %v5879_v38, %v5878_v54  ;;  %v5889_v55 = vsel %vm335_vm1, %v5888_v63, %v5887_v18  ;;  %v8236_v13 = vld [vmem:[%s8452_s11 + $0x1c] ss:$0 sps:$4 sm:$0x44]   ;;  %v9951_v42 = vld [vmem:[%s8452_s11 + $0x28] ss:$0 sps:$4 sm:$0x44]   ;;  %7856 = vmatprep.subr.bf16.mxu0 %v11644_v58 }
 0x134   : > { %v8238_v43 = vld [vmem:[%s8452_s11 + $0x4] ss:$0 sps:$4 sm:$0x88]   ;;  %v5882_v45 = vsel %vm327_vm5, %v5881_v24, %v5880_v5  ;;  %v5891_v30 = vsel %vm338_vm2, %v5890_v60, %v5889_v55  ;;  %v6116_v6 = vrot.slane %v9859_v14, 2  ;;  %v6104_v31 = vrot.slane %v9844_v34, 1 }
 0x135   : > { %v8239_v38 = vld [vmem:[%s8452_s11 + $0x10] ss:$0 sps:$4 sm:$0x88]   ;;  %v5883_v63 = vpack.c.b16 %v5882_v45, %v5882_v45  ;;  %v5892_v54 = vpack.c.b16 %v5891_v30, %v5891_v30  ;;  %v6113_v18 = vsel %vm321_vm3, %v6112_v49, %v6111_v51  ;;  %v6106_v4 = vrot.slane %v9852_v32, 7  ;;  %7845 = vmatmul.mubr.msk.bf16.vlgmr.msra.gmra.mrb[24].mxu0 %vm389_vm10, %v9577_v62 }
 0x136   : > { %v8240_v37 = vld [vmem:[%s8452_s11 + $0x1c] ss:$0 sps:$4 sm:$0x88]   ;;  %v6115_v2 = vsel %vm324_vm4, %v6114_v27, %v6113_v18  ;;  %v6105_v24 = vsel %vm332_vm0, %v9850_v1, %v6104_v31  ;;  %v6108_v60 = vrot.slane %v9859_v14, 6  ;;  %v2906_v34 = vsel %vm375_vm6, %v9736_v11, %v9752_v52  ;;  %v9973_v55 = vpop.permute.xlu1 %3689  ;;  %v9983_v52 = vpop.permute.xlu0 %3441  ;;  %7860 = vmatprep.mubr.msk.bf16.mxu0 %vm8355_vm9, %v11644_v58 }
 0x137   : > { %v8241_v5 = vld [vmem:[%s8452_s11 + $0x28] ss:$0 sps:$4 sm:$0x88]   ;;  %5884 = vrot.lane.b32.xlu0 %v5883_v63, %s8352_s12  ;;  %5893 = vrot.lane.b32.xlu1 %v5892_v54, %s8353_s13  ;;  %v6117_v32 = vsel %vm327_vm5, %v6116_v6, %v6115_v2  ;;  %v6107_v1 = vsel %vm335_vm1, %v6106_v4, %v6105_v24  ;;  %v2907_v14 = vsel %vm379_vm7, %v2906_v34, 0  ;;  %v3078_v11 = vsel %vm375_vm6, %v8983_v40, %v9765_v50 }
 0x138   : > { %v6118_v51 = vpack.c.b16 %v6117_v32, %v6117_v32  ;;  %v6109_v49 = vsel %vm338_vm2, %v6108_v60, %v6107_v1  ;;  %v6313_v27 = vunpack.c.l.b16 %v9936_v56  ;;  %v6314_v45 = vunpack.c.l.b16 %v9939_v20  ;;  %7851 = vmatpush3.bf16.msra.mxu1 %v2907_v14  ;;  %v8242_v24 = vld [vmem:[%s8452_s11 + $0x4] ss:$0 sps:$4 sm:$0x88]   ;;  %v8243_v32 = vld [vmem:[%s8452_s11 + $0x10] ss:$0 sps:$4 sm:$0x88]  }
 0x139   : > { %v9990_v2 = vpack.c.b16 %v6109_v49, %v6109_v49  ;;  %v6315_v30 = vunpack.c.l.b16 %v8236_v13  ;;  %v6316_v6 = vunpack.c.l.b16 %v9951_v42  ;;  %v9993_v31 = vunpack.c.l.b16 %v8238_v43  ;;  %7864 = vmatprep.subr.bf16.mxu1 %v11644_v58 }
 0x13a   : > { %v6325_v40 = vrot.slane %v6313_v27, 1  ;;  %v9996_v50 = vunpack.c.l.b16 %v8239_v38  ;;  %v9998_v56 = vunpack.c.l.b16 %v8240_v37  ;;  %v10000_v20 = vunpack.c.l.b16 %v8241_v5  ;;  %v10009_v38 = vpop.permute.xlu0 %3474  ;;  %v10019_v60 = vpop.permute.xlu1 %3476 }
 0x13b   : > { %6119 = vrot.lane.b32.xlu0 %v6118_v51, %s8352_s12  ;;  %6121 = vrot.lane.b32.xlu1 %v9990_v2, %s8353_s13  ;;  %v6327_v13 = vrot.slane %v6315_v30, 7  ;;  %v6329_v42 = vrot.slane %v6316_v6, 6  ;;  %v6569_v43 = vrot.slane %v9993_v31, 2  ;;  %v3278_v63 = vsel %vm375_vm6, %v9005_v53, %v9781_v3  ;;  %v8244_v51 = vld [vmem:[%s8452_s11 + $0x1c] ss:$0 sps:$4 sm:$0x88]  }
 0x13c   : > { %v6326_v37 = vsel %vm332_vm0, %v6314_v45, %v6325_v40  ;;  %v6570_v54 = vrot.slane %v9996_v50, 1  ;;  %v6573_v18 = vrot.slane %v10000_v20, 7  ;;  %v3080_v4 = vsel %vm379_vm7, %v3078_v11, %v9801_v12  ;;  %7853 = vmatmul.mubr.msk.bf16.vlgmr.msra.gmra.mrb[24].mxu1 %vm389_vm10, %v9577_v62 }
 0x13d   : > { %v6328_v53 = vsel %vm335_vm1, %v6327_v13, %v6326_v37  ;;  %v6317_v3 = vrot.slane %v6313_v27, 5  ;;  %v6318_v34 = vrot.slane %v6314_v45, 4  ;;  %v6320_v5 = vrot.slane %v6315_v30, 3  ;;  %7868 = vmatprep.mubr.msk.bf16.mxu1 %vm8355_vm9, %v11644_v58  ;;  %v8245_v30 = vld [vmem:[%s8452_s11 + $0x28] ss:$0 sps:$4 sm:$0x88]  }
 0x13e   : > { %v6330_v1 = vsel %vm338_vm2, %v6329_v42, %v6328_v53  ;;  %v6571_v12 = vsel %vm332_vm0, %v6570_v54, %v6569_v43  ;;  %v6322_v14 = vrot.slane %v6316_v6, 2  ;;  %v6561_v11 = vrot.slane %v9993_v31, 6  ;;  %v10038_v43 = vpop.permute.xlu0 %3706 }
 0x13f   : > { %v6331_v49 = vpack.c.b16 %v6330_v1, %v6330_v1  ;;  %v6572_v40 = vsel %vm335_vm1, %v9998_v56, %v6571_v12  ;;  %v6319_v27 = vsel %vm321_vm3, %v6318_v34, %v6317_v3  ;;  %v6562_v45 = vrot.slane %v9996_v50, 5 }
 0x140   : > { %v6574_v13 = vsel %vm338_vm2, %v6573_v18, %v6572_v40  ;;  %v6321_v37 = vsel %vm324_vm4, %v6320_v5, %v6319_v27  ;;  %v6564_v42 = vrot.slane %v9998_v56, 4  ;;  %v6566_v6 = vrot.slane %v10000_v20, 3  ;;  %v10050_v40 = vpop.permute.xlu1 %3708 }
 0x141   : > { %6332 = vrot.lane.b32.xlu0 %v6331_v49, %s8352_s12  ;;  %v6575_v54 = vpack.c.b16 %v6574_v13, %v6574_v13  ;;  %v6323_v53 = vsel %vm327_vm5, %v6322_v14, %v6321_v37  ;;  %v6563_v3 = vsel %vm321_vm3, %v6562_v45, %v6561_v11  ;;  %v3280_v34 = vsel %vm379_vm7, %v3278_v63, %v9813_v33 }
 0x142   : > { %v10045_v1 = vpack.c.b16 %v6323_v53, %v6323_v53  ;;  %v6565_v18 = vsel %vm324_vm4, %v6564_v42, %v6563_v3  ;;  %v3082_v5 = vsel %vm382_vm8, %v3080_v4, %v9041_v46  ;;  %v6348_v12 = vunpack.c.l.b16 %v8242_v24  ;;  %v10067_v42 = vld [vmem:[%s8452_s11 + $0x4] ss:$0 sps:$4 sm:$0x88]  }
 0x143   : > { %6576 = vrot.lane.b32.xlu1 %v6575_v54, %s8352_s12  ;;  %v6567_v49 = vsel %vm327_vm5, %v6566_v6, %v6565_v18  ;;  %7857 = vmatpush3.bf16.msra.mxu0 %v3082_v5  ;;  %v6349_v14 = vunpack.c.l.b16 %v8243_v32  ;;  %v6350_v11 = vunpack.c.l.b16 %v8244_v51  ;;  %v6351_v27 = vunpack.c.l.b16 %v8245_v30  ;;  %v10070_v6 = vld [vmem:[%s8452_s11 + $0x10] ss:$0 sps:$4 sm:$0x88]   ;;  %v10085_v18 = vld [vmem:[%s8452_s11 + $0x28] ss:$0 sps:$4 sm:$0x88]  }
 0x144   : > { %v10054_v33 = vpack.c.b16 %v6567_v49, %v6567_v49  ;;  %v6359_v63 = vrot.slane %v6348_v12, 6  ;;  %v6352_v45 = vrot.slane %v6348_v12, 2  ;;  %v3282_v46 = vsel %vm382_vm8, %v3280_v34, %v9076_v15  ;;  %7858 = vmatprep.subr.bf16.mxu0 %v11644_v58  ;;  %v10082_v34 = vld [vmem:[%s8452_s11 + $0x1c] ss:$0 sps:$4 sm:$0x88]  }
 0x145   : > { %6334 = vrot.lane.b32.xlu0 %v10045_v1, %s8353_s13  ;;  %v6360_v4 = vrot.slane %v6349_v14, 5  ;;  %v6362_v24 = vrot.slane %v6350_v11, 4  ;;  %v6364_v13 = vrot.slane %v6351_v27, 3  ;;  %v6353_v32 = vrot.slane %v6349_v14, 1  ;;  %7865 = vmatpush3.bf16.msra.mxu1 %v3282_v46  ;;  %v10073_v54 = vpop.permute.xlu0 %3919 }
 0x146   : > { %v6356_v51 = vrot.slane %v6351_v27, 7  ;;  %v3086_v30 = vsel %vm375_vm6, %v9847_v7, %v9854_v16  ;;  %v6587_v37 = vrot.slane %v9993_v31, 7  ;;  %v6588_v15 = vrot.slane %v9996_v50, 6  ;;  %7866 = vmatprep.subr.bf16.mxu1 %v11644_v58  ;;  %v10092_v27 = vld [vmem:[%s8452_s11 + $0x8] ss:$0 sps:$4 sm:$0x11]  }
 0x147   : > { %6578 = vrot.lane.b32.xlu1 %v10054_v33, %s8353_s13  ;;  %v6361_v53 = vsel %vm321_vm3, %v6360_v4, %v6359_v63  ;;  %v6354_v7 = vsel %vm332_vm0, %v6353_v32, %v6352_v45  ;;  %v3087_v16 = vsel %vm379_vm7, %v3086_v30, 0  ;;  %v6590_v3 = vrot.slane %v9998_v56, 5 }
 0x148   : > { %v6363_v5 = vsel %vm324_vm4, %v6362_v24, %v6361_v53  ;;  %v6355_v12 = vsel %vm335_vm1, %v6350_v11, %v6354_v7  ;;  %v6589_v49 = vsel %vm321_vm3, %v6588_v15, %v6587_v37  ;;  %v6592_v14 = vrot.slane %v10000_v20, 4  ;;  %7859 = vmatpush3.bf16.msra.mxu0 %v3087_v16  ;;  %v10094_v63 = vpop.permute.xlu1 %4174  ;;  %v10101_v11 = vld [vmem:[%s8452_s11 + $0x14] ss:$0 sps:$4 sm:$0x11]  }
 0x149   : > { %v6365_v45 = vsel %vm327_vm5, %v6364_v13, %v6363_v5  ;;  %v6357_v46 = vsel %vm338_vm2, %v6356_v51, %v6355_v12  ;;  %v6591_v4 = vsel %vm324_vm4, %v6590_v3, %v6589_v49  ;;  %v6580_v24 = vrot.slane %v9993_v31, 3  ;;  %7872 = vmatprep.subr.bf16.mxu0 %v11644_v58  ;;  %v10109_v53 = vld [vmem:[%s8452_s11 + $0x20] ss:$0 sps:$4 sm:$0x11]  }
 0x14a   : > { %v6366_v32 = vpack.c.b16 %v6365_v45, %v6365_v45  ;;  %v10104_v30 = vpack.c.b16 %v6357_v46, %v6357_v46  ;;  %v6593_v37 = vsel %vm327_vm5, %v6592_v14, %v6591_v4  ;;  %v6581_v15 = vrot.slane %v9996_v50, 2  ;;  %v10119_v16 = vld [vmem:[%s8452_s11 + $0x2c] ss:$0 sps:$4 sm:$0x11]   ;;  %v10130_v3 = vpop.permute.xlu0 %3921 }
 0x14b   : > { %v6594_v13 = vpack.c.b16 %v6593_v37, %v6593_v37  ;;  %v6583_v51 = vrot.slane %v9998_v56, 1  ;;  %v3286_v31 = vsel %vm375_vm6, %v9894_v57, %v9902_v8  ;;  %v3480_v7 = vsel %vm375_vm6, %v9130_v41, %v9929_v9  ;;  %7861 = vmatmul.mubr.msk.bf16.vlgmr.msra.gmra.mrb[28].mxu0 %vm389_vm10, %v9577_v62  ;;  %v11656_v37 = vld [vmem:[#allocation7_spill] sm:$0xff] }
 0x14c   : > { %11654 = vst [vmem:[#allocation16_spill] sm:$0xff] %v10104_v30  ;;  %6367 = vrot.lane.b32.xlu0 %v6366_v32, %s8352_s12  ;;  %6369 = vrot.lane.b32.xlu1 %v10104_v30, %s8353_s13  ;;  %v6582_v50 = vsel %vm332_vm0, %v6581_v15, %v6580_v24  ;;  %v3287_v56 = vsel %vm379_vm7, %v3286_v31, 0  ;;  %v6789_v57 = vunpack.c.l.b16 %v10067_v42  ;;  %v6790_v8 = vunpack.c.l.b16 %v10070_v6  ;;  %v10132_v41 = vpop.permute.xlu1 %4176 }
 0x14d   : > { %v6584_v9 = vsel %vm335_vm1, %v6583_v51, %v6582_v50  ;;  %v6791_v5 = vunpack.c.l.b16 %v10082_v34  ;;  %v6792_v12 = vunpack.c.l.b16 %v10085_v18  ;;  %v10138_v49 = vunpack.c.l.b16 %v10092_v27  ;;  %7867 = vmatpush3.bf16.msra.mxu1 %v3287_v56  ;;  %7876 = vmatprep.mubr.msk.bf16.mxu0 %vm8355_vm9, %v11644_v58 }
 0x14e   : > { %v6585_v42 = vsel %vm338_vm2, %v10000_v20, %v6584_v9  ;;  %v6801_v6 = vrot.slane %v6789_v57, 3  ;;  %v6802_v14 = vrot.slane %v6790_v8, 2  ;;  %v10145_v45 = vunpack.c.l.b16 %v10101_v11  ;;  %7880 = vmatprep.subr.bf16.mxu1 %v11644_v58 }
 0x14f   : > { %v10148_v34 = vpack.c.b16 %v6585_v42, %v6585_v42  ;;  %v6804_v18 = vrot.slane %v6791_v5, 1  ;;  %v10151_v46 = vunpack.c.l.b16 %v10109_v53  ;;  %v10154_v4 = vunpack.c.l.b16 %v10119_v16  ;;  %v8254_v42 = vld [vmem:[%s8452_s11 + $0x8] ss:$0 sps:$4 sm:$0x11]  }
 0x150   : > { %6595 = vrot.lane.b32.xlu0 %v6594_v13, %s8352_s12  ;;  %v6803_v20 = vsel %vm332_vm0, %v6802_v14, %v6801_v6  ;;  %v7044_v24 = vrot.slane %v10138_v49, 4  ;;  %v7045_v32 = vrot.slane %v10145_v45, 3  ;;  %v3712_v15 = vsel %vm375_vm6, %v11656_v37, %v9941_v59  ;;  %7869 = vmatmul.mubr.msk.bf16.vlgmr.msra.gmra.mrb[28].mxu1 %vm389_vm10, %v9577_v62  ;;  %v8255_v37 = vld [vmem:[%s8452_s11 + $0x14] ss:$0 sps:$4 sm:$0x11]  }
 0x151   : > { %11655 = vst [vmem:[#allocation17_spill] sm:$0xff] %v10148_v34  ;;  %6597 = vrot.lane.b32.xlu1 %v10148_v34, %s8353_s13  ;;  %v6805_v51 = vsel %vm335_vm1, %v6804_v18, %v6803_v20  ;;  %v7047_v13 = vrot.slane %v10151_v46, 2  ;;  %v7049_v31 = vrot.slane %v10154_v4, 1  ;;  %v3482_v50 = vsel %vm379_vm7, %v3480_v7, %v9983_v52  ;;  %7884 = vmatprep.mubr.msk.bf16.mxu1 %vm8355_vm9, %v11644_v58 }
 0x152   : > { %v6806_v59 = vsel %vm338_vm2, %v6792_v12, %v6805_v51  ;;  %v7046_v62 = vsel %vm332_vm0, %v7045_v32, %v7044_v24  ;;  %v6793_v56 = vrot.slane %v6789_v57, 7  ;;  %v6794_v9 = vrot.slane %v6790_v8, 6  ;;  %v10177_v6 = vpop.permute.xlu0 %3958  ;;  %v10179_v14 = vpop.permute.xlu1 %3967  ;;  %v8256_v8 = vld [vmem:[%s8452_s11 + $0x20] ss:$0 sps:$4 sm:$0x11]  }
 0x153   : > { %v6807_v18 = vpack.c.b16 %v6806_v59, %v6806_v59  ;;  %v7048_v20 = vsel %vm335_vm1, %v7047_v13, %v7046_v62  ;;  %v6796_v52 = vrot.slane %v6791_v5, 5  ;;  %v6798_v7 = vrot.slane %v6792_v12, 4  ;;  %v8257_v32 = vld [vmem:[%s8452_s11 + $0x2c] ss:$0 sps:$4 sm:$0x11]  }
 0x154   : > { %v7050_v34 = vsel %vm338_vm2, %v7049_v31, %v7048_v20  ;;  %v6795_v51 = vsel %vm321_vm3, %v6794_v9, %v6793_v56  ;;  %v7054_v24 = vunpack.c.h.b16 %v10092_v27  ;;  %v7055_v57 = vunpack.c.h.b16 %v10101_v11  ;;  %v11657_v27 = vld [vmem:[#allocation8_spill] sm:$0xff] }
 0x155   : > { %6808 = vrot.lane.b32.xlu0 %v6807_v18, %s8352_s12  ;;  %v7051_v30 = vpack.c.b16 %v7050_v34, %v7050_v34  ;;  %v6797_v59 = vsel %vm324_vm4, %v6796_v52, %v6795_v51  ;;  %v7056_v13 = vunpack.c.h.b16 %v10109_v53  ;;  %v7057_v5 = vunpack.c.h.b16 %v10119_v16 }
 0x156   : > { %v6799_v12 = vsel %vm327_vm5, %v6798_v7, %v6797_v59  ;;  %v7058_v31 = vrot.slane %v7055_v57, 7  ;;  %v3714_v62 = vsel %vm379_vm7, %v3712_v15, %v9973_v55  ;;  %v3484_v11 = vsel %vm382_vm8, %v3482_v50, %v11657_v27  ;;  %v10198_v56 = vpop.permute.xlu0 %4193  ;;  %v10203_v16 = vpop.permute.xlu1 %4195  ;;  %v11658_v50 = vld [vmem:[#allocation9_spill] sm:$0xff] }
 0x157   : > { %7052 = vrot.lane.b32.xlu1 %v7051_v30, %s8352_s12  ;;  %v10201_v34 = vpack.c.b16 %v6799_v12, %v6799_v12  ;;  %v7060_v9 = vrot.slane %v7056_v13, 6  ;;  %v7062_v18 = vrot.slane %v7057_v5, 5  ;;  %7873 = vmatpush3.bf16.msra.mxu0 %v3484_v11  ;;  %v6824_v53 = vunpack.c.l.b16 %v8254_v42 }
 0x158   : > { %v7059_v20 = vsel %vm321_vm3, %v7058_v31, %v7054_v24  ;;  %v6825_v52 = vunpack.c.l.b16 %v8255_v37  ;;  %v6826_v7 = vunpack.c.l.b16 %v8256_v8  ;;  %v6827_v55 = vunpack.c.l.b16 %v8257_v32  ;;  %7874 = vmatprep.subr.bf16.mxu0 %v11644_v58 }
 0x159   : > { %6810 = vrot.lane.b32.xlu0 %v10201_v34, %s8353_s13  ;;  %v7061_v30 = vsel %vm324_vm4, %v7060_v9, %v7059_v20  ;;  %v6828_v15 = vrot.slane %v6824_v53, 4  ;;  %v3716_v51 = vsel %vm382_vm8, %v3714_v62, %v11658_v50  ;;  %v3488_v42 = vsel %vm375_vm6, %v10009_v38, %v10019_v60 }
 0x15a   : > { %v7063_v24 = vsel %vm327_vm5, %v7062_v18, %v7061_v30  ;;  %v6836_v37 = vrot.slane %v6825_v52, 7  ;;  %v6838_v57 = vrot.slane %v6826_v7, 6  ;;  %v6840_v8 = vrot.slane %v6827_v55, 5  ;;  %7881 = vmatpush3.bf16.msra.mxu1 %v3716_v51 }
 0x15b   : > { %v7064_v32 = vpack.c.b16 %v7063_v24, %v7063_v24  ;;  %v6829_v59 = vrot.slane %v6825_v52, 3  ;;  %v6831_v13 = vrot.slane %v6826_v7, 2  ;;  %v6833_v5 = vrot.slane %v6827_v55, 1  ;;  %7882 = vmatprep.subr.bf16.mxu1 %v11644_v58  ;;  %v10217_v12 = vpop.permute.xlu0 %4406 }
 0x15c   : > { %v6837_v31 = vsel %vm321_vm3, %v6836_v37, %v6824_v53  ;;  %v3492_v62 = vsel %vm379_vm7, %v3488_v42, 0  ;;  %v7075_v38 = vrot.slane %v10138_v49, 1  ;;  %v7077_v60 = vrot.slane %v10151_v46, 7  ;;  %v10231_v53 = vld [vmem:[%s11621_s1 + $0x4] sm:$0xf]  ;;  %v4651_v20 = vpop.permute.xlu1 %4650 }
 0x15d   : > { %7065 = vrot.lane.b32.xlu1 %v7064_v32, %s8353_s13  ;;  %v6839_v27 = vsel %vm324_vm4, %v6838_v57, %v6837_v31  ;;  %v6830_v11 = vsel %vm332_vm0, %v6829_v59, %v6828_v15  ;;  %v7079_v9 = vrot.slane %v10154_v4, 6  ;;  %v7067_v18 = vrot.slane %v10138_v49, 5  ;;  %7875 = vmatpush3.bf16.msra.mxu0 %v3492_v62 }
 0x15e   : > { %v6841_v52 = vsel %vm327_vm5, %v6840_v8, %v6839_v27  ;;  %v6832_v7 = vsel %vm335_vm1, %v6831_v13, %v6830_v11  ;;  %v7076_v55 = vsel %vm321_vm3, %v10145_v45, %v7075_v38  ;;  %v7068_v30 = vrot.slane %v10145_v45, 4  ;;  %7888 = vmatprep.subr.bf16.mxu0 %v11644_v58 }
 0x15f   : > { %v6842_v15 = vpack.c.b16 %v6841_v52, %v6841_v52  ;;  %v6834_v50 = vsel %vm338_vm2, %v6833_v5, %v6832_v7  ;;  %v7078_v51 = vsel %vm324_vm4, %v7077_v60, %v7076_v55  ;;  %v7070_v42 = vrot.slane %v10151_v46, 3  ;;  %v10249_v32 = vpop.permute.xlu0 %4408  ;;  %v8269_v52 = vld [vmem:[%s8452_s11 + $0x18] ss:$0 sps:$4 sm:$0x44]  }
 0x160   : > { %v10242_v24 = vpack.c.b16 %v6834_v50, %v6834_v50  ;;  %v7080_v37 = vsel %vm327_vm5, %v7079_v9, %v7078_v51  ;;  %v7069_v57 = vsel %vm332_vm0, %v7068_v30, %v7067_v18  ;;  %v7072_v8 = vrot.slane %v10154_v4, 2  ;;  %7877 = vmatmul.mubr.msk.bf16.vlgmr.msra.gmra.mrb[32].mxu0 %vm389_vm10, %v10231_v53  ;;  %v8268_v9 = vld [vmem:[%s8452_s11 + $0xc] ss:$0 sps:$4 sm:$0x44]  }
 0x161   : > { %6843 = vrot.lane.b32.xlu0 %v6842_v15, %s8352_s12  ;;  %v7081_v59 = vpack.c.b16 %v7080_v37, %v7080_v37  ;;  %v7071_v13 = vsel %vm335_vm1, %v7070_v42, %v7069_v57  ;;  %v3720_v5 = vsel %vm375_vm6, %v10038_v43, %v10050_v40  ;;  %v4653_v31 = vpop.permute.xlu1 %4652  ;;  %v4199_v60 = vsel %vm375_vm6, %v9307_v44, %v10094_v63  ;;  %v8267_v40 = vld [vmem:[%s8452_s11] ss:$0 sps:$4 sm:$0x44]   ;;  %v8270_v55 = vld [vmem:[%s8452_s11 + $0x24] ss:$0 sps:$4 sm:$0x44]  }
 0x162   : > { %6845 = vrot.lane.b32.xlu1 %v10242_v24, %s8353_s13  ;;  %v7073_v62 = vsel %vm338_vm2, %v7072_v8, %v7071_v13  ;;  %v3721_v38 = vsel %vm379_vm7, %v3720_v5, 0  ;;  %7892 = vmatprep.mubr.msk.bf16.mxu0 %vm8355_vm9, %v11644_v58  ;;  %v4201_v43 = vsel %vm379_vm7, %v4199_v60, %v10132_v41  ;;  %v3935_v11 = vunpack.c.h.b16 %v8267_v40  ;;  %v11659_v15 = vld [vmem:[#allocation10_spill] sm:$0xff] }
 0x163   : > { %v10265_v27 = vpack.c.b16 %v7073_v62, %v7073_v62  ;;  %7883 = vmatpush3.bf16.msra.mxu1 %v3721_v38  ;;  %v3936_v18 = vunpack.c.h.b16 %v8268_v9  ;;  %v3937_v7 = vunpack.c.h.b16 %v8269_v52  ;;  %v3938_v30 = vunpack.c.h.b16 %v8270_v55 }
 0x164   : > { %7896 = vmatprep.subr.bf16.mxu1 %v11644_v58  ;;  %v4203_v44 = vsel %vm382_vm8, %v4201_v43, %v9381_v29  ;;  %v4207_v41 = vsel %vm375_vm6, %v10198_v56, %v10203_v16  ;;  %v3971_v50 = vsel %vm375_vm6, %v11659_v15, %v10073_v54  ;;  %v4675_v29 = vsel %vm375_vm6, %v9457_v22, %v4651_v20 }
 0x165   : > { %7082 = vrot.lane.b32.xlu0 %v7081_v59, %s8352_s12  ;;  %v3939_v63 = vrot.slane %v3936_v18, 7  ;;  %v3941_v51 = vrot.slane %v3937_v7, 6  ;;  %v3943_v42 = vrot.slane %v3938_v30, 5  ;;  %v5111_v16 = vrot.slane %v9550_v26, 7  ;;  %s11564_s12 = scalar_lea.hbm %s11624_s4, %s7647_s8 }
 0x166   : > { %7084 = vrot.lane.b32.xlu1 %v10265_v27, %s8353_s13  ;;  %7885 = vmatmul.mubr.msk.bf16.vlgmr.msra.gmra.mrb[32].mxu1 %vm389_vm10, %v10231_v53  ;;  %v4442_v37 = vpop.permute.xlu0 %4441  ;;  %v4208_v8 = vsel %vm379_vm7, %v4207_v41, 0  ;;  %v3973_v59 = vsel %vm379_vm7, %v3971_v50, %v10130_v3  ;;  %v4677_v20 = vsel %vm379_vm7, %v4675_v29, %v4653_v31  ;;  %v5113_v13 = vrot.slane %v9555_v35, 6  ;;  %s8271_s13 = scalar_lea.vmem %s11566_s9, 2048 }
 0x167   : > { %v3940_v57 = vsel %vm332_vm0, %v3939_v63, %v3935_v11  ;;  %7897 = vmatpush3.bf16.msra.mxu1 %v4203_v44  ;;  %7900 = vmatprep.mubr.msk.bf16.mxu1 %vm8355_vm9, %v11644_v58  ;;  %v4444_v56 = vpop.permute.xlu1 %4443  ;;  %v5112_v26 = vsel %vm321_vm3, %v5111_v16, %v9543_v19  ;;  %v5861_v38 = vunpack.c.h.b16 %v9870_v10  ;;  %v5862_v60 = vunpack.c.h.b16 %v9875_v47  ;;  %p8272_p12 = scmp.ne.s32.totalorder %s11566_s9, %s8271_s13  ;;  %p8279_p2 = scmp.lt.s32.totalorder %s8277_s22, %s8271_s13 }
 0x168   : > { %v3942_v54 = vsel %vm335_vm1, %v3941_v51, %v3940_v57  ;;  %7898 = vmatprep.subr.bf16.mxu1 %v11644_v58  ;;  %v3979_v43 = vsel %vm375_vm6, %v10177_v6, %v10179_v14  ;;  %v4447_v3 = vsel %vm375_vm6, %v9436_v25, %v10217_v12  ;;  %v5863_v35 = vunpack.c.h.b16 %v9883_v21 }
 0x169   : > { %v3944_v22 = vsel %vm338_vm2, %v3943_v42, %v3942_v54  ;;  %v5864_v40 = vunpack.c.h.b16 %v9892_v48  ;;  %v4679_v10 = vsel %vm382_vm8, %v4677_v20, %v9531_v39  ;;  %v5115_v47 = vrot.slane %v9558_v23, 5  ;;  %v11662_v54 = vld [vmem:[#allocation13_spill] sm:$0xff]  ;;  %p8273_p13 = pnand %p8272_p12, %p8426_p4  ;;  %p8280_p3 = por %p8279_p2, %p8278_p1 }
 0x16a   : > { %v3945_v5 = vpack.c.b16 %v3944_v22, %v3944_v22  ;;  %v4670_v62 = vpop.permute.xlu0 %4669  ;;  %v5865_v6 = vrot.slane %v5862_v60, 7  ;;  %v5114_v25 = vsel %vm324_vm4, %v5113_v13, %v5112_v26  ;;  %v5867_v12 = vrot.slane %v5863_v35, 6 }
 0x16b   : > { %7899 = vmatpush3.bf16.msra.mxu1 %v4208_v8  ;;  %v4672_v31 = vpop.permute.xlu1 %4671  ;;  %v5869_v11 = vrot.slane %v5864_v40, 5  ;;  %v3980_v21 = vsel %vm379_vm7, %v3979_v43, 0  ;;  %v7037_v39 = vrot.slane %v10145_v45, 7  ;;  %v4449_v23 = vsel %vm379_vm7, %v4447_v3, %v10249_v32  ;;  %p8274_p0 = pneg %p8273_p13 }
 0x16c   : > { %v3975_v19 = vsel %vm382_vm8, %v3973_v59, %v3945_v5  ;;  %7912 = vmatprep.subr.bf16.mxu1 %v11644_v58  ;;  %v4683_v14 = vsel %vm375_vm6, %v4670_v62, %v4672_v31  ;;  %v5866_v48 = vsel %vm332_vm0, %v5865_v6, %v5861_v38  ;;  %v7039_v18 = vrot.slane %v10151_v46, 6  ;;  %v11660_v46 = vld [vmem:[#allocation11_spill] sm:$0xff] }
 0x16d   : > { %7889 = vmatpush3.bf16.msra.mxu0 %v3975_v19  ;;  %v5868_v9 = vsel %vm335_vm1, %v5867_v12, %v5866_v48  ;;  %v7041_v52 = vrot.slane %v10154_v4, 5  ;;  %v4684_v7 = vsel %vm379_vm7, %v4683_v14, 0  ;;  %v5116_v55 = vsel %vm327_vm5, %v5115_v47, %v5114_v25  ;;  %p8281_p5 = pnand %p8280_p3, %p8274_p0 }
 0x16e   : > { %7890 = vmatprep.subr.bf16.mxu0 %v11644_v58  ;;  %7901 = vmatmul.mubr.msk.bf16.vlgmr.msra.gmra.mrb[36].mxu1 %vm389_vm10, %v10231_v53  ;;  %v10337_v45 = vsel %vm338_vm2, %v5869_v11, %v5868_v9  ;;  %v7038_v32 = vsel %vm321_vm3, %v7037_v39, %v10138_v49  ;;  %v4451_v4 = vsel %vm382_vm8, %v4449_v23, %v11660_v46  ;;  %v8356_v62 = vmov 1966171168   ;;  %v11664_v11 = vld [vmem:[#allocation6_spill] sm:$0xff] }
 0x16f   : > { %7913 = vmatpush3.bf16.msra.mxu1 %v4679_v10  ;;  %7916 = vmatprep.mubr.msk.bf16.mxu1 %vm8355_vm9, %v11644_v58  ;;  %v7040_v44 = vsel %vm324_vm4, %v7039_v18, %v7038_v32  ;;  %v4455_v41 = vsel %vm375_vm6, %v4442_v37, %v4444_v56  ;;  %v5117_v15 = vpack.c.b16 %v5116_v55, %v5116_v55  ;;  %v11661_v56 = vld [vmem:[#allocation12_spill] sm:$0xff]  ;;  %v441_v26 = vunpack.c.l.s4 %v8356_v62  ;;  %v11663_v10 = vld [vmem:[#allocation5_spill] sm:$0xff] }
 0x170   : > { %7914 = vmatprep.subr.bf16.mxu1 %v11644_v58  ;;  %v10346_v63 = vsel %vm327_vm5, %v7041_v52, %v7040_v44  ;;  %v4456_v51 = vsel %vm379_vm7, %v4455_v41, 0  ;;  %v443_v38 = vlaneseq }
 0x171   : > { %7891 = vmatpush3.bf16.msra.mxu0 %v3980_v21  ;;  %v4883_v30 = vpop.permute.xlu0 %4882  ;;  %v442_v31 = vunpack.c.0.s8 %v441_v26 }
 0x172   : > { %7904 = vmatprep.subr.bf16.mxu0 %v11644_v58  ;;  %v5127_v50 = vpop.permute.xlu1 %5126  ;;  %v4923_v49 = vsel %vm375_vm6, %v9612_v17, %v4883_v30  ;;  %v10385_v35 = vshrl.u32 %v443_v38, 7 }
 0x173   : > { %7915 = vmatpush3.bf16.msra.mxu1 %v4684_v7  ;;  %v5162_v29 = vsel %vm375_vm6, %v5117_v15, %v5127_v50 }
 0x174   : > { %7893 = vmatmul.mubr.msk.bf16.vlgmr.msra.gmra.mrb[36].mxu0 %vm389_vm10, %v10231_v53  ;;  %7928 = vmatprep.subr.bf16.mxu1 %v11644_v58  ;;  %v10396_v48 = vsub.s32 %v442_v31, %v10385_v35 }
 0x175   : > { %7905 = vmatpush3.bf16.msra.mxu0 %v4451_v4  ;;  %7908 = vmatprep.mubr.msk.bf16.mxu0 %vm8355_vm9, %v11644_v58  ;;  %v4885_v42 = vpop.permute.xlu0 %4884 }
 0x176   : > { %7906 = vmatprep.subr.bf16.mxu0 %v11644_v58  ;;  %7917 = vmatmul.mubr.msk.bf16.vlgmr.msra.gmra.mrb[40].mxu1 %vm389_vm10, %v10231_v53  ;;  %v4925_v37 = vsel %vm379_vm7, %v4923_v49, %v4885_v42 }
 0x177   : > { %7932 = vmatprep.mubr.msk.bf16.mxu1 %vm8355_vm9, %v11644_v58  ;;  %v4927_v16 = vsel %vm382_vm8, %v4925_v37, %v11661_v56 }
 0x179   : > { %7907 = vmatpush3.bf16.msra.mxu0 %v4456_v51  ;;  %v5140_v17 = vpop.permute.xlu1 %5139 }
 0x17a   : > { %v5164_v57 = vsel %vm379_vm7, %v5162_v29, %v5140_v17  ;;  %7920 = vmatprep.subr.bf16.mxu0 %v11644_v58 }
 0x17b   : > { %v5166_v8 = vsel %vm382_vm8, %v5164_v57, %v11662_v54 }
 0x17c   : > { %7909 = vmatmul.mubr.msk.bf16.vlgmr.msra.gmra.mrb[40].mxu0 %vm389_vm10, %v10231_v53  ;;  %7929 = vmatpush3.bf16.msra.mxu1 %v5166_v8  ;;  %v4918_v59 = vpop.permute.xlu0 %4917 }
 0x17d   : > { %7921 = vmatpush3.bf16.msra.mxu0 %v4927_v16  ;;  %v4920_v22 = vpop.permute.xlu1 %4919  ;;  %7924 = vmatprep.mubr.msk.bf16.mxu0 %vm8355_vm9, %v11644_v58 }
 0x17e   : > { %v4931_v20 = vsel %vm375_vm6, %v4918_v59, %v4920_v22  ;;  %7922 = vmatprep.subr.bf16.mxu0 %v11644_v58  ;;  %7930 = vmatprep.subr.bf16.mxu1 %v11644_v58 }
 0x17f   : > { %v4932_v13 = vsel %vm379_vm7, %v4931_v20, 0 }
 0x180   : > { %v5157_v5 = vpop.permute.xlu0 %5156 }
 0x181   : > { %7923 = vmatpush3.bf16.msra.mxu0 %v4932_v13 }
 0x182   : > { %7936 = vmatprep.subr.bf16.mxu0 %v11644_v58  ;;  %v5159_v60 = vpop.permute.xlu1 %5158 }
 0x183   : > { %v5170_v43 = vsel %vm375_vm6, %v5157_v5, %v5159_v60 }
 0x184   : > { %7925 = vmatmul.mubr.msk.bf16.vlgmr.msra.gmra.mrb[44].mxu0 %vm389_vm10, %v10231_v53  ;;  %v5171_v3 = vsel %vm379_vm7, %v5170_v43, 0 }
 0x185   : > { %7940 = vmatprep.mubr.msk.bf16.mxu0 %vm8355_vm9, %v11644_v58  ;;  %7931 = vmatpush3.bf16.msra.mxu1 %v5171_v3  ;;  %v429_v40 = vpop.f32.mrb[0].mxu0 }
 0x186   : > { %7944 = vmatprep.subr.bf16.mxu1 %v11644_v58  ;;  %v435_v47 = vmul.f32 %v429_v40, %v11663_v10  ;;  %v7750_v6 = vpop.f32.mrb[1].mxu0 }
 0x187   : > { %v5370_v19 = vpop.permute.xlu0 %5369  ;;  %v432_v14 = vpop.f32.mrb[2].mxu0 }
 0x188   : > { %v5410_v25 = vsel %vm375_vm6, %v9755_v28, %v5370_v19  ;;  %7933 = vmatmul.mubr.msk.bf16.vlgmr.msra.gmra.mrb[44].mxu1 %vm389_vm10, %v10231_v53  ;;  %v436_v21 = vadd.f32 %v435_v47, %v11664_v11  ;;  %v7751_v39 = vpop.f32.mrb[3].mxu0 }
 0x189   : > { %v5614_v12 = vpop.permute.xlu1 %5613  ;;  %7948 = vmatprep.mubr.msk.bf16.mxu1 %vm8355_vm9, %v11644_v58 }
 0x18a   : > { %v5638_v23 = vsel %vm375_vm6, %v9763_v36, %v5614_v12  ;;  %v437_v18 = vmax.f32 %v436_v21, 0.0 }
 0x18b   : > { %v5372_v9 = vpop.permute.xlu0 %5371 }
 0x18c   : > { %v5412_v28 = vsel %vm379_vm7, %v5410_v25, %v5372_v9  ;;  %v439_v55 = vcombine.high %v437_v18, %v437_v18  ;;  %v446_v32 = vrot.slane %v437_v18, %v10396_v48 }
 0x18d   : > { %v5616_v52 = vpop.permute.xlu1 %5615  ;;  %v5414_v7 = vsel %vm382_vm8, %v5412_v28, %v9787_v61  ;;  %v5871_v28 = vpack.c.b16 %v10337_v45, %v10337_v45 }
 0x18e   : > { %v5640_v30 = vsel %vm379_vm7, %v5638_v23, %v5616_v52  ;;  %7937 = vmatpush3.bf16.msra.mxu0 %v5414_v7  ;;  %v453_v44 = vrot.slane %v439_v55, %v10396_v48  ;;  %v454_v46 = vcombine.high %v446_v32, %v446_v32  ;;  %v462_v4 = vrot.slane %v446_v32, %v10396_v48  ;;  %v11665_v55 = vld [vmem:[#allocation14_spill] sm:$0xff] }
 0x18f   : > { %7938 = vmatprep.subr.bf16.mxu0 %v11644_v58  ;;  %v5642_v36 = vsel %vm382_vm8, %v5640_v30, %v9842_v0 }
 0x190   : > { %7945 = vmatpush3.bf16.msra.mxu1 %v5642_v36  ;;  %v455_v61 = vcombine.high %v453_v44, %v453_v44  ;;  %v469_v15 = vrot.slane %v453_v44, %v10396_v48  ;;  %v476_v50 = vrot.slane %v454_v46, %v10396_v48  ;;  %v484_v49 = vcombine.high %v462_v4, %v462_v4 }
 0x191   : > { %v5405_v41 = vpop.permute.xlu0 %5404  ;;  %7946 = vmatprep.subr.bf16.mxu1 %v11644_v58  ;;  %497 = vst.msk [vmem:[%s10417_s6] sm:$0x1] %vm496_vm11, %v462_v4  ;;  %v630_v51 = vpop.f32.mrb[0].mxu1 }
 0x192   : > { %v5407_v0 = vpop.permute.xlu1 %5406  ;;  %v483_v29 = vrot.slane %v455_v61, %v10396_v48  ;;  %v485_v37 = vcombine.high %v469_v15, %v469_v15  ;;  %v486_v17 = vcombine.high %v476_v50, %v476_v50  ;;  %v7758_v57 = vpop.f32.mrb[1].mxu1  ;;  %498 = vst.msk [vmem:[%s10417_s6 + $0x10] sm:$0x1] %vm496_vm11, %v476_v50  ;;  %499 = vst.msk [vmem:[%s10417_s6 + $0x20] sm:$0x1] %vm496_vm11, %v484_v49  ;;  %v11666_v61 = vld [vmem:[#allocation15_spill] sm:$0xff] }
 0x193   : > { %v5418_v42 = vsel %vm375_vm6, %v5405_v41, %v5407_v0  ;;  %501 = vst.msk [vmem:[%s10417_s6 + $0x40] sm:$0x1] %vm496_vm11, %v469_v15  ;;  %v636_v16 = vmul.f32 %v630_v51, %v11663_v10  ;;  %v633_v54 = vpop.f32.mrb[2].mxu1 }
 0x194   : > { %v5419_v56 = vsel %vm379_vm7, %v5418_v42, 0  ;;  %v7759_v8 = vpop.f32.mrb[3].mxu1  ;;  %500 = vst.msk [vmem:[%s10417_s6 + $0x30] sm:$0x1] %vm496_vm11, %v486_v17  ;;  %502 = vst.msk [vmem:[%s10417_s6 + $0x50] sm:$0x1] %vm496_vm11, %v483_v29  ;;  %v487_v59 = vcombine.high %v483_v29, %v483_v29 }
 0x195   : > { %7939 = vmatpush3.bf16.msra.mxu0 %v5419_v56  ;;  %503 = vst.msk [vmem:[%s10417_s6 + $0x60] sm:$0x1] %vm496_vm11, %v485_v37  ;;  %v637_v22 = vadd.f32 %v636_v16, %v11664_v11 }
 0x196   : > { %7952 = vmatprep.subr.bf16.mxu0 %v11644_v58  ;;  %504 = vst.msk [vmem:[%s10417_s6 + $0x70] sm:$0x1] %vm496_vm11, %v487_v59 }
 0x197   : > { %v5633_v20 = vpop.permute.xlu0 %5632  ;;  %v638_v13 = vmax.f32 %v637_v22, 0.0  ;;  %v810_v5 = vpop.f32.mrb[4].mxu0 }
 0x198   : > { %7941 = vmatmul.mubr.msk.bf16.vlgmr.msra.gmra.mrb[48].mxu0 %vm389_vm10, %v10231_v53  ;;  %v5635_v62 = vpop.permute.xlu1 %5634  ;;  %v816_v26 = vmul.f32 %v810_v5, %v11663_v10  ;;  %v7766_v38 = vpop.f32.mrb[5].mxu0 }
 0x199   : > { %7956 = vmatprep.mubr.msk.bf16.mxu0 %vm8355_vm9, %v11644_v58  ;;  %v5646_v60 = vsel %vm375_vm6, %v5633_v20, %v5635_v62  ;;  %v640_v43 = vcombine.high %v638_v13, %v638_v13  ;;  %v647_v3 = vrot.slane %v638_v13, %v10396_v48  ;;  %v813_v31 = vpop.f32.mrb[6].mxu0 }
 0x19a   : > { %v5647_v40 = vsel %vm379_vm7, %v5646_v60, 0  ;;  %v817_v19 = vadd.f32 %v816_v26, %v11664_v11  ;;  %v7767_v47 = vpop.f32.mrb[7].mxu0 }
 0x19b   : > { %7947 = vmatpush3.bf16.msra.mxu1 %v5647_v40  ;;  %v654_v6 = vrot.slane %v640_v43, %v10396_v48  ;;  %v655_v14 = vcombine.high %v647_v3, %v647_v3  ;;  %v663_v25 = vrot.slane %v647_v3, %v10396_v48 }
 0x19c   : > { %7960 = vmatprep.subr.bf16.mxu1 %v11644_v58  ;;  %v818_v12 = vmax.f32 %v817_v19, 0.0 }
 0x19d   : > { %v656_v39 = vcombine.high %v654_v6, %v654_v6  ;;  %v670_v23 = vrot.slane %v654_v6, %v10396_v48  ;;  %v677_v9 = vrot.slane %v655_v14, %v10396_v48  ;;  %v685_v18 = vcombine.high %v663_v25, %v663_v25  ;;  %697 = vst.msk [vmem:[%s10417_s6 + $0x1] sm:$0x1] %vm496_vm11, %v663_v25 }
 0x19e   : > { %v5846_v21 = vpop.permute.xlu0 %5845  ;;  %7949 = vmatmul.mubr.msk.bf16.vlgmr.msra.gmra.mrb[48].mxu1 %vm389_vm10, %v10231_v53  ;;  %v820_v52 = vcombine.high %v818_v12, %v818_v12  ;;  %v827_v7 = vrot.slane %v818_v12, %v10396_v48 }
 0x19f   : > { %v5897_v32 = vsel %vm375_vm6, %v11665_v55, %v5846_v21  ;;  %7964 = vmatprep.mubr.msk.bf16.mxu1 %vm8355_vm9, %v11644_v58  ;;  %v684_v30 = vrot.slane %v656_v39, %v10396_v48  ;;  %v686_v36 = vcombine.high %v670_v23, %v670_v23  ;;  %v687_v44 = vcombine.high %v677_v9, %v677_v9 }
 0x1a0   : > { %698 = vst.msk [vmem:[%s10417_s6 + $0x11] sm:$0x1] %vm496_vm11, %v677_v9  ;;  %699 = vst.msk [vmem:[%s10417_s6 + $0x21] sm:$0x1] %vm496_vm11, %v685_v18  ;;  %v6101_v45 = vpop.permute.xlu1 %6100  ;;  %v834_v46 = vrot.slane %v820_v52, %v10396_v48  ;;  %v835_v4 = vcombine.high %v827_v7, %v827_v7  ;;  %v843_v41 = vrot.slane %v827_v7, %v10396_v48 }
 0x1a1   : > { %701 = vst.msk [vmem:[%s10417_s6 + $0x41] sm:$0x1] %vm496_vm11, %v670_v23  ;;  %v6125_v15 = vsel %vm375_vm6, %v11666_v61, %v6101_v45  ;;  %700 = vst.msk [vmem:[%s10417_s6 + $0x31] sm:$0x1] %vm496_vm11, %v687_v44  ;;  %v688_v49 = vcombine.high %v684_v30, %v684_v30 }
 0x1a2   : > { %v5848_v50 = vpop.permute.xlu0 %5847  ;;  %702 = vst.msk [vmem:[%s10417_s6 + $0x51] sm:$0x1] %vm496_vm11, %v684_v30  ;;  %703 = vst.msk [vmem:[%s10417_s6 + $0x61] sm:$0x1] %vm496_vm11, %v686_v36  ;;  %v836_v51 = vcombine.high %v834_v46, %v834_v46  ;;  %v850_v42 = vrot.slane %v834_v46, %v10396_v48  ;;  %v857_v29 = vrot.slane %v835_v4, %v10396_v48 }
 0x1a3   : > { %v5899_v0 = vsel %vm379_vm7, %v5897_v32, %v5848_v50  ;;  %877 = vst.msk [vmem:[%s10417_s6 + $0x2] sm:$0x1] %vm496_vm11, %v843_v41  ;;  %v865_v17 = vcombine.high %v843_v41, %v843_v41  ;;  %704 = vst.msk [vmem:[%s10417_s6 + $0x71] sm:$0x1] %vm496_vm11, %v688_v49 }
 0x1a4   : > { %v5901_v37 = vsel %vm382_vm8, %v5899_v0, %v5871_v28  ;;  %v6103_v57 = vpop.permute.xlu1 %6102  ;;  %v864_v56 = vrot.slane %v836_v51, %v10396_v48  ;;  %v866_v16 = vcombine.high %v850_v42, %v850_v42  ;;  %v867_v54 = vcombine.high %v857_v29, %v857_v29  ;;  %878 = vst.msk [vmem:[%s10417_s6 + $0x12] sm:$0x1] %vm496_vm11, %v857_v29  ;;  %v11667_v0 = vld [vmem:[#allocation16_spill] sm:$0xff] }
 0x1a5   : > { %7953 = vmatpush3.bf16.msra.mxu0 %v5901_v37  ;;  %881 = vst.msk [vmem:[%s10417_s6 + $0x42] sm:$0x1] %vm496_vm11, %v850_v42  ;;  %v6127_v8 = vsel %vm379_vm7, %v6125_v15, %v6103_v57  ;;  %879 = vst.msk [vmem:[%s10417_s6 + $0x22] sm:$0x1] %vm496_vm11, %v865_v17 }
 0x1a6   : > { %7954 = vmatprep.subr.bf16.mxu0 %v11644_v58  ;;  %v6129_v59 = vsel %vm382_vm8, %v6127_v8, %v9990_v2  ;;  %880 = vst.msk [vmem:[%s10417_s6 + $0x32] sm:$0x1] %vm496_vm11, %v867_v54  ;;  %882 = vst.msk [vmem:[%s10417_s6 + $0x52] sm:$0x1] %vm496_vm11, %v864_v56  ;;  %v868_v22 = vcombine.high %v864_v56, %v864_v56 }
 0x1a7   : > { %883 = vst.msk [vmem:[%s10417_s6 + $0x62] sm:$0x1] %vm496_vm11, %v866_v16  ;;  %7961 = vmatpush3.bf16.msra.mxu1 %v6129_v59  ;;  %v11668_v16 = vld [vmem:[#allocation17_spill] sm:$0xff] }
 0x1a8   : > { %7962 = vmatprep.subr.bf16.mxu1 %v11644_v58  ;;  %884 = vst.msk [vmem:[%s10417_s6 + $0x72] sm:$0x1] %vm496_vm11, %v868_v22 }
 0x1a9   : > { %v5885_v20 = vpop.permute.xlu0 %5884  ;;  %v5894_v13 = vpop.permute.xlu1 %5893 }
 0x1aa   : > { %v5905_v5 = vsel %vm375_vm6, %v5885_v20, %v5894_v13 }
 0x1ab   : > { %v5906_v62 = vsel %vm379_vm7, %v5905_v5, 0 }
 0x1ac   : > { %7955 = vmatpush3.bf16.msra.mxu0 %v5906_v62  ;;  %v1021_v2 = vpop.f32.mrb[4].mxu1 }
 0x1ad   : > { %v6120_v26 = vpop.permute.xlu0 %6119  ;;  %v6122_v38 = vpop.permute.xlu1 %6121  ;;  %7968 = vmatprep.subr.bf16.mxu0 %v11644_v58  ;;  %v1027_v60 = vmul.f32 %v1021_v2, %v11663_v10 }
 0x1ae   : > { %v6133_v43 = vsel %vm375_vm6, %v6120_v26, %v6122_v38  ;;  %v7774_v3 = vpop.f32.mrb[5].mxu1 }
 0x1af   : > { %v6134_v31 = vsel %vm379_vm7, %v6133_v43, 0  ;;  %7957 = vmatmul.mubr.msk.bf16.vlgmr.msra.gmra.mrb[52].mxu0 %vm389_vm10, %v10231_v53  ;;  %v1028_v40 = vadd.f32 %v1027_v60, %v11664_v11  ;;  %v1024_v19 = vpop.f32.mrb[6].mxu1  ;;  %v1201_v47 = vpop.f32.mrb[8].mxu0 }
 0x1b0   : > { %7963 = vmatpush3.bf16.msra.mxu1 %v6134_v31  ;;  %7972 = vmatprep.mubr.msk.bf16.mxu0 %vm8355_vm9, %v11644_v58  ;;  %v7775_v6 = vpop.f32.mrb[7].mxu1  ;;  %v1207_v25 = vmul.f32 %v1201_v47, %v11663_v10  ;;  %v7782_v12 = vpop.f32.mrb[9].mxu0 }
 0x1b1   : > { %7976 = vmatprep.subr.bf16.mxu1 %v11644_v58  ;;  %v1029_v14 = vmax.f32 %v1028_v40, 0.0  ;;  %v1204_v21 = vpop.f32.mrb[10].mxu0 }
 0x1b2   : > { %v1208_v18 = vadd.f32 %v1207_v25, %v11664_v11  ;;  %v7783_v28 = vpop.f32.mrb[11].mxu0 }
 0x1b3   : > { %v6333_v39 = vpop.permute.xlu0 %6332  ;;  %7965 = vmatmul.mubr.msk.bf16.vlgmr.msra.gmra.mrb[52].mxu1 %vm389_vm10, %v10231_v53  ;;  %v1031_v23 = vcombine.high %v1029_v14, %v1029_v14  ;;  %v1038_v9 = vrot.slane %v1029_v14, %v10396_v48 }
 0x1b4   : > { %v6373_v52 = vsel %vm375_vm6, %v10045_v1, %v6333_v39  ;;  %7980 = vmatprep.mubr.msk.bf16.mxu1 %vm8355_vm9, %v11644_v58  ;;  %v1209_v36 = vmax.f32 %v1208_v18, 0.0 }
 0x1b5   : > { %v6577_v7 = vpop.permute.xlu1 %6576  ;;  %v1045_v55 = vrot.slane %v1031_v23, %v10396_v48  ;;  %v1046_v32 = vcombine.high %v1038_v9, %v1038_v9  ;;  %v1054_v30 = vrot.slane %v1038_v9, %v10396_v48 }
 0x1b6   : > { %v6601_v44 = vsel %vm375_vm6, %v10054_v33, %v6577_v7  ;;  %v1211_v15 = vcombine.high %v1209_v36, %v1209_v36  ;;  %v1218_v50 = vrot.slane %v1209_v36, %v10396_v48 }
 0x1b7   : > { %v6335_v45 = vpop.permute.xlu0 %6334  ;;  %v1047_v46 = vcombine.high %v1045_v55, %v1045_v55  ;;  %v1061_v1 = vrot.slane %v1045_v55, %v10396_v48  ;;  %v1068_v4 = vrot.slane %v1046_v32, %v10396_v48  ;;  %v1076_v41 = vcombine.high %v1054_v30, %v1054_v30  ;;  %1088 = vst.msk [vmem:[%s10417_s6 + $0x3] sm:$0x1] %vm496_vm11, %v1054_v30 }
 0x1b8   : > { %v6375_v61 = vsel %vm379_vm7, %v6373_v52, %v6335_v45  ;;  %v1225_v17 = vrot.slane %v1211_v15, %v10396_v48  ;;  %v1226_v57 = vcombine.high %v1218_v50, %v1218_v50  ;;  %v1234_v56 = vrot.slane %v1218_v50, %v10396_v48 }
 0x1b9   : > { %v6579_v49 = vpop.permute.xlu1 %6578  ;;  %v6377_v33 = vsel %vm382_vm8, %v6375_v61, %v11667_v0  ;;  %v1075_v51 = vrot.slane %v1047_v46, %v10396_v48  ;;  %v1077_v42 = vcombine.high %v1061_v1, %v1061_v1  ;;  %v1078_v29 = vcombine.high %v1068_v4, %v1068_v4  ;;  %1089 = vst.msk [vmem:[%s10417_s6 + $0x13] sm:$0x1] %vm496_vm11, %v1068_v4 }
 0x1ba   : > { %1090 = vst.msk [vmem:[%s10417_s6 + $0x23] sm:$0x1] %vm496_vm11, %v1076_v41  ;;  %1092 = vst.msk [vmem:[%s10417_s6 + $0x43] sm:$0x1] %vm496_vm11, %v1061_v1  ;;  %v6603_v37 = vsel %vm379_vm7, %v6601_v44, %v6579_v49  ;;  %7969 = vmatpush3.bf16.msra.mxu0 %v6377_v33  ;;  %v1227_v22 = vcombine.high %v1225_v17, %v1225_v17  ;;  %v1241_v20 = vrot.slane %v1225_v17, %v10396_v48 }
 0x1bb   : > { %7970 = vmatprep.subr.bf16.mxu0 %v11644_v58  ;;  %v6605_v54 = vsel %vm382_vm8, %v6603_v37, %v11668_v16  ;;  %v1401_v8 = vpop.f32.mrb[8].mxu1  ;;  %1091 = vst.msk [vmem:[%s10417_s6 + $0x33] sm:$0x1] %vm496_vm11, %v1078_v29  ;;  %1093 = vst.msk [vmem:[%s10417_s6 + $0x53] sm:$0x1] %vm496_vm11, %v1075_v51  ;;  %v1079_v59 = vcombine.high %v1075_v51, %v1075_v51  ;;  %v1248_v13 = vrot.slane %v1226_v57, %v10396_v48 }
 0x1bc   : > { %1094 = vst.msk [vmem:[%s10417_s6 + $0x63] sm:$0x1] %vm496_vm11, %v1077_v42  ;;  %7977 = vmatpush3.bf16.msra.mxu1 %v6605_v54  ;;  %v1256_v5 = vcombine.high %v1234_v56, %v1234_v56  ;;  %v7790_v62 = vpop.f32.mrb[9].mxu1  ;;  %1268 = vst.msk [vmem:[%s10417_s6 + $0x4] sm:$0x1] %vm496_vm11, %v1234_v56  ;;  %v1407_v2 = vmul.f32 %v1401_v8, %v11663_v10  ;;  %v1255_v43 = vrot.slane %v1227_v22, %v10396_v48 }
 0x1bd   : > { %7978 = vmatprep.subr.bf16.mxu1 %v11644_v58  ;;  %v1404_v26 = vpop.f32.mrb[10].mxu1  ;;  %1095 = vst.msk [vmem:[%s10417_s6 + $0x73] sm:$0x1] %vm496_vm11, %v1079_v59  ;;  %v1257_v3 = vcombine.high %v1241_v20, %v1241_v20  ;;  %v1258_v31 = vcombine.high %v1248_v13, %v1248_v13  ;;  %1269 = vst.msk [vmem:[%s10417_s6 + $0x14] sm:$0x1] %vm496_vm11, %v1248_v13  ;;  %v7043_v61 = vpack.c.b16 %v10346_v63, %v10346_v63 }
 0x1be   : > { %v6368_v38 = vpop.permute.xlu0 %6367  ;;  %v6370_v60 = vpop.permute.xlu1 %6369  ;;  %1270 = vst.msk [vmem:[%s10417_s6 + $0x24] sm:$0x1] %vm496_vm11, %v1256_v5  ;;  %1272 = vst.msk [vmem:[%s10417_s6 + $0x44] sm:$0x1] %vm496_vm11, %v1241_v20  ;;  %v1408_v19 = vadd.f32 %v1407_v2, %v11664_v11  ;;  %v1259_v14 = vcombine.high %v1255_v43, %v1255_v43 }
 0x1bf   : > { %v6381_v40 = vsel %vm375_vm6, %v6368_v38, %v6370_v60  ;;  %v7791_v47 = vpop.f32.mrb[11].mxu1  ;;  %1271 = vst.msk [vmem:[%s10417_s6 + $0x34] sm:$0x1] %vm496_vm11, %v1258_v31  ;;  %1273 = vst.msk [vmem:[%s10417_s6 + $0x54] sm:$0x1] %vm496_vm11, %v1255_v43 }
 0x1c0   : > { %v6382_v6 = vsel %vm379_vm7, %v6381_v40, 0  ;;  %1274 = vst.msk [vmem:[%s10417_s6 + $0x64] sm:$0x1] %vm496_vm11, %v1257_v3  ;;  %v1409_v25 = vmax.f32 %v1408_v19, 0.0  ;;  %1275 = vst.msk [vmem:[%s10417_s6 + $0x74] sm:$0x1] %vm496_vm11, %v1259_v14 }
 0x1c1   : > { %7971 = vmatpush3.bf16.msra.mxu0 %v6382_v6 }
 0x1c2   : > { %v6596_v12 = vpop.permute.xlu0 %6595  ;;  %7984 = vmatprep.subr.bf16.mxu0 %v11644_v58  ;;  %v1411_v39 = vcombine.high %v1409_v25, %v1409_v25  ;;  %v1418_v23 = vrot.slane %v1409_v25, %v10396_v48 }
 0x1c3   : > { %v6598_v21 = vpop.permute.xlu1 %6597 }
 0x1c4   : > { %v6609_v9 = vsel %vm375_vm6, %v6596_v12, %v6598_v21  ;;  %7973 = vmatmul.mubr.msk.bf16.vlgmr.msra.gmra.mrb[56].mxu0 %vm389_vm10, %v10231_v53  ;;  %v1581_v18 = vpop.f32.mrb[12].mxu0  ;;  %v1425_v52 = vrot.slane %v1411_v39, %v10396_v48  ;;  %v1426_v7 = vcombine.high %v1418_v23, %v1418_v23  ;;  %v1434_v55 = vrot.slane %v1418_v23, %v10396_v48 }
 0x1c5   : > { %v6610_v28 = vsel %vm379_vm7, %v6609_v9, 0  ;;  %7988 = vmatprep.mubr.msk.bf16.mxu0 %vm8355_vm9, %v11644_v58  ;;  %v7798_v32 = vpop.f32.mrb[13].mxu0  ;;  %v1587_v30 = vmul.f32 %v1581_v18, %v11663_v10 }
 0x1c6   : > { %7979 = vmatpush3.bf16.msra.mxu1 %v6610_v28  ;;  %v1584_v36 = vpop.f32.mrb[14].mxu0  ;;  %v1427_v45 = vcombine.high %v1425_v52, %v1425_v52  ;;  %v1441_v46 = vrot.slane %v1425_v52, %v10396_v48  ;;  %v1448_v1 = vrot.slane %v1426_v7, %v10396_v48  ;;  %v1456_v4 = vcombine.high %v1434_v55, %v1434_v55 }
 0x1c7   : > { %v6809_v44 = vpop.permute.xlu0 %6808  ;;  %7992 = vmatprep.subr.bf16.mxu1 %v11644_v58  ;;  %v7799_v41 = vpop.f32.mrb[15].mxu0  ;;  %1468 = vst.msk [vmem:[%s10417_s6 + $0x5] sm:$0x1] %vm496_vm11, %v1434_v55  ;;  %v1588_v15 = vadd.f32 %v1587_v30, %v11664_v11 }
 0x1c8   : > { %v6849_v50 = vsel %vm375_vm6, %v10201_v34, %v6809_v44  ;;  %v1455_v0 = vrot.slane %v1427_v45, %v10396_v48  ;;  %v1457_v33 = vcombine.high %v1441_v46, %v1441_v46  ;;  %v1458_v51 = vcombine.high %v1448_v1, %v1448_v1  ;;  %1469 = vst.msk [vmem:[%s10417_s6 + $0x15] sm:$0x1] %vm496_vm11, %v1448_v1 }
 0x1c9   : > { %v7053_v49 = vpop.permute.xlu1 %7052  ;;  %7981 = vmatmul.mubr.msk.bf16.vlgmr.msra.gmra.mrb[56].mxu1 %vm389_vm10, %v10231_v53  ;;  %1470 = vst.msk [vmem:[%s10417_s6 + $0x25] sm:$0x1] %vm496_vm11, %v1456_v4  ;;  %1472 = vst.msk [vmem:[%s10417_s6 + $0x45] sm:$0x1] %vm496_vm11, %v1441_v46  ;;  %v1589_v63 = vmax.f32 %v1588_v15, 0.0 }
 0x1ca   : > { %7996 = vmatprep.mubr.msk.bf16.mxu1 %vm8355_vm9, %v11644_v58  ;;  %1471 = vst.msk [vmem:[%s10417_s6 + $0x35] sm:$0x1] %vm496_vm11, %v1458_v51  ;;  %1473 = vst.msk [vmem:[%s10417_s6 + $0x55] sm:$0x1] %vm496_vm11, %v1455_v0  ;;  %v1459_v42 = vcombine.high %v1455_v0, %v1455_v0  ;;  %v7088_v57 = vsel %vm375_vm6, %v7043_v61, %v7053_v49 }
 0x1cb   : > { %v6811_v34 = vpop.permute.xlu0 %6810  ;;  %1474 = vst.msk [vmem:[%s10417_s6 + $0x65] sm:$0x1] %vm496_vm11, %v1457_v33  ;;  %v1591_v37 = vcombine.high %v1589_v63, %v1589_v63  ;;  %v1598_v17 = vrot.slane %v1589_v63, %v10396_v48 }
 0x1cc   : > { %v6851_v29 = vsel %vm379_vm7, %v6849_v50, %v6811_v34  ;;  %1475 = vst.msk [vmem:[%s10417_s6 + $0x75] sm:$0x1] %vm496_vm11, %v1459_v42 }
 0x1cd   : > { %v6853_v56 = vsel %vm382_vm8, %v6851_v29, %v10242_v24  ;;  %v1605_v16 = vrot.slane %v1591_v37, %v10396_v48  ;;  %v1606_v54 = vcombine.high %v1598_v17, %v1598_v17  ;;  %v1614_v8 = vrot.slane %v1598_v17, %v10396_v48 }
 0x1ce   : > { %7985 = vmatpush3.bf16.msra.mxu0 %v6853_v56  ;;  %v1781_v59 = vpop.f32.mrb[12].mxu1 }
 0x1cf   : > { %v7066_v22 = vpop.permute.xlu1 %7065  ;;  %7986 = vmatprep.subr.bf16.mxu0 %v11644_v58  ;;  %v1787_v20 = vmul.f32 %v1781_v59, %v11663_v10  ;;  %v7806_v13 = vpop.f32.mrb[13].mxu1  ;;  %v1607_v5 = vcombine.high %v1605_v16, %v1605_v16  ;;  %v1621_v62 = vrot.slane %v1605_v16, %v10396_v48  ;;  %v1628_v2 = vrot.slane %v1606_v54, %v10396_v48 }
 0x1d0   : > { %v7090_v24 = vsel %vm379_vm7, %v7088_v57, %v7066_v22  ;;  %v1784_v26 = vpop.f32.mrb[14].mxu1  ;;  %1648 = vst.msk [vmem:[%s10417_s6 + $0x6] sm:$0x1] %vm496_vm11, %v1614_v8  ;;  %v1636_v60 = vcombine.high %v1614_v8, %v1614_v8 }
 0x1d1   : > { %v7092_v38 = vsel %vm382_vm8, %v7090_v24, %v10265_v27  ;;  %v1788_v43 = vadd.f32 %v1787_v20, %v11664_v11  ;;  %v7807_v3 = vpop.f32.mrb[15].mxu1  ;;  %v1635_v31 = vrot.slane %v1607_v5, %v10396_v48  ;;  %v1637_v40 = vcombine.high %v1621_v62, %v1621_v62  ;;  %1649 = vst.msk [vmem:[%s10417_s6 + $0x16] sm:$0x1] %vm496_vm11, %v1628_v2 }
 0x1d2   : > { %7993 = vmatpush3.bf16.msra.mxu1 %v7092_v38  ;;  %v1638_v19 = vcombine.high %v1628_v2, %v1628_v2  ;;  %1652 = vst.msk [vmem:[%s10417_s6 + $0x46] sm:$0x1] %vm496_vm11, %v1621_v62  ;;  %1650 = vst.msk [vmem:[%s10417_s6 + $0x26] sm:$0x1] %vm496_vm11, %v1636_v60 }
 0x1d3   : > { %v6844_v47 = vpop.permute.xlu0 %6843  ;;  %7994 = vmatprep.subr.bf16.mxu1 %v11644_v58  ;;  %v1789_v27 = vmax.f32 %v1788_v43, 0.0  ;;  %1653 = vst.msk [vmem:[%s10417_s6 + $0x56] sm:$0x1] %vm496_vm11, %v1635_v31  ;;  %1654 = vst.msk [vmem:[%s10417_s6 + $0x66] sm:$0x1] %vm496_vm11, %v1637_v40  ;;  %v1639_v14 = vcombine.high %v1635_v31, %v1635_v31 }
 0x1d4   : > { %v6846_v6 = vpop.permute.xlu1 %6845  ;;  %1651 = vst.msk [vmem:[%s10417_s6 + $0x36] sm:$0x1] %vm496_vm11, %v1638_v19 }
 0x1d5   : > { %v6857_v25 = vsel %vm375_vm6, %v6844_v47, %v6846_v6  ;;  %v1791_v12 = vcombine.high %v1789_v27, %v1789_v27  ;;  %v1798_v21 = vrot.slane %v1789_v27, %v10396_v48  ;;  %1655 = vst.msk [vmem:[%s10417_s6 + $0x76] sm:$0x1] %vm496_vm11, %v1639_v14 }
 0x1d6   : > { %v6858_v39 = vsel %vm379_vm7, %v6857_v25, 0 }
 0x1d7   : > { %7987 = vmatpush3.bf16.msra.mxu0 %v6858_v39  ;;  %v7083_v58 = vpop.permute.xlu0 %7082  ;;  %v1805_v23 = vrot.slane %v1791_v12, %v10396_v48  ;;  %v1806_v9 = vcombine.high %v1798_v21, %v1798_v21  ;;  %v1814_v18 = vrot.slane %v1798_v21, %v10396_v48 }
 0x1d8   : > { %v7085_v28 = vpop.permute.xlu1 %7084 }
 0x1d9   : > { %v7096_v52 = vsel %vm375_vm6, %v7083_v58, %v7085_v28  ;;  %v1807_v7 = vcombine.high %v1805_v23, %v1805_v23  ;;  %v1821_v55 = vrot.slane %v1805_v23, %v10396_v48  ;;  %v1828_v32 = vrot.slane %v1806_v9, %v10396_v48  ;;  %1848 = vst.msk [vmem:[%s10417_s6 + $0x7] sm:$0x1] %vm496_vm11, %v1814_v18 }
 0x1da   : > { %v7097_v30 = vsel %vm379_vm7, %v7096_v52, 0  ;;  %7989 = vmatmul.mubr.msk.bf16.vlgmr.msra.gmra.mrb[60].mxu0 %vm389_vm10, %v10231_v53  ;;  %v1836_v36 = vcombine.high %v1814_v18, %v1814_v18 }
 0x1db   : > { %7995 = vmatpush3.bf16.msra.mxu1 %v7097_v30  ;;  %v1835_v44 = vrot.slane %v1807_v7, %v10396_v48  ;;  %v1837_v45 = vcombine.high %v1821_v55, %v1821_v55  ;;  %v1838_v46 = vcombine.high %v1828_v32, %v1828_v32  ;;  %1849 = vst.msk [vmem:[%s10417_s6 + $0x17] sm:$0x1] %vm496_vm11, %v1828_v32  ;;  %1852 = vst.msk [vmem:[%s10417_s6 + $0x47] sm:$0x1] %vm496_vm11, %v1821_v55 }
 0x1dc   : > { %1850 = vst.msk [vmem:[%s10417_s6 + $0x27] sm:$0x1] %vm496_vm11, %v1836_v36 }
 0x1dd   : > { %1851 = vst.msk [vmem:[%s10417_s6 + $0x37] sm:$0x1] %vm496_vm11, %v1838_v46  ;;  %1853 = vst.msk [vmem:[%s10417_s6 + $0x57] sm:$0x1] %vm496_vm11, %v1835_v44  ;;  %v1839_v1 = vcombine.high %v1835_v44, %v1835_v44 }
 0x1de   : > { %1854 = vst.msk [vmem:[%s10417_s6 + $0x67] sm:$0x1] %vm496_vm11, %v1837_v45  ;;  %7997 = vmatmul.mubr.msk.bf16.vlgmr.msra.gmra.mrb[60].mxu1 %vm389_vm10, %v10231_v53  ;;  %v1972_v4 = vpop.f32.mrb[16].mxu0 }
 0x1df   : > { %1855 = vst.msk [vmem:[%s10417_s6 + $0x77] sm:$0x1] %vm496_vm11, %v1839_v1  ;;  %v1978_v41 = vmul.f32 %v1972_v4, %v11663_v10  ;;  %v7814_v61 = vpop.f32.mrb[17].mxu0 }
 0x1e0   : > { %v1975_v15 = vpop.f32.mrb[18].mxu0 }
 0x1e1   : > { %v1979_v50 = vadd.f32 %v1978_v41, %v11664_v11  ;;  %v7815_v49 = vpop.f32.mrb[19].mxu0 }
 0x1e2   : > { %v2172_v0 = vpop.f32.mrb[16].mxu1 }
 0x1e3   : > { %v1980_v33 = vmax.f32 %v1979_v50, 0.0  ;;  %v2178_v51 = vmul.f32 %v2172_v0, %v11663_v10  ;;  %v7822_v63 = vpop.f32.mrb[17].mxu1 }
 0x1e4   : > { %v2175_v34 = vpop.f32.mrb[18].mxu1 }
 0x1e5   : > { %v1982_v42 = vcombine.high %v1980_v33, %v1980_v33  ;;  %v1989_v53 = vrot.slane %v1980_v33, %v10396_v48  ;;  %v2179_v29 = vadd.f32 %v2178_v51, %v11664_v11  ;;  %v7823_v37 = vpop.f32.mrb[19].mxu1 }
 0x1e7   : > { %v1996_v17 = vrot.slane %v1982_v42, %v10396_v48  ;;  %v1997_v57 = vcombine.high %v1989_v53, %v1989_v53  ;;  %v2005_v56 = vrot.slane %v1989_v53, %v10396_v48  ;;  %v2180_v16 = vmax.f32 %v2179_v29, 0.0 }
 0x1e9   : > { %v1998_v54 = vcombine.high %v1996_v17, %v1996_v17  ;;  %v2012_v8 = vrot.slane %v1996_v17, %v10396_v48  ;;  %v2019_v59 = vrot.slane %v1997_v57, %v10396_v48  ;;  %v2027_v22 = vcombine.high %v2005_v56, %v2005_v56  ;;  %2039 = vst.msk [vmem:[%s10417_s6 + $0x8] sm:$0x1] %vm496_vm11, %v2005_v56 }
 0x1ea   : > { %v2182_v20 = vcombine.high %v2180_v16, %v2180_v16  ;;  %v2189_v13 = vrot.slane %v2180_v16, %v10396_v48 }
 0x1eb   : > { %v2026_v24 = vrot.slane %v1998_v54, %v10396_v48  ;;  %v2028_v5 = vcombine.high %v2012_v8, %v2012_v8  ;;  %v2029_v62 = vcombine.high %v2019_v59, %v2019_v59  ;;  %2040 = vst.msk [vmem:[%s10417_s6 + $0x18] sm:$0x1] %vm496_vm11, %v2019_v59  ;;  %2041 = vst.msk [vmem:[%s10417_s6 + $0x28] sm:$0x1] %vm496_vm11, %v2027_v22 }
 0x1ec   : > { %2043 = vst.msk [vmem:[%s10417_s6 + $0x48] sm:$0x1] %vm496_vm11, %v2012_v8  ;;  %v2196_v2 = vrot.slane %v2182_v20, %v10396_v48  ;;  %v2197_v26 = vcombine.high %v2189_v13, %v2189_v13  ;;  %v2205_v38 = vrot.slane %v2189_v13, %v10396_v48 }
 0x1ed   : > { %2042 = vst.msk [vmem:[%s10417_s6 + $0x38] sm:$0x1] %vm496_vm11, %v2029_v62  ;;  %2044 = vst.msk [vmem:[%s10417_s6 + $0x58] sm:$0x1] %vm496_vm11, %v2026_v24  ;;  %v2030_v60 = vcombine.high %v2026_v24, %v2026_v24 }
 0x1ee   : > { %2045 = vst.msk [vmem:[%s10417_s6 + $0x68] sm:$0x1] %vm496_vm11, %v2028_v5  ;;  %v2198_v43 = vcombine.high %v2196_v2, %v2196_v2  ;;  %v2212_v3 = vrot.slane %v2196_v2, %v10396_v48  ;;  %v2219_v31 = vrot.slane %v2197_v26, %v10396_v48  ;;  %v2227_v40 = vcombine.high %v2205_v38, %v2205_v38 }
 0x1ef   : > { %2239 = vst.msk [vmem:[%s10417_s6 + $0x9] sm:$0x1] %vm496_vm11, %v2205_v38  ;;  %2046 = vst.msk [vmem:[%s10417_s6 + $0x78] sm:$0x1] %vm496_vm11, %v2030_v60 }
 0x1f0   : > { %v2226_v19 = vrot.slane %v2198_v43, %v10396_v48  ;;  %v2228_v47 = vcombine.high %v2212_v3, %v2212_v3  ;;  %v2229_v27 = vcombine.high %v2219_v31, %v2219_v31  ;;  %2240 = vst.msk [vmem:[%s10417_s6 + $0x19] sm:$0x1] %vm496_vm11, %v2219_v31  ;;  %2241 = vst.msk [vmem:[%s10417_s6 + $0x29] sm:$0x1] %vm496_vm11, %v2227_v40 }
 0x1f1   : > { %2243 = vst.msk [vmem:[%s10417_s6 + $0x49] sm:$0x1] %vm496_vm11, %v2212_v3 }
 0x1f2   : > { %2242 = vst.msk [vmem:[%s10417_s6 + $0x39] sm:$0x1] %vm496_vm11, %v2229_v27  ;;  %2244 = vst.msk [vmem:[%s10417_s6 + $0x59] sm:$0x1] %vm496_vm11, %v2226_v19  ;;  %v2230_v6 = vcombine.high %v2226_v19, %v2226_v19 }
 0x1f3   : > { %2245 = vst.msk [vmem:[%s10417_s6 + $0x69] sm:$0x1] %vm496_vm11, %v2228_v47 }
 0x1f4   : > { %v2352_v14 = vpop.f32.mrb[20].mxu0  ;;  %2246 = vst.msk [vmem:[%s10417_s6 + $0x79] sm:$0x1] %vm496_vm11, %v2230_v6 }
 0x1f5   : > { %v2358_v25 = vmul.f32 %v2352_v14, %v11663_v10  ;;  %v7830_v12 = vpop.f32.mrb[21].mxu0 }
 0x1f6   : > { %v2355_v21 = vpop.f32.mrb[22].mxu0 }
 0x1f7   : > { %v2359_v39 = vadd.f32 %v2358_v25, %v11664_v11  ;;  %v7831_v58 = vpop.f32.mrb[23].mxu0 }
 0x1f9   : > { %v2360_v23 = vmax.f32 %v2359_v39, 0.0 }
 0x1fb   : > { %v2362_v9 = vcombine.high %v2360_v23, %v2360_v23  ;;  %v2369_v18 = vrot.slane %v2360_v23, %v10396_v48 }
 0x1fd   : > { %v2376_v28 = vrot.slane %v2362_v9, %v10396_v48  ;;  %v2377_v52 = vcombine.high %v2369_v18, %v2369_v18  ;;  %v2385_v7 = vrot.slane %v2369_v18, %v10396_v48 }
 0x1fe   : > { %v2563_v55 = vpop.f32.mrb[20].mxu1 }
 0x1ff   : > { %v2569_v32 = vmul.f32 %v2563_v55, %v11663_v10  ;;  %v7838_v30 = vpop.f32.mrb[21].mxu1  ;;  %v2378_v36 = vcombine.high %v2376_v28, %v2376_v28  ;;  %v2392_v44 = vrot.slane %v2376_v28, %v10396_v48  ;;  %v2399_v45 = vrot.slane %v2377_v52, %v10396_v48  ;;  %2419 = vst.msk [vmem:[%s10417_s6 + $0xa] sm:$0x1] %vm496_vm11, %v2385_v7 }
 0x200   : > { %v2407_v46 = vcombine.high %v2385_v7, %v2385_v7  ;;  %v2566_v1 = vpop.f32.mrb[22].mxu1 }
 0x201   : > { %v2570_v4 = vadd.f32 %v2569_v32, %v11664_v11  ;;  %v7839_v41 = vpop.f32.mrb[23].mxu1  ;;  %v2406_v61 = vrot.slane %v2378_v36, %v10396_v48  ;;  %v2408_v15 = vcombine.high %v2392_v44, %v2392_v44  ;;  %v2409_v50 = vcombine.high %v2399_v45, %v2399_v45  ;;  %2420 = vst.msk [vmem:[%s10417_s6 + $0x1a] sm:$0x1] %vm496_vm11, %v2399_v45 }
 0x202   : > { %2421 = vst.msk [vmem:[%s10417_s6 + $0x2a] sm:$0x1] %vm496_vm11, %v2407_v46  ;;  %2423 = vst.msk [vmem:[%s10417_s6 + $0x4a] sm:$0x1] %vm496_vm11, %v2392_v44 }
 0x203   : > { %v2571_v49 = vmax.f32 %v2570_v4, 0.0  ;;  %2422 = vst.msk [vmem:[%s10417_s6 + $0x3a] sm:$0x1] %vm496_vm11, %v2409_v50  ;;  %2424 = vst.msk [vmem:[%s10417_s6 + $0x5a] sm:$0x1] %vm496_vm11, %v2406_v61  ;;  %v2410_v0 = vcombine.high %v2406_v61, %v2406_v61 }
 0x204   : > { %2425 = vst.msk [vmem:[%s10417_s6 + $0x6a] sm:$0x1] %vm496_vm11, %v2408_v15 }
 0x205   : > { %v2573_v33 = vcombine.high %v2571_v49, %v2571_v49  ;;  %v2580_v51 = vrot.slane %v2571_v49, %v10396_v48  ;;  %2426 = vst.msk [vmem:[%s10417_s6 + $0x7a] sm:$0x1] %vm496_vm11, %v2410_v0 }
 0x207   : > { %v2587_v63 = vrot.slane %v2573_v33, %v10396_v48  ;;  %v2588_v34 = vcombine.high %v2580_v51, %v2580_v51  ;;  %v2596_v42 = vrot.slane %v2580_v51, %v10396_v48 }
 0x208   : > { %v2743_v57 = vpop.f32.mrb[24].mxu0 }
 0x209   : > { %v2589_v53 = vcombine.high %v2587_v63, %v2587_v63  ;;  %v2603_v29 = vrot.slane %v2587_v63, %v10396_v48  ;;  %v2610_v37 = vrot.slane %v2588_v34, %v10396_v48  ;;  %v2618_v17 = vcombine.high %v2596_v42, %v2596_v42  ;;  %2630 = vst.msk [vmem:[%s10417_s6 + $0xb] sm:$0x1] %vm496_vm11, %v2596_v42  ;;  %v7846_v16 = vpop.f32.mrb[25].mxu0 }
 0x20a   : > { %v2749_v56 = vmul.f32 %v2743_v57, %v11663_v10  ;;  %v2746_v22 = vpop.f32.mrb[26].mxu0 }
 0x20b   : > { %v2617_v54 = vrot.slane %v2589_v53, %v10396_v48  ;;  %v2619_v8 = vcombine.high %v2603_v29, %v2603_v29  ;;  %v2620_v59 = vcombine.high %v2610_v37, %v2610_v37  ;;  %2631 = vst.msk [vmem:[%s10417_s6 + $0x1b] sm:$0x1] %vm496_vm11, %v2610_v37  ;;  %2632 = vst.msk [vmem:[%s10417_s6 + $0x2b] sm:$0x1] %vm496_vm11, %v2618_v17  ;;  %v7847_v13 = vpop.f32.mrb[27].mxu0 }
 0x20c   : > { %2634 = vst.msk [vmem:[%s10417_s6 + $0x4b] sm:$0x1] %vm496_vm11, %v2603_v29  ;;  %v2750_v20 = vadd.f32 %v2749_v56, %v11664_v11 }
 0x20d   : > { %2633 = vst.msk [vmem:[%s10417_s6 + $0x3b] sm:$0x1] %vm496_vm11, %v2620_v59  ;;  %2635 = vst.msk [vmem:[%s10417_s6 + $0x5b] sm:$0x1] %vm496_vm11, %v2617_v54  ;;  %v2621_v24 = vcombine.high %v2617_v54, %v2617_v54 }
 0x20e   : > { %2636 = vst.msk [vmem:[%s10417_s6 + $0x6b] sm:$0x1] %vm496_vm11, %v2619_v8  ;;  %v2751_v5 = vmax.f32 %v2750_v20, 0.0 }
 0x20f   : > { %v2943_v62 = vpop.f32.mrb[24].mxu1  ;;  %2637 = vst.msk [vmem:[%s10417_s6 + $0x7b] sm:$0x1] %vm496_vm11, %v2621_v24 }
 0x210   : > { %v2753_v2 = vcombine.high %v2751_v5, %v2751_v5  ;;  %v2760_v26 = vrot.slane %v2751_v5, %v10396_v48  ;;  %v2949_v38 = vmul.f32 %v2943_v62, %v11663_v10  ;;  %v7854_v60 = vpop.f32.mrb[25].mxu1 }
 0x211   : > { %v2946_v43 = vpop.f32.mrb[26].mxu1 }
 0x212   : > { %v2767_v3 = vrot.slane %v2753_v2, %v10396_v48  ;;  %v2768_v31 = vcombine.high %v2760_v26, %v2760_v26  ;;  %v2776_v40 = vrot.slane %v2760_v26, %v10396_v48  ;;  %v2950_v19 = vadd.f32 %v2949_v38, %v11664_v11  ;;  %v7855_v47 = vpop.f32.mrb[27].mxu1 }
 0x214   : > { %v2769_v27 = vcombine.high %v2767_v3, %v2767_v3  ;;  %v2783_v6 = vrot.slane %v2767_v3, %v10396_v48  ;;  %v2790_v14 = vrot.slane %v2768_v31, %v10396_v48  ;;  %v2798_v25 = vcombine.high %v2776_v40, %v2776_v40  ;;  %2810 = vst.msk [vmem:[%s10417_s6 + $0xc] sm:$0x1] %vm496_vm11, %v2776_v40 }
 0x215   : > { %v2951_v12 = vmax.f32 %v2950_v19, 0.0 }
 0x216   : > { %v2797_v21 = vrot.slane %v2769_v27, %v10396_v48  ;;  %v2799_v39 = vcombine.high %v2783_v6, %v2783_v6  ;;  %v2800_v58 = vcombine.high %v2790_v14, %v2790_v14  ;;  %2811 = vst.msk [vmem:[%s10417_s6 + $0x1c] sm:$0x1] %vm496_vm11, %v2790_v14  ;;  %2812 = vst.msk [vmem:[%s10417_s6 + $0x2c] sm:$0x1] %vm496_vm11, %v2798_v25 }
 0x217   : > { %2814 = vst.msk [vmem:[%s10417_s6 + $0x4c] sm:$0x1] %vm496_vm11, %v2783_v6  ;;  %v2953_v23 = vcombine.high %v2951_v12, %v2951_v12  ;;  %v2960_v9 = vrot.slane %v2951_v12, %v10396_v48 }
 0x218   : > { %2813 = vst.msk [vmem:[%s10417_s6 + $0x3c] sm:$0x1] %vm496_vm11, %v2800_v58  ;;  %2815 = vst.msk [vmem:[%s10417_s6 + $0x5c] sm:$0x1] %vm496_vm11, %v2797_v21  ;;  %v2801_v18 = vcombine.high %v2797_v21, %v2797_v21 }
 0x219   : > { %2816 = vst.msk [vmem:[%s10417_s6 + $0x6c] sm:$0x1] %vm496_vm11, %v2799_v39  ;;  %v2967_v28 = vrot.slane %v2953_v23, %v10396_v48  ;;  %v2968_v52 = vcombine.high %v2960_v9, %v2960_v9  ;;  %v2976_v7 = vrot.slane %v2960_v9, %v10396_v48 }
 0x21a   : > { %2817 = vst.msk [vmem:[%s10417_s6 + $0x7c] sm:$0x1] %vm496_vm11, %v2801_v18 }
 0x21b   : > { %v2969_v55 = vcombine.high %v2967_v28, %v2967_v28  ;;  %v2983_v32 = vrot.slane %v2967_v28, %v10396_v48  ;;  %v2990_v30 = vrot.slane %v2968_v52, %v10396_v48  ;;  %v2998_v36 = vcombine.high %v2976_v7, %v2976_v7  ;;  %3010 = vst.msk [vmem:[%s10417_s6 + $0xd] sm:$0x1] %vm496_vm11, %v2976_v7 }
 0x21d   : > { %v2997_v44 = vrot.slane %v2969_v55, %v10396_v48  ;;  %v2999_v45 = vcombine.high %v2983_v32, %v2983_v32  ;;  %v3000_v46 = vcombine.high %v2990_v30, %v2990_v30  ;;  %3011 = vst.msk [vmem:[%s10417_s6 + $0x1d] sm:$0x1] %vm496_vm11, %v2990_v30  ;;  %3012 = vst.msk [vmem:[%s10417_s6 + $0x2d] sm:$0x1] %vm496_vm11, %v2998_v36  ;;  %v10889_v55 = vsub.s32 0, %v10385_v35 }
 0x21e   : > { %3014 = vst.msk [vmem:[%s10417_s6 + $0x4d] sm:$0x1] %vm496_vm11, %v2983_v32  ;;  %v3123_v1 = vpop.f32.mrb[28].mxu0 }
 0x21f   : > { %v3129_v4 = vmul.f32 %v3123_v1, %v11663_v10  ;;  %v7862_v41 = vpop.f32.mrb[29].mxu0  ;;  %3013 = vst.msk [vmem:[%s10417_s6 + $0x3d] sm:$0x1] %vm496_vm11, %v3000_v46  ;;  %3015 = vst.msk [vmem:[%s10417_s6 + $0x5d] sm:$0x1] %vm496_vm11, %v2997_v44  ;;  %v3001_v61 = vcombine.high %v2997_v44, %v2997_v44 }
 0x220   : > { %3016 = vst.msk [vmem:[%s10417_s6 + $0x6d] sm:$0x1] %vm496_vm11, %v2999_v45  ;;  %v3126_v15 = vpop.f32.mrb[30].mxu0 }
 0x221   : > { %v3130_v50 = vadd.f32 %v3129_v4, %v11664_v11  ;;  %v7863_v49 = vpop.f32.mrb[31].mxu0  ;;  %3017 = vst.msk [vmem:[%s10417_s6 + $0x7d] sm:$0x1] %vm496_vm11, %v3001_v61 }
 0x223   : > { %v3131_v0 = vmax.f32 %v3130_v50, 0.0  ;;  %v3323_v33 = vpop.f32.mrb[28].mxu1 }
 0x224   : > { %v3329_v51 = vmul.f32 %v3323_v33, %v11663_v10  ;;  %v7870_v63 = vpop.f32.mrb[29].mxu1 }
 0x225   : > { %v3133_v34 = vcombine.high %v3131_v0, %v3131_v0  ;;  %v3140_v42 = vrot.slane %v3131_v0, %v10396_v48  ;;  %v3326_v53 = vpop.f32.mrb[30].mxu1 }
 0x226   : > { %v3330_v29 = vadd.f32 %v3329_v51, %v11664_v11  ;;  %v7871_v37 = vpop.f32.mrb[31].mxu1 }
 0x227   : > { %v3147_v17 = vrot.slane %v3133_v34, %v10396_v48  ;;  %v3148_v57 = vcombine.high %v3140_v42, %v3140_v42  ;;  %v3156_v56 = vrot.slane %v3140_v42, %v10396_v48 }
 0x228   : > { %v3331_v16 = vmax.f32 %v3330_v29, 0.0 }
 0x229   : > { %v3149_v54 = vcombine.high %v3147_v17, %v3147_v17  ;;  %v3163_v8 = vrot.slane %v3147_v17, %v10396_v48  ;;  %v3170_v59 = vrot.slane %v3148_v57, %v10396_v48  ;;  %v3178_v22 = vcombine.high %v3156_v56, %v3156_v56  ;;  %3190 = vst.msk [vmem:[%s10417_s6 + $0xe] sm:$0x1] %vm496_vm11, %v3156_v56 }
 0x22a   : > { %v3333_v20 = vcombine.high %v3331_v16, %v3331_v16  ;;  %v3340_v13 = vrot.slane %v3331_v16, %v10396_v48 }
 0x22b   : > { %v3177_v24 = vrot.slane %v3149_v54, %v10396_v48  ;;  %v3179_v5 = vcombine.high %v3163_v8, %v3163_v8  ;;  %v3180_v62 = vcombine.high %v3170_v59, %v3170_v59  ;;  %3191 = vst.msk [vmem:[%s10417_s6 + $0x1e] sm:$0x1] %vm496_vm11, %v3170_v59  ;;  %3192 = vst.msk [vmem:[%s10417_s6 + $0x2e] sm:$0x1] %vm496_vm11, %v3178_v22 }
 0x22c   : > { %3194 = vst.msk [vmem:[%s10417_s6 + $0x4e] sm:$0x1] %vm496_vm11, %v3163_v8  ;;  %v3347_v2 = vrot.slane %v3333_v20, %v10396_v48  ;;  %v3348_v26 = vcombine.high %v3340_v13, %v3340_v13  ;;  %v3356_v38 = vrot.slane %v3340_v13, %v10396_v48 }
 0x22d   : > { %3193 = vst.msk [vmem:[%s10417_s6 + $0x3e] sm:$0x1] %vm496_vm11, %v3180_v62  ;;  %3195 = vst.msk [vmem:[%s10417_s6 + $0x5e] sm:$0x1] %vm496_vm11, %v3177_v24  ;;  %v3181_v60 = vcombine.high %v3177_v24, %v3177_v24 }
 0x22e   : > { %3196 = vst.msk [vmem:[%s10417_s6 + $0x6e] sm:$0x1] %vm496_vm11, %v3179_v5  ;;  %v3349_v43 = vcombine.high %v3347_v2, %v3347_v2  ;;  %v3363_v3 = vrot.slane %v3347_v2, %v10396_v48  ;;  %v3370_v31 = vrot.slane %v3348_v26, %v10396_v48  ;;  %v3378_v40 = vcombine.high %v3356_v38, %v3356_v38 }
 0x22f   : > { %3390 = vst.msk [vmem:[%s10417_s6 + $0xf] sm:$0x1] %vm496_vm11, %v3356_v38  ;;  %3197 = vst.msk [vmem:[%s10417_s6 + $0x7e] sm:$0x1] %vm496_vm11, %v3181_v60 }
 0x230   : > { %v3377_v19 = vrot.slane %v3349_v43, %v10396_v48  ;;  %v3379_v47 = vcombine.high %v3363_v3, %v3363_v3  ;;  %v3380_v27 = vcombine.high %v3370_v31, %v3370_v31  ;;  %3391 = vst.msk [vmem:[%s10417_s6 + $0x1f] sm:$0x1] %vm496_vm11, %v3370_v31  ;;  %3392 = vst.msk [vmem:[%s10417_s6 + $0x2f] sm:$0x1] %vm496_vm11, %v3378_v40 }
 0x231   : > { %3394 = vst.msk [vmem:[%s10417_s6 + $0x4f] sm:$0x1] %vm496_vm11, %v3363_v3 }
 0x232   : > { %3393 = vst.msk [vmem:[%s10417_s6 + $0x3f] sm:$0x1] %vm496_vm11, %v3380_v27  ;;  %3395 = vst.msk [vmem:[%s10417_s6 + $0x5f] sm:$0x1] %vm496_vm11, %v3377_v19  ;;  %v3381_v6 = vcombine.high %v3377_v19, %v3377_v19 }
 0x233   : > { %3396 = vst.msk [vmem:[%s10417_s6 + $0x6f] sm:$0x1] %vm496_vm11, %v3379_v47  ;;  %v3528_v14 = vpop.f32.mrb[32].mxu0 }
 0x234   : > { %v3534_v25 = vmul.f32 %v3528_v14, %v11663_v10  ;;  %v7878_v12 = vpop.f32.mrb[33].mxu0  ;;  %3397 = vst.msk [vmem:[%s10417_s6 + $0x7f] sm:$0x1] %vm496_vm11, %v3381_v6 }
 0x235   : > { %v3531_v21 = vpop.f32.mrb[34].mxu0 }
 0x236   : > { %v3535_v39 = vadd.f32 %v3534_v25, %v11664_v11  ;;  %v7879_v58 = vpop.f32.mrb[35].mxu0 }
 0x238   : > { %v3536_v23 = vmax.f32 %v3535_v39, 0.0 }
 0x239   : > { %v3757_v9 = vpop.f32.mrb[32].mxu1 }
 0x23a   : > { %v3545_v18 = vrot.slane %v3536_v23, %v10396_v48  ;;  %v3763_v28 = vmul.f32 %v3757_v9, %v11663_v10  ;;  %v7886_v52 = vpop.f32.mrb[33].mxu1  ;;  %v3538_v46 = vcombine.high %v3536_v23, %v3536_v23 }
 0x23b   : > { %v3760_v7 = vpop.f32.mrb[34].mxu1 }
 0x23c   : > { %v3553_v32 = vcombine.high %v3545_v18, %v3545_v18  ;;  %v3561_v30 = vrot.slane %v3545_v18, %v10396_v48  ;;  %v3764_v36 = vadd.f32 %v3763_v28, %v11664_v11  ;;  %v7887_v44 = vpop.f32.mrb[35].mxu1  ;;  %v3552_v50 = vrot.slane %v3538_v46, %v10396_v48 }
 0x23e   : > { %v3575_v45 = vrot.slane %v3553_v32, %v10396_v48  ;;  %v3765_v1 = vmax.f32 %v3764_v36, 0.0  ;;  %v3590_v4 = vrot.slane %v3561_v30, %v10889_v55  ;;  %v3583_v34 = vcombine.high %v3561_v30, %v3561_v30 }
 0x23f   : > { %v3554_v53 = vcombine.high %v3552_v50, %v3552_v50  ;;  %v3568_v8 = vrot.slane %v3552_v50, %v10396_v48 }
 0x240   : > { %v3594_v41 = vrot.slane %v3575_v45, %v10889_v55  ;;  %v3774_v61 = vrot.slane %v3765_v1, %v10396_v48  ;;  %3619 = vrot.lane.b32.xlu0 %v3590_v4, %s8357_s7  ;;  %v3767_v29 = vcombine.high %v3765_v1, %v3765_v1  ;;  %v3585_v57 = vcombine.high %v3575_v45, %v3575_v45 }
 0x241   : > { %v4244_v35 = vpop.f32.mrb[36].mxu1  ;;  %v3598_v59 = vrot.slane %v3583_v34, %v10889_v55  ;;  %v3582_v62 = vrot.slane %v3554_v53, %v10396_v48  ;;  %v3606_v43 = vrot.slane %v3568_v8, %v10889_v55  ;;  %v3584_v18 = vcombine.high %v3568_v8, %v3568_v8 }
 0x242   : > { %3621 = vrot.lane.b32.xlu1 %v3594_v41, %s8357_s7  ;;  %v7902_v15 = vpop.f32.mrb[37].mxu1  ;;  %v3782_v49 = vcombine.high %v3774_v61, %v3774_v61  ;;  %v3790_v0 = vrot.slane %v3774_v61, %v10396_v48  ;;  %v3781_v13 = vrot.slane %v3767_v29, %v10396_v48  ;;  %v3602_v5 = vrot.slane %v3585_v57, %v10889_v55 }
 0x243   : > { %v4247_v33 = vpop.f32.mrb[38].mxu1  ;;  %v4250_v60 = vmul.f32 %v4244_v35, %v11663_v10  ;;  %v3610_v40 = vrot.slane %v3582_v62, %v10889_v55  ;;  %v3586_v32 = vcombine.high %v3582_v62, %v3582_v62  ;;  %v3614_v45 = vrot.slane %v3584_v18, %v10889_v55 }
 0x244   : > { %v7903_v51 = vpop.f32.mrb[39].mxu1  ;;  %v3804_v63 = vrot.slane %v3782_v49, %v10396_v48  ;;  %v3819_v42 = vrot.slane %v3790_v0, %v10889_v55  ;;  %v3812_v38 = vcombine.high %v3790_v0, %v3790_v0  ;;  %v3783_v3 = vcombine.high %v3781_v13, %v3781_v13 }
 0x245   : > { %v3797_v14 = vrot.slane %v3781_v13, %v10396_v48  ;;  %v4251_v39 = vadd.f32 %v4250_v60, %v11664_v11  ;;  %v3618_v61 = vrot.slane %v3586_v32, %v10889_v55 }
 0x246   : > { %v3823_v17 = vrot.slane %v3804_v63, %v10889_v55  ;;  %3848 = vrot.lane.b32.xlu0 %v3819_v42, %s8357_s7  ;;  %v3814_v19 = vcombine.high %v3804_v63, %v3804_v63  ;;  %v3827_v25 = vrot.slane %v3812_v38, %v10889_v55  ;;  %v3811_v23 = vrot.slane %v3783_v3, %v10396_v48 }
 0x247   : > { %v4016_v37 = vpop.f32.mrb[36].mxu0  ;;  %v3835_v9 = vrot.slane %v3797_v14, %v10889_v55  ;;  %v4252_v52 = vmax.f32 %v4251_v39, 0.0  ;;  %v3813_v46 = vcombine.high %v3797_v14, %v3797_v14 }
 0x248   : > { %v7894_v56 = vpop.f32.mrb[37].mxu0  ;;  %3850 = vrot.lane.b32.xlu1 %v3823_v17, %s8357_s7  ;;  %v4022_v24 = vmul.f32 %v4016_v37, %v11663_v10  ;;  %v3831_v58 = vrot.slane %v3814_v19, %v10889_v55  ;;  %v3839_v7 = vrot.slane %v3811_v23, %v10889_v55  ;;  %v3815_v35 = vcombine.high %v3811_v23, %v3811_v23 }
 0x249   : > { %v4019_v16 = vpop.f32.mrb[38].mxu0  ;;  %v10906_v54 = vpop.f32.mrb[40].mxu1  ;;  %v4261_v41 = vrot.slane %v4252_v52, %v10396_v48  ;;  %v3843_v0 = vrot.slane %v3813_v46, %v10889_v55 }
 0x24a   : > { %v7895_v22 = vpop.f32.mrb[39].mxu0  ;;  %v7918_v20 = vpop.f32.mrb[41].mxu1  ;;  %3623 = vrot.lane.b32.xlu0 %v3598_v59, %s8357_s7  ;;  %v4023_v31 = vadd.f32 %v4022_v24, %v11664_v11  ;;  %v3847_v42 = vrot.slane %v3815_v35, %v10889_v55 }
 0x24b   : > { %v4723_v2 = vpop.f32.mrb[42].mxu1  ;;  %v4269_v34 = vcombine.high %v4261_v41, %v4261_v41  ;;  %v4277_v29 = vrot.slane %v4261_v41, %v10396_v48  ;;  %v4254_v22 = vcombine.high %v4252_v52, %v4252_v52 }
 0x24c   : > { %v7919_v26 = vpop.f32.mrb[43].mxu1  ;;  %3625 = vrot.lane.b32.xlu1 %v3602_v5, %s8357_s7  ;;  %v4024_v21 = vmax.f32 %v4023_v31, 0.0 }
 0x24d   : > { %v4291_v57 = vrot.slane %v4269_v34, %v10396_v48  ;;  %v4306_v8 = vrot.slane %v4277_v29, %v10889_v55  ;;  %v4268_v62 = vrot.slane %v4254_v22, %v10396_v48  ;;  %v4299_v31 = vcombine.high %v4277_v29, %v4277_v29 }
 0x24e   : > { %3627 = vrot.lane.b32.xlu0 %v3606_v43, %s8357_s7  ;;  %v4033_v28 = vrot.slane %v4024_v21, %v10396_v48  ;;  %v4026_v51 = vcombine.high %v4024_v21, %v4024_v21 }
 0x24f   : > { %v10920_v47 = vpop.f32.mrb[40].mxu0  ;;  %v4310_v20 = vrot.slane %v4291_v57, %v10889_v55  ;;  %v4314_v21 = vrot.slane %v4299_v31, %v10889_v55 }
 0x250   : > { %v7910_v27 = vpop.f32.mrb[41].mxu0  ;;  %3629 = vrot.lane.b32.xlu1 %v3610_v40, %s8357_s7  ;;  %v4041_v4 = vcombine.high %v4033_v28, %v4033_v28  ;;  %v4049_v49 = vrot.slane %v4033_v28, %v10396_v48  ;;  %v4040_v17 = vrot.slane %v4026_v51, %v10396_v48  ;;  %v4498_v2 = vmul.f32 %v10920_v47, %v11663_v10 }
 0x251   : > { %v4495_v6 = vpop.f32.mrb[42].mxu0  ;;  %v4726_v40 = vmul.f32 %v10906_v54, %v11663_v10  ;;  %v4270_v47 = vcombine.high %v4268_v62, %v4268_v62 }
 0x252   : > { %v7911_v12 = vpop.f32.mrb[43].mxu0  ;;  %3852 = vrot.lane.b32.xlu0 %v3827_v25, %s8357_s7  ;;  %v4063_v63 = vrot.slane %v4041_v4, %v10396_v48  ;;  %v4078_v37 = vrot.slane %v4049_v49, %v10889_v55  ;;  %v4071_v16 = vcombine.high %v4049_v49, %v4049_v49  ;;  %v4042_v59 = vcombine.high %v4040_v17, %v4040_v17 }
 0x253   : > { %v4056_v24 = vrot.slane %v4040_v17, %v10396_v48  ;;  %v4499_v6 = vadd.f32 %v4498_v2, %v11664_v11  ;;  %v4301_v25 = vcombine.high %v4291_v57, %v4291_v57  ;;  %v4284_v12 = vrot.slane %v4268_v62, %v10396_v48 }
 0x254   : > { %3854 = vrot.lane.b32.xlu1 %v3831_v58, %s8357_s7  ;;  %v4082_v56 = vrot.slane %v4063_v63, %v10889_v55  ;;  %v4073_v13 = vcombine.high %v4063_v63, %v4063_v63  ;;  %v4086_v5 = vrot.slane %v4071_v16, %v10889_v55  ;;  %v4070_v38 = vrot.slane %v4042_v59, %v10396_v48 }
 0x255   : > { %v4094_v19 = vrot.slane %v4056_v24, %v10889_v55  ;;  %v4500_v54 = vmax.f32 %v4499_v6, 0.0  ;;  %v4727_v58 = vadd.f32 %v4726_v40, %v11664_v11  ;;  %v4318_v23 = vrot.slane %v4301_v25, %v10889_v55 }
 0x256   : > { %3856 = vrot.lane.b32.xlu0 %v3835_v9, %s8357_s7  ;;  %v4090_v26 = vrot.slane %v4073_v13, %v10889_v55  ;;  %v4098_v14 = vrot.slane %v4070_v38, %v10889_v55  ;;  %v4298_v9 = vrot.slane %v4270_v47, %v10396_v48  ;;  %v4072_v32 = vcombine.high %v4056_v24, %v4056_v24 }
 0x257   : > { %v10934_v30 = vpop.f32.mrb[44].mxu0  ;;  %v4074_v46 = vcombine.high %v4070_v38, %v4070_v38  ;;  %v4300_v4 = vcombine.high %v4284_v12, %v4284_v12 }
 0x258   : > { %v7926_v36 = vpop.f32.mrb[45].mxu0  ;;  %3858 = vrot.lane.b32.xlu1 %v3839_v7, %s8357_s7  ;;  %v4322_v7 = vrot.slane %v4284_v12, %v10889_v55  ;;  %v4974_v40 = vmul.f32 %v10934_v30, %v11663_v10 }
 0x259   : > { %v4971_v44 = vpop.f32.mrb[46].mxu0  ;;  %v4509_v36 = vrot.slane %v4500_v54, %v10396_v48  ;;  %v4106_v35 = vrot.slane %v4074_v46, %v10889_v55 }
 0x25a   : > { %v7927_v1 = vpop.f32.mrb[47].mxu0  ;;  %3631 = vrot.lane.b32.xlu0 %v3614_v45, %s8357_s7  ;;  %v4728_v44 = vmax.f32 %v4727_v58, 0.0  ;;  %v4326_v45 = vrot.slane %v4298_v9, %v10889_v55  ;;  %v4975_v25 = vadd.f32 %v4974_v40, %v11664_v11 }
 0x25b   : > { %v10942_v15 = vpop.f32.mrb[44].mxu1  ;;  %v4102_v1 = vrot.slane %v4072_v32, %v10889_v55  ;;  %v4517_v41 = vcombine.high %v4509_v36, %v4509_v36  ;;  %v4525_v49 = vrot.slane %v4509_v36, %v10396_v48 }
 0x25c   : > { %3633 = vrot.lane.b32.xlu1 %v3618_v61, %s8357_s7  ;;  %v7934_v50 = vpop.f32.mrb[45].mxu1  ;;  %v4737_v61 = vrot.slane %v4728_v44, %v10396_v48  ;;  %v4730_v22 = vcombine.high %v4728_v44, %v4728_v44  ;;  %v5213_v12 = vmul.f32 %v10942_v15, %v11663_v10 }
 0x25d   : > { %v5210_v33 = vpop.f32.mrb[46].mxu1  ;;  %v4302_v50 = vcombine.high %v4298_v9, %v4298_v9  ;;  %v4539_v51 = vrot.slane %v4517_v41, %v10396_v48  ;;  %v4547_v59 = vcombine.high %v4525_v49, %v4525_v49 }
 0x25e   : > { %v7935_v53 = vpop.f32.mrb[47].mxu1  ;;  %3860 = vrot.lane.b32.xlu0 %v3843_v0, %s8357_s7  ;;  %v4330_v0 = vrot.slane %v4300_v4, %v10889_v55  ;;  %v4502_v33 = vcombine.high %v4500_v54, %v4500_v54  ;;  %v4745_v63 = vcombine.high %v4737_v61, %v4737_v61  ;;  %v5214_v9 = vadd.f32 %v5213_v12, %v11664_v11 }
 0x25f   : > { %v4334_v34 = vrot.slane %v4302_v50, %v10889_v55  ;;  %v4554_v53 = vrot.slane %v4525_v49, %v10889_v55  ;;  %v4558_v57 = vrot.slane %v4539_v51, %v10889_v55  ;;  %v4549_v62 = vcombine.high %v4539_v51, %v4539_v51 }
 0x260   : > { %3862 = vrot.lane.b32.xlu1 %v3847_v42, %s8357_s7  ;;  %v4753_v42 = vrot.slane %v4737_v61, %v10396_v48  ;;  %v4767_v17 = vrot.slane %v4745_v63, %v10396_v48  ;;  %v4562_v31 = vrot.slane %v4547_v59, %v10889_v55  ;;  %v5215_v32 = vmax.f32 %v5214_v9, 0.0 }
 0x262   : > { %4107 = vrot.lane.b32.xlu0 %v4078_v37, %s8357_s7  ;;  %v4516_v37 = vrot.slane %v4502_v33, %v10396_v48  ;;  %v4775_v6 = vcombine.high %v4753_v42, %v4753_v42  ;;  %v4777_v30 = vcombine.high %v4767_v17, %v4767_v17  ;;  %v5224_v50 = vrot.slane %v5215_v32, %v10396_v48 }
 0x264   : > { %4109 = vrot.lane.b32.xlu1 %v4082_v56, %s8357_s7  ;;  %v4518_v24 = vcombine.high %v4516_v37, %v4516_v37  ;;  %v4790_v58 = vrot.slane %v4775_v6, %v10889_v55 }
 0x266   : > { %4335 = vrot.lane.b32.xlu0 %v4306_v8, %s8357_s7 }
 0x268   : > { %4337 = vrot.lane.b32.xlu1 %v4310_v20, %s8357_s7  ;;  %v4782_v20 = vrot.slane %v4753_v42, %v10889_v55 }
 0x26a   : > { %4111 = vrot.lane.b32.xlu0 %v4086_v5, %s8357_s7  ;;  %v4786_v5 = vrot.slane %v4767_v17, %v10889_v55  ;;  %v5232_v17 = vcombine.high %v5224_v50, %v5224_v50 }
 0x26b   : > { %v10969_v60 = vpop.f32.mrb[48].mxu0 }
 0x26c   : > { %v7942_v43 = vpop.f32.mrb[49].mxu0  ;;  %4113 = vrot.lane.b32.xlu1 %v4090_v26, %s8357_s7  ;;  %v5461_v40 = vmul.f32 %v10969_v60, %v11663_v10 }
 0x26d   : > { %v5458_v3 = vpop.f32.mrb[50].mxu0  ;;  %v4532_v43 = vrot.slane %v4516_v37, %v10396_v48 }
 0x26e   : > { %v7943_v27 = vpop.f32.mrb[51].mxu0  ;;  %4115 = vrot.lane.b32.xlu0 %v4094_v19, %s8357_s7  ;;  %v4744_v3 = vrot.slane %v4730_v22, %v10396_v48  ;;  %v4566_v19 = vrot.slane %v4549_v62, %v10889_v55  ;;  %v5254_v22 = vrot.slane %v5232_v17, %v10396_v48 }
 0x26f   : > { %v4546_v27 = vrot.slane %v4518_v24, %v10396_v48 }
 0x270   : > { %4117 = vrot.lane.b32.xlu1 %v4098_v14, %s8357_s7  ;;  %v4746_v47 = vcombine.high %v4744_v3, %v4744_v3  ;;  %v4570_v14 = vrot.slane %v4532_v43, %v10889_v55  ;;  %v4760_v54 = vrot.slane %v4744_v3, %v10396_v48 }
 0x271   : > { %v10982_v39 = vpop.f32.mrb[48].mxu1 }
 0x272   : > { %v7950_v18 = vpop.f32.mrb[49].mxu1  ;;  %4339 = vrot.lane.b32.xlu0 %v4314_v21, %s8357_s7  ;;  %v4574_v21 = vrot.slane %v4546_v27, %v10889_v55  ;;  %v4798_v15 = vrot.slane %v4760_v54, %v10889_v55  ;;  %v4776_v41 = vcombine.high %v4760_v54, %v4760_v54  ;;  %v5689_v60 = vmul.f32 %v10982_v39, %v11663_v10 }
 0x273   : > { %v5686_v28 = vpop.f32.mrb[50].mxu1  ;;  %v4794_v18 = vrot.slane %v4777_v30, %v10889_v55  ;;  %v5264_v54 = vcombine.high %v5254_v22, %v5254_v22 }
 0x274   : > { %4341 = vrot.lane.b32.xlu1 %v4318_v23, %s8357_s7  ;;  %v7951_v52 = vpop.f32.mrb[51].mxu1  ;;  %v4976_v23 = vmax.f32 %v4975_v25, 0.0  ;;  %v4774_v28 = vrot.slane %v4746_v47, %v10396_v48 }
 0x275   : > { %v4548_v52 = vcombine.high %v4532_v43, %v4532_v43 }
 0x276   : > { %4343 = vrot.lane.b32.xlu0 %v4322_v7, %s8357_s7  ;;  %v4985_v7 = vrot.slane %v4976_v23, %v10396_v48  ;;  %v4802_v44 = vrot.slane %v4774_v28, %v10889_v55 }
 0x277   : > { %v4578_v4 = vrot.slane %v4548_v52, %v10889_v55  ;;  %v5690_v52 = vadd.f32 %v5689_v60, %v11664_v11 }
 0x278   : > { %4345 = vrot.lane.b32.xlu1 %v4326_v45, %s8357_s7  ;;  %v4550_v45 = vcombine.high %v4546_v27, %v4546_v27  ;;  %v5001_v63 = vrot.slane %v4985_v7, %v10396_v48 }
 0x27a   : > { %4119 = vrot.lane.b32.xlu0 %v4102_v1, %s8357_s7  ;;  %v4582_v49 = vrot.slane %v4550_v45, %v10889_v55  ;;  %v5023_v24 = vcombine.high %v5001_v63, %v5001_v63 }
 0x27c   : > { %4121 = vrot.lane.b32.xlu1 %v4106_v35, %s8357_s7  ;;  %v4993_v35 = vcombine.high %v4985_v7, %v4985_v7 }
 0x27e   : > { %4347 = vrot.lane.b32.xlu0 %v4330_v0, %s8357_s7  ;;  %v4778_v0 = vcombine.high %v4774_v28, %v4774_v28  ;;  %v5015_v37 = vrot.slane %v4993_v35, %v10396_v48  ;;  %v5691_v35 = vmax.f32 %v5690_v52, 0.0 }
 0x280   : > { %4349 = vrot.lane.b32.xlu1 %v4334_v34, %s8357_s7  ;;  %v4806_v34 = vrot.slane %v4776_v41, %v10889_v55 }
 0x282   : > { %v11007_v29 = vpop.f32.mrb[52].mxu0  ;;  %4583 = vrot.lane.b32.xlu0 %v4554_v53, %s8357_s7  ;;  %v4978_v53 = vcombine.high %v4976_v23, %v4976_v23 }
 0x283   : > { %v7958_v56 = vpop.f32.mrb[53].mxu0 }
 0x284   : > { %v5945_v16 = vpop.f32.mrb[54].mxu0  ;;  %4585 = vrot.lane.b32.xlu1 %v4558_v57, %s8357_s7  ;;  %v4810_v57 = vrot.slane %v4778_v0, %v10889_v55  ;;  %v4992_v59 = vrot.slane %v4978_v53, %v10396_v48 }
 0x285   : > { %v7959_v8 = vpop.f32.mrb[55].mxu0  ;;  %v5240_v16 = vrot.slane %v5224_v50, %v10396_v48 }
 0x286   : > { %v11015_v13 = vpop.f32.mrb[52].mxu1  ;;  %4811 = vrot.lane.b32.xlu0 %v4782_v20, %s8357_s7  ;;  %v5030_v8 = vrot.slane %v5001_v63, %v10889_v55  ;;  %v5034_v20 = vrot.slane %v5015_v37, %v10889_v55  ;;  %v5008_v43 = vrot.slane %v4992_v59, %v10396_v48 }
 0x287   : > { %v7966_v2 = vpop.f32.mrb[53].mxu1  ;;  %v5269_v62 = vrot.slane %v5240_v16, %v10889_v55 }
 0x288   : > { %v6173_v26 = vpop.f32.mrb[54].mxu1  ;;  %4813 = vrot.lane.b32.xlu1 %v4786_v5, %s8357_s7  ;;  %v5217_v5 = vcombine.high %v5215_v32, %v5215_v32  ;;  %v4994_v2 = vcombine.high %v4992_v59, %v4992_v59  ;;  %v5046_v25 = vrot.slane %v5008_v43, %v10889_v55  ;;  %v5281_v32 = vrot.slane %v5264_v54, %v10889_v55 }
 0x289   : > { %v7967_v38 = vpop.f32.mrb[55].mxu1  ;;  %v5273_v26 = vrot.slane %v5254_v22, %v10889_v55  ;;  %v5024_v41 = vcombine.high %v5008_v43, %v5008_v43 }
 0x28a   : > { %4587 = vrot.lane.b32.xlu0 %v4562_v31, %s8357_s7  ;;  %v5025_v38 = vcombine.high %v5015_v37, %v5015_v37  ;;  %v5231_v3 = vrot.slane %v5217_v5, %v10396_v48  ;;  %v5038_v31 = vrot.slane %v5023_v24, %v10889_v55  ;;  %v5022_v27 = vrot.slane %v4994_v2, %v10396_v48 }
 0x28c   : > { %4589 = vrot.lane.b32.xlu1 %v4566_v19, %s8357_s7  ;;  %v5042_v19 = vrot.slane %v5025_v38, %v10889_v55  ;;  %v5233_v6 = vcombine.high %v5231_v3, %v5231_v3  ;;  %v5050_v30 = vrot.slane %v5022_v27, %v10889_v55 }
 0x28e   : > { %4591 = vrot.lane.b32.xlu0 %v4570_v14, %s8357_s7  ;;  %v5262_v14 = vcombine.high %v5240_v16, %v5240_v16 }
 0x290   : > { %4593 = vrot.lane.b32.xlu1 %v4574_v21, %s8357_s7  ;;  %v5462_v21 = vadd.f32 %v5461_v40, %v11664_v11  ;;  %v5277_v28 = vrot.slane %v5262_v14, %v10889_v55 }
 0x292   : > { %4815 = vrot.lane.b32.xlu0 %v4790_v58, %s8357_s7  ;;  %v5463_v39 = vmax.f32 %v5462_v21, 0.0 }
 0x294   : > { %4817 = vrot.lane.b32.xlu1 %v4794_v18, %s8357_s7  ;;  %v5247_v18 = vrot.slane %v5231_v3, %v10396_v48 }
 0x296   : > { %4819 = vrot.lane.b32.xlu0 %v4798_v15, %s8357_s7  ;;  %v5263_v63 = vcombine.high %v5247_v18, %v5247_v18 }
 0x297   : > { %v11045_v36 = vpop.f32.mrb[56].mxu0 }
 0x298   : > { %v7974_v46 = vpop.f32.mrb[57].mxu0  ;;  %4821 = vrot.lane.b32.xlu1 %v4802_v44, %s8357_s7  ;;  %v5261_v44 = vrot.slane %v5233_v6, %v10396_v48  ;;  %v5693_v6 = vcombine.high %v5691_v35, %v5691_v35 }
 0x299   : > { %v6421_v1 = vpop.f32.mrb[58].mxu0 }
 0x29a   : > { %v7975_v61 = vpop.f32.mrb[59].mxu0  ;;  %4595 = vrot.lane.b32.xlu0 %v4578_v4, %s8357_s7  ;;  %v5285_v4 = vrot.slane %v5247_v18, %v10889_v55  ;;  %v5289_v50 = vrot.slane %v5261_v44, %v10889_v55  ;;  %v5265_v17 = vcombine.high %v5261_v44, %v5261_v44  ;;  %v6176_v44 = vmul.f32 %v11015_v13, %v11663_v10 }
 0x29b   : > { %v5472_v61 = vrot.slane %v5463_v39, %v10396_v48 }
 0x29c   : > { %v11053_v33 = vpop.f32.mrb[56].mxu1  ;;  %4597 = vrot.lane.b32.xlu1 %v4582_v49, %s8357_s7  ;;  %v5026_v49 = vcombine.high %v5022_v27, %v5022_v27  ;;  %v5297_v24 = vrot.slane %v5265_v17, %v10889_v55  ;;  %v6177_v13 = vadd.f32 %v6176_v44, %v11664_v11 }
 0x29d   : > { %v7982_v51 = vpop.f32.mrb[57].mxu1 }
 0x29e   : > { %v6649_v42 = vpop.f32.mrb[58].mxu1  ;;  %4823 = vrot.lane.b32.xlu0 %v4806_v34, %s8357_s7  ;;  %v5054_v51 = vrot.slane %v5024_v41, %v10889_v55  ;;  %v5480_v34 = vcombine.high %v5472_v61, %v5472_v61  ;;  %v5058_v37 = vrot.slane %v5026_v49, %v10889_v55 }
 0x29f   : > { %v7983_v56 = vpop.f32.mrb[59].mxu1  ;;  %v5700_v42 = vrot.slane %v5691_v35, %v10396_v48 }
 0x2a0   : > { %4825 = vrot.lane.b32.xlu1 %v4810_v57, %s8357_s7  ;;  %v5465_v57 = vcombine.high %v5463_v39, %v5463_v39  ;;  %v5488_v56 = vrot.slane %v5472_v61, %v10396_v48  ;;  %v5502_v59 = vrot.slane %v5480_v34, %v10396_v48 }
 0x2a1   : > { %v5708_v22 = vcombine.high %v5700_v42, %v5700_v42 }
 0x2a2   : > { %5059 = vrot.lane.b32.xlu0 %v5030_v8, %s8357_s7  ;;  %v5293_v8 = vrot.slane %v5263_v63, %v10889_v55  ;;  %v5479_v5 = vrot.slane %v5465_v57, %v10396_v48  ;;  %v5521_v3 = vrot.slane %v5502_v59, %v10889_v55  ;;  %v5510_v40 = vcombine.high %v5488_v56, %v5488_v56 }
 0x2a3   : > { %v5730_v38 = vrot.slane %v5708_v22, %v10396_v48 }
 0x2a4   : > { %5061 = vrot.lane.b32.xlu1 %v5034_v20, %s8357_s7  ;;  %v5495_v21 = vrot.slane %v5479_v5, %v10396_v48 }
 0x2a6   : > { %5298 = vrot.lane.b32.xlu0 %v5269_v62, %s8357_s7  ;;  %v5716_v62 = vrot.slane %v5700_v42, %v10396_v48  ;;  %v5533_v52 = vrot.slane %v5495_v21, %v10889_v55  ;;  %v5511_v63 = vcombine.high %v5495_v21, %v5495_v21  ;;  %v6178_v42 = vmax.f32 %v6177_v13, 0.0 }
 0x2a8   : > { %5300 = vrot.lane.b32.xlu1 %v5273_v26, %s8357_s7  ;;  %v5517_v26 = vrot.slane %v5488_v56, %v10889_v55  ;;  %v5745_v27 = vrot.slane %v5716_v62, %v10889_v55  ;;  %v5541_v56 = vrot.slane %v5511_v63, %v10889_v55 }
 0x2aa   : > { %5063 = vrot.lane.b32.xlu0 %v5038_v31, %s8357_s7  ;;  %v5481_v31 = vcombine.high %v5479_v5, %v5479_v5 }
 0x2ac   : > { %5065 = vrot.lane.b32.xlu1 %v5042_v19, %s8357_s7  ;;  %v5509_v54 = vrot.slane %v5481_v31, %v10396_v48 }
 0x2ad   : > { %v11082_v47 = vpop.f32.mrb[60].mxu0 }
 0x2ae   : > { %v7990_v12 = vpop.f32.mrb[61].mxu0  ;;  %5067 = vrot.lane.b32.xlu0 %v5046_v25, %s8357_s7  ;;  %v5749_v25 = vrot.slane %v5730_v38, %v10889_v55  ;;  %v5513_v17 = vcombine.high %v5509_v54, %v5509_v54 }
 0x2af   : > { %v6897_v58 = vpop.f32.mrb[62].mxu0  ;;  %v5512_v12 = vcombine.high %v5502_v59, %v5502_v59  ;;  %v6187_v59 = vrot.slane %v6178_v42, %v10396_v48 }
 0x2b0   : > { %v7991_v23 = vpop.f32.mrb[63].mxu0  ;;  %5069 = vrot.lane.b32.xlu1 %v5050_v30, %s8357_s7  ;;  %v5525_v30 = vrot.slane %v5510_v40, %v10889_v55  ;;  %v5707_v58 = vrot.slane %v5693_v6, %v10396_v48 }
 0x2b1   : > { %v11091_v9 = vpop.f32.mrb[60].mxu1  ;;  %v5948_v23 = vmul.f32 %v11007_v29, %v11663_v10  ;;  %v6203_v40 = vrot.slane %v6187_v59, %v10396_v48 }
 0x2b2   : > { %v7998_v15 = vpop.f32.mrb[61].mxu1  ;;  %v3620_v7 = vpop.permute.xlu0 %3619  ;;  %5302 = vrot.lane.b32.xlu0 %v5277_v28, %s8357_s7  ;;  %v5529_v28 = vrot.slane %v5512_v12, %v10889_v55  ;;  %v5709_v29 = vcombine.high %v5707_v58, %v5707_v58 }
 0x2b3   : > { %v7136_v45 = vpop.f32.mrb[62].mxu1  ;;  %3644 = vst.msk [vmem:[%s10417_s6] sm:$0x1] %vm3643_vm12, %v3620_v7  ;;  %v5738_v15 = vcombine.high %v5716_v62, %v5716_v62  ;;  %v5537_v7 = vrot.slane %v5509_v54, %v10889_v55  ;;  %v6232_v54 = vrot.slane %v6203_v40, %v10889_v55 }
 0x2b4   : > { %v3622_v46 = vpop.permute.xlu1 %3621  ;;  %v7999_v1 = vpop.f32.mrb[63].mxu1  ;;  %5304 = vrot.lane.b32.xlu1 %v5281_v32, %s8357_s7  ;;  %v5949_v32 = vadd.f32 %v5948_v23, %v11664_v11  ;;  %v5737_v49 = vrot.slane %v5709_v29, %v10396_v48  ;;  %v6424_v29 = vmul.f32 %v11045_v36, %v11663_v10 }
 0x2b5   : > { %3645 = vst.msk [vmem:[%s10417_s6 + $0x10] sm:$0x1] %vm3643_vm12, %v3622_v46  ;;  %v5740_v46 = vcombine.high %v5730_v38, %v5730_v38  ;;  %v5723_v1 = vrot.slane %v5707_v58, %v10396_v48  ;;  %v5753_v41 = vrot.slane %v5738_v15, %v10889_v55 }
 0x2b6   : > { %5306 = vrot.lane.b32.xlu0 %v5285_v4, %s8357_s7  ;;  %v5950_v61 = vmax.f32 %v5949_v32, 0.0 }
 0x2b8   : > { %5308 = vrot.lane.b32.xlu1 %v5289_v50, %s8357_s7  ;;  %v3849_v0 = vpop.permute.xlu0 %3848  ;;  %v5757_v50 = vrot.slane %v5740_v46, %v10889_v55  ;;  %v5959_v34 = vrot.slane %v5950_v61, %v10396_v48 }
 0x2b9   : > { %3872 = vst.msk [vmem:[%s10417_s6 + $0x1] sm:$0x1] %vm3643_vm12, %v3849_v0 }
 0x2ba   : > { %v3851_v53 = vpop.permute.xlu1 %3850  ;;  %5071 = vrot.lane.b32.xlu0 %v5054_v51, %s8357_s7  ;;  %v5761_v51 = vrot.slane %v5723_v1, %v10889_v55  ;;  %v5975_v5 = vrot.slane %v5959_v34, %v10396_v48 }
 0x2bb   : > { %3873 = vst.msk [vmem:[%s10417_s6 + $0x11] sm:$0x1] %vm3643_vm12, %v3851_v53 }
 0x2bc   : > { %5073 = vrot.lane.b32.xlu1 %v5058_v37, %s8357_s7  ;;  %v3624_v16 = vpop.permute.xlu0 %3623  ;;  %v5765_v37 = vrot.slane %v5737_v49, %v10889_v55  ;;  %v5997_v21 = vcombine.high %v5975_v5, %v5975_v5 }
 0x2bd   : > { %3646 = vst.msk [vmem:[%s10417_s6 + $0x20] sm:$0x1] %vm3643_vm12, %v3624_v16  ;;  %v5739_v16 = vcombine.high %v5723_v1, %v5723_v1  ;;  %v6225_v1 = vcombine.high %v6203_v40, %v6203_v40 }
 0x2be   : > { %v3626_v20 = vpop.permute.xlu1 %3625  ;;  %5310 = vrot.lane.b32.xlu0 %v5293_v8, %s8357_s7  ;;  %v5967_v8 = vcombine.high %v5959_v34, %v5959_v34 }
 0x2bf   : > { %3647 = vst.msk [vmem:[%s10417_s6 + $0x30] sm:$0x1] %vm3643_vm12, %v3626_v20  ;;  %v5545_v20 = vrot.slane %v5513_v17, %v10889_v55 }
 0x2c0   : > { %5312 = vrot.lane.b32.xlu1 %v5297_v24, %s8357_s7  ;;  %v3628_v2 = vpop.permute.xlu0 %3627  ;;  %v5741_v24 = vcombine.high %v5737_v49, %v5737_v49  ;;  %v5989_v38 = vrot.slane %v5967_v8, %v10396_v48 }
 0x2c1   : > { %3648 = vst.msk [vmem:[%s10417_s6 + $0x40] sm:$0x1] %vm3643_vm12, %v3628_v2  ;;  %v5769_v2 = vrot.slane %v5739_v16, %v10889_v55 }
 0x2c2   : > { %v3630_v43 = vpop.permute.xlu1 %3629  ;;  %5546 = vrot.lane.b32.xlu0 %v5517_v26, %s8357_s7  ;;  %v5952_v26 = vcombine.high %v5950_v61, %v5950_v61  ;;  %v5773_v31 = vrot.slane %v5741_v24, %v10889_v55  ;;  %v6008_v12 = vrot.slane %v5989_v38, %v10889_v55  ;;  %v6652_v61 = vmul.f32 %v11053_v33, %v11663_v10 }
 0x2c3   : > { %3649 = vst.msk [vmem:[%s10417_s6 + $0x50] sm:$0x1] %vm3643_vm12, %v3630_v43  ;;  %v6195_v43 = vcombine.high %v6187_v59, %v6187_v59 }
 0x2c4   : > { %5548 = vrot.lane.b32.xlu1 %v5521_v3, %s8357_s7  ;;  %v3853_v19 = vpop.permute.xlu0 %3852  ;;  %v5966_v6 = vrot.slane %v5952_v26, %v10396_v48  ;;  %v6653_v63 = vadd.f32 %v6652_v61, %v11664_v11 }
 0x2c5   : > { %3874 = vst.msk [vmem:[%s10417_s6 + $0x21] sm:$0x1] %vm3643_vm12, %v3853_v19 }
 0x2c6   : > { %v3855_v14 = vpop.permute.xlu1 %3854  ;;  %5774 = vrot.lane.b32.xlu0 %v5745_v27, %s8357_s7  ;;  %v6004_v27 = vrot.slane %v5975_v5, %v10889_v55  ;;  %v5968_v58 = vcombine.high %v5966_v6, %v5966_v6  ;;  %v5982_v15 = vrot.slane %v5966_v6, %v10396_v48  ;;  %v6654_v16 = vmax.f32 %v6653_v63, 0.0 }
 0x2c7   : > { %3875 = vst.msk [vmem:[%s10417_s6 + $0x31] sm:$0x1] %vm3643_vm12, %v3855_v14  ;;  %v6217_v14 = vrot.slane %v6195_v43, %v10396_v48 }
 0x2c8   : > { %5776 = vrot.lane.b32.xlu1 %v5749_v25, %s8357_s7  ;;  %v3857_v60 = vpop.permute.xlu0 %3856  ;;  %v6020_v36 = vrot.slane %v5982_v15, %v10889_v55 }
 0x2c9   : > { %3876 = vst.msk [vmem:[%s10417_s6 + $0x41] sm:$0x1] %vm3643_vm12, %v3857_v60  ;;  %v6180_v60 = vcombine.high %v6178_v42, %v6178_v42 }
 0x2ca   : > { %v3859_v18 = vpop.permute.xlu1 %3858  ;;  %5550 = vrot.lane.b32.xlu0 %v5525_v30, %s8357_s7 }
 0x2cb   : > { %3877 = vst.msk [vmem:[%s10417_s6 + $0x51] sm:$0x1] %vm3643_vm12, %v3859_v18  ;;  %v6236_v18 = vrot.slane %v6217_v14, %v10889_v55 }
 0x2cc   : > { %5552 = vrot.lane.b32.xlu1 %v5529_v28, %s8357_s7  ;;  %v3632_v39 = vpop.permute.xlu0 %3631  ;;  %v5999_v28 = vcombine.high %v5989_v38, %v5989_v38 }
 0x2cd   : > { %3650 = vst.msk [vmem:[%s10417_s6 + $0x60] sm:$0x1] %vm3643_vm12, %v3632_v39  ;;  %v6194_v39 = vrot.slane %v6180_v60, %v10396_v48 }
 0x2ce   : > { %v3634_v45 = vpop.permute.xlu1 %3633  ;;  %5554 = vrot.lane.b32.xlu0 %v5533_v52, %s8357_s7  ;;  %v6016_v44 = vrot.slane %v5999_v28, %v10889_v55 }
 0x2cf   : > { %3651 = vst.msk [vmem:[%s10417_s6 + $0x70] sm:$0x1] %vm3643_vm12, %v3634_v45  ;;  %v5996_v45 = vrot.slane %v5968_v58, %v10396_v48  ;;  %v6196_v46 = vcombine.high %v6194_v39, %v6194_v39  ;;  %v6210_v49 = vrot.slane %v6194_v39, %v10396_v48 }
 0x2d0   : > { %5556 = vrot.lane.b32.xlu1 %v5537_v7, %s8357_s7  ;;  %v3861_v4 = vpop.permute.xlu0 %3860  ;;  %v6012_v7 = vrot.slane %v5997_v21, %v10889_v55 }
 0x2d1   : > { %3878 = vst.msk [vmem:[%s10417_s6 + $0x61] sm:$0x1] %vm3643_vm12, %v3861_v4  ;;  %v6248_v17 = vrot.slane %v6210_v49, %v10889_v55  ;;  %v6226_v5 = vcombine.high %v6210_v49, %v6210_v49 }
 0x2d2   : > { %v3863_v35 = vpop.permute.xlu1 %3862  ;;  %5778 = vrot.lane.b32.xlu0 %v5753_v41, %s8357_s7  ;;  %v6425_v41 = vadd.f32 %v6424_v29, %v11664_v11 }
 0x2d3   : > { %3879 = vst.msk [vmem:[%s10417_s6 + $0x71] sm:$0x1] %vm3643_vm12, %v3863_v35  ;;  %v6024_v35 = vrot.slane %v5996_v45, %v10889_v55  ;;  %v6256_v40 = vrot.slane %v6226_v5, %v10889_v55 }
 0x2d4   : > { %5780 = vrot.lane.b32.xlu1 %v5757_v50, %s8357_s7  ;;  %v4108_v0 = vpop.permute.xlu0 %4107  ;;  %v6227_v50 = vcombine.high %v6217_v14, %v6217_v14  ;;  %v6426_v33 = vmax.f32 %v6425_v41, 0.0 }
 0x2d5   : > { %4131 = vst.msk [vmem:[%s10417_s6 + $0x2] sm:$0x1] %vm3643_vm12, %v4108_v0 }
 0x2d6   : > { %v4110_v53 = vpop.permute.xlu1 %4109  ;;  %5782 = vrot.lane.b32.xlu0 %v5761_v51, %s8357_s7  ;;  %v6240_v51 = vrot.slane %v6225_v1, %v10889_v55  ;;  %v6244_v42 = vrot.slane %v6227_v50, %v10889_v55 }
 0x2d7   : > { %4132 = vst.msk [vmem:[%s10417_s6 + $0x12] sm:$0x1] %vm3643_vm12, %v4110_v53  ;;  %v6224_v53 = vrot.slane %v6196_v46, %v10396_v48 }
 0x2d8   : > { %5784 = vrot.lane.b32.xlu1 %v5765_v37, %s8357_s7  ;;  %v4336_v57 = vpop.permute.xlu0 %4335 }
 0x2d9   : > { %4359 = vst.msk [vmem:[%s10417_s6 + $0x3] sm:$0x1] %vm3643_vm12, %v4336_v57  ;;  %v5998_v57 = vcombine.high %v5982_v15, %v5982_v15  ;;  %v6252_v59 = vrot.slane %v6224_v53, %v10889_v55  ;;  %v6228_v43 = vcombine.high %v6224_v53, %v6224_v53 }
 0x2da   : > { %v4338_v22 = vpop.permute.xlu1 %4337  ;;  %5558 = vrot.lane.b32.xlu0 %v5541_v56, %s8357_s7  ;;  %v6435_v56 = vrot.slane %v6426_v33, %v10396_v48 }
 0x2db   : > { %4360 = vst.msk [vmem:[%s10417_s6 + $0x13] sm:$0x1] %vm3643_vm12, %v4338_v22  ;;  %v6000_v22 = vcombine.high %v5996_v45, %v5996_v45  ;;  %v6028_v24 = vrot.slane %v5998_v57, %v10889_v55 }
 0x2dc   : > { %5560 = vrot.lane.b32.xlu1 %v5545_v20, %s8357_s7  ;;  %v4112_v62 = vpop.permute.xlu0 %4111 }
 0x2dd   : > { %4133 = vst.msk [vmem:[%s10417_s6 + $0x22] sm:$0x1] %vm3643_vm12, %v4112_v62  ;;  %v6443_v62 = vcombine.high %v6435_v56, %v6435_v56  ;;  %v6032_v38 = vrot.slane %v6000_v22, %v10889_v55 }
 0x2de   : > { %v4114_v3 = vpop.permute.xlu1 %4113  ;;  %5786 = vrot.lane.b32.xlu0 %v5769_v2, %s8357_s7  ;;  %v6663_v2 = vrot.slane %v6654_v16, %v10396_v48 }
 0x2df   : > { %4134 = vst.msk [vmem:[%s10417_s6 + $0x32] sm:$0x1] %vm3643_vm12, %v4114_v3  ;;  %v6451_v3 = vrot.slane %v6435_v56, %v10396_v48 }
 0x2e0   : > { %5788 = vrot.lane.b32.xlu1 %v5773_v31, %s8357_s7  ;;  %v4116_v19 = vpop.permute.xlu0 %4115  ;;  %v6671_v6 = vcombine.high %v6663_v2, %v6663_v2 }
 0x2e1   : > { %4135 = vst.msk [vmem:[%s10417_s6 + $0x42] sm:$0x1] %vm3643_vm12, %v4116_v19  ;;  %v6428_v19 = vcombine.high %v6426_v33, %v6426_v33  ;;  %v6480_v60 = vrot.slane %v6451_v3, %v10889_v55 }
 0x2e2   : > { %v4118_v25 = vpop.permute.xlu1 %4117  ;;  %6033 = vrot.lane.b32.xlu0 %v6004_v27, %s8357_s7  ;;  %v6465_v27 = vrot.slane %v6443_v62, %v10396_v48 }
 0x2e3   : > { %4136 = vst.msk [vmem:[%s10417_s6 + $0x52] sm:$0x1] %vm3643_vm12, %v4118_v25  ;;  %v6260_v25 = vrot.slane %v6228_v43, %v10889_v55 }
 0x2e4   : > { %6035 = vrot.lane.b32.xlu1 %v6008_v12, %s8357_s7  ;;  %v4340_v30 = vpop.permute.xlu0 %4339  ;;  %v6679_v12 = vrot.slane %v6663_v2, %v10396_v48 }
 0x2e5   : > { %4361 = vst.msk [vmem:[%s10417_s6 + $0x23] sm:$0x1] %vm3643_vm12, %v4340_v30  ;;  %v6442_v30 = vrot.slane %v6428_v19, %v10396_v48 }
 0x2e6   : > { %v4342_v23 = vpop.permute.xlu1 %4341  ;;  %6261 = vrot.lane.b32.xlu0 %v6232_v54, %s8357_s7  ;;  %v6693_v54 = vrot.slane %v6671_v6, %v10396_v48  ;;  %v6708_v15 = vrot.slane %v6679_v12, %v10889_v55 }
 0x2e7   : > { %4362 = vst.msk [vmem:[%s10417_s6 + $0x33] sm:$0x1] %vm3643_vm12, %v4342_v23  ;;  %v6484_v23 = vrot.slane %v6465_v27, %v10889_v55  ;;  %v6444_v39 = vcombine.high %v6442_v30, %v6442_v30 }
 0x2e8   : > { %6263 = vrot.lane.b32.xlu1 %v6236_v18, %s8357_s7  ;;  %v4344_v52 = vpop.permute.xlu0 %4343  ;;  %v6473_v18 = vcombine.high %v6451_v3, %v6451_v3  ;;  %v6712_v29 = vrot.slane %v6693_v54, %v10889_v55  ;;  %v6703_v33 = vcombine.high %v6693_v54, %v6693_v54  ;;  %v7139_v3 = vmul.f32 %v11091_v9, %v11663_v10 }
 0x2e9   : > { %4363 = vst.msk [vmem:[%s10417_s6 + $0x43] sm:$0x1] %vm3643_vm12, %v4344_v52  ;;  %v6656_v52 = vcombine.high %v6654_v16, %v6654_v16  ;;  %v6472_v61 = vrot.slane %v6444_v39, %v10396_v48 }
 0x2ea   : > { %v4346_v32 = vpop.permute.xlu1 %4345  ;;  %6037 = vrot.lane.b32.xlu0 %v6012_v7, %s8357_s7  ;;  %v6488_v46 = vrot.slane %v6473_v18, %v10889_v55  ;;  %v7140_v9 = vadd.f32 %v7139_v3, %v11664_v11 }
 0x2eb   : > { %4364 = vst.msk [vmem:[%s10417_s6 + $0x53] sm:$0x1] %vm3643_vm12, %v4346_v32  ;;  %v6475_v32 = vcombine.high %v6465_v27, %v6465_v27  ;;  %v6670_v1 = vrot.slane %v6656_v52, %v10396_v48 }
 0x2ec   : > { %6039 = vrot.lane.b32.xlu1 %v6016_v44, %s8357_s7  ;;  %v4120_v4 = vpop.permute.xlu0 %4119  ;;  %v6458_v44 = vrot.slane %v6442_v30, %v10396_v48 }
 0x2ed   : > { %4137 = vst.msk [vmem:[%s10417_s6 + $0x62] sm:$0x1] %vm3643_vm12, %v4120_v4  ;;  %v6900_v4 = vmul.f32 %v11082_v47, %v11663_v10  ;;  %v6492_v41 = vrot.slane %v6475_v32, %v10889_v55  ;;  %v6672_v47 = vcombine.high %v6670_v1, %v6670_v1  ;;  %v6686_v63 = vrot.slane %v6670_v1, %v10396_v48 }
 0x2ee   : > { %v4122_v13 = vpop.permute.xlu1 %4121  ;;  %6041 = vrot.lane.b32.xlu0 %v6020_v36, %s8357_s7  ;;  %v6496_v50 = vrot.slane %v6458_v44, %v10889_v55 }
 0x2ef   : > { %4138 = vst.msk [vmem:[%s10417_s6 + $0x72] sm:$0x1] %vm3643_vm12, %v4122_v13  ;;  %v6701_v13 = vcombine.high %v6679_v12, %v6679_v12  ;;  %v6901_v49 = vadd.f32 %v6900_v4, %v11664_v11  ;;  %v6700_v57 = vrot.slane %v6672_v47, %v10396_v48  ;;  %v6724_v16 = vrot.slane %v6686_v63, %v10889_v55 }
 0x2f0   : > { %6043 = vrot.lane.b32.xlu1 %v6024_v35, %s8357_s7  ;;  %v4348_v0 = vpop.permute.xlu0 %4347 }
 0x2f1   : > { %4365 = vst.msk [vmem:[%s10417_s6 + $0x63] sm:$0x1] %vm3643_vm12, %v4348_v0  ;;  %v6902_v53 = vmax.f32 %v6901_v49, 0.0 }
 0x2f2   : > { %v4350_v34 = vpop.permute.xlu1 %4349  ;;  %6265 = vrot.lane.b32.xlu0 %v6240_v51, %s8357_s7  ;;  %v6500_v51 = vrot.slane %v6472_v61, %v10889_v55 }
 0x2f3   : > { %4366 = vst.msk [vmem:[%s10417_s6 + $0x73] sm:$0x1] %vm3643_vm12, %v4350_v34  ;;  %v6911_v22 = vrot.slane %v6902_v53, %v10396_v48 }
 0x2f4   : > { %6267 = vrot.lane.b32.xlu1 %v6244_v42, %s8357_s7  ;;  %v4584_v37 = vpop.permute.xlu0 %4583  ;;  %v6716_v42 = vrot.slane %v6701_v13, %v10889_v55 }
 0x2f5   : > { %4607 = vst.msk [vmem:[%s10417_s6 + $0x4] sm:$0x1] %vm3643_vm12, %v4584_v37  ;;  %v6919_v43 = vcombine.high %v6911_v22, %v6911_v22  ;;  %v6927_v19 = vrot.slane %v6911_v22, %v10396_v48 }
 0x2f6   : > { %v4586_v8 = vpop.permute.xlu1 %4585  ;;  %6269 = vrot.lane.b32.xlu0 %v6248_v17, %s8357_s7  ;;  %v6720_v17 = vrot.slane %v6703_v33, %v10889_v55 }
 0x2f7   : > { %4608 = vst.msk [vmem:[%s10417_s6 + $0x14] sm:$0x1] %vm3643_vm12, %v4586_v8  ;;  %v6474_v8 = vcombine.high %v6458_v44, %v6458_v44  ;;  %v6941_v10 = vrot.slane %v6919_v43, %v10396_v48  ;;  %v6956_v30 = vrot.slane %v6927_v19, %v10889_v55 }
 0x2f8   : > { %6271 = vrot.lane.b32.xlu1 %v6252_v59, %s8357_s7  ;;  %v4812_v20 = vpop.permute.xlu0 %4811  ;;  %v6476_v59 = vcombine.high %v6472_v61, %v6472_v61 }
 0x2f9   : > { %4835 = vst.msk [vmem:[%s10417_s6 + $0x5] sm:$0x1] %vm3643_vm12, %v4812_v20  ;;  %v6504_v62 = vrot.slane %v6474_v8, %v10889_v55  ;;  %v6951_v18 = vcombine.high %v6941_v10, %v6941_v10 }
 0x2fa   : > { %v4814_v26 = vpop.permute.xlu1 %4813  ;;  %6045 = vrot.lane.b32.xlu0 %v6028_v24, %s8357_s7  ;;  %v6728_v24 = vrot.slane %v6700_v57, %v10889_v55  ;;  %v6508_v2 = vrot.slane %v6476_v59, %v10889_v55 }
 0x2fb   : > { %4836 = vst.msk [vmem:[%s10417_s6 + $0x15] sm:$0x1] %vm3643_vm12, %v4814_v26  ;;  %v6702_v26 = vcombine.high %v6686_v63, %v6686_v63 }
 0x2fc   : > { %6047 = vrot.lane.b32.xlu1 %v6032_v38, %s8357_s7  ;;  %v4588_v31 = vpop.permute.xlu0 %4587  ;;  %v6904_v38 = vcombine.high %v6902_v53, %v6902_v53 }
 0x2fd   : > { %4609 = vst.msk [vmem:[%s10417_s6 + $0x24] sm:$0x1] %vm3643_vm12, %v4588_v31  ;;  %v6732_v6 = vrot.slane %v6702_v26, %v10889_v55 }
 0x2fe   : > { %v4590_v14 = vpop.permute.xlu1 %4589  ;;  %6273 = vrot.lane.b32.xlu0 %v6256_v40, %s8357_s7  ;;  %v6704_v40 = vcombine.high %v6700_v57, %v6700_v57 }
 0x2ff   : > { %4610 = vst.msk [vmem:[%s10417_s6 + $0x34] sm:$0x1] %vm3643_vm12, %v4590_v14  ;;  %v6918_v14 = vrot.slane %v6904_v38, %v10396_v48 }
 0x300   : > { %6275 = vrot.lane.b32.xlu1 %v6260_v25, %s8357_s7  ;;  %v4592_v21 = vpop.permute.xlu0 %4591  ;;  %v6736_v12 = vrot.slane %v6704_v40, %v10889_v55 }
 0x301   : > { %4611 = vst.msk [vmem:[%s10417_s6 + $0x44] sm:$0x1] %vm3643_vm12, %v4592_v21  ;;  %v6949_v21 = vcombine.high %v6927_v19, %v6927_v19  ;;  %v6920_v54 = vcombine.high %v6918_v14, %v6918_v14 }
 0x302   : > { %v4594_v58 = vpop.permute.xlu1 %4593  ;;  %6509 = vrot.lane.b32.xlu0 %v6480_v60, %s8357_s7 }
 0x303   : > { %4612 = vst.msk [vmem:[%s10417_s6 + $0x54] sm:$0x1] %vm3643_vm12, %v4594_v58  ;;  %v7141_v58 = vmax.f32 %v7140_v9, 0.0  ;;  %v6964_v39 = vrot.slane %v6949_v21, %v10889_v55  ;;  %v6948_v32 = vrot.slane %v6920_v54, %v10396_v48 }
 0x304   : > { %6511 = vrot.lane.b32.xlu1 %v6484_v23, %s8357_s7  ;;  %v4816_v28 = vpop.permute.xlu0 %4815  ;;  %v6960_v23 = vrot.slane %v6941_v10, %v10889_v55 }
 0x305   : > { %4837 = vst.msk [vmem:[%s10417_s6 + $0x25] sm:$0x1] %vm3643_vm12, %v4816_v28  ;;  %v6934_v28 = vrot.slane %v6918_v14, %v10396_v48  ;;  %v7150_v52 = vrot.slane %v7141_v58, %v10396_v48  ;;  %v7143_v1 = vcombine.high %v7141_v58, %v7141_v58  ;;  %v6952_v61 = vcombine.high %v6948_v32, %v6948_v32 }
 0x306   : > { %v4818_v7 = vpop.permute.xlu1 %4817  ;;  %6737 = vrot.lane.b32.xlu0 %v6708_v15, %s8357_s7 }
 0x307   : > { %4838 = vst.msk [vmem:[%s10417_s6 + $0x35] sm:$0x1] %vm3643_vm12, %v4818_v7  ;;  %v7158_v4 = vcombine.high %v7150_v52, %v7150_v52  ;;  %v7166_v13 = vrot.slane %v7150_v52, %v10396_v48  ;;  %v7157_v47 = vrot.slane %v7143_v1, %v10396_v48 }
 0x308   : > { %6739 = vrot.lane.b32.xlu1 %v6712_v29, %s8357_s7  ;;  %v4820_v45 = vpop.permute.xlu0 %4819  ;;  %v6968_v29 = vrot.slane %v6951_v18, %v10889_v55 }
 0x309   : > { %4839 = vst.msk [vmem:[%s10417_s6 + $0x45] sm:$0x1] %vm3643_vm12, %v4820_v45  ;;  %v6972_v45 = vrot.slane %v6934_v28, %v10889_v55  ;;  %v7180_v49 = vrot.slane %v7158_v4, %v10396_v48  ;;  %v7188_v33 = vcombine.high %v7166_v13, %v7166_v13  ;;  %v7173_v57 = vrot.slane %v7157_v47, %v10396_v48 }
 0x30a   : > { %v4822_v36 = vpop.permute.xlu1 %4821  ;;  %6513 = vrot.lane.b32.xlu0 %v6488_v46, %s8357_s7  ;;  %v6950_v46 = vcombine.high %v6934_v28, %v6934_v28 }
 0x30b   : > { %4840 = vst.msk [vmem:[%s10417_s6 + $0x55] sm:$0x1] %vm3643_vm12, %v4822_v36 }
 0x30c   : > { %6515 = vrot.lane.b32.xlu1 %v6492_v41, %s8357_s7  ;;  %v4596_v35 = vpop.permute.xlu0 %4595  ;;  %v6976_v41 = vrot.slane %v6948_v32, %v10889_v55 }
 0x30d   : > { %4613 = vst.msk [vmem:[%s10417_s6 + $0x64] sm:$0x1] %vm3643_vm12, %v4596_v35 }
 0x30e   : > { %v4598_v0 = vpop.permute.xlu1 %4597  ;;  %6517 = vrot.lane.b32.xlu0 %v6496_v50, %s8357_s7  ;;  %v6980_v50 = vrot.slane %v6950_v46, %v10889_v55 }
 0x30f   : > { %4614 = vst.msk [vmem:[%s10417_s6 + $0x74] sm:$0x1] %vm3643_vm12, %v4598_v0 }
 0x310   : > { %6519 = vrot.lane.b32.xlu1 %v6500_v51, %s8357_s7  ;;  %v4824_v34 = vpop.permute.xlu0 %4823  ;;  %v6984_v51 = vrot.slane %v6952_v61, %v10889_v55 }
 0x311   : > { %4841 = vst.msk [vmem:[%s10417_s6 + $0x65] sm:$0x1] %vm3643_vm12, %v4824_v34  ;;  %v7195_v34 = vrot.slane %v7166_v13, %v10889_v55 }
 0x312   : > { %v4826_v37 = vpop.permute.xlu1 %4825  ;;  %6741 = vrot.lane.b32.xlu0 %v6716_v42, %s8357_s7  ;;  %v7159_v42 = vcombine.high %v7157_v47, %v7157_v47 }
 0x313   : > { %4842 = vst.msk [vmem:[%s10417_s6 + $0x75] sm:$0x1] %vm3643_vm12, %v4826_v37  ;;  %v7199_v37 = vrot.slane %v7180_v49, %v10889_v55 }
 0x314   : > { %6743 = vrot.lane.b32.xlu1 %v6720_v17, %s8357_s7  ;;  %v5060_v56 = vpop.permute.xlu0 %5059  ;;  %v7190_v17 = vcombine.high %v7180_v49, %v7180_v49  ;;  %v7187_v22 = vrot.slane %v7159_v42, %v10396_v48 }
 0x315   : > { %5083 = vst.msk [vmem:[%s10417_s6 + $0x6] sm:$0x1] %vm3643_vm12, %v5060_v56 }
 0x316   : > { %v5062_v20 = vpop.permute.xlu1 %5061  ;;  %6745 = vrot.lane.b32.xlu0 %v6724_v16, %s8357_s7  ;;  %v7203_v16 = vrot.slane %v7188_v33, %v10889_v55  ;;  %v7207_v59 = vrot.slane %v7190_v17, %v10889_v55  ;;  %v7191_v48 = vcombine.high %v7187_v22, %v7187_v22 }
 0x317   : > { %5084 = vst.msk [vmem:[%s10417_s6 + $0x16] sm:$0x1] %vm3643_vm12, %v5062_v20 }
 0x318   : > { %6747 = vrot.lane.b32.xlu1 %v6728_v24, %s8357_s7  ;;  %v5299_v5 = vpop.permute.xlu0 %5298  ;;  %v7211_v24 = vrot.slane %v7173_v57, %v10889_v55  ;;  %v7223_v3 = vrot.slane %v7191_v48, %v10889_v55 }
 0x319   : > { %5322 = vst.msk [vmem:[%s10417_s6 + $0x7] sm:$0x1] %vm3643_vm12, %v5299_v5  ;;  %v7189_v5 = vcombine.high %v7173_v57, %v7173_v57 }
 0x31a   : > { %v5301_v31 = vpop.permute.xlu1 %5300  ;;  %6521 = vrot.lane.b32.xlu0 %v6504_v62, %s8357_s7 }
 0x31b   : > { %5323 = vst.msk [vmem:[%s10417_s6 + $0x17] sm:$0x1] %vm3643_vm12, %v5301_v31  ;;  %v7219_v38 = vrot.slane %v7189_v5, %v10889_v55 }
 0x31c   : > { %6523 = vrot.lane.b32.xlu1 %v6508_v2, %s8357_s7  ;;  %v5064_v27 = vpop.permute.xlu0 %5063  ;;  %v7215_v2 = vrot.slane %v7187_v22, %v10889_v55 }
 0x31d   : > { %5085 = vst.msk [vmem:[%s10417_s6 + $0x26] sm:$0x1] %vm3643_vm12, %v5064_v27 }
 0x31e   : > { %v5066_v25 = vpop.permute.xlu1 %5065  ;;  %6749 = vrot.lane.b32.xlu0 %v6732_v6, %s8357_s7 }
 0x31f   : > { %5086 = vst.msk [vmem:[%s10417_s6 + $0x36] sm:$0x1] %vm3643_vm12, %v5066_v25 }
 0x320   : > { %6751 = vrot.lane.b32.xlu1 %v6736_v12, %s8357_s7  ;;  %v5068_v60 = vpop.permute.xlu0 %5067 }
 0x321   : > { %5087 = vst.msk [vmem:[%s10417_s6 + $0x46] sm:$0x1] %vm3643_vm12, %v5068_v60 }
 0x322   : > { %v5070_v11 = vpop.permute.xlu1 %5069  ;;  %6985 = vrot.lane.b32.xlu0 %v6956_v30, %s8357_s7 }
 0x323   : > { %5088 = vst.msk [vmem:[%s10417_s6 + $0x56] sm:$0x1] %vm3643_vm12, %v5070_v11 }
 0x324   : > { %6987 = vrot.lane.b32.xlu1 %v6960_v23, %s8357_s7  ;;  %v5303_v15 = vpop.permute.xlu0 %5302 }
 0x325   : > { %5324 = vst.msk [vmem:[%s10417_s6 + $0x27] sm:$0x1] %vm3643_vm12, %v5303_v15 }
 0x326   : > { %v5305_v7 = vpop.permute.xlu1 %5304  ;;  %6989 = vrot.lane.b32.xlu0 %v6964_v39, %s8357_s7 }
 0x327   : > { %5325 = vst.msk [vmem:[%s10417_s6 + $0x37] sm:$0x1] %vm3643_vm12, %v5305_v7 }
 0x328   : > { %6991 = vrot.lane.b32.xlu1 %v6968_v29, %s8357_s7  ;;  %v5307_v44 = vpop.permute.xlu0 %5306 }
 0x329   : > { %5326 = vst.msk [vmem:[%s10417_s6 + $0x47] sm:$0x1] %vm3643_vm12, %v5307_v44 }
 0x32a   : > { %v5309_v36 = vpop.permute.xlu1 %5308  ;;  %6993 = vrot.lane.b32.xlu0 %v6972_v45, %s8357_s7 }
 0x32b   : > { %5327 = vst.msk [vmem:[%s10417_s6 + $0x57] sm:$0x1] %vm3643_vm12, %v5309_v36 }
 0x32c   : > { %6995 = vrot.lane.b32.xlu1 %v6976_v41, %s8357_s7  ;;  %v5072_v35 = vpop.permute.xlu0 %5071 }
 0x32d   : > { %5089 = vst.msk [vmem:[%s10417_s6 + $0x66] sm:$0x1] %vm3643_vm12, %v5072_v35 }
 0x32e   : > { %v5074_v0 = vpop.permute.xlu1 %5073  ;;  %6997 = vrot.lane.b32.xlu0 %v6980_v50, %s8357_s7 }
 0x32f   : > { %5090 = vst.msk [vmem:[%s10417_s6 + $0x76] sm:$0x1] %vm3643_vm12, %v5074_v0 }
 0x330   : > { %6999 = vrot.lane.b32.xlu1 %v6984_v51, %s8357_s7  ;;  %v5311_v63 = vpop.permute.xlu0 %5310 }
 0x331   : > { %5328 = vst.msk [vmem:[%s10417_s6 + $0x67] sm:$0x1] %vm3643_vm12, %v5311_v63 }
 0x332   : > { %v5313_v53 = vpop.permute.xlu1 %5312  ;;  %7224 = vrot.lane.b32.xlu0 %v7195_v34, %s8357_s7 }
 0x333   : > { %5329 = vst.msk [vmem:[%s10417_s6 + $0x77] sm:$0x1] %vm3643_vm12, %v5313_v53 }
 0x334   : > { %7226 = vrot.lane.b32.xlu1 %v7199_v37, %s8357_s7  ;;  %v5547_v56 = vpop.permute.xlu0 %5546 }
 0x335   : > { %5570 = vst.msk [vmem:[%s10417_s6 + $0x8] sm:$0x1] %vm3643_vm12, %v5547_v56 }
 0x336   : > { %v5549_v8 = vpop.permute.xlu1 %5548  ;;  %7228 = vrot.lane.b32.xlu0 %v7203_v16, %s8357_s7 }
 0x337   : > { %5571 = vst.msk [vmem:[%s10417_s6 + $0x18] sm:$0x1] %vm3643_vm12, %v5549_v8 }
 0x338   : > { %7230 = vrot.lane.b32.xlu1 %v7207_v59, %s8357_s7  ;;  %v5775_v20 = vpop.permute.xlu0 %5774 }
 0x339   : > { %5798 = vst.msk [vmem:[%s10417_s6 + $0x9] sm:$0x1] %vm3643_vm12, %v5775_v20 }
 0x33a   : > { %v5777_v62 = vpop.permute.xlu1 %5776  ;;  %7232 = vrot.lane.b32.xlu0 %v7211_v24, %s8357_s7 }
 0x33b   : > { %5799 = vst.msk [vmem:[%s10417_s6 + $0x19] sm:$0x1] %vm3643_vm12, %v5777_v62 }
 0x33c   : > { %7234 = vrot.lane.b32.xlu1 %v7215_v2, %s8357_s7  ;;  %v5551_v26 = vpop.permute.xlu0 %5550 }
 0x33d   : > { %5572 = vst.msk [vmem:[%s10417_s6 + $0x28] sm:$0x1] %vm3643_vm12, %v5551_v26 }
 0x33e   : > { %v5553_v43 = vpop.permute.xlu1 %5552  ;;  %7236 = vrot.lane.b32.xlu0 %v7219_v38, %s8357_s7 }
 0x33f   : > { %5573 = vst.msk [vmem:[%s10417_s6 + $0x38] sm:$0x1] %vm3643_vm12, %v5553_v43 }
 0x340   : > { %7238 = vrot.lane.b32.xlu1 %v7223_v3, %s8357_s7  ;;  %v5555_v31 = vpop.permute.xlu0 %5554 }
 0x341   : > { %5574 = vst.msk [vmem:[%s10417_s6 + $0x48] sm:$0x1] %vm3643_vm12, %v5555_v31 }
 0x342   : > { %v5557_v40 = vpop.permute.xlu1 %5556 }
 0x343   : > { %5575 = vst.msk [vmem:[%s10417_s6 + $0x58] sm:$0x1] %vm3643_vm12, %v5557_v40 }
 0x344   : > { %v5779_v19 = vpop.permute.xlu0 %5778 }
 0x345   : > { %5800 = vst.msk [vmem:[%s10417_s6 + $0x29] sm:$0x1] %vm3643_vm12, %v5779_v19 }
 0x346   : > { %v5781_v55 = vpop.permute.xlu1 %5780 }
 0x347   : > { %5801 = vst.msk [vmem:[%s10417_s6 + $0x39] sm:$0x1] %vm3643_vm12, %v5781_v55 }
 0x348   : > { %v5783_v27 = vpop.permute.xlu0 %5782 }
 0x349   : > { %5802 = vst.msk [vmem:[%s10417_s6 + $0x49] sm:$0x1] %vm3643_vm12, %v5783_v27 }
 0x34a   : > { %v5785_v6 = vpop.permute.xlu1 %5784 }
 0x34b   : > { %5803 = vst.msk [vmem:[%s10417_s6 + $0x59] sm:$0x1] %vm3643_vm12, %v5785_v6 }
 0x34c   : > { %v5559_v14 = vpop.permute.xlu0 %5558 }
 0x34d   : > { %5576 = vst.msk [vmem:[%s10417_s6 + $0x68] sm:$0x1] %vm3643_vm12, %v5559_v14 }
 0x34e   : > { %v5561_v10 = vpop.permute.xlu1 %5560 }
 0x34f   : > { %5577 = vst.msk [vmem:[%s10417_s6 + $0x78] sm:$0x1] %vm3643_vm12, %v5561_v10 }
 0x350   : > { %v5787_v9 = vpop.permute.xlu0 %5786 }
 0x351   : > { %5804 = vst.msk [vmem:[%s10417_s6 + $0x69] sm:$0x1] %vm3643_vm12, %v5787_v9 }
 0x352   : > { %v5789_v25 = vpop.permute.xlu1 %5788 }
 0x353   : > { %5805 = vst.msk [vmem:[%s10417_s6 + $0x79] sm:$0x1] %vm3643_vm12, %v5789_v25 }
 0x354   : > { %v6034_v12 = vpop.permute.xlu0 %6033 }
 0x355   : > { %6057 = vst.msk [vmem:[%s10417_s6 + $0xa] sm:$0x1] %vm3643_vm12, %v6034_v12 }
 0x356   : > { %v6036_v21 = vpop.permute.xlu1 %6035 }
 0x357   : > { %6058 = vst.msk [vmem:[%s10417_s6 + $0x1a] sm:$0x1] %vm3643_vm12, %v6036_v21 }
 0x358   : > { %v6262_v60 = vpop.permute.xlu0 %6261 }
 0x359   : > { %6285 = vst.msk [vmem:[%s10417_s6 + $0xb] sm:$0x1] %vm3643_vm12, %v6262_v60 }
 0x35a   : > { %v6264_v30 = vpop.permute.xlu1 %6263 }
 0x35b   : > { %6286 = vst.msk [vmem:[%s10417_s6 + $0x1b] sm:$0x1] %vm3643_vm12, %v6264_v30 }
 0x35c   : > { %v6038_v54 = vpop.permute.xlu0 %6037 }
 0x35d   : > { %6059 = vst.msk [vmem:[%s10417_s6 + $0x2a] sm:$0x1] %vm3643_vm12, %v6038_v54 }
 0x35e   : > { %v6040_v58 = vpop.permute.xlu1 %6039 }
 0x35f   : > { %6060 = vst.msk [vmem:[%s10417_s6 + $0x3a] sm:$0x1] %vm3643_vm12, %v6040_v58 }
 0x360   : > { %v6042_v11 = vpop.permute.xlu0 %6041 }
 0x361   : > { %6061 = vst.msk [vmem:[%s10417_s6 + $0x4a] sm:$0x1] %vm3643_vm12, %v6042_v11 }
 0x362   : > { %v6044_v23 = vpop.permute.xlu1 %6043 }
 0x363   : > { %6062 = vst.msk [vmem:[%s10417_s6 + $0x5a] sm:$0x1] %vm3643_vm12, %v6044_v23 }
 0x364   : > { %v6266_v18 = vpop.permute.xlu0 %6265 }
 0x365   : > { %6287 = vst.msk [vmem:[%s10417_s6 + $0x2b] sm:$0x1] %vm3643_vm12, %v6266_v18 }
 0x366   : > { %v6268_v28 = vpop.permute.xlu1 %6267 }
 0x367   : > { %6288 = vst.msk [vmem:[%s10417_s6 + $0x3b] sm:$0x1] %vm3643_vm12, %v6268_v28 }
 0x368   : > { %v6270_v15 = vpop.permute.xlu0 %6269 }
 0x369   : > { %6289 = vst.msk [vmem:[%s10417_s6 + $0x4b] sm:$0x1] %vm3643_vm12, %v6270_v15 }
 0x36a   : > { %v6272_v39 = vpop.permute.xlu1 %6271 }
 0x36b   : > { %6290 = vst.msk [vmem:[%s10417_s6 + $0x5b] sm:$0x1] %vm3643_vm12, %v6272_v39 }
 0x36c   : > { %v6046_v52 = vpop.permute.xlu0 %6045 }
 0x36d   : > { %6063 = vst.msk [vmem:[%s10417_s6 + $0x6a] sm:$0x1] %vm3643_vm12, %v6046_v52 }
 0x36e   : > { %v6048_v7 = vpop.permute.xlu1 %6047 }
 0x36f   : > { %6064 = vst.msk [vmem:[%s10417_s6 + $0x7a] sm:$0x1] %vm3643_vm12, %v6048_v7 }
 0x370   : > { %v6274_v29 = vpop.permute.xlu0 %6273 }
 0x371   : > { %6291 = vst.msk [vmem:[%s10417_s6 + $0x6b] sm:$0x1] %vm3643_vm12, %v6274_v29 }
 0x372   : > { %v6276_v32 = vpop.permute.xlu1 %6275 }
 0x373   : > { %6292 = vst.msk [vmem:[%s10417_s6 + $0x7b] sm:$0x1] %vm3643_vm12, %v6276_v32 }
 0x374   : > { %v6510_v44 = vpop.permute.xlu0 %6509 }
 0x375   : > { %6533 = vst.msk [vmem:[%s10417_s6 + $0xc] sm:$0x1] %vm3643_vm12, %v6510_v44 }
 0x376   : > { %v6512_v45 = vpop.permute.xlu1 %6511 }
 0x377   : > { %6534 = vst.msk [vmem:[%s10417_s6 + $0x1c] sm:$0x1] %vm3643_vm12, %v6512_v45 }
 0x378   : > { %v6738_v46 = vpop.permute.xlu0 %6737 }
 0x379   : > { %6761 = vst.msk [vmem:[%s10417_s6 + $0xd] sm:$0x1] %vm3643_vm12, %v6738_v46 }
 0x37a   : > { %v6740_v1 = vpop.permute.xlu1 %6739 }
 0x37b   : > { %6762 = vst.msk [vmem:[%s10417_s6 + $0x1d] sm:$0x1] %vm3643_vm12, %v6740_v1 }
 0x37c   : > { %v6514_v4 = vpop.permute.xlu0 %6513 }
 0x37d   : > { %6535 = vst.msk [vmem:[%s10417_s6 + $0x2c] sm:$0x1] %vm3643_vm12, %v6514_v4 }
 0x37e   : > { %v6516_v36 = vpop.permute.xlu1 %6515 }
 0x37f   : > { %6536 = vst.msk [vmem:[%s10417_s6 + $0x3c] sm:$0x1] %vm3643_vm12, %v6516_v36 }
 0x380   : > { %v6518_v41 = vpop.permute.xlu0 %6517 }
 0x381   : > { %6537 = vst.msk [vmem:[%s10417_s6 + $0x4c] sm:$0x1] %vm3643_vm12, %v6518_v41 }
 0x382   : > { %v6520_v61 = vpop.permute.xlu1 %6519 }
 0x383   : > { %6538 = vst.msk [vmem:[%s10417_s6 + $0x5c] sm:$0x1] %vm3643_vm12, %v6520_v61 }
 0x384   : > { %v6742_v13 = vpop.permute.xlu0 %6741 }
 0x385   : > { %6763 = vst.msk [vmem:[%s10417_s6 + $0x2d] sm:$0x1] %vm3643_vm12, %v6742_v13 }
 0x386   : > { %v6744_v35 = vpop.permute.xlu1 %6743 }
 0x387   : > { %6764 = vst.msk [vmem:[%s10417_s6 + $0x3d] sm:$0x1] %vm3643_vm12, %v6744_v35 }
 0x388   : > { %v6746_v50 = vpop.permute.xlu0 %6745 }
 0x389   : > { %6765 = vst.msk [vmem:[%s10417_s6 + $0x4d] sm:$0x1] %vm3643_vm12, %v6746_v50 }
 0x38a   : > { %v6748_v47 = vpop.permute.xlu1 %6747 }
 0x38b   : > { %6766 = vst.msk [vmem:[%s10417_s6 + $0x5d] sm:$0x1] %vm3643_vm12, %v6748_v47 }
 0x38c   : > { %v6522_v49 = vpop.permute.xlu0 %6521 }
 0x38d   : > { %6539 = vst.msk [vmem:[%s10417_s6 + $0x6c] sm:$0x1] %vm3643_vm12, %v6522_v49 }
 0x38e   : > { %v6524_v0 = vpop.permute.xlu1 %6523 }
 0x38f   : > { %6540 = vst.msk [vmem:[%s10417_s6 + $0x7c] sm:$0x1] %vm3643_vm12, %v6524_v0 }
 0x390   : > { %v6750_v51 = vpop.permute.xlu0 %6749 }
 0x391   : > { %6767 = vst.msk [vmem:[%s10417_s6 + $0x6d] sm:$0x1] %vm3643_vm12, %v6750_v51 }
 0x392   : > { %v6752_v33 = vpop.permute.xlu1 %6751 }
 0x393   : > { %6768 = vst.msk [vmem:[%s10417_s6 + $0x7d] sm:$0x1] %vm3643_vm12, %v6752_v33 }
 0x394   : > { %v6986_v63 = vpop.permute.xlu0 %6985 }
 0x395   : > { %7009 = vst.msk [vmem:[%s10417_s6 + $0xe] sm:$0x1] %vm3643_vm12, %v6986_v63 }
 0x396   : > { %v6988_v34 = vpop.permute.xlu1 %6987 }
 0x397   : > { %7010 = vst.msk [vmem:[%s10417_s6 + $0x1e] sm:$0x1] %vm3643_vm12, %v6988_v34 }
 0x398   : > { %v6990_v42 = vpop.permute.xlu0 %6989 }
 0x399   : > { %7011 = vst.msk [vmem:[%s10417_s6 + $0x2e] sm:$0x1] %vm3643_vm12, %v6990_v42 }
 0x39a   : > { %v6992_v53 = vpop.permute.xlu1 %6991 }
 0x39b   : > { %7012 = vst.msk [vmem:[%s10417_s6 + $0x3e] sm:$0x1] %vm3643_vm12, %v6992_v53 }
 0x39c   : > { %v6994_v37 = vpop.permute.xlu0 %6993 }
 0x39d   : > { %7013 = vst.msk [vmem:[%s10417_s6 + $0x4e] sm:$0x1] %vm3643_vm12, %v6994_v37 }
 0x39e   : > { %v6996_v17 = vpop.permute.xlu1 %6995 }
 0x39f   : > { %7014 = vst.msk [vmem:[%s10417_s6 + $0x5e] sm:$0x1] %vm3643_vm12, %v6996_v17 }
 0x3a0   : > { %v6998_v57 = vpop.permute.xlu0 %6997 }
 0x3a1   : > { %7015 = vst.msk [vmem:[%s10417_s6 + $0x6e] sm:$0x1] %vm3643_vm12, %v6998_v57 }
 0x3a2   : > { %v7000_v56 = vpop.permute.xlu1 %6999 }
 0x3a3   : > { %7016 = vst.msk [vmem:[%s10417_s6 + $0x7e] sm:$0x1] %vm3643_vm12, %v7000_v56 }
 0x3a4   : > { %v7225_v16 = vpop.permute.xlu0 %7224 }
 0x3a5   : > { %7248 = vst.msk [vmem:[%s10417_s6 + $0xf] sm:$0x1] %vm3643_vm12, %v7225_v16 }
 0x3a6   : > { %v7227_v8 = vpop.permute.xlu1 %7226 }
 0x3a7   : > { %7249 = vst.msk [vmem:[%s10417_s6 + $0x1f] sm:$0x1] %vm3643_vm12, %v7227_v8 }
 0x3a8   : > { %v7229_v59 = vpop.permute.xlu0 %7228 }
 0x3a9   : > { %7250 = vst.msk [vmem:[%s10417_s6 + $0x2f] sm:$0x1] %vm3643_vm12, %v7229_v59 }
 0x3aa   : > { %v7231_v22 = vpop.permute.xlu1 %7230 }
 0x3ab   : > { %7251 = vst.msk [vmem:[%s10417_s6 + $0x3f] sm:$0x1] %vm3643_vm12, %v7231_v22 }
 0x3ac   : > { %v7233_v20 = vpop.permute.xlu0 %7232 }
 0x3ad   : > { %7252 = vst.msk [vmem:[%s10417_s6 + $0x4f] sm:$0x1] %vm3643_vm12, %v7233_v20 }
 0x3ae   : > { %v7235_v24 = vpop.permute.xlu1 %7234 }
 0x3af   : > { %7253 = vst.msk [vmem:[%s10417_s6 + $0x5f] sm:$0x1] %vm3643_vm12, %v7235_v24 }
 0x3b0   : > { %v7237_v5 = vpop.permute.xlu0 %7236 }
 0x3b1   : > { %7254 = vst.msk [vmem:[%s10417_s6 + $0x6f] sm:$0x1] %vm3643_vm12, %v7237_v5 }
 0x3b2   : > { %v7239_v62 = vpop.permute.xlu1 %7238 }
 0x3b3   : > { %7255 = vst.msk [vmem:[%s10417_s6 + $0x7f] sm:$0x1] %vm3643_vm12, %v7239_v62 }
 0x3b4   : > { %8284 = shalt.err (!%p8281_p5)
}
 0x3b5   : > { %s8285_s24 = scalar_lea.hbm %s11564_s12, 2048  ;;  %s8289_s30 = scalar_lea.hbm %s11624_s4, 4096 }
 0x3b6   : > { %p8286_p6 = scmp.ne.s32.totalorder %s11564_s12, %s8285_s24  ;;  %p8290_p10 = scmp.lt.u32.totalorder %s11564_s12, %s11624_s4 }
 0x3b7   : > { %p8291_p11 = scmp.lt.u32.totalorder %s8289_s30, %s8285_s24  ;;  %p8293_p13 = scmp.lt.u32.totalorder %s8285_s24, %s11564_s12 }
 0x3b8   : > { %p8287_p7 = pnand %p8286_p6, %p8426_p4 }
 0x3b9   : > { %p8292_p12 = por %p8291_p11, %p8290_p10 }
 0x3ba   : > { %p8288_p9 = pneg %p8287_p7 }
 0x3bb   : > { %p8294_p0 = por %p8293_p13, %p8292_p12 }
 0x3bd   : > { %p8295_p1 = pnand %p8294_p0, %p8288_p9 }
 0x3bf   : > { %8298 = shalt.err (!%p8295_p1)
}
 0x3c0   : > { %s8359_s7 = smov 128   ;;  %s8360_s8 = smov 8  }
 0x3c1   : > { %8001 = dma.vmem_to_hbm [thread:$0]  (%p8426_p4), %s11566_s9, 2048, %s11564_s12, %s11574_s18, %s8359_s7, %s8359_s7, %s8360_s8  }
 0x3c2 PF: > { %p8007_p2 = scmp.ge.s32.totalorder %s8349_s20, 2  ;;  %s7290_s10 = sand.u32 1, %s8329_s15  }
 0x3c3   : > { %s7291_s11 = scalar_lea.sflag [#allocation3], %s7290_s10 }
 0x3c4   : > { %p8004_p3 = pnand %p8007_p2, %p8433_p8 }
 0x3c6   : > { %8324 = dma.done.wait (!%p8004_p3), %s7291_s11, 2048  }
 0x3c7   : > { %8326 = vsyncadd (!%p8004_p3), %s7291_s11, 4294965248  ;;  %s17_s20 = sadd.s32 1, %s8349_s20   ;;  %s11669_s15 = smov %s8333_s16 }
 0x3c8   : > { %p14_p5 = scmp.ge.s32.totalorder %s17_s20, 4   ;;  %s11670_s16 = smov %s8337_s17 }
 0x3c9   : > { %s11671_s17 = smov %s8439_s28  ;;  %s11672_s18 = smov %s8345_s19 }
 0x3ca   : > { %s11673_s19 = smov %s11675_s23  ;;  %16 = sbr.rel (!%p14_p5) target bundleno = 4 (0x4), region = 81 }
 0x3d1   :  { %7296 = vsyncpa [#allocation3], 1 }
 0x3d2   :  { %7298 = vsyncpa [#allocation3 + $0x1], 1 }

</bundles_post_ra>
